<compile_context>
chip_gen: v5e
topology: v5e:2x2
jax: 0.10.0
libtpu: 0.0.40
codegen_flags: <defaults>
</compile_context>

<pallas_src>
import math

import jax
import jax.numpy as jnp
from jax.experimental import pallas as pl
from jax.experimental.pallas import tpu as pltpu


_COMPILER_PARAMS = pltpu.CompilerParams(
    dimension_semantics=("parallel",),        # batch grid axis -> both TCs on v7x
    vmem_limit_bytes=32 * 1024 * 1024,
)


# -----------------------------------------------------------------------------
# In-kernel helpers.  All activations are (C, L) tiles: C on sublanes, L on lanes.
# -----------------------------------------------------------------------------
def _swish(x):
    return x * jax.nn.sigmoid(x)


def _shift_prev(x):
    """out[:, l] = x[:, l-1]; column 0 = 0 (left zero-padding of the sequence)."""
    return jnp.concatenate([jnp.zeros_like(x[:, :1]), x[:, :-1]], axis=1)


def _shift_next(x):
    """out[:, l] = x[:, l+1]; last column = 0 (right zero-padding of the sequence)."""
    return jnp.concatenate([x[:, 1:], jnp.zeros_like(x[:, :1])], axis=1)


def _conv3(x, w_ref, b_ref):
    """Conv1d(k=3, pad=1) in (C, L) layout: W0 @ x_{l-1} + W1 @ x_l + W2 @ x_{l+1} + b.

    w_ref block is (3, Cout, Cin); b_ref block is (Cout, 1) and broadcasts along L.
    """
    return (jnp.dot(w_ref[0], _shift_prev(x), preferred_element_type=jnp.float32)
            + jnp.dot(w_ref[1], x, preferred_element_type=jnp.float32)
            + jnp.dot(w_ref[2], _shift_next(x), preferred_element_type=jnp.float32)
            + b_ref[...])


def _pconv3(e, o, w_ref, b_ref):
    """Polyphase Conv1d(k=3, pad=1) of the interleaved sequence x[2l]=e[:,l], x[2l+1]=o[:,l].

    Returns (out_even, out_odd); the x2-upsampled activations are therefore never
    materialized/interleaved inside the kernel.
    """
    p0e = jnp.dot(w_ref[0], e, preferred_element_type=jnp.float32)
    p0o = jnp.dot(w_ref[0], o, preferred_element_type=jnp.float32)
    p1e = jnp.dot(w_ref[1], e, preferred_element_type=jnp.float32)
    p1o = jnp.dot(w_ref[1], o, preferred_element_type=jnp.float32)
    p2e = jnp.dot(w_ref[2], e, preferred_element_type=jnp.float32)
    p2o = jnp.dot(w_ref[2], o, preferred_element_type=jnp.float32)
    b = b_ref[...]
    # out[2l]   uses taps x[2l-1]=o[l-1], x[2l]=e[l], x[2l+1]=o[l]
    out_e = _shift_prev(p0o) + p1e + p2o + b
    # out[2l+1] uses taps x[2l]=e[l],   x[2l+1]=o[l], x[2l+2]=e[l+1]
    out_o = p0e + p1o + _shift_next(p2e) + b
    return out_e, out_o


# -----------------------------------------------------------------------------
# Fused kernel 1: DecoderBlock (upsample+concat+conv+swish) + DecoderResidualBlock4L
# -----------------------------------------------------------------------------
def _level_kernel(dec_ref, z_ref, uwd_ref, uwz_ref, ub_ref,
                  wa_ref, ba_ref, wb_ref, bb_ref, wc_ref, bc_ref,
                  oe_ref, oo_ref):
    dec = dec_ref[0]                       # (D, Li)
    zv = z_ref[0]                          # (D, Li)

    # UpsamplingConvBlock4L(2D, 2D): nearest x2 -> conv3 -> swish.
    # zs = concat_channels(decoder_out, z) is fused by splitting the conv weight over its
    # Cin halves; the x2 upsample is fused by emitting the even/odd output phases directly.
    p0 = (jnp.dot(uwd_ref[0], dec, preferred_element_type=jnp.float32)
          + jnp.dot(uwz_ref[0], zv, preferred_element_type=jnp.float32))
    p1 = (jnp.dot(uwd_ref[1], dec, preferred_element_type=jnp.float32)
          + jnp.dot(uwz_ref[1], zv, preferred_element_type=jnp.float32))
    p2 = (jnp.dot(uwd_ref[2], dec, preferred_element_type=jnp.float32)
          + jnp.dot(uwz_ref[2], zv, preferred_element_type=jnp.float32))
    ub = ub_ref[...]
    h_e = _swish(_shift_prev(p0) + p1 + p2 + ub)   # up[2l]  : taps zs[l-1], zs[l], zs[l]
    h_o = _swish(p0 + p1 + _shift_next(p2) + ub)   # up[2l+1]: taps zs[l],  zs[l], zs[l+1]

    # DecoderResidualBlock4L(D): y = swish(conv(h)); out = y + 0.1 * conv(swish(conv(y)))
    y_e, y_o = _pconv3(h_e, h_o, wa_ref, ba_ref)
    y_e, y_o = _swish(y_e), _swish(y_o)
    t_e, t_o = _pconv3(y_e, y_o, wb_ref, bb_ref)
    t_e, t_o = _swish(t_e), _swish(t_o)
    r_e, r_o = _pconv3(t_e, t_o, wc_ref, bc_ref)
    oe_ref[0] = (y_e + 0.1 * r_e).astype(oe_ref.dtype)
    oo_ref[0] = (y_o + 0.1 * r_o).astype(oo_ref.dtype)


def _run_level(dec, z, p):
    B, D, Li = dec.shape
    C2 = 2 * D
    act = pl.BlockSpec((1, D, Li), lambda b: (b, 0, 0))
    w = lambda co, ci: pl.BlockSpec((3, co, ci), lambda b: (0, 0, 0))
    bia = lambda co: pl.BlockSpec((co, 1), lambda b: (0, 0))
    out_e, out_o = pl.pallas_call(
        _level_kernel,
        out_shape=(jax.ShapeDtypeStruct((B, D, Li), dec.dtype),
                   jax.ShapeDtypeStruct((B, D, Li), dec.dtype)),
        grid=(B,),
        in_specs=[act, act,
                  w(C2, D), w(C2, D), bia(C2),
                  w(D, C2), bia(D), w(D, D), bia(D), w(D, D), bia(D)],
        out_specs=[act, act],
        compiler_params=_COMPILER_PARAMS,
    )(dec, z, p["up_w_dec"], p["up_w_z"], p["up_b"],
      p["drb_wa"], p["drb_ba"], p["drb_wb"], p["drb_bb"], p["drb_wc"], p["drb_bc"])
    # Interleave the two phases back into the flat (B, D, 2*Li) layout (one cheap XLA op);
    # everything before/after this lives inside fused Pallas kernels.
    return jnp.stack([out_e, out_o], axis=-1).reshape(B, D, 2 * Li)


# -----------------------------------------------------------------------------
# Fused kernel 2: condition_z_mean[i] + condition_z_var[i] + reparameterize
# -----------------------------------------------------------------------------
def _cond_kernel(dec_ref, eps_ref,
                 m_r1w, m_r1b, m_r2w, m_r2b, m_ow, m_ob,
                 v_r1w, v_r1b, v_r2w, v_r2b, v_ow, v_ob,
                 z_ref):
    x = dec_ref[0]                         # (D, L)

    def head(r1w, r1b, r2w, r2b, ow, ob):
        # ResidualBlock4L(D) -> Swish -> Conv1d(D, D, 3, padding=1)
        t1 = _swish(_conv3(x, r1w, r1b))
        rb = x + 0.1 * _conv3(t1, r2w, r2b)
        return _conv3(_swish(rb), ow, ob)

    mu = head(m_r1w, m_r1b, m_r2w, m_r2b, m_ow, m_ob)
    log_var = head(v_r1w, v_r1b, v_r2w, v_r2b, v_ow, v_ob)
    # reparameterize(mu, exp(0.5*log_var)) = mu + std * eps, fused into the same kernel.
    z_ref[0] = (mu + jnp.exp(0.5 * log_var) * eps_ref[0]).astype(z_ref.dtype)


def _run_cond(dec, eps, p_mean, p_var):
    B, D, L = dec.shape
    act = pl.BlockSpec((1, D, L), lambda b: (b, 0, 0))
    w = pl.BlockSpec((3, D, D), lambda b: (0, 0, 0))
    bia = pl.BlockSpec((D, 1), lambda b: (0, 0))
    return pl.pallas_call(
        _cond_kernel,
        out_shape=jax.ShapeDtypeStruct((B, D, L), dec.dtype),
        grid=(B,),
        in_specs=[act, act, w, bia, w, bia, w, bia, w, bia, w, bia, w, bia],
        out_specs=act,
        compiler_params=_COMPILER_PARAMS,
    )(dec, eps,
      p_mean["r1_w"], p_mean["r1_b"], p_mean["r2_w"], p_mean["r2_b"],
      p_mean["out_w"], p_mean["out_b"],
      p_var["r1_w"], p_var["r1_b"], p_var["r2_w"], p_var["r2_b"],
      p_var["out_w"], p_var["out_b"])


# -----------------------------------------------------------------------------
# Fused kernel 3: recon = ResidualBlock4L -> Conv1d -> Swish -> Conv1d  (+ sigmoid)
# -----------------------------------------------------------------------------
def _recon_kernel(dec_ref, r1w, r1b, r2w, r2b, c1w, c1b, c2w, c2b,
                  xh_ref, xs_ref):
    x = dec_ref[0]
    t1 = _swish(_conv3(x, r1w, r1b))
    rb = x + 0.1 * _conv3(t1, r2w, r2b)
    c1 = _conv3(rb, c1w, c1b)
    xh = _conv3(_swish(c1), c2w, c2b)
    xh_ref[0] = xh.astype(xh_ref.dtype)
    # torch calls self.recon twice; it is deterministic so sigmoid(x_hat) is identical.
    xs_ref[0] = jax.nn.sigmoid(xh).astype(xs_ref.dtype)


def _run_recon(dec, p):
    B, D, L = dec.shape
    act = pl.BlockSpec((1, D, L), lambda b: (b, 0, 0))
    w = pl.BlockSpec((3, D, D), lambda b: (0, 0, 0))
    bia = pl.BlockSpec((D, 1), lambda b: (0, 0))
    return pl.pallas_call(
        _recon_kernel,
        out_shape=(jax.ShapeDtypeStruct((B, D, L), dec.dtype),
                   jax.ShapeDtypeStruct((B, D, L), dec.dtype)),
        grid=(B,),
        in_specs=[act, w, bia, w, bia, w, bia, w, bia],
        out_specs=[act, act],
        compiler_params=_COMPILER_PARAMS,
    )(dec, p["r1_w"], p["r1_b"], p["r2_w"], p["r2_b"],
      p["c1_w"], p["c1_b"], p["c2_w"], p["c2_b"])


# -----------------------------------------------------------------------------
# Parameters (deterministic synthetic init; shapes implied by the module __init__)
# Weights are stored per tap as (3, Cout, Cin) (= transpose of torch's (Cout, Cin, K));
# biases as (Cout, 1) so they broadcast along L inside the kernels.
# -----------------------------------------------------------------------------
def _conv_params(key, cin, cout):
    kw, kb = jax.random.split(key)
    scale = 1.0 / math.sqrt(3.0 * cin)
    w = scale * jax.random.normal(kw, (3, cout, cin), jnp.float32)
    b = 0.01 * jax.random.normal(kb, (cout, 1), jnp.float32)
    return w, b


def init_params(key, z_dim):
    D, C2 = z_dim, 2 * z_dim
    params = {}
    keys = jax.random.split(key, 64)
    k = iter(keys)

    for i in range(4):
        lvl = {}
        # DecoderBlock -> UpsamplingConvBlock4L(2D, 2D).  The Cin halves of the up-conv
        # weight are stored split so the channel concat can be fused in-kernel
        # (channels [0:D] = decoder_out, [D:2D] = z, matching torch.cat([dec, z], dim=1)).
        up_w, up_b = _conv_params(next(k), C2, C2)
        lvl["up_w_dec"], lvl["up_w_z"], lvl["up_b"] = up_w[:, :, :D], up_w[:, :, D:], up_b
        # DecoderResidualBlock4L(D): 2D -> D, then residual refinement
        lvl["drb_wa"], lvl["drb_ba"] = _conv_params(next(k), C2, D)
        lvl["drb_wb"], lvl["drb_bb"] = _conv_params(next(k), D, D)
        lvl["drb_wc"], lvl["drb_bc"] = _conv_params(next(k), D, D)
        if i < 3:
            for name in ("cz_mean", "cz_var"):
                px = {}
                px["r1_w"], px["r1_b"] = _conv_params(next(k), D, D)    # ResidualBlock4L conv1
                px["r2_w"], px["r2_b"] = _conv_params(next(k), D, D)    # ResidualBlock4L conv2
                px["out_w"], px["out_b"] = _conv_params(next(k), D, D)  # Conv1d(D, D, 3, p=1)
                lvl[name] = px
        params[f"level{i}"] = lvl

    # condition_xz_mean / condition_xz_var exist in __init__ but are only used when
    # xs is not None; they are not exercised here and are therefore not materialized.

    recon = {}
    recon["r1_w"], recon["r1_b"] = _conv_params(next(k), D, D)
    recon["r2_w"], recon["r2_b"] = _conv_params(next(k), D, D)
    recon["c1_w"], recon["c1_b"] = _conv_params(next(k), D, D)
    recon["c2_w"], recon["c2_b"] = _conv_params(next(k), D, D)
    params["recon"] = recon
    return params


# -----------------------------------------------------------------------------
# Decoder forward (xs=None, mode='random', freeze_level=-1)
# -----------------------------------------------------------------------------
def decoder_forward(params, z_ncl, key):
    """z_ncl: (B, z_dim, L) in PyTorch NCL layout. Returns (x_hat, x_hat_sigmoid, kl_losses)."""
    B, D, L = z_ncl.shape
    z = z_ncl                                   # kernels use NCL natively; no transposes
    decoder_out = jnp.zeros((B, D, L), z.dtype)
    kl_losses = []                              # xs is None -> no condition_xz / kl_2 branch
    eps_keys = jax.random.split(key, 3)

    for i in range(4):
        p = params[f"level{i}"]
        # Fused: concat(dec, z) + nearest x2 + conv3 + swish + DecoderResidualBlock4L
        decoder_out = _run_level(decoder_out, z, p)           # (B, D, 2 * L_i)
        if i == 3:
            break
        # Fused: condition_z_mean[i] + condition_z_var[i] + reparameterize
        eps = jax.random.normal(eps_keys[i], decoder_out.shape, decoder_out.dtype)
        z = _run_cond(decoder_out, eps, p["cz_mean"], p["cz_var"])

    x_hat, x_hat_sigmoid = _run_recon(decoder_out, params["recon"])
    return x_hat, x_hat_sigmoid, kl_losses


# -----------------------------------------------------------------------------
# Demo
# -----------------------------------------------------------------------------
if __name__ == "__main__":
    key = jax.random.PRNGKey(0)
    k_params, k_z, k_eps = jax.random.split(key, 3)

    z_dim, B, L = 4, 2, 8
    params = init_params(k_params, z_dim)
    z = jax.random.normal(k_z, (B, z_dim, L), jnp.float32)    # (B, z_dim, length)

    fwd = jax.jit(decoder_forward)
    x_hat, x_hat_sigmoid, kl_losses = fwd(params, z, k_eps)
    jax.block_until_ready((x_hat, x_hat_sigmoid))

    # 4 upsampling levels of x2 -> length grows 16x; channels stay z_dim.
    assert x_hat.shape == (B, z_dim, L * 16), x_hat.shape
    assert x_hat_sigmoid.shape == (B, z_dim, L * 16)
    assert kl_losses == []
    assert bool(jnp.all(jnp.isfinite(x_hat)))
    assert bool(jnp.all((x_hat_sigmoid >= 0.0) & (x_hat_sigmoid <= 1.0)))
    print("KERNEL_OK")
</pallas_src>

<mosaic_0001>
module attributes {stable_mosaic.version = 11 : i64} {
  func.func @_level_kernel(%arg0: i32, %arg1: memref<1x4x8xf32, #tpu.memory_space<vmem>>, %arg2: memref<1x4x8xf32, #tpu.memory_space<vmem>>, %arg3: memref<3x8x4xf32, #tpu.memory_space<vmem>>, %arg4: memref<3x8x4xf32, #tpu.memory_space<vmem>>, %arg5: memref<8x1xf32, #tpu.memory_space<vmem>>, %arg6: memref<3x4x8xf32, #tpu.memory_space<vmem>>, %arg7: memref<4x1xf32, #tpu.memory_space<vmem>>, %arg8: memref<3x4x4xf32, #tpu.memory_space<vmem>>, %arg9: memref<4x1xf32, #tpu.memory_space<vmem>>, %arg10: memref<3x4x4xf32, #tpu.memory_space<vmem>>, %arg11: memref<4x1xf32, #tpu.memory_space<vmem>>, %arg12: memref<1x4x8xf32, #tpu.memory_space<vmem>>, %arg13: memref<1x4x8xf32, #tpu.memory_space<vmem>>) attributes {dimension_semantics = [#tpu.dimension_semantics<parallel>], iteration_bounds = array<i64: 2>, scalar_prefetch = 0 : i64, scratch_operands = 0 : i64, tpu.core_type = #tpu.core_type<tc>, window_params = [{transform_indices = @transform_0, window_bounds = array<i64: 1, 4, 8>}, {transform_indices = @transform_1, window_bounds = array<i64: 1, 4, 8>}, {pipeline_mode = #tpu.pipeline_mode<synchronous>, transform_indices = @transform_2, window_bounds = array<i64: 3, 8, 4>}, {pipeline_mode = #tpu.pipeline_mode<synchronous>, transform_indices = @transform_3, window_bounds = array<i64: 3, 8, 4>}, {pipeline_mode = #tpu.pipeline_mode<synchronous>, transform_indices = @transform_4, window_bounds = array<i64: 8, 1>}, {pipeline_mode = #tpu.pipeline_mode<synchronous>, transform_indices = @transform_5, window_bounds = array<i64: 3, 4, 8>}, {pipeline_mode = #tpu.pipeline_mode<synchronous>, transform_indices = @transform_6, window_bounds = array<i64: 4, 1>}, {pipeline_mode = #tpu.pipeline_mode<synchronous>, transform_indices = @transform_7, window_bounds = array<i64: 3, 4, 4>}, {pipeline_mode = #tpu.pipeline_mode<synchronous>, transform_indices = @transform_8, window_bounds = array<i64: 4, 1>}, {pipeline_mode = #tpu.pipeline_mode<synchronous>, transform_indices = @transform_9, window_bounds = array<i64: 3, 4, 4>}, {pipeline_mode = #tpu.pipeline_mode<synchronous>, transform_indices = @transform_10, window_bounds = array<i64: 4, 1>}, {transform_indices = @transform_11, window_bounds = array<i64: 1, 4, 8>}, {transform_indices = @transform_12, window_bounds = array<i64: 1, 4, 8>}]} {
    %c0 = arith.constant 0 : index
    %c0_0 = arith.constant 0 : index
    %c0_1 = arith.constant 0 : index
    %0 = vector.load %arg1[%c0, %c0_0, %c0_1] : memref<1x4x8xf32, #tpu.memory_space<vmem>>, vector<1x4x8xf32>
    %1 = vector.shape_cast %0 : vector<1x4x8xf32> to vector<4x8xf32>
    %c0_2 = arith.constant 0 : index
    %c0_3 = arith.constant 0 : index
    %c0_4 = arith.constant 0 : index
    %2 = vector.load %arg2[%c0_2, %c0_3, %c0_4] : memref<1x4x8xf32, #tpu.memory_space<vmem>>, vector<1x4x8xf32>
    %3 = vector.shape_cast %2 : vector<1x4x8xf32> to vector<4x8xf32>
    %c0_5 = arith.constant 0 : index
    %c0_6 = arith.constant 0 : index
    %c0_7 = arith.constant 0 : index
    %4 = vector.load %arg3[%c0_5, %c0_6, %c0_7] : memref<3x8x4xf32, #tpu.memory_space<vmem>>, vector<1x8x4xf32>
    %5 = vector.shape_cast %4 : vector<1x8x4xf32> to vector<8x4xf32>
    %cst = arith.constant dense<0.000000e+00> : vector<8x8xf32>
    %6 = tpu.matmul %5, %1, %cst {dimension_numbers = #tpu.dot_dimension_numbers<[1], [0], [0], [1], [0, 0, 1, 1], [], []>} : vector<8x4xf32>, vector<4x8xf32>, vector<8x8xf32> -> vector<8x8xf32>
    %c0_8 = arith.constant 0 : index
    %c0_9 = arith.constant 0 : index
    %c0_10 = arith.constant 0 : index
    %7 = vector.load %arg4[%c0_8, %c0_9, %c0_10] : memref<3x8x4xf32, #tpu.memory_space<vmem>>, vector<1x8x4xf32>
    %8 = vector.shape_cast %7 : vector<1x8x4xf32> to vector<8x4xf32>
    %cst_11 = arith.constant dense<0.000000e+00> : vector<8x8xf32>
    %9 = tpu.matmul %8, %3, %cst_11 {dimension_numbers = #tpu.dot_dimension_numbers<[1], [0], [0], [1], [0, 0, 1, 1], [], []>} : vector<8x4xf32>, vector<4x8xf32>, vector<8x8xf32> -> vector<8x8xf32>
    %10 = arith.addf %6, %9 : vector<8x8xf32>
    %c1 = arith.constant 1 : index
    %c0_12 = arith.constant 0 : index
    %c0_13 = arith.constant 0 : index
    %11 = vector.load %arg3[%c1, %c0_12, %c0_13] : memref<3x8x4xf32, #tpu.memory_space<vmem>>, vector<1x8x4xf32>
    %12 = vector.shape_cast %11 : vector<1x8x4xf32> to vector<8x4xf32>
    %cst_14 = arith.constant dense<0.000000e+00> : vector<8x8xf32>
    %13 = tpu.matmul %12, %1, %cst_14 {dimension_numbers = #tpu.dot_dimension_numbers<[1], [0], [0], [1], [0, 0, 1, 1], [], []>} : vector<8x4xf32>, vector<4x8xf32>, vector<8x8xf32> -> vector<8x8xf32>
    %c1_15 = arith.constant 1 : index
    %c0_16 = arith.constant 0 : index
    %c0_17 = arith.constant 0 : index
    %14 = vector.load %arg4[%c1_15, %c0_16, %c0_17] : memref<3x8x4xf32, #tpu.memory_space<vmem>>, vector<1x8x4xf32>
    %15 = vector.shape_cast %14 : vector<1x8x4xf32> to vector<8x4xf32>
    %cst_18 = arith.constant dense<0.000000e+00> : vector<8x8xf32>
    %16 = tpu.matmul %15, %3, %cst_18 {dimension_numbers = #tpu.dot_dimension_numbers<[1], [0], [0], [1], [0, 0, 1, 1], [], []>} : vector<8x4xf32>, vector<4x8xf32>, vector<8x8xf32> -> vector<8x8xf32>
    %17 = arith.addf %13, %16 : vector<8x8xf32>
    %c2 = arith.constant 2 : index
    %c0_19 = arith.constant 0 : index
    %c0_20 = arith.constant 0 : index
    %18 = vector.load %arg3[%c2, %c0_19, %c0_20] : memref<3x8x4xf32, #tpu.memory_space<vmem>>, vector<1x8x4xf32>
    %19 = vector.shape_cast %18 : vector<1x8x4xf32> to vector<8x4xf32>
    %cst_21 = arith.constant dense<0.000000e+00> : vector<8x8xf32>
    %20 = tpu.matmul %19, %1, %cst_21 {dimension_numbers = #tpu.dot_dimension_numbers<[1], [0], [0], [1], [0, 0, 1, 1], [], []>} : vector<8x4xf32>, vector<4x8xf32>, vector<8x8xf32> -> vector<8x8xf32>
    %c2_22 = arith.constant 2 : index
    %c0_23 = arith.constant 0 : index
    %c0_24 = arith.constant 0 : index
    %21 = vector.load %arg4[%c2_22, %c0_23, %c0_24] : memref<3x8x4xf32, #tpu.memory_space<vmem>>, vector<1x8x4xf32>
    %22 = vector.shape_cast %21 : vector<1x8x4xf32> to vector<8x4xf32>
    %cst_25 = arith.constant dense<0.000000e+00> : vector<8x8xf32>
    %23 = tpu.matmul %22, %3, %cst_25 {dimension_numbers = #tpu.dot_dimension_numbers<[1], [0], [0], [1], [0, 0, 1, 1], [], []>} : vector<8x4xf32>, vector<4x8xf32>, vector<8x8xf32> -> vector<8x8xf32>
    %24 = arith.addf %20, %23 : vector<8x8xf32>
    %c0_26 = arith.constant 0 : index
    %c0_27 = arith.constant 0 : index
    %25 = vector.load %arg5[%c0_26, %c0_27] : memref<8x1xf32, #tpu.memory_space<vmem>>, vector<8x1xf32>
    %cst_28 = arith.constant 0.000000e+00 : f32
    %26 = vector.broadcast %cst_28 : f32 to vector<8x1xf32>
    %27 = vector.extract_strided_slice %10 {offsets = [0, 0], sizes = [8, 7], strides = [1, 1]} : vector<8x8xf32> to vector<8x7xf32>
    %28 = tpu.concatenate %26, %27 in 1 : vector<8x1xf32>, vector<8x7xf32> -> vector<8x8xf32>
    %29 = arith.addf %28, %17 : vector<8x8xf32>
    %30 = arith.addf %29, %24 : vector<8x8xf32>
    %31 = vector.broadcast %25 : vector<8x1xf32> to vector<8x8xf32>
    %32 = arith.addf %30, %31 : vector<8x8xf32>
    %33 = arith.negf %32 : vector<8x8xf32>
    %34 = math.exp %33 : vector<8x8xf32>
    %cst_29 = arith.constant 1.000000e+00 : f32
    %35 = vector.broadcast %cst_29 : f32 to vector<8x8xf32>
    %36 = arith.addf %35, %34 : vector<8x8xf32>
    %37 = arith.divf %35, %36 : vector<8x8xf32>
    %38 = arith.mulf %32, %37 : vector<8x8xf32>
    %39 = arith.addf %10, %17 : vector<8x8xf32>
    %40 = vector.extract_strided_slice %24 {offsets = [0, 1], sizes = [8, 7], strides = [1, 1]} : vector<8x8xf32> to vector<8x7xf32>
    %cst_30 = arith.constant 0.000000e+00 : f32
    %41 = vector.broadcast %cst_30 : f32 to vector<8x1xf32>
    %42 = tpu.concatenate %40, %41 in 1 : vector<8x7xf32>, vector<8x1xf32> -> vector<8x8xf32>
    %43 = arith.addf %39, %42 : vector<8x8xf32>
    %44 = vector.broadcast %25 : vector<8x1xf32> to vector<8x8xf32>
    %45 = arith.addf %43, %44 : vector<8x8xf32>
    %46 = arith.negf %45 : vector<8x8xf32>
    %47 = math.exp %46 : vector<8x8xf32>
    %cst_31 = arith.constant 1.000000e+00 : f32
    %48 = vector.broadcast %cst_31 : f32 to vector<8x8xf32>
    %49 = arith.addf %48, %47 : vector<8x8xf32>
    %50 = arith.divf %48, %49 : vector<8x8xf32>
    %51 = arith.mulf %45, %50 : vector<8x8xf32>
    %c0_32 = arith.constant 0 : index
    %c0_33 = arith.constant 0 : index
    %c0_34 = arith.constant 0 : index
    %52 = vector.load %arg6[%c0_32, %c0_33, %c0_34] : memref<3x4x8xf32, #tpu.memory_space<vmem>>, vector<1x4x8xf32>
    %53 = vector.shape_cast %52 : vector<1x4x8xf32> to vector<4x8xf32>
    %cst_35 = arith.constant dense<0.000000e+00> : vector<4x8xf32>
    %54 = tpu.matmul %53, %38, %cst_35 {dimension_numbers = #tpu.dot_dimension_numbers<[1], [0], [0], [1], [0, 0, 1, 1], [], []>} : vector<4x8xf32>, vector<8x8xf32>, vector<4x8xf32> -> vector<4x8xf32>
    %c0_36 = arith.constant 0 : index
    %c0_37 = arith.constant 0 : index
    %c0_38 = arith.constant 0 : index
    %55 = vector.load %arg6[%c0_36, %c0_37, %c0_38] : memref<3x4x8xf32, #tpu.memory_space<vmem>>, vector<1x4x8xf32>
    %56 = vector.shape_cast %55 : vector<1x4x8xf32> to vector<4x8xf32>
    %cst_39 = arith.constant dense<0.000000e+00> : vector<4x8xf32>
    %57 = tpu.matmul %56, %51, %cst_39 {dimension_numbers = #tpu.dot_dimension_numbers<[1], [0], [0], [1], [0, 0, 1, 1], [], []>} : vector<4x8xf32>, vector<8x8xf32>, vector<4x8xf32> -> vector<4x8xf32>
    %c1_40 = arith.constant 1 : index
    %c0_41 = arith.constant 0 : index
    %c0_42 = arith.constant 0 : index
    %58 = vector.load %arg6[%c1_40, %c0_41, %c0_42] : memref<3x4x8xf32, #tpu.memory_space<vmem>>, vector<1x4x8xf32>
    %59 = vector.shape_cast %58 : vector<1x4x8xf32> to vector<4x8xf32>
    %cst_43 = arith.constant dense<0.000000e+00> : vector<4x8xf32>
    %60 = tpu.matmul %59, %38, %cst_43 {dimension_numbers = #tpu.dot_dimension_numbers<[1], [0], [0], [1], [0, 0, 1, 1], [], []>} : vector<4x8xf32>, vector<8x8xf32>, vector<4x8xf32> -> vector<4x8xf32>
    %c1_44 = arith.constant 1 : index
    %c0_45 = arith.constant 0 : index
    %c0_46 = arith.constant 0 : index
    %61 = vector.load %arg6[%c1_44, %c0_45, %c0_46] : memref<3x4x8xf32, #tpu.memory_space<vmem>>, vector<1x4x8xf32>
    %62 = vector.shape_cast %61 : vector<1x4x8xf32> to vector<4x8xf32>
    %cst_47 = arith.constant dense<0.000000e+00> : vector<4x8xf32>
    %63 = tpu.matmul %62, %51, %cst_47 {dimension_numbers = #tpu.dot_dimension_numbers<[1], [0], [0], [1], [0, 0, 1, 1], [], []>} : vector<4x8xf32>, vector<8x8xf32>, vector<4x8xf32> -> vector<4x8xf32>
    %c2_48 = arith.constant 2 : index
    %c0_49 = arith.constant 0 : index
    %c0_50 = arith.constant 0 : index
    %64 = vector.load %arg6[%c2_48, %c0_49, %c0_50] : memref<3x4x8xf32, #tpu.memory_space<vmem>>, vector<1x4x8xf32>
    %65 = vector.shape_cast %64 : vector<1x4x8xf32> to vector<4x8xf32>
    %cst_51 = arith.constant dense<0.000000e+00> : vector<4x8xf32>
    %66 = tpu.matmul %65, %38, %cst_51 {dimension_numbers = #tpu.dot_dimension_numbers<[1], [0], [0], [1], [0, 0, 1, 1], [], []>} : vector<4x8xf32>, vector<8x8xf32>, vector<4x8xf32> -> vector<4x8xf32>
    %c2_52 = arith.constant 2 : index
    %c0_53 = arith.constant 0 : index
    %c0_54 = arith.constant 0 : index
    %67 = vector.load %arg6[%c2_52, %c0_53, %c0_54] : memref<3x4x8xf32, #tpu.memory_space<vmem>>, vector<1x4x8xf32>
    %68 = vector.shape_cast %67 : vector<1x4x8xf32> to vector<4x8xf32>
    %cst_55 = arith.constant dense<0.000000e+00> : vector<4x8xf32>
    %69 = tpu.matmul %68, %51, %cst_55 {dimension_numbers = #tpu.dot_dimension_numbers<[1], [0], [0], [1], [0, 0, 1, 1], [], []>} : vector<4x8xf32>, vector<8x8xf32>, vector<4x8xf32> -> vector<4x8xf32>
    %c0_56 = arith.constant 0 : index
    %c0_57 = arith.constant 0 : index
    %70 = vector.load %arg7[%c0_56, %c0_57] : memref<4x1xf32, #tpu.memory_space<vmem>>, vector<4x1xf32>
    %cst_58 = arith.constant 0.000000e+00 : f32
    %71 = vector.broadcast %cst_58 : f32 to vector<4x1xf32>
    %72 = vector.extract_strided_slice %57 {offsets = [0, 0], sizes = [4, 7], strides = [1, 1]} : vector<4x8xf32> to vector<4x7xf32>
    %73 = tpu.concatenate %71, %72 in 1 : vector<4x1xf32>, vector<4x7xf32> -> vector<4x8xf32>
    %74 = arith.addf %73, %60 : vector<4x8xf32>
    %75 = arith.addf %74, %69 : vector<4x8xf32>
    %76 = vector.broadcast %70 : vector<4x1xf32> to vector<4x8xf32>
    %77 = arith.addf %75, %76 : vector<4x8xf32>
    %78 = arith.addf %54, %63 : vector<4x8xf32>
    %79 = vector.extract_strided_slice %66 {offsets = [0, 1], sizes = [4, 7], strides = [1, 1]} : vector<4x8xf32> to vector<4x7xf32>
    %cst_59 = arith.constant 0.000000e+00 : f32
    %80 = vector.broadcast %cst_59 : f32 to vector<4x1xf32>
    %81 = tpu.concatenate %79, %80 in 1 : vector<4x7xf32>, vector<4x1xf32> -> vector<4x8xf32>
    %82 = arith.addf %78, %81 : vector<4x8xf32>
    %83 = vector.broadcast %70 : vector<4x1xf32> to vector<4x8xf32>
    %84 = arith.addf %82, %83 : vector<4x8xf32>
    %85 = arith.negf %77 : vector<4x8xf32>
    %86 = math.exp %85 : vector<4x8xf32>
    %cst_60 = arith.constant 1.000000e+00 : f32
    %87 = vector.broadcast %cst_60 : f32 to vector<4x8xf32>
    %88 = arith.addf %87, %86 : vector<4x8xf32>
    %89 = arith.divf %87, %88 : vector<4x8xf32>
    %90 = arith.mulf %77, %89 : vector<4x8xf32>
    %91 = arith.negf %84 : vector<4x8xf32>
    %92 = math.exp %91 : vector<4x8xf32>
    %cst_61 = arith.constant 1.000000e+00 : f32
    %93 = vector.broadcast %cst_61 : f32 to vector<4x8xf32>
    %94 = arith.addf %93, %92 : vector<4x8xf32>
    %95 = arith.divf %93, %94 : vector<4x8xf32>
    %96 = arith.mulf %84, %95 : vector<4x8xf32>
    %c0_62 = arith.constant 0 : index
    %c0_63 = arith.constant 0 : index
    %c0_64 = arith.constant 0 : index
    %97 = vector.load %arg8[%c0_62, %c0_63, %c0_64] : memref<3x4x4xf32, #tpu.memory_space<vmem>>, vector<1x4x4xf32>
    %98 = vector.shape_cast %97 : vector<1x4x4xf32> to vector<4x4xf32>
    %cst_65 = arith.constant dense<0.000000e+00> : vector<4x8xf32>
    %99 = tpu.matmul %98, %90, %cst_65 {dimension_numbers = #tpu.dot_dimension_numbers<[1], [0], [0], [1], [0, 0, 1, 1], [], []>} : vector<4x4xf32>, vector<4x8xf32>, vector<4x8xf32> -> vector<4x8xf32>
    %c0_66 = arith.constant 0 : index
    %c0_67 = arith.constant 0 : index
    %c0_68 = arith.constant 0 : index
    %100 = vector.load %arg8[%c0_66, %c0_67, %c0_68] : memref<3x4x4xf32, #tpu.memory_space<vmem>>, vector<1x4x4xf32>
    %101 = vector.shape_cast %100 : vector<1x4x4xf32> to vector<4x4xf32>
    %cst_69 = arith.constant dense<0.000000e+00> : vector<4x8xf32>
    %102 = tpu.matmul %101, %96, %cst_69 {dimension_numbers = #tpu.dot_dimension_numbers<[1], [0], [0], [1], [0, 0, 1, 1], [], []>} : vector<4x4xf32>, vector<4x8xf32>, vector<4x8xf32> -> vector<4x8xf32>
    %c1_70 = arith.constant 1 : index
    %c0_71 = arith.constant 0 : index
    %c0_72 = arith.constant 0 : index
    %103 = vector.load %arg8[%c1_70, %c0_71, %c0_72] : memref<3x4x4xf32, #tpu.memory_space<vmem>>, vector<1x4x4xf32>
    %104 = vector.shape_cast %103 : vector<1x4x4xf32> to vector<4x4xf32>
    %cst_73 = arith.constant dense<0.000000e+00> : vector<4x8xf32>
    %105 = tpu.matmul %104, %90, %cst_73 {dimension_numbers = #tpu.dot_dimension_numbers<[1], [0], [0], [1], [0, 0, 1, 1], [], []>} : vector<4x4xf32>, vector<4x8xf32>, vector<4x8xf32> -> vector<4x8xf32>
    %c1_74 = arith.constant 1 : index
    %c0_75 = arith.constant 0 : index
    %c0_76 = arith.constant 0 : index
    %106 = vector.load %arg8[%c1_74, %c0_75, %c0_76] : memref<3x4x4xf32, #tpu.memory_space<vmem>>, vector<1x4x4xf32>
    %107 = vector.shape_cast %106 : vector<1x4x4xf32> to vector<4x4xf32>
    %cst_77 = arith.constant dense<0.000000e+00> : vector<4x8xf32>
    %108 = tpu.matmul %107, %96, %cst_77 {dimension_numbers = #tpu.dot_dimension_numbers<[1], [0], [0], [1], [0, 0, 1, 1], [], []>} : vector<4x4xf32>, vector<4x8xf32>, vector<4x8xf32> -> vector<4x8xf32>
    %c2_78 = arith.constant 2 : index
    %c0_79 = arith.constant 0 : index
    %c0_80 = arith.constant 0 : index
    %109 = vector.load %arg8[%c2_78, %c0_79, %c0_80] : memref<3x4x4xf32, #tpu.memory_space<vmem>>, vector<1x4x4xf32>
    %110 = vector.shape_cast %109 : vector<1x4x4xf32> to vector<4x4xf32>
    %cst_81 = arith.constant dense<0.000000e+00> : vector<4x8xf32>
    %111 = tpu.matmul %110, %90, %cst_81 {dimension_numbers = #tpu.dot_dimension_numbers<[1], [0], [0], [1], [0, 0, 1, 1], [], []>} : vector<4x4xf32>, vector<4x8xf32>, vector<4x8xf32> -> vector<4x8xf32>
    %c2_82 = arith.constant 2 : index
    %c0_83 = arith.constant 0 : index
    %c0_84 = arith.constant 0 : index
    %112 = vector.load %arg8[%c2_82, %c0_83, %c0_84] : memref<3x4x4xf32, #tpu.memory_space<vmem>>, vector<1x4x4xf32>
    %113 = vector.shape_cast %112 : vector<1x4x4xf32> to vector<4x4xf32>
    %cst_85 = arith.constant dense<0.000000e+00> : vector<4x8xf32>
    %114 = tpu.matmul %113, %96, %cst_85 {dimension_numbers = #tpu.dot_dimension_numbers<[1], [0], [0], [1], [0, 0, 1, 1], [], []>} : vector<4x4xf32>, vector<4x8xf32>, vector<4x8xf32> -> vector<4x8xf32>
    %c0_86 = arith.constant 0 : index
    %c0_87 = arith.constant 0 : index
    %115 = vector.load %arg9[%c0_86, %c0_87] : memref<4x1xf32, #tpu.memory_space<vmem>>, vector<4x1xf32>
    %cst_88 = arith.constant 0.000000e+00 : f32
    %116 = vector.broadcast %cst_88 : f32 to vector<4x1xf32>
    %117 = vector.extract_strided_slice %102 {offsets = [0, 0], sizes = [4, 7], strides = [1, 1]} : vector<4x8xf32> to vector<4x7xf32>
    %118 = tpu.concatenate %116, %117 in 1 : vector<4x1xf32>, vector<4x7xf32> -> vector<4x8xf32>
    %119 = arith.addf %118, %105 : vector<4x8xf32>
    %120 = arith.addf %119, %114 : vector<4x8xf32>
    %121 = vector.broadcast %115 : vector<4x1xf32> to vector<4x8xf32>
    %122 = arith.addf %120, %121 : vector<4x8xf32>
    %123 = arith.addf %99, %108 : vector<4x8xf32>
    %124 = vector.extract_strided_slice %111 {offsets = [0, 1], sizes = [4, 7], strides = [1, 1]} : vector<4x8xf32> to vector<4x7xf32>
    %cst_89 = arith.constant 0.000000e+00 : f32
    %125 = vector.broadcast %cst_89 : f32 to vector<4x1xf32>
    %126 = tpu.concatenate %124, %125 in 1 : vector<4x7xf32>, vector<4x1xf32> -> vector<4x8xf32>
    %127 = arith.addf %123, %126 : vector<4x8xf32>
    %128 = vector.broadcast %115 : vector<4x1xf32> to vector<4x8xf32>
    %129 = arith.addf %127, %128 : vector<4x8xf32>
    %130 = arith.negf %122 : vector<4x8xf32>
    %131 = math.exp %130 : vector<4x8xf32>
    %cst_90 = arith.constant 1.000000e+00 : f32
    %132 = vector.broadcast %cst_90 : f32 to vector<4x8xf32>
    %133 = arith.addf %132, %131 : vector<4x8xf32>
    %134 = arith.divf %132, %133 : vector<4x8xf32>
    %135 = arith.mulf %122, %134 : vector<4x8xf32>
    %136 = arith.negf %129 : vector<4x8xf32>
    %137 = math.exp %136 : vector<4x8xf32>
    %cst_91 = arith.constant 1.000000e+00 : f32
    %138 = vector.broadcast %cst_91 : f32 to vector<4x8xf32>
    %139 = arith.addf %138, %137 : vector<4x8xf32>
    %140 = arith.divf %138, %139 : vector<4x8xf32>
    %141 = arith.mulf %129, %140 : vector<4x8xf32>
    %c0_92 = arith.constant 0 : index
    %c0_93 = arith.constant 0 : index
    %c0_94 = arith.constant 0 : index
    %142 = vector.load %arg10[%c0_92, %c0_93, %c0_94] : memref<3x4x4xf32, #tpu.memory_space<vmem>>, vector<1x4x4xf32>
    %143 = vector.shape_cast %142 : vector<1x4x4xf32> to vector<4x4xf32>
    %cst_95 = arith.constant dense<0.000000e+00> : vector<4x8xf32>
    %144 = tpu.matmul %143, %135, %cst_95 {dimension_numbers = #tpu.dot_dimension_numbers<[1], [0], [0], [1], [0, 0, 1, 1], [], []>} : vector<4x4xf32>, vector<4x8xf32>, vector<4x8xf32> -> vector<4x8xf32>
    %c0_96 = arith.constant 0 : index
    %c0_97 = arith.constant 0 : index
    %c0_98 = arith.constant 0 : index
    %145 = vector.load %arg10[%c0_96, %c0_97, %c0_98] : memref<3x4x4xf32, #tpu.memory_space<vmem>>, vector<1x4x4xf32>
    %146 = vector.shape_cast %145 : vector<1x4x4xf32> to vector<4x4xf32>
    %cst_99 = arith.constant dense<0.000000e+00> : vector<4x8xf32>
    %147 = tpu.matmul %146, %141, %cst_99 {dimension_numbers = #tpu.dot_dimension_numbers<[1], [0], [0], [1], [0, 0, 1, 1], [], []>} : vector<4x4xf32>, vector<4x8xf32>, vector<4x8xf32> -> vector<4x8xf32>
    %c1_100 = arith.constant 1 : index
    %c0_101 = arith.constant 0 : index
    %c0_102 = arith.constant 0 : index
    %148 = vector.load %arg10[%c1_100, %c0_101, %c0_102] : memref<3x4x4xf32, #tpu.memory_space<vmem>>, vector<1x4x4xf32>
    %149 = vector.shape_cast %148 : vector<1x4x4xf32> to vector<4x4xf32>
    %cst_103 = arith.constant dense<0.000000e+00> : vector<4x8xf32>
    %150 = tpu.matmul %149, %135, %cst_103 {dimension_numbers = #tpu.dot_dimension_numbers<[1], [0], [0], [1], [0, 0, 1, 1], [], []>} : vector<4x4xf32>, vector<4x8xf32>, vector<4x8xf32> -> vector<4x8xf32>
    %c1_104 = arith.constant 1 : index
    %c0_105 = arith.constant 0 : index
    %c0_106 = arith.constant 0 : index
    %151 = vector.load %arg10[%c1_104, %c0_105, %c0_106] : memref<3x4x4xf32, #tpu.memory_space<vmem>>, vector<1x4x4xf32>
    %152 = vector.shape_cast %151 : vector<1x4x4xf32> to vector<4x4xf32>
    %cst_107 = arith.constant dense<0.000000e+00> : vector<4x8xf32>
    %153 = tpu.matmul %152, %141, %cst_107 {dimension_numbers = #tpu.dot_dimension_numbers<[1], [0], [0], [1], [0, 0, 1, 1], [], []>} : vector<4x4xf32>, vector<4x8xf32>, vector<4x8xf32> -> vector<4x8xf32>
    %c2_108 = arith.constant 2 : index
    %c0_109 = arith.constant 0 : index
    %c0_110 = arith.constant 0 : index
    %154 = vector.load %arg10[%c2_108, %c0_109, %c0_110] : memref<3x4x4xf32, #tpu.memory_space<vmem>>, vector<1x4x4xf32>
    %155 = vector.shape_cast %154 : vector<1x4x4xf32> to vector<4x4xf32>
    %cst_111 = arith.constant dense<0.000000e+00> : vector<4x8xf32>
    %156 = tpu.matmul %155, %135, %cst_111 {dimension_numbers = #tpu.dot_dimension_numbers<[1], [0], [0], [1], [0, 0, 1, 1], [], []>} : vector<4x4xf32>, vector<4x8xf32>, vector<4x8xf32> -> vector<4x8xf32>
    %c2_112 = arith.constant 2 : index
    %c0_113 = arith.constant 0 : index
    %c0_114 = arith.constant 0 : index
    %157 = vector.load %arg10[%c2_112, %c0_113, %c0_114] : memref<3x4x4xf32, #tpu.memory_space<vmem>>, vector<1x4x4xf32>
    %158 = vector.shape_cast %157 : vector<1x4x4xf32> to vector<4x4xf32>
    %cst_115 = arith.constant dense<0.000000e+00> : vector<4x8xf32>
    %159 = tpu.matmul %158, %141, %cst_115 {dimension_numbers = #tpu.dot_dimension_numbers<[1], [0], [0], [1], [0, 0, 1, 1], [], []>} : vector<4x4xf32>, vector<4x8xf32>, vector<4x8xf32> -> vector<4x8xf32>
    %c0_116 = arith.constant 0 : index
    %c0_117 = arith.constant 0 : index
    %160 = vector.load %arg11[%c0_116, %c0_117] : memref<4x1xf32, #tpu.memory_space<vmem>>, vector<4x1xf32>
    %cst_118 = arith.constant 0.000000e+00 : f32
    %161 = vector.broadcast %cst_118 : f32 to vector<4x1xf32>
    %162 = vector.extract_strided_slice %147 {offsets = [0, 0], sizes = [4, 7], strides = [1, 1]} : vector<4x8xf32> to vector<4x7xf32>
    %163 = tpu.concatenate %161, %162 in 1 : vector<4x1xf32>, vector<4x7xf32> -> vector<4x8xf32>
    %164 = arith.addf %163, %150 : vector<4x8xf32>
    %165 = arith.addf %164, %159 : vector<4x8xf32>
    %166 = vector.broadcast %160 : vector<4x1xf32> to vector<4x8xf32>
    %167 = arith.addf %165, %166 : vector<4x8xf32>
    %168 = arith.addf %144, %153 : vector<4x8xf32>
    %169 = vector.extract_strided_slice %156 {offsets = [0, 1], sizes = [4, 7], strides = [1, 1]} : vector<4x8xf32> to vector<4x7xf32>
    %cst_119 = arith.constant 0.000000e+00 : f32
    %170 = vector.broadcast %cst_119 : f32 to vector<4x1xf32>
    %171 = tpu.concatenate %169, %170 in 1 : vector<4x7xf32>, vector<4x1xf32> -> vector<4x8xf32>
    %172 = arith.addf %168, %171 : vector<4x8xf32>
    %173 = vector.broadcast %160 : vector<4x1xf32> to vector<4x8xf32>
    %174 = arith.addf %172, %173 : vector<4x8xf32>
    %cst_120 = arith.constant 1.000000e-01 : f32
    %175 = vector.broadcast %cst_120 : f32 to vector<4x8xf32>
    %176 = arith.mulf %175, %167 : vector<4x8xf32>
    %177 = arith.addf %90, %176 : vector<4x8xf32>
    %c0_121 = arith.constant 0 : index
    %c0_122 = arith.constant 0 : index
    %c0_123 = arith.constant 0 : index
    %178 = vector.load %arg12[%c0_121, %c0_122, %c0_123] : memref<1x4x8xf32, #tpu.memory_space<vmem>>, vector<1x4x8xf32>
    %179 = vector.shape_cast %178 : vector<1x4x8xf32> to vector<4x8xf32>
    %180 = vector.shape_cast %177 : vector<4x8xf32> to vector<1x4x8xf32>
    tpu.vector_store %arg12[%c0_121, %c0_122, %c0_123], %180 {strides = array<i32>} : memref<1x4x8xf32, #tpu.memory_space<vmem>>, vector<1x4x8xf32>,
    %cst_124 = arith.constant 1.000000e-01 : f32
    %181 = vector.broadcast %cst_124 : f32 to vector<4x8xf32>
    %182 = arith.mulf %181, %174 : vector<4x8xf32>
    %183 = arith.addf %96, %182 : vector<4x8xf32>
    %c0_125 = arith.constant 0 : index
    %c0_126 = arith.constant 0 : index
    %c0_127 = arith.constant 0 : index
    %184 = vector.load %arg13[%c0_125, %c0_126, %c0_127] : memref<1x4x8xf32, #tpu.memory_space<vmem>>, vector<1x4x8xf32>
    %185 = vector.shape_cast %184 : vector<1x4x8xf32> to vector<4x8xf32>
    %186 = vector.shape_cast %183 : vector<4x8xf32> to vector<1x4x8xf32>
    tpu.vector_store %arg13[%c0_125, %c0_126, %c0_127], %186 {strides = array<i32>} : memref<1x4x8xf32, #tpu.memory_space<vmem>>, vector<1x4x8xf32>,
    return
  }
  func.func @transform_0(%arg0: i32) -> (i32, i32, i32) {
    %c0_i32 = arith.constant 0 : i32
    %c0_i32_0 = arith.constant 0 : i32
    %c0_i32_1 = arith.constant 0 : i32
    return %arg0, %c0_i32, %c0_i32_0 : i32, i32, i32
  }
  func.func @transform_1(%arg0: i32) -> (i32, i32, i32) {
    %c0_i32 = arith.constant 0 : i32
    %c0_i32_0 = arith.constant 0 : i32
    %c0_i32_1 = arith.constant 0 : i32
    return %arg0, %c0_i32, %c0_i32_0 : i32, i32, i32
  }
  func.func @transform_2(%arg0: i32) -> (i32, i32, i32) {
    %c0_i32 = arith.constant 0 : i32
    %c0_i32_0 = arith.constant 0 : i32
    %c0_i32_1 = arith.constant 0 : i32
    %c0_i32_2 = arith.constant 0 : i32
    return %c0_i32, %c0_i32_0, %c0_i32_1 : i32, i32, i32
  }
  func.func @transform_3(%arg0: i32) -> (i32, i32, i32) {
    %c0_i32 = arith.constant 0 : i32
    %c0_i32_0 = arith.constant 0 : i32
    %c0_i32_1 = arith.constant 0 : i32
    %c0_i32_2 = arith.constant 0 : i32
    return %c0_i32, %c0_i32_0, %c0_i32_1 : i32, i32, i32
  }
  func.func @transform_4(%arg0: i32) -> (i32, i32) {
    %c0_i32 = arith.constant 0 : i32
    %c0_i32_0 = arith.constant 0 : i32
    %c0_i32_1 = arith.constant 0 : i32
    return %c0_i32, %c0_i32_0 : i32, i32
  }
  func.func @transform_5(%arg0: i32) -> (i32, i32, i32) {
    %c0_i32 = arith.constant 0 : i32
    %c0_i32_0 = arith.constant 0 : i32
    %c0_i32_1 = arith.constant 0 : i32
    %c0_i32_2 = arith.constant 0 : i32
    return %c0_i32, %c0_i32_0, %c0_i32_1 : i32, i32, i32
  }
  func.func @transform_6(%arg0: i32) -> (i32, i32) {
    %c0_i32 = arith.constant 0 : i32
    %c0_i32_0 = arith.constant 0 : i32
    %c0_i32_1 = arith.constant 0 : i32
    return %c0_i32, %c0_i32_0 : i32, i32
  }
  func.func @transform_7(%arg0: i32) -> (i32, i32, i32) {
    %c0_i32 = arith.constant 0 : i32
    %c0_i32_0 = arith.constant 0 : i32
    %c0_i32_1 = arith.constant 0 : i32
    %c0_i32_2 = arith.constant 0 : i32
    return %c0_i32, %c0_i32_0, %c0_i32_1 : i32, i32, i32
  }
  func.func @transform_8(%arg0: i32) -> (i32, i32) {
    %c0_i32 = arith.constant 0 : i32
    %c0_i32_0 = arith.constant 0 : i32
    %c0_i32_1 = arith.constant 0 : i32
    return %c0_i32, %c0_i32_0 : i32, i32
  }
  func.func @transform_9(%arg0: i32) -> (i32, i32, i32) {
    %c0_i32 = arith.constant 0 : i32
    %c0_i32_0 = arith.constant 0 : i32
    %c0_i32_1 = arith.constant 0 : i32
    %c0_i32_2 = arith.constant 0 : i32
    return %c0_i32, %c0_i32_0, %c0_i32_1 : i32, i32, i32
  }
  func.func @transform_10(%arg0: i32) -> (i32, i32) {
    %c0_i32 = arith.constant 0 : i32
    %c0_i32_0 = arith.constant 0 : i32
    %c0_i32_1 = arith.constant 0 : i32
    return %c0_i32, %c0_i32_0 : i32, i32
  }
  func.func @transform_11(%arg0: i32) -> (i32, i32, i32) {
    %c0_i32 = arith.constant 0 : i32
    %c0_i32_0 = arith.constant 0 : i32
    %c0_i32_1 = arith.constant 0 : i32
    return %arg0, %c0_i32, %c0_i32_0 : i32, i32, i32
  }
  func.func @transform_12(%arg0: i32) -> (i32, i32, i32) {
    %c0_i32 = arith.constant 0 : i32
    %c0_i32_0 = arith.constant 0 : i32
    %c0_i32_1 = arith.constant 0 : i32
    return %arg0, %c0_i32, %c0_i32_0 : i32, i32, i32
  }
}

module attributes {stable_mosaic.version = 11 : i64} {
  func.func @_cond_kernel(%arg0: i32, %arg1: memref<1x4x16xf32, #tpu.memory_space<vmem>>, %arg2: memref<1x4x16xf32, #tpu.memory_space<vmem>>, %arg3: memref<3x4x4xf32, #tpu.memory_space<vmem>>, %arg4: memref<4x1xf32, #tpu.memory_space<vmem>>, %arg5: memref<3x4x4xf32, #tpu.memory_space<vmem>>, %arg6: memref<4x1xf32, #tpu.memory_space<vmem>>, %arg7: memref<3x4x4xf32, #tpu.memory_space<vmem>>, %arg8: memref<4x1xf32, #tpu.memory_space<vmem>>, %arg9: memref<3x4x4xf32, #tpu.memory_space<vmem>>, %arg10: memref<4x1xf32, #tpu.memory_space<vmem>>, %arg11: memref<3x4x4xf32, #tpu.memory_space<vmem>>, %arg12: memref<4x1xf32, #tpu.memory_space<vmem>>, %arg13: memref<3x4x4xf32, #tpu.memory_space<vmem>>, %arg14: memref<4x1xf32, #tpu.memory_space<vmem>>, %arg15: memref<1x4x16xf32, #tpu.memory_space<vmem>>) attributes {dimension_semantics = [#tpu.dimension_semantics<parallel>], iteration_bounds = array<i64: 2>, scalar_prefetch = 0 : i64, scratch_operands = 0 : i64, tpu.core_type = #tpu.core_type<tc>, window_params = [{transform_indices = @transform_0, window_bounds = array<i64: 1, 4, 16>}, {transform_indices = @transform_1, window_bounds = array<i64: 1, 4, 16>}, {pipeline_mode = #tpu.pipeline_mode<synchronous>, transform_indices = @transform_2, window_bounds = array<i64: 3, 4, 4>}, {pipeline_mode = #tpu.pipeline_mode<synchronous>, transform_indices = @transform_3, window_bounds = array<i64: 4, 1>}, {pipeline_mode = #tpu.pipeline_mode<synchronous>, transform_indices = @transform_4, window_bounds = array<i64: 3, 4, 4>}, {pipeline_mode = #tpu.pipeline_mode<synchronous>, transform_indices = @transform_5, window_bounds = array<i64: 4, 1>}, {pipeline_mode = #tpu.pipeline_mode<synchronous>, transform_indices = @transform_6, window_bounds = array<i64: 3, 4, 4>}, {pipeline_mode = #tpu.pipeline_mode<synchronous>, transform_indices = @transform_7, window_bounds = array<i64: 4, 1>}, {pipeline_mode = #tpu.pipeline_mode<synchronous>, transform_indices = @transform_8, window_bounds = array<i64: 3, 4, 4>}, {pipeline_mode = #tpu.pipeline_mode<synchronous>, transform_indices = @transform_9, window_bounds = array<i64: 4, 1>}, {pipeline_mode = #tpu.pipeline_mode<synchronous>, transform_indices = @transform_10, window_bounds = array<i64: 3, 4, 4>}, {pipeline_mode = #tpu.pipeline_mode<synchronous>, transform_indices = @transform_11, window_bounds = array<i64: 4, 1>}, {pipeline_mode = #tpu.pipeline_mode<synchronous>, transform_indices = @transform_12, window_bounds = array<i64: 3, 4, 4>}, {pipeline_mode = #tpu.pipeline_mode<synchronous>, transform_indices = @transform_13, window_bounds = array<i64: 4, 1>}, {transform_indices = @transform_14, window_bounds = array<i64: 1, 4, 16>}]} {
    %c0 = arith.constant 0 : index
    %c0_0 = arith.constant 0 : index
    %c0_1 = arith.constant 0 : index
    %0 = vector.load %arg1[%c0, %c0_0, %c0_1] : memref<1x4x16xf32, #tpu.memory_space<vmem>>, vector<1x4x16xf32>
    %1 = vector.shape_cast %0 : vector<1x4x16xf32> to vector<4x16xf32>
    %c0_2 = arith.constant 0 : index
    %c0_3 = arith.constant 0 : index
    %c0_4 = arith.constant 0 : index
    %2 = vector.load %arg3[%c0_2, %c0_3, %c0_4] : memref<3x4x4xf32, #tpu.memory_space<vmem>>, vector<1x4x4xf32>
    %3 = vector.shape_cast %2 : vector<1x4x4xf32> to vector<4x4xf32>
    %cst = arith.constant 0.000000e+00 : f32
    %4 = vector.broadcast %cst : f32 to vector<4x1xf32>
    %5 = vector.extract_strided_slice %1 {offsets = [0, 0], sizes = [4, 15], strides = [1, 1]} : vector<4x16xf32> to vector<4x15xf32>
    %6 = tpu.concatenate %4, %5 in 1 : vector<4x1xf32>, vector<4x15xf32> -> vector<4x16xf32>
    %cst_5 = arith.constant dense<0.000000e+00> : vector<4x16xf32>
    %7 = tpu.matmul %3, %6, %cst_5 {dimension_numbers = #tpu.dot_dimension_numbers<[1], [0], [0], [1], [0, 0, 1, 1], [], []>} : vector<4x4xf32>, vector<4x16xf32>, vector<4x16xf32> -> vector<4x16xf32>
    %c1 = arith.constant 1 : index
    %c0_6 = arith.constant 0 : index
    %c0_7 = arith.constant 0 : index
    %8 = vector.load %arg3[%c1, %c0_6, %c0_7] : memref<3x4x4xf32, #tpu.memory_space<vmem>>, vector<1x4x4xf32>
    %9 = vector.shape_cast %8 : vector<1x4x4xf32> to vector<4x4xf32>
    %cst_8 = arith.constant dense<0.000000e+00> : vector<4x16xf32>
    %10 = tpu.matmul %9, %1, %cst_8 {dimension_numbers = #tpu.dot_dimension_numbers<[1], [0], [0], [1], [0, 0, 1, 1], [], []>} : vector<4x4xf32>, vector<4x16xf32>, vector<4x16xf32> -> vector<4x16xf32>
    %11 = arith.addf %7, %10 : vector<4x16xf32>
    %c2 = arith.constant 2 : index
    %c0_9 = arith.constant 0 : index
    %c0_10 = arith.constant 0 : index
    %12 = vector.load %arg3[%c2, %c0_9, %c0_10] : memref<3x4x4xf32, #tpu.memory_space<vmem>>, vector<1x4x4xf32>
    %13 = vector.shape_cast %12 : vector<1x4x4xf32> to vector<4x4xf32>
    %14 = vector.extract_strided_slice %1 {offsets = [0, 1], sizes = [4, 15], strides = [1, 1]} : vector<4x16xf32> to vector<4x15xf32>
    %cst_11 = arith.constant 0.000000e+00 : f32
    %15 = vector.broadcast %cst_11 : f32 to vector<4x1xf32>
    %16 = tpu.concatenate %14, %15 in 1 : vector<4x15xf32>, vector<4x1xf32> -> vector<4x16xf32>
    %cst_12 = arith.constant dense<0.000000e+00> : vector<4x16xf32>
    %17 = tpu.matmul %13, %16, %cst_12 {dimension_numbers = #tpu.dot_dimension_numbers<[1], [0], [0], [1], [0, 0, 1, 1], [], []>} : vector<4x4xf32>, vector<4x16xf32>, vector<4x16xf32> -> vector<4x16xf32>
    %18 = arith.addf %11, %17 : vector<4x16xf32>
    %c0_13 = arith.constant 0 : index
    %c0_14 = arith.constant 0 : index
    %19 = vector.load %arg4[%c0_13, %c0_14] : memref<4x1xf32, #tpu.memory_space<vmem>>, vector<4x1xf32>
    %20 = vector.broadcast %19 : vector<4x1xf32> to vector<4x16xf32>
    %21 = arith.addf %18, %20 : vector<4x16xf32>
    %22 = arith.negf %21 : vector<4x16xf32>
    %23 = math.exp %22 : vector<4x16xf32>
    %cst_15 = arith.constant 1.000000e+00 : f32
    %24 = vector.broadcast %cst_15 : f32 to vector<4x16xf32>
    %25 = arith.addf %24, %23 : vector<4x16xf32>
    %26 = arith.divf %24, %25 : vector<4x16xf32>
    %27 = arith.mulf %21, %26 : vector<4x16xf32>
    %c0_16 = arith.constant 0 : index
    %c0_17 = arith.constant 0 : index
    %c0_18 = arith.constant 0 : index
    %28 = vector.load %arg5[%c0_16, %c0_17, %c0_18] : memref<3x4x4xf32, #tpu.memory_space<vmem>>, vector<1x4x4xf32>
    %29 = vector.shape_cast %28 : vector<1x4x4xf32> to vector<4x4xf32>
    %cst_19 = arith.constant 0.000000e+00 : f32
    %30 = vector.broadcast %cst_19 : f32 to vector<4x1xf32>
    %31 = vector.extract_strided_slice %27 {offsets = [0, 0], sizes = [4, 15], strides = [1, 1]} : vector<4x16xf32> to vector<4x15xf32>
    %32 = tpu.concatenate %30, %31 in 1 : vector<4x1xf32>, vector<4x15xf32> -> vector<4x16xf32>
    %cst_20 = arith.constant dense<0.000000e+00> : vector<4x16xf32>
    %33 = tpu.matmul %29, %32, %cst_20 {dimension_numbers = #tpu.dot_dimension_numbers<[1], [0], [0], [1], [0, 0, 1, 1], [], []>} : vector<4x4xf32>, vector<4x16xf32>, vector<4x16xf32> -> vector<4x16xf32>
    %c1_21 = arith.constant 1 : index
    %c0_22 = arith.constant 0 : index
    %c0_23 = arith.constant 0 : index
    %34 = vector.load %arg5[%c1_21, %c0_22, %c0_23] : memref<3x4x4xf32, #tpu.memory_space<vmem>>, vector<1x4x4xf32>
    %35 = vector.shape_cast %34 : vector<1x4x4xf32> to vector<4x4xf32>
    %cst_24 = arith.constant dense<0.000000e+00> : vector<4x16xf32>
    %36 = tpu.matmul %35, %27, %cst_24 {dimension_numbers = #tpu.dot_dimension_numbers<[1], [0], [0], [1], [0, 0, 1, 1], [], []>} : vector<4x4xf32>, vector<4x16xf32>, vector<4x16xf32> -> vector<4x16xf32>
    %37 = arith.addf %33, %36 : vector<4x16xf32>
    %c2_25 = arith.constant 2 : index
    %c0_26 = arith.constant 0 : index
    %c0_27 = arith.constant 0 : index
    %38 = vector.load %arg5[%c2_25, %c0_26, %c0_27] : memref<3x4x4xf32, #tpu.memory_space<vmem>>, vector<1x4x4xf32>
    %39 = vector.shape_cast %38 : vector<1x4x4xf32> to vector<4x4xf32>
    %40 = vector.extract_strided_slice %27 {offsets = [0, 1], sizes = [4, 15], strides = [1, 1]} : vector<4x16xf32> to vector<4x15xf32>
    %cst_28 = arith.constant 0.000000e+00 : f32
    %41 = vector.broadcast %cst_28 : f32 to vector<4x1xf32>
    %42 = tpu.concatenate %40, %41 in 1 : vector<4x15xf32>, vector<4x1xf32> -> vector<4x16xf32>
    %cst_29 = arith.constant dense<0.000000e+00> : vector<4x16xf32>
    %43 = tpu.matmul %39, %42, %cst_29 {dimension_numbers = #tpu.dot_dimension_numbers<[1], [0], [0], [1], [0, 0, 1, 1], [], []>} : vector<4x4xf32>, vector<4x16xf32>, vector<4x16xf32> -> vector<4x16xf32>
    %44 = arith.addf %37, %43 : vector<4x16xf32>
    %c0_30 = arith.constant 0 : index
    %c0_31 = arith.constant 0 : index
    %45 = vector.load %arg6[%c0_30, %c0_31] : memref<4x1xf32, #tpu.memory_space<vmem>>, vector<4x1xf32>
    %46 = vector.broadcast %45 : vector<4x1xf32> to vector<4x16xf32>
    %47 = arith.addf %44, %46 : vector<4x16xf32>
    %cst_32 = arith.constant 1.000000e-01 : f32
    %48 = vector.broadcast %cst_32 : f32 to vector<4x16xf32>
    %49 = arith.mulf %48, %47 : vector<4x16xf32>
    %50 = arith.addf %1, %49 : vector<4x16xf32>
    %51 = arith.negf %50 : vector<4x16xf32>
    %52 = math.exp %51 : vector<4x16xf32>
    %cst_33 = arith.constant 1.000000e+00 : f32
    %53 = vector.broadcast %cst_33 : f32 to vector<4x16xf32>
    %54 = arith.addf %53, %52 : vector<4x16xf32>
    %55 = arith.divf %53, %54 : vector<4x16xf32>
    %56 = arith.mulf %50, %55 : vector<4x16xf32>
    %c0_34 = arith.constant 0 : index
    %c0_35 = arith.constant 0 : index
    %c0_36 = arith.constant 0 : index
    %57 = vector.load %arg7[%c0_34, %c0_35, %c0_36] : memref<3x4x4xf32, #tpu.memory_space<vmem>>, vector<1x4x4xf32>
    %58 = vector.shape_cast %57 : vector<1x4x4xf32> to vector<4x4xf32>
    %cst_37 = arith.constant 0.000000e+00 : f32
    %59 = vector.broadcast %cst_37 : f32 to vector<4x1xf32>
    %60 = vector.extract_strided_slice %56 {offsets = [0, 0], sizes = [4, 15], strides = [1, 1]} : vector<4x16xf32> to vector<4x15xf32>
    %61 = tpu.concatenate %59, %60 in 1 : vector<4x1xf32>, vector<4x15xf32> -> vector<4x16xf32>
    %cst_38 = arith.constant dense<0.000000e+00> : vector<4x16xf32>
    %62 = tpu.matmul %58, %61, %cst_38 {dimension_numbers = #tpu.dot_dimension_numbers<[1], [0], [0], [1], [0, 0, 1, 1], [], []>} : vector<4x4xf32>, vector<4x16xf32>, vector<4x16xf32> -> vector<4x16xf32>
    %c1_39 = arith.constant 1 : index
    %c0_40 = arith.constant 0 : index
    %c0_41 = arith.constant 0 : index
    %63 = vector.load %arg7[%c1_39, %c0_40, %c0_41] : memref<3x4x4xf32, #tpu.memory_space<vmem>>, vector<1x4x4xf32>
    %64 = vector.shape_cast %63 : vector<1x4x4xf32> to vector<4x4xf32>
    %cst_42 = arith.constant dense<0.000000e+00> : vector<4x16xf32>
    %65 = tpu.matmul %64, %56, %cst_42 {dimension_numbers = #tpu.dot_dimension_numbers<[1], [0], [0], [1], [0, 0, 1, 1], [], []>} : vector<4x4xf32>, vector<4x16xf32>, vector<4x16xf32> -> vector<4x16xf32>
    %66 = arith.addf %62, %65 : vector<4x16xf32>
    %c2_43 = arith.constant 2 : index
    %c0_44 = arith.constant 0 : index
    %c0_45 = arith.constant 0 : index
    %67 = vector.load %arg7[%c2_43, %c0_44, %c0_45] : memref<3x4x4xf32, #tpu.memory_space<vmem>>, vector<1x4x4xf32>
    %68 = vector.shape_cast %67 : vector<1x4x4xf32> to vector<4x4xf32>
    %69 = vector.extract_strided_slice %56 {offsets = [0, 1], sizes = [4, 15], strides = [1, 1]} : vector<4x16xf32> to vector<4x15xf32>
    %cst_46 = arith.constant 0.000000e+00 : f32
    %70 = vector.broadcast %cst_46 : f32 to vector<4x1xf32>
    %71 = tpu.concatenate %69, %70 in 1 : vector<4x15xf32>, vector<4x1xf32> -> vector<4x16xf32>
    %cst_47 = arith.constant dense<0.000000e+00> : vector<4x16xf32>
    %72 = tpu.matmul %68, %71, %cst_47 {dimension_numbers = #tpu.dot_dimension_numbers<[1], [0], [0], [1], [0, 0, 1, 1], [], []>} : vector<4x4xf32>, vector<4x16xf32>, vector<4x16xf32> -> vector<4x16xf32>
    %73 = arith.addf %66, %72 : vector<4x16xf32>
    %c0_48 = arith.constant 0 : index
    %c0_49 = arith.constant 0 : index
    %74 = vector.load %arg8[%c0_48, %c0_49] : memref<4x1xf32, #tpu.memory_space<vmem>>, vector<4x1xf32>
    %75 = vector.broadcast %74 : vector<4x1xf32> to vector<4x16xf32>
    %76 = arith.addf %73, %75 : vector<4x16xf32>
    %c0_50 = arith.constant 0 : index
    %c0_51 = arith.constant 0 : index
    %c0_52 = arith.constant 0 : index
    %77 = vector.load %arg9[%c0_50, %c0_51, %c0_52] : memref<3x4x4xf32, #tpu.memory_space<vmem>>, vector<1x4x4xf32>
    %78 = vector.shape_cast %77 : vector<1x4x4xf32> to vector<4x4xf32>
    %cst_53 = arith.constant 0.000000e+00 : f32
    %79 = vector.broadcast %cst_53 : f32 to vector<4x1xf32>
    %80 = vector.extract_strided_slice %1 {offsets = [0, 0], sizes = [4, 15], strides = [1, 1]} : vector<4x16xf32> to vector<4x15xf32>
    %81 = tpu.concatenate %79, %80 in 1 : vector<4x1xf32>, vector<4x15xf32> -> vector<4x16xf32>
    %cst_54 = arith.constant dense<0.000000e+00> : vector<4x16xf32>
    %82 = tpu.matmul %78, %81, %cst_54 {dimension_numbers = #tpu.dot_dimension_numbers<[1], [0], [0], [1], [0, 0, 1, 1], [], []>} : vector<4x4xf32>, vector<4x16xf32>, vector<4x16xf32> -> vector<4x16xf32>
    %c1_55 = arith.constant 1 : index
    %c0_56 = arith.constant 0 : index
    %c0_57 = arith.constant 0 : index
    %83 = vector.load %arg9[%c1_55, %c0_56, %c0_57] : memref<3x4x4xf32, #tpu.memory_space<vmem>>, vector<1x4x4xf32>
    %84 = vector.shape_cast %83 : vector<1x4x4xf32> to vector<4x4xf32>
    %cst_58 = arith.constant dense<0.000000e+00> : vector<4x16xf32>
    %85 = tpu.matmul %84, %1, %cst_58 {dimension_numbers = #tpu.dot_dimension_numbers<[1], [0], [0], [1], [0, 0, 1, 1], [], []>} : vector<4x4xf32>, vector<4x16xf32>, vector<4x16xf32> -> vector<4x16xf32>
    %86 = arith.addf %82, %85 : vector<4x16xf32>
    %c2_59 = arith.constant 2 : index
    %c0_60 = arith.constant 0 : index
    %c0_61 = arith.constant 0 : index
    %87 = vector.load %arg9[%c2_59, %c0_60, %c0_61] : memref<3x4x4xf32, #tpu.memory_space<vmem>>, vector<1x4x4xf32>
    %88 = vector.shape_cast %87 : vector<1x4x4xf32> to vector<4x4xf32>
    %89 = vector.extract_strided_slice %1 {offsets = [0, 1], sizes = [4, 15], strides = [1, 1]} : vector<4x16xf32> to vector<4x15xf32>
    %cst_62 = arith.constant 0.000000e+00 : f32
    %90 = vector.broadcast %cst_62 : f32 to vector<4x1xf32>
    %91 = tpu.concatenate %89, %90 in 1 : vector<4x15xf32>, vector<4x1xf32> -> vector<4x16xf32>
    %cst_63 = arith.constant dense<0.000000e+00> : vector<4x16xf32>
    %92 = tpu.matmul %88, %91, %cst_63 {dimension_numbers = #tpu.dot_dimension_numbers<[1], [0], [0], [1], [0, 0, 1, 1], [], []>} : vector<4x4xf32>, vector<4x16xf32>, vector<4x16xf32> -> vector<4x16xf32>
    %93 = arith.addf %86, %92 : vector<4x16xf32>
    %c0_64 = arith.constant 0 : index
    %c0_65 = arith.constant 0 : index
    %94 = vector.load %arg10[%c0_64, %c0_65] : memref<4x1xf32, #tpu.memory_space<vmem>>, vector<4x1xf32>
    %95 = vector.broadcast %94 : vector<4x1xf32> to vector<4x16xf32>
    %96 = arith.addf %93, %95 : vector<4x16xf32>
    %97 = arith.negf %96 : vector<4x16xf32>
    %98 = math.exp %97 : vector<4x16xf32>
    %cst_66 = arith.constant 1.000000e+00 : f32
    %99 = vector.broadcast %cst_66 : f32 to vector<4x16xf32>
    %100 = arith.addf %99, %98 : vector<4x16xf32>
    %101 = arith.divf %99, %100 : vector<4x16xf32>
    %102 = arith.mulf %96, %101 : vector<4x16xf32>
    %c0_67 = arith.constant 0 : index
    %c0_68 = arith.constant 0 : index
    %c0_69 = arith.constant 0 : index
    %103 = vector.load %arg11[%c0_67, %c0_68, %c0_69] : memref<3x4x4xf32, #tpu.memory_space<vmem>>, vector<1x4x4xf32>
    %104 = vector.shape_cast %103 : vector<1x4x4xf32> to vector<4x4xf32>
    %cst_70 = arith.constant 0.000000e+00 : f32
    %105 = vector.broadcast %cst_70 : f32 to vector<4x1xf32>
    %106 = vector.extract_strided_slice %102 {offsets = [0, 0], sizes = [4, 15], strides = [1, 1]} : vector<4x16xf32> to vector<4x15xf32>
    %107 = tpu.concatenate %105, %106 in 1 : vector<4x1xf32>, vector<4x15xf32> -> vector<4x16xf32>
    %cst_71 = arith.constant dense<0.000000e+00> : vector<4x16xf32>
    %108 = tpu.matmul %104, %107, %cst_71 {dimension_numbers = #tpu.dot_dimension_numbers<[1], [0], [0], [1], [0, 0, 1, 1], [], []>} : vector<4x4xf32>, vector<4x16xf32>, vector<4x16xf32> -> vector<4x16xf32>
    %c1_72 = arith.constant 1 : index
    %c0_73 = arith.constant 0 : index
    %c0_74 = arith.constant 0 : index
    %109 = vector.load %arg11[%c1_72, %c0_73, %c0_74] : memref<3x4x4xf32, #tpu.memory_space<vmem>>, vector<1x4x4xf32>
    %110 = vector.shape_cast %109 : vector<1x4x4xf32> to vector<4x4xf32>
    %cst_75 = arith.constant dense<0.000000e+00> : vector<4x16xf32>
    %111 = tpu.matmul %110, %102, %cst_75 {dimension_numbers = #tpu.dot_dimension_numbers<[1], [0], [0], [1], [0, 0, 1, 1], [], []>} : vector<4x4xf32>, vector<4x16xf32>, vector<4x16xf32> -> vector<4x16xf32>
    %112 = arith.addf %108, %111 : vector<4x16xf32>
    %c2_76 = arith.constant 2 : index
    %c0_77 = arith.constant 0 : index
    %c0_78 = arith.constant 0 : index
    %113 = vector.load %arg11[%c2_76, %c0_77, %c0_78] : memref<3x4x4xf32, #tpu.memory_space<vmem>>, vector<1x4x4xf32>
    %114 = vector.shape_cast %113 : vector<1x4x4xf32> to vector<4x4xf32>
    %115 = vector.extract_strided_slice %102 {offsets = [0, 1], sizes = [4, 15], strides = [1, 1]} : vector<4x16xf32> to vector<4x15xf32>
    %cst_79 = arith.constant 0.000000e+00 : f32
    %116 = vector.broadcast %cst_79 : f32 to vector<4x1xf32>
    %117 = tpu.concatenate %115, %116 in 1 : vector<4x15xf32>, vector<4x1xf32> -> vector<4x16xf32>
    %cst_80 = arith.constant dense<0.000000e+00> : vector<4x16xf32>
    %118 = tpu.matmul %114, %117, %cst_80 {dimension_numbers = #tpu.dot_dimension_numbers<[1], [0], [0], [1], [0, 0, 1, 1], [], []>} : vector<4x4xf32>, vector<4x16xf32>, vector<4x16xf32> -> vector<4x16xf32>
    %119 = arith.addf %112, %118 : vector<4x16xf32>
    %c0_81 = arith.constant 0 : index
    %c0_82 = arith.constant 0 : index
    %120 = vector.load %arg12[%c0_81, %c0_82] : memref<4x1xf32, #tpu.memory_space<vmem>>, vector<4x1xf32>
    %121 = vector.broadcast %120 : vector<4x1xf32> to vector<4x16xf32>
    %122 = arith.addf %119, %121 : vector<4x16xf32>
    %cst_83 = arith.constant 1.000000e-01 : f32
    %123 = vector.broadcast %cst_83 : f32 to vector<4x16xf32>
    %124 = arith.mulf %123, %122 : vector<4x16xf32>
    %125 = arith.addf %1, %124 : vector<4x16xf32>
    %126 = arith.negf %125 : vector<4x16xf32>
    %127 = math.exp %126 : vector<4x16xf32>
    %cst_84 = arith.constant 1.000000e+00 : f32
    %128 = vector.broadcast %cst_84 : f32 to vector<4x16xf32>
    %129 = arith.addf %128, %127 : vector<4x16xf32>
    %130 = arith.divf %128, %129 : vector<4x16xf32>
    %131 = arith.mulf %125, %130 : vector<4x16xf32>
    %c0_85 = arith.constant 0 : index
    %c0_86 = arith.constant 0 : index
    %c0_87 = arith.constant 0 : index
    %132 = vector.load %arg13[%c0_85, %c0_86, %c0_87] : memref<3x4x4xf32, #tpu.memory_space<vmem>>, vector<1x4x4xf32>
    %133 = vector.shape_cast %132 : vector<1x4x4xf32> to vector<4x4xf32>
    %cst_88 = arith.constant 0.000000e+00 : f32
    %134 = vector.broadcast %cst_88 : f32 to vector<4x1xf32>
    %135 = vector.extract_strided_slice %131 {offsets = [0, 0], sizes = [4, 15], strides = [1, 1]} : vector<4x16xf32> to vector<4x15xf32>
    %136 = tpu.concatenate %134, %135 in 1 : vector<4x1xf32>, vector<4x15xf32> -> vector<4x16xf32>
    %cst_89 = arith.constant dense<0.000000e+00> : vector<4x16xf32>
    %137 = tpu.matmul %133, %136, %cst_89 {dimension_numbers = #tpu.dot_dimension_numbers<[1], [0], [0], [1], [0, 0, 1, 1], [], []>} : vector<4x4xf32>, vector<4x16xf32>, vector<4x16xf32> -> vector<4x16xf32>
    %c1_90 = arith.constant 1 : index
    %c0_91 = arith.constant 0 : index
    %c0_92 = arith.constant 0 : index
    %138 = vector.load %arg13[%c1_90, %c0_91, %c0_92] : memref<3x4x4xf32, #tpu.memory_space<vmem>>, vector<1x4x4xf32>
    %139 = vector.shape_cast %138 : vector<1x4x4xf32> to vector<4x4xf32>
    %cst_93 = arith.constant dense<0.000000e+00> : vector<4x16xf32>
    %140 = tpu.matmul %139, %131, %cst_93 {dimension_numbers = #tpu.dot_dimension_numbers<[1], [0], [0], [1], [0, 0, 1, 1], [], []>} : vector<4x4xf32>, vector<4x16xf32>, vector<4x16xf32> -> vector<4x16xf32>
    %141 = arith.addf %137, %140 : vector<4x16xf32>
    %c2_94 = arith.constant 2 : index
    %c0_95 = arith.constant 0 : index
    %c0_96 = arith.constant 0 : index
    %142 = vector.load %arg13[%c2_94, %c0_95, %c0_96] : memref<3x4x4xf32, #tpu.memory_space<vmem>>, vector<1x4x4xf32>
    %143 = vector.shape_cast %142 : vector<1x4x4xf32> to vector<4x4xf32>
    %144 = vector.extract_strided_slice %131 {offsets = [0, 1], sizes = [4, 15], strides = [1, 1]} : vector<4x16xf32> to vector<4x15xf32>
    %cst_97 = arith.constant 0.000000e+00 : f32
    %145 = vector.broadcast %cst_97 : f32 to vector<4x1xf32>
    %146 = tpu.concatenate %144, %145 in 1 : vector<4x15xf32>, vector<4x1xf32> -> vector<4x16xf32>
    %cst_98 = arith.constant dense<0.000000e+00> : vector<4x16xf32>
    %147 = tpu.matmul %143, %146, %cst_98 {dimension_numbers = #tpu.dot_dimension_numbers<[1], [0], [0], [1], [0, 0, 1, 1], [], []>} : vector<4x4xf32>, vector<4x16xf32>, vector<4x16xf32> -> vector<4x16xf32>
    %148 = arith.addf %141, %147 : vector<4x16xf32>
    %c0_99 = arith.constant 0 : index
    %c0_100 = arith.constant 0 : index
    %149 = vector.load %arg14[%c0_99, %c0_100] : memref<4x1xf32, #tpu.memory_space<vmem>>, vector<4x1xf32>
    %150 = vector.broadcast %149 : vector<4x1xf32> to vector<4x16xf32>
    %151 = arith.addf %148, %150 : vector<4x16xf32>
    %cst_101 = arith.constant 5.000000e-01 : f32
    %152 = vector.broadcast %cst_101 : f32 to vector<4x16xf32>
    %153 = arith.mulf %152, %151 : vector<4x16xf32>
    %154 = math.exp %153 : vector<4x16xf32>
    %c0_102 = arith.constant 0 : index
    %c0_103 = arith.constant 0 : index
    %c0_104 = arith.constant 0 : index
    %155 = vector.load %arg2[%c0_102, %c0_103, %c0_104] : memref<1x4x16xf32, #tpu.memory_space<vmem>>, vector<1x4x16xf32>
    %156 = vector.shape_cast %155 : vector<1x4x16xf32> to vector<4x16xf32>
    %157 = arith.mulf %154, %156 : vector<4x16xf32>
    %158 = arith.addf %76, %157 : vector<4x16xf32>
    %c0_105 = arith.constant 0 : index
    %c0_106 = arith.constant 0 : index
    %c0_107 = arith.constant 0 : index
    %159 = vector.load %arg15[%c0_105, %c0_106, %c0_107] : memref<1x4x16xf32, #tpu.memory_space<vmem>>, vector<1x4x16xf32>
    %160 = vector.shape_cast %159 : vector<1x4x16xf32> to vector<4x16xf32>
    %161 = vector.shape_cast %158 : vector<4x16xf32> to vector<1x4x16xf32>
    tpu.vector_store %arg15[%c0_105, %c0_106, %c0_107], %161 {strides = array<i32>} : memref<1x4x16xf32, #tpu.memory_space<vmem>>, vector<1x4x16xf32>,
    return
  }
  func.func @transform_0(%arg0: i32) -> (i32, i32, i32) {
    %c0_i32 = arith.constant 0 : i32
    %c0_i32_0 = arith.constant 0 : i32
    %c0_i32_1 = arith.constant 0 : i32
    return %arg0, %c0_i32, %c0_i32_0 : i32, i32, i32
  }
  func.func @transform_1(%arg0: i32) -> (i32, i32, i32) {
    %c0_i32 = arith.constant 0 : i32
    %c0_i32_0 = arith.constant 0 : i32
    %c0_i32_1 = arith.constant 0 : i32
    return %arg0, %c0_i32, %c0_i32_0 : i32, i32, i32
  }
  func.func @transform_2(%arg0: i32) -> (i32, i32, i32) {
    %c0_i32 = arith.constant 0 : i32
    %c0_i32_0 = arith.constant 0 : i32
    %c0_i32_1 = arith.constant 0 : i32
    %c0_i32_2 = arith.constant 0 : i32
    return %c0_i32, %c0_i32_0, %c0_i32_1 : i32, i32, i32
  }
  func.func @transform_3(%arg0: i32) -> (i32, i32) {
    %c0_i32 = arith.constant 0 : i32
    %c0_i32_0 = arith.constant 0 : i32
    %c0_i32_1 = arith.constant 0 : i32
    return %c0_i32, %c0_i32_0 : i32, i32
  }
  func.func @transform_4(%arg0: i32) -> (i32, i32, i32) {
    %c0_i32 = arith.constant 0 : i32
    %c0_i32_0 = arith.constant 0 : i32
    %c0_i32_1 = arith.constant 0 : i32
    %c0_i32_2 = arith.constant 0 : i32
    return %c0_i32, %c0_i32_0, %c0_i32_1 : i32, i32, i32
  }
  func.func @transform_5(%arg0: i32) -> (i32, i32) {
    %c0_i32 = arith.constant 0 : i32
    %c0_i32_0 = arith.constant 0 : i32
    %c0_i32_1 = arith.constant 0 : i32
    return %c0_i32, %c0_i32_0 : i32, i32
  }
  func.func @transform_6(%arg0: i32) -> (i32, i32, i32) {
    %c0_i32 = arith.constant 0 : i32
    %c0_i32_0 = arith.constant 0 : i32
    %c0_i32_1 = arith.constant 0 : i32
    %c0_i32_2 = arith.constant 0 : i32
    return %c0_i32, %c0_i32_0, %c0_i32_1 : i32, i32, i32
  }
  func.func @transform_7(%arg0: i32) -> (i32, i32) {
    %c0_i32 = arith.constant 0 : i32
    %c0_i32_0 = arith.constant 0 : i32
    %c0_i32_1 = arith.constant 0 : i32
    return %c0_i32, %c0_i32_0 : i32, i32
  }
  func.func @transform_8(%arg0: i32) -> (i32, i32, i32) {
    %c0_i32 = arith.constant 0 : i32
    %c0_i32_0 = arith.constant 0 : i32
    %c0_i32_1 = arith.constant 0 : i32
    %c0_i32_2 = arith.constant 0 : i32
    return %c0_i32, %c0_i32_0, %c0_i32_1 : i32, i32, i32
  }
  func.func @transform_9(%arg0: i32) -> (i32, i32) {
    %c0_i32 = arith.constant 0 : i32
    %c0_i32_0 = arith.constant 0 : i32
    %c0_i32_1 = arith.constant 0 : i32
    return %c0_i32, %c0_i32_0 : i32, i32
  }
  func.func @transform_10(%arg0: i32) -> (i32, i32, i32) {
    %c0_i32 = arith.constant 0 : i32
    %c0_i32_0 = arith.constant 0 : i32
    %c0_i32_1 = arith.constant 0 : i32
    %c0_i32_2 = arith.constant 0 : i32
    return %c0_i32, %c0_i32_0, %c0_i32_1 : i32, i32, i32
  }
  func.func @transform_11(%arg0: i32) -> (i32, i32) {
    %c0_i32 = arith.constant 0 : i32
    %c0_i32_0 = arith.constant 0 : i32
    %c0_i32_1 = arith.constant 0 : i32
    return %c0_i32, %c0_i32_0 : i32, i32
  }
  func.func @transform_12(%arg0: i32) -> (i32, i32, i32) {
    %c0_i32 = arith.constant 0 : i32
    %c0_i32_0 = arith.constant 0 : i32
    %c0_i32_1 = arith.constant 0 : i32
    %c0_i32_2 = arith.constant 0 : i32
    return %c0_i32, %c0_i32_0, %c0_i32_1 : i32, i32, i32
  }
  func.func @transform_13(%arg0: i32) -> (i32, i32) {
    %c0_i32 = arith.constant 0 : i32
    %c0_i32_0 = arith.constant 0 : i32
    %c0_i32_1 = arith.constant 0 : i32
    return %c0_i32, %c0_i32_0 : i32, i32
  }
  func.func @transform_14(%arg0: i32) -> (i32, i32, i32) {
    %c0_i32 = arith.constant 0 : i32
    %c0_i32_0 = arith.constant 0 : i32
    %c0_i32_1 = arith.constant 0 : i32
    return %arg0, %c0_i32, %c0_i32_0 : i32, i32, i32
  }
}

module attributes {stable_mosaic.version = 11 : i64} {
  func.func @_level_kernel(%arg0: i32, %arg1: memref<1x4x16xf32, #tpu.memory_space<vmem>>, %arg2: memref<1x4x16xf32, #tpu.memory_space<vmem>>, %arg3: memref<3x8x4xf32, #tpu.memory_space<vmem>>, %arg4: memref<3x8x4xf32, #tpu.memory_space<vmem>>, %arg5: memref<8x1xf32, #tpu.memory_space<vmem>>, %arg6: memref<3x4x8xf32, #tpu.memory_space<vmem>>, %arg7: memref<4x1xf32, #tpu.memory_space<vmem>>, %arg8: memref<3x4x4xf32, #tpu.memory_space<vmem>>, %arg9: memref<4x1xf32, #tpu.memory_space<vmem>>, %arg10: memref<3x4x4xf32, #tpu.memory_space<vmem>>, %arg11: memref<4x1xf32, #tpu.memory_space<vmem>>, %arg12: memref<1x4x16xf32, #tpu.memory_space<vmem>>, %arg13: memref<1x4x16xf32, #tpu.memory_space<vmem>>) attributes {dimension_semantics = [#tpu.dimension_semantics<parallel>], iteration_bounds = array<i64: 2>, scalar_prefetch = 0 : i64, scratch_operands = 0 : i64, tpu.core_type = #tpu.core_type<tc>, window_params = [{transform_indices = @transform_0, window_bounds = array<i64: 1, 4, 16>}, {transform_indices = @transform_1, window_bounds = array<i64: 1, 4, 16>}, {pipeline_mode = #tpu.pipeline_mode<synchronous>, transform_indices = @transform_2, window_bounds = array<i64: 3, 8, 4>}, {pipeline_mode = #tpu.pipeline_mode<synchronous>, transform_indices = @transform_3, window_bounds = array<i64: 3, 8, 4>}, {pipeline_mode = #tpu.pipeline_mode<synchronous>, transform_indices = @transform_4, window_bounds = array<i64: 8, 1>}, {pipeline_mode = #tpu.pipeline_mode<synchronous>, transform_indices = @transform_5, window_bounds = array<i64: 3, 4, 8>}, {pipeline_mode = #tpu.pipeline_mode<synchronous>, transform_indices = @transform_6, window_bounds = array<i64: 4, 1>}, {pipeline_mode = #tpu.pipeline_mode<synchronous>, transform_indices = @transform_7, window_bounds = array<i64: 3, 4, 4>}, {pipeline_mode = #tpu.pipeline_mode<synchronous>, transform_indices = @transform_8, window_bounds = array<i64: 4, 1>}, {pipeline_mode = #tpu.pipeline_mode<synchronous>, transform_indices = @transform_9, window_bounds = array<i64: 3, 4, 4>}, {pipeline_mode = #tpu.pipeline_mode<synchronous>, transform_indices = @transform_10, window_bounds = array<i64: 4, 1>}, {transform_indices = @transform_11, window_bounds = array<i64: 1, 4, 16>}, {transform_indices = @transform_12, window_bounds = array<i64: 1, 4, 16>}]} {
    %c0 = arith.constant 0 : index
    %c0_0 = arith.constant 0 : index
    %c0_1 = arith.constant 0 : index
    %0 = vector.load %arg1[%c0, %c0_0, %c0_1] : memref<1x4x16xf32, #tpu.memory_space<vmem>>, vector<1x4x16xf32>
    %1 = vector.shape_cast %0 : vector<1x4x16xf32> to vector<4x16xf32>
    %c0_2 = arith.constant 0 : index
    %c0_3 = arith.constant 0 : index
    %c0_4 = arith.constant 0 : index
    %2 = vector.load %arg2[%c0_2, %c0_3, %c0_4] : memref<1x4x16xf32, #tpu.memory_space<vmem>>, vector<1x4x16xf32>
    %3 = vector.shape_cast %2 : vector<1x4x16xf32> to vector<4x16xf32>
    %c0_5 = arith.constant 0 : index
    %c0_6 = arith.constant 0 : index
    %c0_7 = arith.constant 0 : index
    %4 = vector.load %arg3[%c0_5, %c0_6, %c0_7] : memref<3x8x4xf32, #tpu.memory_space<vmem>>, vector<1x8x4xf32>
    %5 = vector.shape_cast %4 : vector<1x8x4xf32> to vector<8x4xf32>
    %cst = arith.constant dense<0.000000e+00> : vector<8x16xf32>
    %6 = tpu.matmul %5, %1, %cst {dimension_numbers = #tpu.dot_dimension_numbers<[1], [0], [0], [1], [0, 0, 1, 1], [], []>} : vector<8x4xf32>, vector<4x16xf32>, vector<8x16xf32> -> vector<8x16xf32>
    %c0_8 = arith.constant 0 : index
    %c0_9 = arith.constant 0 : index
    %c0_10 = arith.constant 0 : index
    %7 = vector.load %arg4[%c0_8, %c0_9, %c0_10] : memref<3x8x4xf32, #tpu.memory_space<vmem>>, vector<1x8x4xf32>
    %8 = vector.shape_cast %7 : vector<1x8x4xf32> to vector<8x4xf32>
    %cst_11 = arith.constant dense<0.000000e+00> : vector<8x16xf32>
    %9 = tpu.matmul %8, %3, %cst_11 {dimension_numbers = #tpu.dot_dimension_numbers<[1], [0], [0], [1], [0, 0, 1, 1], [], []>} : vector<8x4xf32>, vector<4x16xf32>, vector<8x16xf32> -> vector<8x16xf32>
    %10 = arith.addf %6, %9 : vector<8x16xf32>
    %c1 = arith.constant 1 : index
    %c0_12 = arith.constant 0 : index
    %c0_13 = arith.constant 0 : index
    %11 = vector.load %arg3[%c1, %c0_12, %c0_13] : memref<3x8x4xf32, #tpu.memory_space<vmem>>, vector<1x8x4xf32>
    %12 = vector.shape_cast %11 : vector<1x8x4xf32> to vector<8x4xf32>
    %cst_14 = arith.constant dense<0.000000e+00> : vector<8x16xf32>
    %13 = tpu.matmul %12, %1, %cst_14 {dimension_numbers = #tpu.dot_dimension_numbers<[1], [0], [0], [1], [0, 0, 1, 1], [], []>} : vector<8x4xf32>, vector<4x16xf32>, vector<8x16xf32> -> vector<8x16xf32>
    %c1_15 = arith.constant 1 : index
    %c0_16 = arith.constant 0 : index
    %c0_17 = arith.constant 0 : index
    %14 = vector.load %arg4[%c1_15, %c0_16, %c0_17] : memref<3x8x4xf32, #tpu.memory_space<vmem>>, vector<1x8x4xf32>
    %15 = vector.shape_cast %14 : vector<1x8x4xf32> to vector<8x4xf32>
    %cst_18 = arith.constant dense<0.000000e+00> : vector<8x16xf32>
    %16 = tpu.matmul %15, %3, %cst_18 {dimension_numbers = #tpu.dot_dimension_numbers<[1], [0], [0], [1], [0, 0, 1, 1], [], []>} : vector<8x4xf32>, vector<4x16xf32>, vector<8x16xf32> -> vector<8x16xf32>
    %17 = arith.addf %13, %16 : vector<8x16xf32>
    %c2 = arith.constant 2 : index
    %c0_19 = arith.constant 0 : index
    %c0_20 = arith.constant 0 : index
    %18 = vector.load %arg3[%c2, %c0_19, %c0_20] : memref<3x8x4xf32, #tpu.memory_space<vmem>>, vector<1x8x4xf32>
    %19 = vector.shape_cast %18 : vector<1x8x4xf32> to vector<8x4xf32>
    %cst_21 = arith.constant dense<0.000000e+00> : vector<8x16xf32>
    %20 = tpu.matmul %19, %1, %cst_21 {dimension_numbers = #tpu.dot_dimension_numbers<[1], [0], [0], [1], [0, 0, 1, 1], [], []>} : vector<8x4xf32>, vector<4x16xf32>, vector<8x16xf32> -> vector<8x16xf32>
    %c2_22 = arith.constant 2 : index
    %c0_23 = arith.constant 0 : index
    %c0_24 = arith.constant 0 : index
    %21 = vector.load %arg4[%c2_22, %c0_23, %c0_24] : memref<3x8x4xf32, #tpu.memory_space<vmem>>, vector<1x8x4xf32>
    %22 = vector.shape_cast %21 : vector<1x8x4xf32> to vector<8x4xf32>
    %cst_25 = arith.constant dense<0.000000e+00> : vector<8x16xf32>
    %23 = tpu.matmul %22, %3, %cst_25 {dimension_numbers = #tpu.dot_dimension_numbers<[1], [0], [0], [1], [0, 0, 1, 1], [], []>} : vector<8x4xf32>, vector<4x16xf32>, vector<8x16xf32> -> vector<8x16xf32>
    %24 = arith.addf %20, %23 : vector<8x16xf32>
    %c0_26 = arith.constant 0 : index
    %c0_27 = arith.constant 0 : index
    %25 = vector.load %arg5[%c0_26, %c0_27] : memref<8x1xf32, #tpu.memory_space<vmem>>, vector<8x1xf32>
    %cst_28 = arith.constant 0.000000e+00 : f32
    %26 = vector.broadcast %cst_28 : f32 to vector<8x1xf32>
    %27 = vector.extract_strided_slice %10 {offsets = [0, 0], sizes = [8, 15], strides = [1, 1]} : vector<8x16xf32> to vector<8x15xf32>
    %28 = tpu.concatenate %26, %27 in 1 : vector<8x1xf32>, vector<8x15xf32> -> vector<8x16xf32>
    %29 = arith.addf %28, %17 : vector<8x16xf32>
    %30 = arith.addf %29, %24 : vector<8x16xf32>
    %31 = vector.broadcast %25 : vector<8x1xf32> to vector<8x16xf32>
    %32 = arith.addf %30, %31 : vector<8x16xf32>
    %33 = arith.negf %32 : vector<8x16xf32>
    %34 = math.exp %33 : vector<8x16xf32>
    %cst_29 = arith.constant 1.000000e+00 : f32
    %35 = vector.broadcast %cst_29 : f32 to vector<8x16xf32>
    %36 = arith.addf %35, %34 : vector<8x16xf32>
    %37 = arith.divf %35, %36 : vector<8x16xf32>
    %38 = arith.mulf %32, %37 : vector<8x16xf32>
    %39 = arith.addf %10, %17 : vector<8x16xf32>
    %40 = vector.extract_strided_slice %24 {offsets = [0, 1], sizes = [8, 15], strides = [1, 1]} : vector<8x16xf32> to vector<8x15xf32>
    %cst_30 = arith.constant 0.000000e+00 : f32
    %41 = vector.broadcast %cst_30 : f32 to vector<8x1xf32>
    %42 = tpu.concatenate %40, %41 in 1 : vector<8x15xf32>, vector<8x1xf32> -> vector<8x16xf32>
    %43 = arith.addf %39, %42 : vector<8x16xf32>
    %44 = vector.broadcast %25 : vector<8x1xf32> to vector<8x16xf32>
    %45 = arith.addf %43, %44 : vector<8x16xf32>
    %46 = arith.negf %45 : vector<8x16xf32>
    %47 = math.exp %46 : vector<8x16xf32>
    %cst_31 = arith.constant 1.000000e+00 : f32
    %48 = vector.broadcast %cst_31 : f32 to vector<8x16xf32>
    %49 = arith.addf %48, %47 : vector<8x16xf32>
    %50 = arith.divf %48, %49 : vector<8x16xf32>
    %51 = arith.mulf %45, %50 : vector<8x16xf32>
    %c0_32 = arith.constant 0 : index
    %c0_33 = arith.constant 0 : index
    %c0_34 = arith.constant 0 : index
    %52 = vector.load %arg6[%c0_32, %c0_33, %c0_34] : memref<3x4x8xf32, #tpu.memory_space<vmem>>, vector<1x4x8xf32>
    %53 = vector.shape_cast %52 : vector<1x4x8xf32> to vector<4x8xf32>
    %cst_35 = arith.constant dense<0.000000e+00> : vector<4x16xf32>
    %54 = tpu.matmul %53, %38, %cst_35 {dimension_numbers = #tpu.dot_dimension_numbers<[1], [0], [0], [1], [0, 0, 1, 1], [], []>} : vector<4x8xf32>, vector<8x16xf32>, vector<4x16xf32> -> vector<4x16xf32>
    %c0_36 = arith.constant 0 : index
    %c0_37 = arith.constant 0 : index
    %c0_38 = arith.constant 0 : index
    %55 = vector.load %arg6[%c0_36, %c0_37, %c0_38] : memref<3x4x8xf32, #tpu.memory_space<vmem>>, vector<1x4x8xf32>
    %56 = vector.shape_cast %55 : vector<1x4x8xf32> to vector<4x8xf32>
    %cst_39 = arith.constant dense<0.000000e+00> : vector<4x16xf32>
    %57 = tpu.matmul %56, %51, %cst_39 {dimension_numbers = #tpu.dot_dimension_numbers<[1], [0], [0], [1], [0, 0, 1, 1], [], []>} : vector<4x8xf32>, vector<8x16xf32>, vector<4x16xf32> -> vector<4x16xf32>
    %c1_40 = arith.constant 1 : index
    %c0_41 = arith.constant 0 : index
    %c0_42 = arith.constant 0 : index
    %58 = vector.load %arg6[%c1_40, %c0_41, %c0_42] : memref<3x4x8xf32, #tpu.memory_space<vmem>>, vector<1x4x8xf32>
    %59 = vector.shape_cast %58 : vector<1x4x8xf32> to vector<4x8xf32>
    %cst_43 = arith.constant dense<0.000000e+00> : vector<4x16xf32>
    %60 = tpu.matmul %59, %38, %cst_43 {dimension_numbers = #tpu.dot_dimension_numbers<[1], [0], [0], [1], [0, 0, 1, 1], [], []>} : vector<4x8xf32>, vector<8x16xf32>, vector<4x16xf32> -> vector<4x16xf32>
    %c1_44 = arith.constant 1 : index
    %c0_45 = arith.constant 0 : index
    %c0_46 = arith.constant 0 : index
    %61 = vector.load %arg6[%c1_44, %c0_45, %c0_46] : memref<3x4x8xf32, #tpu.memory_space<vmem>>, vector<1x4x8xf32>
    %62 = vector.shape_cast %61 : vector<1x4x8xf32> to vector<4x8xf32>
    %cst_47 = arith.constant dense<0.000000e+00> : vector<4x16xf32>
    %63 = tpu.matmul %62, %51, %cst_47 {dimension_numbers = #tpu.dot_dimension_numbers<[1], [0], [0], [1], [0, 0, 1, 1], [], []>} : vector<4x8xf32>, vector<8x16xf32>, vector<4x16xf32> -> vector<4x16xf32>
    %c2_48 = arith.constant 2 : index
    %c0_49 = arith.constant 0 : index
    %c0_50 = arith.constant 0 : index
    %64 = vector.load %arg6[%c2_48, %c0_49, %c0_50] : memref<3x4x8xf32, #tpu.memory_space<vmem>>, vector<1x4x8xf32>
    %65 = vector.shape_cast %64 : vector<1x4x8xf32> to vector<4x8xf32>
    %cst_51 = arith.constant dense<0.000000e+00> : vector<4x16xf32>
    %66 = tpu.matmul %65, %38, %cst_51 {dimension_numbers = #tpu.dot_dimension_numbers<[1], [0], [0], [1], [0, 0, 1, 1], [], []>} : vector<4x8xf32>, vector<8x16xf32>, vector<4x16xf32> -> vector<4x16xf32>
    %c2_52 = arith.constant 2 : index
    %c0_53 = arith.constant 0 : index
    %c0_54 = arith.constant 0 : index
    %67 = vector.load %arg6[%c2_52, %c0_53, %c0_54] : memref<3x4x8xf32, #tpu.memory_space<vmem>>, vector<1x4x8xf32>
    %68 = vector.shape_cast %67 : vector<1x4x8xf32> to vector<4x8xf32>
    %cst_55 = arith.constant dense<0.000000e+00> : vector<4x16xf32>
    %69 = tpu.matmul %68, %51, %cst_55 {dimension_numbers = #tpu.dot_dimension_numbers<[1], [0], [0], [1], [0, 0, 1, 1], [], []>} : vector<4x8xf32>, vector<8x16xf32>, vector<4x16xf32> -> vector<4x16xf32>
    %c0_56 = arith.constant 0 : index
    %c0_57 = arith.constant 0 : index
    %70 = vector.load %arg7[%c0_56, %c0_57] : memref<4x1xf32, #tpu.memory_space<vmem>>, vector<4x1xf32>
    %cst_58 = arith.constant 0.000000e+00 : f32
    %71 = vector.broadcast %cst_58 : f32 to vector<4x1xf32>
    %72 = vector.extract_strided_slice %57 {offsets = [0, 0], sizes = [4, 15], strides = [1, 1]} : vector<4x16xf32> to vector<4x15xf32>
    %73 = tpu.concatenate %71, %72 in 1 : vector<4x1xf32>, vector<4x15xf32> -> vector<4x16xf32>
    %74 = arith.addf %73, %60 : vector<4x16xf32>
    %75 = arith.addf %74, %69 : vector<4x16xf32>
    %76 = vector.broadcast %70 : vector<4x1xf32> to vector<4x16xf32>
    %77 = arith.addf %75, %76 : vector<4x16xf32>
    %78 = arith.addf %54, %63 : vector<4x16xf32>
    %79 = vector.extract_strided_slice %66 {offsets = [0, 1], sizes = [4, 15], strides = [1, 1]} : vector<4x16xf32> to vector<4x15xf32>
    %cst_59 = arith.constant 0.000000e+00 : f32
    %80 = vector.broadcast %cst_59 : f32 to vector<4x1xf32>
    %81 = tpu.concatenate %79, %80 in 1 : vector<4x15xf32>, vector<4x1xf32> -> vector<4x16xf32>
    %82 = arith.addf %78, %81 : vector<4x16xf32>
    %83 = vector.broadcast %70 : vector<4x1xf32> to vector<4x16xf32>
    %84 = arith.addf %82, %83 : vector<4x16xf32>
    %85 = arith.negf %77 : vector<4x16xf32>
    %86 = math.exp %85 : vector<4x16xf32>
    %cst_60 = arith.constant 1.000000e+00 : f32
    %87 = vector.broadcast %cst_60 : f32 to vector<4x16xf32>
    %88 = arith.addf %87, %86 : vector<4x16xf32>
    %89 = arith.divf %87, %88 : vector<4x16xf32>
    %90 = arith.mulf %77, %89 : vector<4x16xf32>
    %91 = arith.negf %84 : vector<4x16xf32>
    %92 = math.exp %91 : vector<4x16xf32>
    %cst_61 = arith.constant 1.000000e+00 : f32
    %93 = vector.broadcast %cst_61 : f32 to vector<4x16xf32>
    %94 = arith.addf %93, %92 : vector<4x16xf32>
    %95 = arith.divf %93, %94 : vector<4x16xf32>
    %96 = arith.mulf %84, %95 : vector<4x16xf32>
    %c0_62 = arith.constant 0 : index
    %c0_63 = arith.constant 0 : index
    %c0_64 = arith.constant 0 : index
    %97 = vector.load %arg8[%c0_62, %c0_63, %c0_64] : memref<3x4x4xf32, #tpu.memory_space<vmem>>, vector<1x4x4xf32>
    %98 = vector.shape_cast %97 : vector<1x4x4xf32> to vector<4x4xf32>
    %cst_65 = arith.constant dense<0.000000e+00> : vector<4x16xf32>
    %99 = tpu.matmul %98, %90, %cst_65 {dimension_numbers = #tpu.dot_dimension_numbers<[1], [0], [0], [1], [0, 0, 1, 1], [], []>} : vector<4x4xf32>, vector<4x16xf32>, vector<4x16xf32> -> vector<4x16xf32>
    %c0_66 = arith.constant 0 : index
    %c0_67 = arith.constant 0 : index
    %c0_68 = arith.constant 0 : index
    %100 = vector.load %arg8[%c0_66, %c0_67, %c0_68] : memref<3x4x4xf32, #tpu.memory_space<vmem>>, vector<1x4x4xf32>
    %101 = vector.shape_cast %100 : vector<1x4x4xf32> to vector<4x4xf32>
    %cst_69 = arith.constant dense<0.000000e+00> : vector<4x16xf32>
    %102 = tpu.matmul %101, %96, %cst_69 {dimension_numbers = #tpu.dot_dimension_numbers<[1], [0], [0], [1], [0, 0, 1, 1], [], []>} : vector<4x4xf32>, vector<4x16xf32>, vector<4x16xf32> -> vector<4x16xf32>
    %c1_70 = arith.constant 1 : index
    %c0_71 = arith.constant 0 : index
    %c0_72 = arith.constant 0 : index
    %103 = vector.load %arg8[%c1_70, %c0_71, %c0_72] : memref<3x4x4xf32, #tpu.memory_space<vmem>>, vector<1x4x4xf32>
    %104 = vector.shape_cast %103 : vector<1x4x4xf32> to vector<4x4xf32>
    %cst_73 = arith.constant dense<0.000000e+00> : vector<4x16xf32>
    %105 = tpu.matmul %104, %90, %cst_73 {dimension_numbers = #tpu.dot_dimension_numbers<[1], [0], [0], [1], [0, 0, 1, 1], [], []>} : vector<4x4xf32>, vector<4x16xf32>, vector<4x16xf32> -> vector<4x16xf32>
    %c1_74 = arith.constant 1 : index
    %c0_75 = arith.constant 0 : index
    %c0_76 = arith.constant 0 : index
    %106 = vector.load %arg8[%c1_74, %c0_75, %c0_76] : memref<3x4x4xf32, #tpu.memory_space<vmem>>, vector<1x4x4xf32>
    %107 = vector.shape_cast %106 : vector<1x4x4xf32> to vector<4x4xf32>
    %cst_77 = arith.constant dense<0.000000e+00> : vector<4x16xf32>
    %108 = tpu.matmul %107, %96, %cst_77 {dimension_numbers = #tpu.dot_dimension_numbers<[1], [0], [0], [1], [0, 0, 1, 1], [], []>} : vector<4x4xf32>, vector<4x16xf32>, vector<4x16xf32> -> vector<4x16xf32>
    %c2_78 = arith.constant 2 : index
    %c0_79 = arith.constant 0 : index
    %c0_80 = arith.constant 0 : index
    %109 = vector.load %arg8[%c2_78, %c0_79, %c0_80] : memref<3x4x4xf32, #tpu.memory_space<vmem>>, vector<1x4x4xf32>
    %110 = vector.shape_cast %109 : vector<1x4x4xf32> to vector<4x4xf32>
    %cst_81 = arith.constant dense<0.000000e+00> : vector<4x16xf32>
    %111 = tpu.matmul %110, %90, %cst_81 {dimension_numbers = #tpu.dot_dimension_numbers<[1], [0], [0], [1], [0, 0, 1, 1], [], []>} : vector<4x4xf32>, vector<4x16xf32>, vector<4x16xf32> -> vector<4x16xf32>
    %c2_82 = arith.constant 2 : index
    %c0_83 = arith.constant 0 : index
    %c0_84 = arith.constant 0 : index
    %112 = vector.load %arg8[%c2_82, %c0_83, %c0_84] : memref<3x4x4xf32, #tpu.memory_space<vmem>>, vector<1x4x4xf32>
    %113 = vector.shape_cast %112 : vector<1x4x4xf32> to vector<4x4xf32>
    %cst_85 = arith.constant dense<0.000000e+00> : vector<4x16xf32>
    %114 = tpu.matmul %113, %96, %cst_85 {dimension_numbers = #tpu.dot_dimension_numbers<[1], [0], [0], [1], [0, 0, 1, 1], [], []>} : vector<4x4xf32>, vector<4x16xf32>, vector<4x16xf32> -> vector<4x16xf32>
    %c0_86 = arith.constant 0 : index
    %c0_87 = arith.constant 0 : index
    %115 = vector.load %arg9[%c0_86, %c0_87] : memref<4x1xf32, #tpu.memory_space<vmem>>, vector<4x1xf32>
    %cst_88 = arith.constant 0.000000e+00 : f32
    %116 = vector.broadcast %cst_88 : f32 to vector<4x1xf32>
    %117 = vector.extract_strided_slice %102 {offsets = [0, 0], sizes = [4, 15], strides = [1, 1]} : vector<4x16xf32> to vector<4x15xf32>
    %118 = tpu.concatenate %116, %117 in 1 : vector<4x1xf32>, vector<4x15xf32> -> vector<4x16xf32>
    %119 = arith.addf %118, %105 : vector<4x16xf32>
    %120 = arith.addf %119, %114 : vector<4x16xf32>
    %121 = vector.broadcast %115 : vector<4x1xf32> to vector<4x16xf32>
    %122 = arith.addf %120, %121 : vector<4x16xf32>
    %123 = arith.addf %99, %108 : vector<4x16xf32>
    %124 = vector.extract_strided_slice %111 {offsets = [0, 1], sizes = [4, 15], strides = [1, 1]} : vector<4x16xf32> to vector<4x15xf32>
    %cst_89 = arith.constant 0.000000e+00 : f32
    %125 = vector.broadcast %cst_89 : f32 to vector<4x1xf32>
    %126 = tpu.concatenate %124, %125 in 1 : vector<4x15xf32>, vector<4x1xf32> -> vector<4x16xf32>
    %127 = arith.addf %123, %126 : vector<4x16xf32>
    %128 = vector.broadcast %115 : vector<4x1xf32> to vector<4x16xf32>
    %129 = arith.addf %127, %128 : vector<4x16xf32>
    %130 = arith.negf %122 : vector<4x16xf32>
    %131 = math.exp %130 : vector<4x16xf32>
    %cst_90 = arith.constant 1.000000e+00 : f32
    %132 = vector.broadcast %cst_90 : f32 to vector<4x16xf32>
    %133 = arith.addf %132, %131 : vector<4x16xf32>
    %134 = arith.divf %132, %133 : vector<4x16xf32>
    %135 = arith.mulf %122, %134 : vector<4x16xf32>
    %136 = arith.negf %129 : vector<4x16xf32>
    %137 = math.exp %136 : vector<4x16xf32>
    %cst_91 = arith.constant 1.000000e+00 : f32
    %138 = vector.broadcast %cst_91 : f32 to vector<4x16xf32>
    %139 = arith.addf %138, %137 : vector<4x16xf32>
    %140 = arith.divf %138, %139 : vector<4x16xf32>
    %141 = arith.mulf %129, %140 : vector<4x16xf32>
    %c0_92 = arith.constant 0 : index
    %c0_93 = arith.constant 0 : index
    %c0_94 = arith.constant 0 : index
    %142 = vector.load %arg10[%c0_92, %c0_93, %c0_94] : memref<3x4x4xf32, #tpu.memory_space<vmem>>, vector<1x4x4xf32>
    %143 = vector.shape_cast %142 : vector<1x4x4xf32> to vector<4x4xf32>
    %cst_95 = arith.constant dense<0.000000e+00> : vector<4x16xf32>
    %144 = tpu.matmul %143, %135, %cst_95 {dimension_numbers = #tpu.dot_dimension_numbers<[1], [0], [0], [1], [0, 0, 1, 1], [], []>} : vector<4x4xf32>, vector<4x16xf32>, vector<4x16xf32> -> vector<4x16xf32>
    %c0_96 = arith.constant 0 : index
    %c0_97 = arith.constant 0 : index
    %c0_98 = arith.constant 0 : index
    %145 = vector.load %arg10[%c0_96, %c0_97, %c0_98] : memref<3x4x4xf32, #tpu.memory_space<vmem>>, vector<1x4x4xf32>
    %146 = vector.shape_cast %145 : vector<1x4x4xf32> to vector<4x4xf32>
    %cst_99 = arith.constant dense<0.000000e+00> : vector<4x16xf32>
    %147 = tpu.matmul %146, %141, %cst_99 {dimension_numbers = #tpu.dot_dimension_numbers<[1], [0], [0], [1], [0, 0, 1, 1], [], []>} : vector<4x4xf32>, vector<4x16xf32>, vector<4x16xf32> -> vector<4x16xf32>
    %c1_100 = arith.constant 1 : index
    %c0_101 = arith.constant 0 : index
    %c0_102 = arith.constant 0 : index
    %148 = vector.load %arg10[%c1_100, %c0_101, %c0_102] : memref<3x4x4xf32, #tpu.memory_space<vmem>>, vector<1x4x4xf32>
    %149 = vector.shape_cast %148 : vector<1x4x4xf32> to vector<4x4xf32>
    %cst_103 = arith.constant dense<0.000000e+00> : vector<4x16xf32>
    %150 = tpu.matmul %149, %135, %cst_103 {dimension_numbers = #tpu.dot_dimension_numbers<[1], [0], [0], [1], [0, 0, 1, 1], [], []>} : vector<4x4xf32>, vector<4x16xf32>, vector<4x16xf32> -> vector<4x16xf32>
    %c1_104 = arith.constant 1 : index
    %c0_105 = arith.constant 0 : index
    %c0_106 = arith.constant 0 : index
    %151 = vector.load %arg10[%c1_104, %c0_105, %c0_106] : memref<3x4x4xf32, #tpu.memory_space<vmem>>, vector<1x4x4xf32>
    %152 = vector.shape_cast %151 : vector<1x4x4xf32> to vector<4x4xf32>
    %cst_107 = arith.constant dense<0.000000e+00> : vector<4x16xf32>
    %153 = tpu.matmul %152, %141, %cst_107 {dimension_numbers = #tpu.dot_dimension_numbers<[1], [0], [0], [1], [0, 0, 1, 1], [], []>} : vector<4x4xf32>, vector<4x16xf32>, vector<4x16xf32> -> vector<4x16xf32>
    %c2_108 = arith.constant 2 : index
    %c0_109 = arith.constant 0 : index
    %c0_110 = arith.constant 0 : index
    %154 = vector.load %arg10[%c2_108, %c0_109, %c0_110] : memref<3x4x4xf32, #tpu.memory_space<vmem>>, vector<1x4x4xf32>
    %155 = vector.shape_cast %154 : vector<1x4x4xf32> to vector<4x4xf32>
    %cst_111 = arith.constant dense<0.000000e+00> : vector<4x16xf32>
    %156 = tpu.matmul %155, %135, %cst_111 {dimension_numbers = #tpu.dot_dimension_numbers<[1], [0], [0], [1], [0, 0, 1, 1], [], []>} : vector<4x4xf32>, vector<4x16xf32>, vector<4x16xf32> -> vector<4x16xf32>
    %c2_112 = arith.constant 2 : index
    %c0_113 = arith.constant 0 : index
    %c0_114 = arith.constant 0 : index
    %157 = vector.load %arg10[%c2_112, %c0_113, %c0_114] : memref<3x4x4xf32, #tpu.memory_space<vmem>>, vector<1x4x4xf32>
    %158 = vector.shape_cast %157 : vector<1x4x4xf32> to vector<4x4xf32>
    %cst_115 = arith.constant dense<0.000000e+00> : vector<4x16xf32>
    %159 = tpu.matmul %158, %141, %cst_115 {dimension_numbers = #tpu.dot_dimension_numbers<[1], [0], [0], [1], [0, 0, 1, 1], [], []>} : vector<4x4xf32>, vector<4x16xf32>, vector<4x16xf32> -> vector<4x16xf32>
    %c0_116 = arith.constant 0 : index
    %c0_117 = arith.constant 0 : index
    %160 = vector.load %arg11[%c0_116, %c0_117] : memref<4x1xf32, #tpu.memory_space<vmem>>, vector<4x1xf32>
    %cst_118 = arith.constant 0.000000e+00 : f32
    %161 = vector.broadcast %cst_118 : f32 to vector<4x1xf32>
    %162 = vector.extract_strided_slice %147 {offsets = [0, 0], sizes = [4, 15], strides = [1, 1]} : vector<4x16xf32> to vector<4x15xf32>
    %163 = tpu.concatenate %161, %162 in 1 : vector<4x1xf32>, vector<4x15xf32> -> vector<4x16xf32>
    %164 = arith.addf %163, %150 : vector<4x16xf32>
    %165 = arith.addf %164, %159 : vector<4x16xf32>
    %166 = vector.broadcast %160 : vector<4x1xf32> to vector<4x16xf32>
    %167 = arith.addf %165, %166 : vector<4x16xf32>
    %168 = arith.addf %144, %153 : vector<4x16xf32>
    %169 = vector.extract_strided_slice %156 {offsets = [0, 1], sizes = [4, 15], strides = [1, 1]} : vector<4x16xf32> to vector<4x15xf32>
    %cst_119 = arith.constant 0.000000e+00 : f32
    %170 = vector.broadcast %cst_119 : f32 to vector<4x1xf32>
    %171 = tpu.concatenate %169, %170 in 1 : vector<4x15xf32>, vector<4x1xf32> -> vector<4x16xf32>
    %172 = arith.addf %168, %171 : vector<4x16xf32>
    %173 = vector.broadcast %160 : vector<4x1xf32> to vector<4x16xf32>
    %174 = arith.addf %172, %173 : vector<4x16xf32>
    %cst_120 = arith.constant 1.000000e-01 : f32
    %175 = vector.broadcast %cst_120 : f32 to vector<4x16xf32>
    %176 = arith.mulf %175, %167 : vector<4x16xf32>
    %177 = arith.addf %90, %176 : vector<4x16xf32>
    %c0_121 = arith.constant 0 : index
    %c0_122 = arith.constant 0 : index
    %c0_123 = arith.constant 0 : index
    %178 = vector.load %arg12[%c0_121, %c0_122, %c0_123] : memref<1x4x16xf32, #tpu.memory_space<vmem>>, vector<1x4x16xf32>
    %179 = vector.shape_cast %178 : vector<1x4x16xf32> to vector<4x16xf32>
    %180 = vector.shape_cast %177 : vector<4x16xf32> to vector<1x4x16xf32>
    tpu.vector_store %arg12[%c0_121, %c0_122, %c0_123], %180 {strides = array<i32>} : memref<1x4x16xf32, #tpu.memory_space<vmem>>, vector<1x4x16xf32>,
    %cst_124 = arith.constant 1.000000e-01 : f32
    %181 = vector.broadcast %cst_124 : f32 to vector<4x16xf32>
    %182 = arith.mulf %181, %174 : vector<4x16xf32>
    %183 = arith.addf %96, %182 : vector<4x16xf32>
    %c0_125 = arith.constant 0 : index
    %c0_126 = arith.constant 0 : index
    %c0_127 = arith.constant 0 : index
    %184 = vector.load %arg13[%c0_125, %c0_126, %c0_127] : memref<1x4x16xf32, #tpu.memory_space<vmem>>, vector<1x4x16xf32>
    %185 = vector.shape_cast %184 : vector<1x4x16xf32> to vector<4x16xf32>
    %186 = vector.shape_cast %183 : vector<4x16xf32> to vector<1x4x16xf32>
    tpu.vector_store %arg13[%c0_125, %c0_126, %c0_127], %186 {strides = array<i32>} : memref<1x4x16xf32, #tpu.memory_space<vmem>>, vector<1x4x16xf32>,
    return
  }
  func.func @transform_0(%arg0: i32) -> (i32, i32, i32) {
    %c0_i32 = arith.constant 0 : i32
    %c0_i32_0 = arith.constant 0 : i32
    %c0_i32_1 = arith.constant 0 : i32
    return %arg0, %c0_i32, %c0_i32_0 : i32, i32, i32
  }
  func.func @transform_1(%arg0: i32) -> (i32, i32, i32) {
    %c0_i32 = arith.constant 0 : i32
    %c0_i32_0 = arith.constant 0 : i32
    %c0_i32_1 = arith.constant 0 : i32
    return %arg0, %c0_i32, %c0_i32_0 : i32, i32, i32
  }
  func.func @transform_2(%arg0: i32) -> (i32, i32, i32) {
    %c0_i32 = arith.constant 0 : i32
    %c0_i32_0 = arith.constant 0 : i32
    %c0_i32_1 = arith.constant 0 : i32
    %c0_i32_2 = arith.constant 0 : i32
    return %c0_i32, %c0_i32_0, %c0_i32_1 : i32, i32, i32
  }
  func.func @transform_3(%arg0: i32) -> (i32, i32, i32) {
    %c0_i32 = arith.constant 0 : i32
    %c0_i32_0 = arith.constant 0 : i32
    %c0_i32_1 = arith.constant 0 : i32
    %c0_i32_2 = arith.constant 0 : i32
    return %c0_i32, %c0_i32_0, %c0_i32_1 : i32, i32, i32
  }
  func.func @transform_4(%arg0: i32) -> (i32, i32) {
    %c0_i32 = arith.constant 0 : i32
    %c0_i32_0 = arith.constant 0 : i32
    %c0_i32_1 = arith.constant 0 : i32
    return %c0_i32, %c0_i32_0 : i32, i32
  }
  func.func @transform_5(%arg0: i32) -> (i32, i32, i32) {
    %c0_i32 = arith.constant 0 : i32
    %c0_i32_0 = arith.constant 0 : i32
    %c0_i32_1 = arith.constant 0 : i32
    %c0_i32_2 = arith.constant 0 : i32
    return %c0_i32, %c0_i32_0, %c0_i32_1 : i32, i32, i32
  }
  func.func @transform_6(%arg0: i32) -> (i32, i32) {
    %c0_i32 = arith.constant 0 : i32
    %c0_i32_0 = arith.constant 0 : i32
    %c0_i32_1 = arith.constant 0 : i32
    return %c0_i32, %c0_i32_0 : i32, i32
  }
  func.func @transform_7(%arg0: i32) -> (i32, i32, i32) {
    %c0_i32 = arith.constant 0 : i32
    %c0_i32_0 = arith.constant 0 : i32
    %c0_i32_1 = arith.constant 0 : i32
    %c0_i32_2 = arith.constant 0 : i32
    return %c0_i32, %c0_i32_0, %c0_i32_1 : i32, i32, i32
  }
  func.func @transform_8(%arg0: i32) -> (i32, i32) {
    %c0_i32 = arith.constant 0 : i32
    %c0_i32_0 = arith.constant 0 : i32
    %c0_i32_1 = arith.constant 0 : i32
    return %c0_i32, %c0_i32_0 : i32, i32
  }
  func.func @transform_9(%arg0: i32) -> (i32, i32, i32) {
    %c0_i32 = arith.constant 0 : i32
    %c0_i32_0 = arith.constant 0 : i32
    %c0_i32_1 = arith.constant 0 : i32
    %c0_i32_2 = arith.constant 0 : i32
    return %c0_i32, %c0_i32_0, %c0_i32_1 : i32, i32, i32
  }
  func.func @transform_10(%arg0: i32) -> (i32, i32) {
    %c0_i32 = arith.constant 0 : i32
    %c0_i32_0 = arith.constant 0 : i32
    %c0_i32_1 = arith.constant 0 : i32
    return %c0_i32, %c0_i32_0 : i32, i32
  }
  func.func @transform_11(%arg0: i32) -> (i32, i32, i32) {
    %c0_i32 = arith.constant 0 : i32
    %c0_i32_0 = arith.constant 0 : i32
    %c0_i32_1 = arith.constant 0 : i32
    return %arg0, %c0_i32, %c0_i32_0 : i32, i32, i32
  }
  func.func @transform_12(%arg0: i32) -> (i32, i32, i32) {
    %c0_i32 = arith.constant 0 : i32
    %c0_i32_0 = arith.constant 0 : i32
    %c0_i32_1 = arith.constant 0 : i32
    return %arg0, %c0_i32, %c0_i32_0 : i32, i32, i32
  }
}

module attributes {stable_mosaic.version = 11 : i64} {
  func.func @_cond_kernel(%arg0: i32, %arg1: memref<1x4x32xf32, #tpu.memory_space<vmem>>, %arg2: memref<1x4x32xf32, #tpu.memory_space<vmem>>, %arg3: memref<3x4x4xf32, #tpu.memory_space<vmem>>, %arg4: memref<4x1xf32, #tpu.memory_space<vmem>>, %arg5: memref<3x4x4xf32, #tpu.memory_space<vmem>>, %arg6: memref<4x1xf32, #tpu.memory_space<vmem>>, %arg7: memref<3x4x4xf32, #tpu.memory_space<vmem>>, %arg8: memref<4x1xf32, #tpu.memory_space<vmem>>, %arg9: memref<3x4x4xf32, #tpu.memory_space<vmem>>, %arg10: memref<4x1xf32, #tpu.memory_space<vmem>>, %arg11: memref<3x4x4xf32, #tpu.memory_space<vmem>>, %arg12: memref<4x1xf32, #tpu.memory_space<vmem>>, %arg13: memref<3x4x4xf32, #tpu.memory_space<vmem>>, %arg14: memref<4x1xf32, #tpu.memory_space<vmem>>, %arg15: memref<1x4x32xf32, #tpu.memory_space<vmem>>) attributes {dimension_semantics = [#tpu.dimension_semantics<parallel>], iteration_bounds = array<i64: 2>, scalar_prefetch = 0 : i64, scratch_operands = 0 : i64, tpu.core_type = #tpu.core_type<tc>, window_params = [{transform_indices = @transform_0, window_bounds = array<i64: 1, 4, 32>}, {transform_indices = @transform_1, window_bounds = array<i64: 1, 4, 32>}, {pipeline_mode = #tpu.pipeline_mode<synchronous>, transform_indices = @transform_2, window_bounds = array<i64: 3, 4, 4>}, {pipeline_mode = #tpu.pipeline_mode<synchronous>, transform_indices = @transform_3, window_bounds = array<i64: 4, 1>}, {pipeline_mode = #tpu.pipeline_mode<synchronous>, transform_indices = @transform_4, window_bounds = array<i64: 3, 4, 4>}, {pipeline_mode = #tpu.pipeline_mode<synchronous>, transform_indices = @transform_5, window_bounds = array<i64: 4, 1>}, {pipeline_mode = #tpu.pipeline_mode<synchronous>, transform_indices = @transform_6, window_bounds = array<i64: 3, 4, 4>}, {pipeline_mode = #tpu.pipeline_mode<synchronous>, transform_indices = @transform_7, window_bounds = array<i64: 4, 1>}, {pipeline_mode = #tpu.pipeline_mode<synchronous>, transform_indices = @transform_8, window_bounds = array<i64: 3, 4, 4>}, {pipeline_mode = #tpu.pipeline_mode<synchronous>, transform_indices = @transform_9, window_bounds = array<i64: 4, 1>}, {pipeline_mode = #tpu.pipeline_mode<synchronous>, transform_indices = @transform_10, window_bounds = array<i64: 3, 4, 4>}, {pipeline_mode = #tpu.pipeline_mode<synchronous>, transform_indices = @transform_11, window_bounds = array<i64: 4, 1>}, {pipeline_mode = #tpu.pipeline_mode<synchronous>, transform_indices = @transform_12, window_bounds = array<i64: 3, 4, 4>}, {pipeline_mode = #tpu.pipeline_mode<synchronous>, transform_indices = @transform_13, window_bounds = array<i64: 4, 1>}, {transform_indices = @transform_14, window_bounds = array<i64: 1, 4, 32>}]} {
    %c0 = arith.constant 0 : index
    %c0_0 = arith.constant 0 : index
    %c0_1 = arith.constant 0 : index
    %0 = vector.load %arg1[%c0, %c0_0, %c0_1] : memref<1x4x32xf32, #tpu.memory_space<vmem>>, vector<1x4x32xf32>
    %1 = vector.shape_cast %0 : vector<1x4x32xf32> to vector<4x32xf32>
    %c0_2 = arith.constant 0 : index
    %c0_3 = arith.constant 0 : index
    %c0_4 = arith.constant 0 : index
    %2 = vector.load %arg3[%c0_2, %c0_3, %c0_4] : memref<3x4x4xf32, #tpu.memory_space<vmem>>, vector<1x4x4xf32>
    %3 = vector.shape_cast %2 : vector<1x4x4xf32> to vector<4x4xf32>
    %cst = arith.constant 0.000000e+00 : f32
    %4 = vector.broadcast %cst : f32 to vector<4x1xf32>
    %5 = vector.extract_strided_slice %1 {offsets = [0, 0], sizes = [4, 31], strides = [1, 1]} : vector<4x32xf32> to vector<4x31xf32>
    %6 = tpu.concatenate %4, %5 in 1 : vector<4x1xf32>, vector<4x31xf32> -> vector<4x32xf32>
    %cst_5 = arith.constant dense<0.000000e+00> : vector<4x32xf32>
    %7 = tpu.matmul %3, %6, %cst_5 {dimension_numbers = #tpu.dot_dimension_numbers<[1], [0], [0], [1], [0, 0, 1, 1], [], []>} : vector<4x4xf32>, vector<4x32xf32>, vector<4x32xf32> -> vector<4x32xf32>
    %c1 = arith.constant 1 : index
    %c0_6 = arith.constant 0 : index
    %c0_7 = arith.constant 0 : index
    %8 = vector.load %arg3[%c1, %c0_6, %c0_7] : memref<3x4x4xf32, #tpu.memory_space<vmem>>, vector<1x4x4xf32>
    %9 = vector.shape_cast %8 : vector<1x4x4xf32> to vector<4x4xf32>
    %cst_8 = arith.constant dense<0.000000e+00> : vector<4x32xf32>
    %10 = tpu.matmul %9, %1, %cst_8 {dimension_numbers = #tpu.dot_dimension_numbers<[1], [0], [0], [1], [0, 0, 1, 1], [], []>} : vector<4x4xf32>, vector<4x32xf32>, vector<4x32xf32> -> vector<4x32xf32>
    %11 = arith.addf %7, %10 : vector<4x32xf32>
    %c2 = arith.constant 2 : index
    %c0_9 = arith.constant 0 : index
    %c0_10 = arith.constant 0 : index
    %12 = vector.load %arg3[%c2, %c0_9, %c0_10] : memref<3x4x4xf32, #tpu.memory_space<vmem>>, vector<1x4x4xf32>
    %13 = vector.shape_cast %12 : vector<1x4x4xf32> to vector<4x4xf32>
    %14 = vector.extract_strided_slice %1 {offsets = [0, 1], sizes = [4, 31], strides = [1, 1]} : vector<4x32xf32> to vector<4x31xf32>
    %cst_11 = arith.constant 0.000000e+00 : f32
    %15 = vector.broadcast %cst_11 : f32 to vector<4x1xf32>
    %16 = tpu.concatenate %14, %15 in 1 : vector<4x31xf32>, vector<4x1xf32> -> vector<4x32xf32>
    %cst_12 = arith.constant dense<0.000000e+00> : vector<4x32xf32>
    %17 = tpu.matmul %13, %16, %cst_12 {dimension_numbers = #tpu.dot_dimension_numbers<[1], [0], [0], [1], [0, 0, 1, 1], [], []>} : vector<4x4xf32>, vector<4x32xf32>, vector<4x32xf32> -> vector<4x32xf32>
    %18 = arith.addf %11, %17 : vector<4x32xf32>
    %c0_13 = arith.constant 0 : index
    %c0_14 = arith.constant 0 : index
    %19 = vector.load %arg4[%c0_13, %c0_14] : memref<4x1xf32, #tpu.memory_space<vmem>>, vector<4x1xf32>
    %20 = vector.broadcast %19 : vector<4x1xf32> to vector<4x32xf32>
    %21 = arith.addf %18, %20 : vector<4x32xf32>
    %22 = arith.negf %21 : vector<4x32xf32>
    %23 = math.exp %22 : vector<4x32xf32>
    %cst_15 = arith.constant 1.000000e+00 : f32
    %24 = vector.broadcast %cst_15 : f32 to vector<4x32xf32>
    %25 = arith.addf %24, %23 : vector<4x32xf32>
    %26 = arith.divf %24, %25 : vector<4x32xf32>
    %27 = arith.mulf %21, %26 : vector<4x32xf32>
    %c0_16 = arith.constant 0 : index
    %c0_17 = arith.constant 0 : index
    %c0_18 = arith.constant 0 : index
    %28 = vector.load %arg5[%c0_16, %c0_17, %c0_18] : memref<3x4x4xf32, #tpu.memory_space<vmem>>, vector<1x4x4xf32>
    %29 = vector.shape_cast %28 : vector<1x4x4xf32> to vector<4x4xf32>
    %cst_19 = arith.constant 0.000000e+00 : f32
    %30 = vector.broadcast %cst_19 : f32 to vector<4x1xf32>
    %31 = vector.extract_strided_slice %27 {offsets = [0, 0], sizes = [4, 31], strides = [1, 1]} : vector<4x32xf32> to vector<4x31xf32>
    %32 = tpu.concatenate %30, %31 in 1 : vector<4x1xf32>, vector<4x31xf32> -> vector<4x32xf32>
    %cst_20 = arith.constant dense<0.000000e+00> : vector<4x32xf32>
    %33 = tpu.matmul %29, %32, %cst_20 {dimension_numbers = #tpu.dot_dimension_numbers<[1], [0], [0], [1], [0, 0, 1, 1], [], []>} : vector<4x4xf32>, vector<4x32xf32>, vector<4x32xf32> -> vector<4x32xf32>
    %c1_21 = arith.constant 1 : index
    %c0_22 = arith.constant 0 : index
    %c0_23 = arith.constant 0 : index
    %34 = vector.load %arg5[%c1_21, %c0_22, %c0_23] : memref<3x4x4xf32, #tpu.memory_space<vmem>>, vector<1x4x4xf32>
    %35 = vector.shape_cast %34 : vector<1x4x4xf32> to vector<4x4xf32>
    %cst_24 = arith.constant dense<0.000000e+00> : vector<4x32xf32>
    %36 = tpu.matmul %35, %27, %cst_24 {dimension_numbers = #tpu.dot_dimension_numbers<[1], [0], [0], [1], [0, 0, 1, 1], [], []>} : vector<4x4xf32>, vector<4x32xf32>, vector<4x32xf32> -> vector<4x32xf32>
    %37 = arith.addf %33, %36 : vector<4x32xf32>
    %c2_25 = arith.constant 2 : index
    %c0_26 = arith.constant 0 : index
    %c0_27 = arith.constant 0 : index
    %38 = vector.load %arg5[%c2_25, %c0_26, %c0_27] : memref<3x4x4xf32, #tpu.memory_space<vmem>>, vector<1x4x4xf32>
    %39 = vector.shape_cast %38 : vector<1x4x4xf32> to vector<4x4xf32>
    %40 = vector.extract_strided_slice %27 {offsets = [0, 1], sizes = [4, 31], strides = [1, 1]} : vector<4x32xf32> to vector<4x31xf32>
    %cst_28 = arith.constant 0.000000e+00 : f32
    %41 = vector.broadcast %cst_28 : f32 to vector<4x1xf32>
    %42 = tpu.concatenate %40, %41 in 1 : vector<4x31xf32>, vector<4x1xf32> -> vector<4x32xf32>
    %cst_29 = arith.constant dense<0.000000e+00> : vector<4x32xf32>
    %43 = tpu.matmul %39, %42, %cst_29 {dimension_numbers = #tpu.dot_dimension_numbers<[1], [0], [0], [1], [0, 0, 1, 1], [], []>} : vector<4x4xf32>, vector<4x32xf32>, vector<4x32xf32> -> vector<4x32xf32>
    %44 = arith.addf %37, %43 : vector<4x32xf32>
    %c0_30 = arith.constant 0 : index
    %c0_31 = arith.constant 0 : index
    %45 = vector.load %arg6[%c0_30, %c0_31] : memref<4x1xf32, #tpu.memory_space<vmem>>, vector<4x1xf32>
    %46 = vector.broadcast %45 : vector<4x1xf32> to vector<4x32xf32>
    %47 = arith.addf %44, %46 : vector<4x32xf32>
    %cst_32 = arith.constant 1.000000e-01 : f32
    %48 = vector.broadcast %cst_32 : f32 to vector<4x32xf32>
    %49 = arith.mulf %48, %47 : vector<4x32xf32>
    %50 = arith.addf %1, %49 : vector<4x32xf32>
    %51 = arith.negf %50 : vector<4x32xf32>
    %52 = math.exp %51 : vector<4x32xf32>
    %cst_33 = arith.constant 1.000000e+00 : f32
    %53 = vector.broadcast %cst_33 : f32 to vector<4x32xf32>
    %54 = arith.addf %53, %52 : vector<4x32xf32>
    %55 = arith.divf %53, %54 : vector<4x32xf32>
    %56 = arith.mulf %50, %55 : vector<4x32xf32>
    %c0_34 = arith.constant 0 : index
    %c0_35 = arith.constant 0 : index
    %c0_36 = arith.constant 0 : index
    %57 = vector.load %arg7[%c0_34, %c0_35, %c0_36] : memref<3x4x4xf32, #tpu.memory_space<vmem>>, vector<1x4x4xf32>
    %58 = vector.shape_cast %57 : vector<1x4x4xf32> to vector<4x4xf32>
    %cst_37 = arith.constant 0.000000e+00 : f32
    %59 = vector.broadcast %cst_37 : f32 to vector<4x1xf32>
    %60 = vector.extract_strided_slice %56 {offsets = [0, 0], sizes = [4, 31], strides = [1, 1]} : vector<4x32xf32> to vector<4x31xf32>
    %61 = tpu.concatenate %59, %60 in 1 : vector<4x1xf32>, vector<4x31xf32> -> vector<4x32xf32>
    %cst_38 = arith.constant dense<0.000000e+00> : vector<4x32xf32>
    %62 = tpu.matmul %58, %61, %cst_38 {dimension_numbers = #tpu.dot_dimension_numbers<[1], [0], [0], [1], [0, 0, 1, 1], [], []>} : vector<4x4xf32>, vector<4x32xf32>, vector<4x32xf32> -> vector<4x32xf32>
    %c1_39 = arith.constant 1 : index
    %c0_40 = arith.constant 0 : index
    %c0_41 = arith.constant 0 : index
    %63 = vector.load %arg7[%c1_39, %c0_40, %c0_41] : memref<3x4x4xf32, #tpu.memory_space<vmem>>, vector<1x4x4xf32>
    %64 = vector.shape_cast %63 : vector<1x4x4xf32> to vector<4x4xf32>
    %cst_42 = arith.constant dense<0.000000e+00> : vector<4x32xf32>
    %65 = tpu.matmul %64, %56, %cst_42 {dimension_numbers = #tpu.dot_dimension_numbers<[1], [0], [0], [1], [0, 0, 1, 1], [], []>} : vector<4x4xf32>, vector<4x32xf32>, vector<4x32xf32> -> vector<4x32xf32>
    %66 = arith.addf %62, %65 : vector<4x32xf32>
    %c2_43 = arith.constant 2 : index
    %c0_44 = arith.constant 0 : index
    %c0_45 = arith.constant 0 : index
    %67 = vector.load %arg7[%c2_43, %c0_44, %c0_45] : memref<3x4x4xf32, #tpu.memory_space<vmem>>, vector<1x4x4xf32>
    %68 = vector.shape_cast %67 : vector<1x4x4xf32> to vector<4x4xf32>
    %69 = vector.extract_strided_slice %56 {offsets = [0, 1], sizes = [4, 31], strides = [1, 1]} : vector<4x32xf32> to vector<4x31xf32>
    %cst_46 = arith.constant 0.000000e+00 : f32
    %70 = vector.broadcast %cst_46 : f32 to vector<4x1xf32>
    %71 = tpu.concatenate %69, %70 in 1 : vector<4x31xf32>, vector<4x1xf32> -> vector<4x32xf32>
    %cst_47 = arith.constant dense<0.000000e+00> : vector<4x32xf32>
    %72 = tpu.matmul %68, %71, %cst_47 {dimension_numbers = #tpu.dot_dimension_numbers<[1], [0], [0], [1], [0, 0, 1, 1], [], []>} : vector<4x4xf32>, vector<4x32xf32>, vector<4x32xf32> -> vector<4x32xf32>
    %73 = arith.addf %66, %72 : vector<4x32xf32>
    %c0_48 = arith.constant 0 : index
    %c0_49 = arith.constant 0 : index
    %74 = vector.load %arg8[%c0_48, %c0_49] : memref<4x1xf32, #tpu.memory_space<vmem>>, vector<4x1xf32>
    %75 = vector.broadcast %74 : vector<4x1xf32> to vector<4x32xf32>
    %76 = arith.addf %73, %75 : vector<4x32xf32>
    %c0_50 = arith.constant 0 : index
    %c0_51 = arith.constant 0 : index
    %c0_52 = arith.constant 0 : index
    %77 = vector.load %arg9[%c0_50, %c0_51, %c0_52] : memref<3x4x4xf32, #tpu.memory_space<vmem>>, vector<1x4x4xf32>
    %78 = vector.shape_cast %77 : vector<1x4x4xf32> to vector<4x4xf32>
    %cst_53 = arith.constant 0.000000e+00 : f32
    %79 = vector.broadcast %cst_53 : f32 to vector<4x1xf32>
    %80 = vector.extract_strided_slice %1 {offsets = [0, 0], sizes = [4, 31], strides = [1, 1]} : vector<4x32xf32> to vector<4x31xf32>
    %81 = tpu.concatenate %79, %80 in 1 : vector<4x1xf32>, vector<4x31xf32> -> vector<4x32xf32>
    %cst_54 = arith.constant dense<0.000000e+00> : vector<4x32xf32>
    %82 = tpu.matmul %78, %81, %cst_54 {dimension_numbers = #tpu.dot_dimension_numbers<[1], [0], [0], [1], [0, 0, 1, 1], [], []>} : vector<4x4xf32>, vector<4x32xf32>, vector<4x32xf32> -> vector<4x32xf32>
    %c1_55 = arith.constant 1 : index
    %c0_56 = arith.constant 0 : index
    %c0_57 = arith.constant 0 : index
    %83 = vector.load %arg9[%c1_55, %c0_56, %c0_57] : memref<3x4x4xf32, #tpu.memory_space<vmem>>, vector<1x4x4xf32>
    %84 = vector.shape_cast %83 : vector<1x4x4xf32> to vector<4x4xf32>
    %cst_58 = arith.constant dense<0.000000e+00> : vector<4x32xf32>
    %85 = tpu.matmul %84, %1, %cst_58 {dimension_numbers = #tpu.dot_dimension_numbers<[1], [0], [0], [1], [0, 0, 1, 1], [], []>} : vector<4x4xf32>, vector<4x32xf32>, vector<4x32xf32> -> vector<4x32xf32>
    %86 = arith.addf %82, %85 : vector<4x32xf32>
    %c2_59 = arith.constant 2 : index
    %c0_60 = arith.constant 0 : index
    %c0_61 = arith.constant 0 : index
    %87 = vector.load %arg9[%c2_59, %c0_60, %c0_61] : memref<3x4x4xf32, #tpu.memory_space<vmem>>, vector<1x4x4xf32>
    %88 = vector.shape_cast %87 : vector<1x4x4xf32> to vector<4x4xf32>
    %89 = vector.extract_strided_slice %1 {offsets = [0, 1], sizes = [4, 31], strides = [1, 1]} : vector<4x32xf32> to vector<4x31xf32>
    %cst_62 = arith.constant 0.000000e+00 : f32
    %90 = vector.broadcast %cst_62 : f32 to vector<4x1xf32>
    %91 = tpu.concatenate %89, %90 in 1 : vector<4x31xf32>, vector<4x1xf32> -> vector<4x32xf32>
    %cst_63 = arith.constant dense<0.000000e+00> : vector<4x32xf32>
    %92 = tpu.matmul %88, %91, %cst_63 {dimension_numbers = #tpu.dot_dimension_numbers<[1], [0], [0], [1], [0, 0, 1, 1], [], []>} : vector<4x4xf32>, vector<4x32xf32>, vector<4x32xf32> -> vector<4x32xf32>
    %93 = arith.addf %86, %92 : vector<4x32xf32>
    %c0_64 = arith.constant 0 : index
    %c0_65 = arith.constant 0 : index
    %94 = vector.load %arg10[%c0_64, %c0_65] : memref<4x1xf32, #tpu.memory_space<vmem>>, vector<4x1xf32>
    %95 = vector.broadcast %94 : vector<4x1xf32> to vector<4x32xf32>
    %96 = arith.addf %93, %95 : vector<4x32xf32>
    %97 = arith.negf %96 : vector<4x32xf32>
    %98 = math.exp %97 : vector<4x32xf32>
    %cst_66 = arith.constant 1.000000e+00 : f32
    %99 = vector.broadcast %cst_66 : f32 to vector<4x32xf32>
    %100 = arith.addf %99, %98 : vector<4x32xf32>
    %101 = arith.divf %99, %100 : vector<4x32xf32>
    %102 = arith.mulf %96, %101 : vector<4x32xf32>
    %c0_67 = arith.constant 0 : index
    %c0_68 = arith.constant 0 : index
    %c0_69 = arith.constant 0 : index
    %103 = vector.load %arg11[%c0_67, %c0_68, %c0_69] : memref<3x4x4xf32, #tpu.memory_space<vmem>>, vector<1x4x4xf32>
    %104 = vector.shape_cast %103 : vector<1x4x4xf32> to vector<4x4xf32>
    %cst_70 = arith.constant 0.000000e+00 : f32
    %105 = vector.broadcast %cst_70 : f32 to vector<4x1xf32>
    %106 = vector.extract_strided_slice %102 {offsets = [0, 0], sizes = [4, 31], strides = [1, 1]} : vector<4x32xf32> to vector<4x31xf32>
    %107 = tpu.concatenate %105, %106 in 1 : vector<4x1xf32>, vector<4x31xf32> -> vector<4x32xf32>
    %cst_71 = arith.constant dense<0.000000e+00> : vector<4x32xf32>
    %108 = tpu.matmul %104, %107, %cst_71 {dimension_numbers = #tpu.dot_dimension_numbers<[1], [0], [0], [1], [0, 0, 1, 1], [], []>} : vector<4x4xf32>, vector<4x32xf32>, vector<4x32xf32> -> vector<4x32xf32>
    %c1_72 = arith.constant 1 : index
    %c0_73 = arith.constant 0 : index
    %c0_74 = arith.constant 0 : index
    %109 = vector.load %arg11[%c1_72, %c0_73, %c0_74] : memref<3x4x4xf32, #tpu.memory_space<vmem>>, vector<1x4x4xf32>
    %110 = vector.shape_cast %109 : vector<1x4x4xf32> to vector<4x4xf32>
    %cst_75 = arith.constant dense<0.000000e+00> : vector<4x32xf32>
    %111 = tpu.matmul %110, %102, %cst_75 {dimension_numbers = #tpu.dot_dimension_numbers<[1], [0], [0], [1], [0, 0, 1, 1], [], []>} : vector<4x4xf32>, vector<4x32xf32>, vector<4x32xf32> -> vector<4x32xf32>
    %112 = arith.addf %108, %111 : vector<4x32xf32>
    %c2_76 = arith.constant 2 : index
    %c0_77 = arith.constant 0 : index
    %c0_78 = arith.constant 0 : index
    %113 = vector.load %arg11[%c2_76, %c0_77, %c0_78] : memref<3x4x4xf32, #tpu.memory_space<vmem>>, vector<1x4x4xf32>
    %114 = vector.shape_cast %113 : vector<1x4x4xf32> to vector<4x4xf32>
    %115 = vector.extract_strided_slice %102 {offsets = [0, 1], sizes = [4, 31], strides = [1, 1]} : vector<4x32xf32> to vector<4x31xf32>
    %cst_79 = arith.constant 0.000000e+00 : f32
    %116 = vector.broadcast %cst_79 : f32 to vector<4x1xf32>
    %117 = tpu.concatenate %115, %116 in 1 : vector<4x31xf32>, vector<4x1xf32> -> vector<4x32xf32>
    %cst_80 = arith.constant dense<0.000000e+00> : vector<4x32xf32>
    %118 = tpu.matmul %114, %117, %cst_80 {dimension_numbers = #tpu.dot_dimension_numbers<[1], [0], [0], [1], [0, 0, 1, 1], [], []>} : vector<4x4xf32>, vector<4x32xf32>, vector<4x32xf32> -> vector<4x32xf32>
    %119 = arith.addf %112, %118 : vector<4x32xf32>
    %c0_81 = arith.constant 0 : index
    %c0_82 = arith.constant 0 : index
    %120 = vector.load %arg12[%c0_81, %c0_82] : memref<4x1xf32, #tpu.memory_space<vmem>>, vector<4x1xf32>
    %121 = vector.broadcast %120 : vector<4x1xf32> to vector<4x32xf32>
    %122 = arith.addf %119, %121 : vector<4x32xf32>
    %cst_83 = arith.constant 1.000000e-01 : f32
    %123 = vector.broadcast %cst_83 : f32 to vector<4x32xf32>
    %124 = arith.mulf %123, %122 : vector<4x32xf32>
    %125 = arith.addf %1, %124 : vector<4x32xf32>
    %126 = arith.negf %125 : vector<4x32xf32>
    %127 = math.exp %126 : vector<4x32xf32>
    %cst_84 = arith.constant 1.000000e+00 : f32
    %128 = vector.broadcast %cst_84 : f32 to vector<4x32xf32>
    %129 = arith.addf %128, %127 : vector<4x32xf32>
    %130 = arith.divf %128, %129 : vector<4x32xf32>
    %131 = arith.mulf %125, %130 : vector<4x32xf32>
    %c0_85 = arith.constant 0 : index
    %c0_86 = arith.constant 0 : index
    %c0_87 = arith.constant 0 : index
    %132 = vector.load %arg13[%c0_85, %c0_86, %c0_87] : memref<3x4x4xf32, #tpu.memory_space<vmem>>, vector<1x4x4xf32>
    %133 = vector.shape_cast %132 : vector<1x4x4xf32> to vector<4x4xf32>
    %cst_88 = arith.constant 0.000000e+00 : f32
    %134 = vector.broadcast %cst_88 : f32 to vector<4x1xf32>
    %135 = vector.extract_strided_slice %131 {offsets = [0, 0], sizes = [4, 31], strides = [1, 1]} : vector<4x32xf32> to vector<4x31xf32>
    %136 = tpu.concatenate %134, %135 in 1 : vector<4x1xf32>, vector<4x31xf32> -> vector<4x32xf32>
    %cst_89 = arith.constant dense<0.000000e+00> : vector<4x32xf32>
    %137 = tpu.matmul %133, %136, %cst_89 {dimension_numbers = #tpu.dot_dimension_numbers<[1], [0], [0], [1], [0, 0, 1, 1], [], []>} : vector<4x4xf32>, vector<4x32xf32>, vector<4x32xf32> -> vector<4x32xf32>
    %c1_90 = arith.constant 1 : index
    %c0_91 = arith.constant 0 : index
    %c0_92 = arith.constant 0 : index
    %138 = vector.load %arg13[%c1_90, %c0_91, %c0_92] : memref<3x4x4xf32, #tpu.memory_space<vmem>>, vector<1x4x4xf32>
    %139 = vector.shape_cast %138 : vector<1x4x4xf32> to vector<4x4xf32>
    %cst_93 = arith.constant dense<0.000000e+00> : vector<4x32xf32>
    %140 = tpu.matmul %139, %131, %cst_93 {dimension_numbers = #tpu.dot_dimension_numbers<[1], [0], [0], [1], [0, 0, 1, 1], [], []>} : vector<4x4xf32>, vector<4x32xf32>, vector<4x32xf32> -> vector<4x32xf32>
    %141 = arith.addf %137, %140 : vector<4x32xf32>
    %c2_94 = arith.constant 2 : index
    %c0_95 = arith.constant 0 : index
    %c0_96 = arith.constant 0 : index
    %142 = vector.load %arg13[%c2_94, %c0_95, %c0_96] : memref<3x4x4xf32, #tpu.memory_space<vmem>>, vector<1x4x4xf32>
    %143 = vector.shape_cast %142 : vector<1x4x4xf32> to vector<4x4xf32>
    %144 = vector.extract_strided_slice %131 {offsets = [0, 1], sizes = [4, 31], strides = [1, 1]} : vector<4x32xf32> to vector<4x31xf32>
    %cst_97 = arith.constant 0.000000e+00 : f32
    %145 = vector.broadcast %cst_97 : f32 to vector<4x1xf32>
    %146 = tpu.concatenate %144, %145 in 1 : vector<4x31xf32>, vector<4x1xf32> -> vector<4x32xf32>
    %cst_98 = arith.constant dense<0.000000e+00> : vector<4x32xf32>
    %147 = tpu.matmul %143, %146, %cst_98 {dimension_numbers = #tpu.dot_dimension_numbers<[1], [0], [0], [1], [0, 0, 1, 1], [], []>} : vector<4x4xf32>, vector<4x32xf32>, vector<4x32xf32> -> vector<4x32xf32>
    %148 = arith.addf %141, %147 : vector<4x32xf32>
    %c0_99 = arith.constant 0 : index
    %c0_100 = arith.constant 0 : index
    %149 = vector.load %arg14[%c0_99, %c0_100] : memref<4x1xf32, #tpu.memory_space<vmem>>, vector<4x1xf32>
    %150 = vector.broadcast %149 : vector<4x1xf32> to vector<4x32xf32>
    %151 = arith.addf %148, %150 : vector<4x32xf32>
    %cst_101 = arith.constant 5.000000e-01 : f32
    %152 = vector.broadcast %cst_101 : f32 to vector<4x32xf32>
    %153 = arith.mulf %152, %151 : vector<4x32xf32>
    %154 = math.exp %153 : vector<4x32xf32>
    %c0_102 = arith.constant 0 : index
    %c0_103 = arith.constant 0 : index
    %c0_104 = arith.constant 0 : index
    %155 = vector.load %arg2[%c0_102, %c0_103, %c0_104] : memref<1x4x32xf32, #tpu.memory_space<vmem>>, vector<1x4x32xf32>
    %156 = vector.shape_cast %155 : vector<1x4x32xf32> to vector<4x32xf32>
    %157 = arith.mulf %154, %156 : vector<4x32xf32>
    %158 = arith.addf %76, %157 : vector<4x32xf32>
    %c0_105 = arith.constant 0 : index
    %c0_106 = arith.constant 0 : index
    %c0_107 = arith.constant 0 : index
    %159 = vector.load %arg15[%c0_105, %c0_106, %c0_107] : memref<1x4x32xf32, #tpu.memory_space<vmem>>, vector<1x4x32xf32>
    %160 = vector.shape_cast %159 : vector<1x4x32xf32> to vector<4x32xf32>
    %161 = vector.shape_cast %158 : vector<4x32xf32> to vector<1x4x32xf32>
    tpu.vector_store %arg15[%c0_105, %c0_106, %c0_107], %161 {strides = array<i32>} : memref<1x4x32xf32, #tpu.memory_space<vmem>>, vector<1x4x32xf32>,
    return
  }
  func.func @transform_0(%arg0: i32) -> (i32, i32, i32) {
    %c0_i32 = arith.constant 0 : i32
    %c0_i32_0 = arith.constant 0 : i32
    %c0_i32_1 = arith.constant 0 : i32
    return %arg0, %c0_i32, %c0_i32_0 : i32, i32, i32
  }
  func.func @transform_1(%arg0: i32) -> (i32, i32, i32) {
    %c0_i32 = arith.constant 0 : i32
    %c0_i32_0 = arith.constant 0 : i32
    %c0_i32_1 = arith.constant 0 : i32
    return %arg0, %c0_i32, %c0_i32_0 : i32, i32, i32
  }
  func.func @transform_2(%arg0: i32) -> (i32, i32, i32) {
    %c0_i32 = arith.constant 0 : i32
    %c0_i32_0 = arith.constant 0 : i32
    %c0_i32_1 = arith.constant 0 : i32
    %c0_i32_2 = arith.constant 0 : i32
    return %c0_i32, %c0_i32_0, %c0_i32_1 : i32, i32, i32
  }
  func.func @transform_3(%arg0: i32) -> (i32, i32) {
    %c0_i32 = arith.constant 0 : i32
    %c0_i32_0 = arith.constant 0 : i32
    %c0_i32_1 = arith.constant 0 : i32
    return %c0_i32, %c0_i32_0 : i32, i32
  }
  func.func @transform_4(%arg0: i32) -> (i32, i32, i32) {
    %c0_i32 = arith.constant 0 : i32
    %c0_i32_0 = arith.constant 0 : i32
    %c0_i32_1 = arith.constant 0 : i32
    %c0_i32_2 = arith.constant 0 : i32
    return %c0_i32, %c0_i32_0, %c0_i32_1 : i32, i32, i32
  }
  func.func @transform_5(%arg0: i32) -> (i32, i32) {
    %c0_i32 = arith.constant 0 : i32
    %c0_i32_0 = arith.constant 0 : i32
    %c0_i32_1 = arith.constant 0 : i32
    return %c0_i32, %c0_i32_0 : i32, i32
  }
  func.func @transform_6(%arg0: i32) -> (i32, i32, i32) {
    %c0_i32 = arith.constant 0 : i32
    %c0_i32_0 = arith.constant 0 : i32
    %c0_i32_1 = arith.constant 0 : i32
    %c0_i32_2 = arith.constant 0 : i32
    return %c0_i32, %c0_i32_0, %c0_i32_1 : i32, i32, i32
  }
  func.func @transform_7(%arg0: i32) -> (i32, i32) {
    %c0_i32 = arith.constant 0 : i32
    %c0_i32_0 = arith.constant 0 : i32
    %c0_i32_1 = arith.constant 0 : i32
    return %c0_i32, %c0_i32_0 : i32, i32
  }
  func.func @transform_8(%arg0: i32) -> (i32, i32, i32) {
    %c0_i32 = arith.constant 0 : i32
    %c0_i32_0 = arith.constant 0 : i32
    %c0_i32_1 = arith.constant 0 : i32
    %c0_i32_2 = arith.constant 0 : i32
    return %c0_i32, %c0_i32_0, %c0_i32_1 : i32, i32, i32
  }
  func.func @transform_9(%arg0: i32) -> (i32, i32) {
    %c0_i32 = arith.constant 0 : i32
    %c0_i32_0 = arith.constant 0 : i32
    %c0_i32_1 = arith.constant 0 : i32
    return %c0_i32, %c0_i32_0 : i32, i32
  }
  func.func @transform_10(%arg0: i32) -> (i32, i32, i32) {
    %c0_i32 = arith.constant 0 : i32
    %c0_i32_0 = arith.constant 0 : i32
    %c0_i32_1 = arith.constant 0 : i32
    %c0_i32_2 = arith.constant 0 : i32
    return %c0_i32, %c0_i32_0, %c0_i32_1 : i32, i32, i32
  }
  func.func @transform_11(%arg0: i32) -> (i32, i32) {
    %c0_i32 = arith.constant 0 : i32
    %c0_i32_0 = arith.constant 0 : i32
    %c0_i32_1 = arith.constant 0 : i32
    return %c0_i32, %c0_i32_0 : i32, i32
  }
  func.func @transform_12(%arg0: i32) -> (i32, i32, i32) {
    %c0_i32 = arith.constant 0 : i32
    %c0_i32_0 = arith.constant 0 : i32
    %c0_i32_1 = arith.constant 0 : i32
    %c0_i32_2 = arith.constant 0 : i32
    return %c0_i32, %c0_i32_0, %c0_i32_1 : i32, i32, i32
  }
  func.func @transform_13(%arg0: i32) -> (i32, i32) {
    %c0_i32 = arith.constant 0 : i32
    %c0_i32_0 = arith.constant 0 : i32
    %c0_i32_1 = arith.constant 0 : i32
    return %c0_i32, %c0_i32_0 : i32, i32
  }
  func.func @transform_14(%arg0: i32) -> (i32, i32, i32) {
    %c0_i32 = arith.constant 0 : i32
    %c0_i32_0 = arith.constant 0 : i32
    %c0_i32_1 = arith.constant 0 : i32
    return %arg0, %c0_i32, %c0_i32_0 : i32, i32, i32
  }
}

module attributes {stable_mosaic.version = 11 : i64} {
  func.func @_level_kernel(%arg0: i32, %arg1: memref<1x4x32xf32, #tpu.memory_space<vmem>>, %arg2: memref<1x4x32xf32, #tpu.memory_space<vmem>>, %arg3: memref<3x8x4xf32, #tpu.memory_space<vmem>>, %arg4: memref<3x8x4xf32, #tpu.memory_space<vmem>>, %arg5: memref<8x1xf32, #tpu.memory_space<vmem>>, %arg6: memref<3x4x8xf32, #tpu.memory_space<vmem>>, %arg7: memref<4x1xf32, #tpu.memory_space<vmem>>, %arg8: memref<3x4x4xf32, #tpu.memory_space<vmem>>, %arg9: memref<4x1xf32, #tpu.memory_space<vmem>>, %arg10: memref<3x4x4xf32, #tpu.memory_space<vmem>>, %arg11: memref<4x1xf32, #tpu.memory_space<vmem>>, %arg12: memref<1x4x32xf32, #tpu.memory_space<vmem>>, %arg13: memref<1x4x32xf32, #tpu.memory_space<vmem>>) attributes {dimension_semantics = [#tpu.dimension_semantics<parallel>], iteration_bounds = array<i64: 2>, scalar_prefetch = 0 : i64, scratch_operands = 0 : i64, tpu.core_type = #tpu.core_type<tc>, window_params = [{transform_indices = @transform_0, window_bounds = array<i64: 1, 4, 32>}, {transform_indices = @transform_1, window_bounds = array<i64: 1, 4, 32>}, {pipeline_mode = #tpu.pipeline_mode<synchronous>, transform_indices = @transform_2, window_bounds = array<i64: 3, 8, 4>}, {pipeline_mode = #tpu.pipeline_mode<synchronous>, transform_indices = @transform_3, window_bounds = array<i64: 3, 8, 4>}, {pipeline_mode = #tpu.pipeline_mode<synchronous>, transform_indices = @transform_4, window_bounds = array<i64: 8, 1>}, {pipeline_mode = #tpu.pipeline_mode<synchronous>, transform_indices = @transform_5, window_bounds = array<i64: 3, 4, 8>}, {pipeline_mode = #tpu.pipeline_mode<synchronous>, transform_indices = @transform_6, window_bounds = array<i64: 4, 1>}, {pipeline_mode = #tpu.pipeline_mode<synchronous>, transform_indices = @transform_7, window_bounds = array<i64: 3, 4, 4>}, {pipeline_mode = #tpu.pipeline_mode<synchronous>, transform_indices = @transform_8, window_bounds = array<i64: 4, 1>}, {pipeline_mode = #tpu.pipeline_mode<synchronous>, transform_indices = @transform_9, window_bounds = array<i64: 3, 4, 4>}, {pipeline_mode = #tpu.pipeline_mode<synchronous>, transform_indices = @transform_10, window_bounds = array<i64: 4, 1>}, {transform_indices = @transform_11, window_bounds = array<i64: 1, 4, 32>}, {transform_indices = @transform_12, window_bounds = array<i64: 1, 4, 32>}]} {
    %c0 = arith.constant 0 : index
    %c0_0 = arith.constant 0 : index
    %c0_1 = arith.constant 0 : index
    %0 = vector.load %arg1[%c0, %c0_0, %c0_1] : memref<1x4x32xf32, #tpu.memory_space<vmem>>, vector<1x4x32xf32>
    %1 = vector.shape_cast %0 : vector<1x4x32xf32> to vector<4x32xf32>
    %c0_2 = arith.constant 0 : index
    %c0_3 = arith.constant 0 : index
    %c0_4 = arith.constant 0 : index
    %2 = vector.load %arg2[%c0_2, %c0_3, %c0_4] : memref<1x4x32xf32, #tpu.memory_space<vmem>>, vector<1x4x32xf32>
    %3 = vector.shape_cast %2 : vector<1x4x32xf32> to vector<4x32xf32>
    %c0_5 = arith.constant 0 : index
    %c0_6 = arith.constant 0 : index
    %c0_7 = arith.constant 0 : index
    %4 = vector.load %arg3[%c0_5, %c0_6, %c0_7] : memref<3x8x4xf32, #tpu.memory_space<vmem>>, vector<1x8x4xf32>
    %5 = vector.shape_cast %4 : vector<1x8x4xf32> to vector<8x4xf32>
    %cst = arith.constant dense<0.000000e+00> : vector<8x32xf32>
    %6 = tpu.matmul %5, %1, %cst {dimension_numbers = #tpu.dot_dimension_numbers<[1], [0], [0], [1], [0, 0, 1, 1], [], []>} : vector<8x4xf32>, vector<4x32xf32>, vector<8x32xf32> -> vector<8x32xf32>
    %c0_8 = arith.constant 0 : index
    %c0_9 = arith.constant 0 : index
    %c0_10 = arith.constant 0 : index
    %7 = vector.load %arg4[%c0_8, %c0_9, %c0_10] : memref<3x8x4xf32, #tpu.memory_space<vmem>>, vector<1x8x4xf32>
    %8 = vector.shape_cast %7 : vector<1x8x4xf32> to vector<8x4xf32>
    %cst_11 = arith.constant dense<0.000000e+00> : vector<8x32xf32>
    %9 = tpu.matmul %8, %3, %cst_11 {dimension_numbers = #tpu.dot_dimension_numbers<[1], [0], [0], [1], [0, 0, 1, 1], [], []>} : vector<8x4xf32>, vector<4x32xf32>, vector<8x32xf32> -> vector<8x32xf32>
    %10 = arith.addf %6, %9 : vector<8x32xf32>
    %c1 = arith.constant 1 : index
    %c0_12 = arith.constant 0 : index
    %c0_13 = arith.constant 0 : index
    %11 = vector.load %arg3[%c1, %c0_12, %c0_13] : memref<3x8x4xf32, #tpu.memory_space<vmem>>, vector<1x8x4xf32>
    %12 = vector.shape_cast %11 : vector<1x8x4xf32> to vector<8x4xf32>
    %cst_14 = arith.constant dense<0.000000e+00> : vector<8x32xf32>
    %13 = tpu.matmul %12, %1, %cst_14 {dimension_numbers = #tpu.dot_dimension_numbers<[1], [0], [0], [1], [0, 0, 1, 1], [], []>} : vector<8x4xf32>, vector<4x32xf32>, vector<8x32xf32> -> vector<8x32xf32>
    %c1_15 = arith.constant 1 : index
    %c0_16 = arith.constant 0 : index
    %c0_17 = arith.constant 0 : index
    %14 = vector.load %arg4[%c1_15, %c0_16, %c0_17] : memref<3x8x4xf32, #tpu.memory_space<vmem>>, vector<1x8x4xf32>
    %15 = vector.shape_cast %14 : vector<1x8x4xf32> to vector<8x4xf32>
    %cst_18 = arith.constant dense<0.000000e+00> : vector<8x32xf32>
    %16 = tpu.matmul %15, %3, %cst_18 {dimension_numbers = #tpu.dot_dimension_numbers<[1], [0], [0], [1], [0, 0, 1, 1], [], []>} : vector<8x4xf32>, vector<4x32xf32>, vector<8x32xf32> -> vector<8x32xf32>
    %17 = arith.addf %13, %16 : vector<8x32xf32>
    %c2 = arith.constant 2 : index
    %c0_19 = arith.constant 0 : index
    %c0_20 = arith.constant 0 : index
    %18 = vector.load %arg3[%c2, %c0_19, %c0_20] : memref<3x8x4xf32, #tpu.memory_space<vmem>>, vector<1x8x4xf32>
    %19 = vector.shape_cast %18 : vector<1x8x4xf32> to vector<8x4xf32>
    %cst_21 = arith.constant dense<0.000000e+00> : vector<8x32xf32>
    %20 = tpu.matmul %19, %1, %cst_21 {dimension_numbers = #tpu.dot_dimension_numbers<[1], [0], [0], [1], [0, 0, 1, 1], [], []>} : vector<8x4xf32>, vector<4x32xf32>, vector<8x32xf32> -> vector<8x32xf32>
    %c2_22 = arith.constant 2 : index
    %c0_23 = arith.constant 0 : index
    %c0_24 = arith.constant 0 : index
    %21 = vector.load %arg4[%c2_22, %c0_23, %c0_24] : memref<3x8x4xf32, #tpu.memory_space<vmem>>, vector<1x8x4xf32>
    %22 = vector.shape_cast %21 : vector<1x8x4xf32> to vector<8x4xf32>
    %cst_25 = arith.constant dense<0.000000e+00> : vector<8x32xf32>
    %23 = tpu.matmul %22, %3, %cst_25 {dimension_numbers = #tpu.dot_dimension_numbers<[1], [0], [0], [1], [0, 0, 1, 1], [], []>} : vector<8x4xf32>, vector<4x32xf32>, vector<8x32xf32> -> vector<8x32xf32>
    %24 = arith.addf %20, %23 : vector<8x32xf32>
    %c0_26 = arith.constant 0 : index
    %c0_27 = arith.constant 0 : index
    %25 = vector.load %arg5[%c0_26, %c0_27] : memref<8x1xf32, #tpu.memory_space<vmem>>, vector<8x1xf32>
    %cst_28 = arith.constant 0.000000e+00 : f32
    %26 = vector.broadcast %cst_28 : f32 to vector<8x1xf32>
    %27 = vector.extract_strided_slice %10 {offsets = [0, 0], sizes = [8, 31], strides = [1, 1]} : vector<8x32xf32> to vector<8x31xf32>
    %28 = tpu.concatenate %26, %27 in 1 : vector<8x1xf32>, vector<8x31xf32> -> vector<8x32xf32>
    %29 = arith.addf %28, %17 : vector<8x32xf32>
    %30 = arith.addf %29, %24 : vector<8x32xf32>
    %31 = vector.broadcast %25 : vector<8x1xf32> to vector<8x32xf32>
    %32 = arith.addf %30, %31 : vector<8x32xf32>
    %33 = arith.negf %32 : vector<8x32xf32>
    %34 = math.exp %33 : vector<8x32xf32>
    %cst_29 = arith.constant 1.000000e+00 : f32
    %35 = vector.broadcast %cst_29 : f32 to vector<8x32xf32>
    %36 = arith.addf %35, %34 : vector<8x32xf32>
    %37 = arith.divf %35, %36 : vector<8x32xf32>
    %38 = arith.mulf %32, %37 : vector<8x32xf32>
    %39 = arith.addf %10, %17 : vector<8x32xf32>
    %40 = vector.extract_strided_slice %24 {offsets = [0, 1], sizes = [8, 31], strides = [1, 1]} : vector<8x32xf32> to vector<8x31xf32>
    %cst_30 = arith.constant 0.000000e+00 : f32
    %41 = vector.broadcast %cst_30 : f32 to vector<8x1xf32>
    %42 = tpu.concatenate %40, %41 in 1 : vector<8x31xf32>, vector<8x1xf32> -> vector<8x32xf32>
    %43 = arith.addf %39, %42 : vector<8x32xf32>
    %44 = vector.broadcast %25 : vector<8x1xf32> to vector<8x32xf32>
    %45 = arith.addf %43, %44 : vector<8x32xf32>
    %46 = arith.negf %45 : vector<8x32xf32>
    %47 = math.exp %46 : vector<8x32xf32>
    %cst_31 = arith.constant 1.000000e+00 : f32
    %48 = vector.broadcast %cst_31 : f32 to vector<8x32xf32>
    %49 = arith.addf %48, %47 : vector<8x32xf32>
    %50 = arith.divf %48, %49 : vector<8x32xf32>
    %51 = arith.mulf %45, %50 : vector<8x32xf32>
    %c0_32 = arith.constant 0 : index
    %c0_33 = arith.constant 0 : index
    %c0_34 = arith.constant 0 : index
    %52 = vector.load %arg6[%c0_32, %c0_33, %c0_34] : memref<3x4x8xf32, #tpu.memory_space<vmem>>, vector<1x4x8xf32>
    %53 = vector.shape_cast %52 : vector<1x4x8xf32> to vector<4x8xf32>
    %cst_35 = arith.constant dense<0.000000e+00> : vector<4x32xf32>
    %54 = tpu.matmul %53, %38, %cst_35 {dimension_numbers = #tpu.dot_dimension_numbers<[1], [0], [0], [1], [0, 0, 1, 1], [], []>} : vector<4x8xf32>, vector<8x32xf32>, vector<4x32xf32> -> vector<4x32xf32>
    %c0_36 = arith.constant 0 : index
    %c0_37 = arith.constant 0 : index
    %c0_38 = arith.constant 0 : index
    %55 = vector.load %arg6[%c0_36, %c0_37, %c0_38] : memref<3x4x8xf32, #tpu.memory_space<vmem>>, vector<1x4x8xf32>
    %56 = vector.shape_cast %55 : vector<1x4x8xf32> to vector<4x8xf32>
    %cst_39 = arith.constant dense<0.000000e+00> : vector<4x32xf32>
    %57 = tpu.matmul %56, %51, %cst_39 {dimension_numbers = #tpu.dot_dimension_numbers<[1], [0], [0], [1], [0, 0, 1, 1], [], []>} : vector<4x8xf32>, vector<8x32xf32>, vector<4x32xf32> -> vector<4x32xf32>
    %c1_40 = arith.constant 1 : index
    %c0_41 = arith.constant 0 : index
    %c0_42 = arith.constant 0 : index
    %58 = vector.load %arg6[%c1_40, %c0_41, %c0_42] : memref<3x4x8xf32, #tpu.memory_space<vmem>>, vector<1x4x8xf32>
    %59 = vector.shape_cast %58 : vector<1x4x8xf32> to vector<4x8xf32>
    %cst_43 = arith.constant dense<0.000000e+00> : vector<4x32xf32>
    %60 = tpu.matmul %59, %38, %cst_43 {dimension_numbers = #tpu.dot_dimension_numbers<[1], [0], [0], [1], [0, 0, 1, 1], [], []>} : vector<4x8xf32>, vector<8x32xf32>, vector<4x32xf32> -> vector<4x32xf32>
    %c1_44 = arith.constant 1 : index
    %c0_45 = arith.constant 0 : index
    %c0_46 = arith.constant 0 : index
    %61 = vector.load %arg6[%c1_44, %c0_45, %c0_46] : memref<3x4x8xf32, #tpu.memory_space<vmem>>, vector<1x4x8xf32>
    %62 = vector.shape_cast %61 : vector<1x4x8xf32> to vector<4x8xf32>
    %cst_47 = arith.constant dense<0.000000e+00> : vector<4x32xf32>
    %63 = tpu.matmul %62, %51, %cst_47 {dimension_numbers = #tpu.dot_dimension_numbers<[1], [0], [0], [1], [0, 0, 1, 1], [], []>} : vector<4x8xf32>, vector<8x32xf32>, vector<4x32xf32> -> vector<4x32xf32>
    %c2_48 = arith.constant 2 : index
    %c0_49 = arith.constant 0 : index
    %c0_50 = arith.constant 0 : index
    %64 = vector.load %arg6[%c2_48, %c0_49, %c0_50] : memref<3x4x8xf32, #tpu.memory_space<vmem>>, vector<1x4x8xf32>
    %65 = vector.shape_cast %64 : vector<1x4x8xf32> to vector<4x8xf32>
    %cst_51 = arith.constant dense<0.000000e+00> : vector<4x32xf32>
    %66 = tpu.matmul %65, %38, %cst_51 {dimension_numbers = #tpu.dot_dimension_numbers<[1], [0], [0], [1], [0, 0, 1, 1], [], []>} : vector<4x8xf32>, vector<8x32xf32>, vector<4x32xf32> -> vector<4x32xf32>
    %c2_52 = arith.constant 2 : index
    %c0_53 = arith.constant 0 : index
    %c0_54 = arith.constant 0 : index
    %67 = vector.load %arg6[%c2_52, %c0_53, %c0_54] : memref<3x4x8xf32, #tpu.memory_space<vmem>>, vector<1x4x8xf32>
    %68 = vector.shape_cast %67 : vector<1x4x8xf32> to vector<4x8xf32>
    %cst_55 = arith.constant dense<0.000000e+00> : vector<4x32xf32>
    %69 = tpu.matmul %68, %51, %cst_55 {dimension_numbers = #tpu.dot_dimension_numbers<[1], [0], [0], [1], [0, 0, 1, 1], [], []>} : vector<4x8xf32>, vector<8x32xf32>, vector<4x32xf32> -> vector<4x32xf32>
    %c0_56 = arith.constant 0 : index
    %c0_57 = arith.constant 0 : index
    %70 = vector.load %arg7[%c0_56, %c0_57] : memref<4x1xf32, #tpu.memory_space<vmem>>, vector<4x1xf32>
    %cst_58 = arith.constant 0.000000e+00 : f32
    %71 = vector.broadcast %cst_58 : f32 to vector<4x1xf32>
    %72 = vector.extract_strided_slice %57 {offsets = [0, 0], sizes = [4, 31], strides = [1, 1]} : vector<4x32xf32> to vector<4x31xf32>
    %73 = tpu.concatenate %71, %72 in 1 : vector<4x1xf32>, vector<4x31xf32> -> vector<4x32xf32>
    %74 = arith.addf %73, %60 : vector<4x32xf32>
    %75 = arith.addf %74, %69 : vector<4x32xf32>
    %76 = vector.broadcast %70 : vector<4x1xf32> to vector<4x32xf32>
    %77 = arith.addf %75, %76 : vector<4x32xf32>
    %78 = arith.addf %54, %63 : vector<4x32xf32>
    %79 = vector.extract_strided_slice %66 {offsets = [0, 1], sizes = [4, 31], strides = [1, 1]} : vector<4x32xf32> to vector<4x31xf32>
    %cst_59 = arith.constant 0.000000e+00 : f32
    %80 = vector.broadcast %cst_59 : f32 to vector<4x1xf32>
    %81 = tpu.concatenate %79, %80 in 1 : vector<4x31xf32>, vector<4x1xf32> -> vector<4x32xf32>
    %82 = arith.addf %78, %81 : vector<4x32xf32>
    %83 = vector.broadcast %70 : vector<4x1xf32> to vector<4x32xf32>
    %84 = arith.addf %82, %83 : vector<4x32xf32>
    %85 = arith.negf %77 : vector<4x32xf32>
    %86 = math.exp %85 : vector<4x32xf32>
    %cst_60 = arith.constant 1.000000e+00 : f32
    %87 = vector.broadcast %cst_60 : f32 to vector<4x32xf32>
    %88 = arith.addf %87, %86 : vector<4x32xf32>
    %89 = arith.divf %87, %88 : vector<4x32xf32>
    %90 = arith.mulf %77, %89 : vector<4x32xf32>
    %91 = arith.negf %84 : vector<4x32xf32>
    %92 = math.exp %91 : vector<4x32xf32>
    %cst_61 = arith.constant 1.000000e+00 : f32
    %93 = vector.broadcast %cst_61 : f32 to vector<4x32xf32>
    %94 = arith.addf %93, %92 : vector<4x32xf32>
    %95 = arith.divf %93, %94 : vector<4x32xf32>
    %96 = arith.mulf %84, %95 : vector<4x32xf32>
    %c0_62 = arith.constant 0 : index
    %c0_63 = arith.constant 0 : index
    %c0_64 = arith.constant 0 : index
    %97 = vector.load %arg8[%c0_62, %c0_63, %c0_64] : memref<3x4x4xf32, #tpu.memory_space<vmem>>, vector<1x4x4xf32>
    %98 = vector.shape_cast %97 : vector<1x4x4xf32> to vector<4x4xf32>
    %cst_65 = arith.constant dense<0.000000e+00> : vector<4x32xf32>
    %99 = tpu.matmul %98, %90, %cst_65 {dimension_numbers = #tpu.dot_dimension_numbers<[1], [0], [0], [1], [0, 0, 1, 1], [], []>} : vector<4x4xf32>, vector<4x32xf32>, vector<4x32xf32> -> vector<4x32xf32>
    %c0_66 = arith.constant 0 : index
    %c0_67 = arith.constant 0 : index
    %c0_68 = arith.constant 0 : index
    %100 = vector.load %arg8[%c0_66, %c0_67, %c0_68] : memref<3x4x4xf32, #tpu.memory_space<vmem>>, vector<1x4x4xf32>
    %101 = vector.shape_cast %100 : vector<1x4x4xf32> to vector<4x4xf32>
    %cst_69 = arith.constant dense<0.000000e+00> : vector<4x32xf32>
    %102 = tpu.matmul %101, %96, %cst_69 {dimension_numbers = #tpu.dot_dimension_numbers<[1], [0], [0], [1], [0, 0, 1, 1], [], []>} : vector<4x4xf32>, vector<4x32xf32>, vector<4x32xf32> -> vector<4x32xf32>
    %c1_70 = arith.constant 1 : index
    %c0_71 = arith.constant 0 : index
    %c0_72 = arith.constant 0 : index
    %103 = vector.load %arg8[%c1_70, %c0_71, %c0_72] : memref<3x4x4xf32, #tpu.memory_space<vmem>>, vector<1x4x4xf32>
    %104 = vector.shape_cast %103 : vector<1x4x4xf32> to vector<4x4xf32>
    %cst_73 = arith.constant dense<0.000000e+00> : vector<4x32xf32>
    %105 = tpu.matmul %104, %90, %cst_73 {dimension_numbers = #tpu.dot_dimension_numbers<[1], [0], [0], [1], [0, 0, 1, 1], [], []>} : vector<4x4xf32>, vector<4x32xf32>, vector<4x32xf32> -> vector<4x32xf32>
    %c1_74 = arith.constant 1 : index
    %c0_75 = arith.constant 0 : index
    %c0_76 = arith.constant 0 : index
    %106 = vector.load %arg8[%c1_74, %c0_75, %c0_76] : memref<3x4x4xf32, #tpu.memory_space<vmem>>, vector<1x4x4xf32>
    %107 = vector.shape_cast %106 : vector<1x4x4xf32> to vector<4x4xf32>
    %cst_77 = arith.constant dense<0.000000e+00> : vector<4x32xf32>
    %108 = tpu.matmul %107, %96, %cst_77 {dimension_numbers = #tpu.dot_dimension_numbers<[1], [0], [0], [1], [0, 0, 1, 1], [], []>} : vector<4x4xf32>, vector<4x32xf32>, vector<4x32xf32> -> vector<4x32xf32>
    %c2_78 = arith.constant 2 : index
    %c0_79 = arith.constant 0 : index
    %c0_80 = arith.constant 0 : index
    %109 = vector.load %arg8[%c2_78, %c0_79, %c0_80] : memref<3x4x4xf32, #tpu.memory_space<vmem>>, vector<1x4x4xf32>
    %110 = vector.shape_cast %109 : vector<1x4x4xf32> to vector<4x4xf32>
    %cst_81 = arith.constant dense<0.000000e+00> : vector<4x32xf32>
    %111 = tpu.matmul %110, %90, %cst_81 {dimension_numbers = #tpu.dot_dimension_numbers<[1], [0], [0], [1], [0, 0, 1, 1], [], []>} : vector<4x4xf32>, vector<4x32xf32>, vector<4x32xf32> -> vector<4x32xf32>
    %c2_82 = arith.constant 2 : index
    %c0_83 = arith.constant 0 : index
    %c0_84 = arith.constant 0 : index
    %112 = vector.load %arg8[%c2_82, %c0_83, %c0_84] : memref<3x4x4xf32, #tpu.memory_space<vmem>>, vector<1x4x4xf32>
    %113 = vector.shape_cast %112 : vector<1x4x4xf32> to vector<4x4xf32>
    %cst_85 = arith.constant dense<0.000000e+00> : vector<4x32xf32>
    %114 = tpu.matmul %113, %96, %cst_85 {dimension_numbers = #tpu.dot_dimension_numbers<[1], [0], [0], [1], [0, 0, 1, 1], [], []>} : vector<4x4xf32>, vector<4x32xf32>, vector<4x32xf32> -> vector<4x32xf32>
    %c0_86 = arith.constant 0 : index
    %c0_87 = arith.constant 0 : index
    %115 = vector.load %arg9[%c0_86, %c0_87] : memref<4x1xf32, #tpu.memory_space<vmem>>, vector<4x1xf32>
    %cst_88 = arith.constant 0.000000e+00 : f32
    %116 = vector.broadcast %cst_88 : f32 to vector<4x1xf32>
    %117 = vector.extract_strided_slice %102 {offsets = [0, 0], sizes = [4, 31], strides = [1, 1]} : vector<4x32xf32> to vector<4x31xf32>
    %118 = tpu.concatenate %116, %117 in 1 : vector<4x1xf32>, vector<4x31xf32> -> vector<4x32xf32>
    %119 = arith.addf %118, %105 : vector<4x32xf32>
    %120 = arith.addf %119, %114 : vector<4x32xf32>
    %121 = vector.broadcast %115 : vector<4x1xf32> to vector<4x32xf32>
    %122 = arith.addf %120, %121 : vector<4x32xf32>
    %123 = arith.addf %99, %108 : vector<4x32xf32>
    %124 = vector.extract_strided_slice %111 {offsets = [0, 1], sizes = [4, 31], strides = [1, 1]} : vector<4x32xf32> to vector<4x31xf32>
    %cst_89 = arith.constant 0.000000e+00 : f32
    %125 = vector.broadcast %cst_89 : f32 to vector<4x1xf32>
    %126 = tpu.concatenate %124, %125 in 1 : vector<4x31xf32>, vector<4x1xf32> -> vector<4x32xf32>
    %127 = arith.addf %123, %126 : vector<4x32xf32>
    %128 = vector.broadcast %115 : vector<4x1xf32> to vector<4x32xf32>
    %129 = arith.addf %127, %128 : vector<4x32xf32>
    %130 = arith.negf %122 : vector<4x32xf32>
    %131 = math.exp %130 : vector<4x32xf32>
    %cst_90 = arith.constant 1.000000e+00 : f32
    %132 = vector.broadcast %cst_90 : f32 to vector<4x32xf32>
    %133 = arith.addf %132, %131 : vector<4x32xf32>
    %134 = arith.divf %132, %133 : vector<4x32xf32>
    %135 = arith.mulf %122, %134 : vector<4x32xf32>
    %136 = arith.negf %129 : vector<4x32xf32>
    %137 = math.exp %136 : vector<4x32xf32>
    %cst_91 = arith.constant 1.000000e+00 : f32
    %138 = vector.broadcast %cst_91 : f32 to vector<4x32xf32>
    %139 = arith.addf %138, %137 : vector<4x32xf32>
    %140 = arith.divf %138, %139 : vector<4x32xf32>
    %141 = arith.mulf %129, %140 : vector<4x32xf32>
    %c0_92 = arith.constant 0 : index
    %c0_93 = arith.constant 0 : index
    %c0_94 = arith.constant 0 : index
    %142 = vector.load %arg10[%c0_92, %c0_93, %c0_94] : memref<3x4x4xf32, #tpu.memory_space<vmem>>, vector<1x4x4xf32>
    %143 = vector.shape_cast %142 : vector<1x4x4xf32> to vector<4x4xf32>
    %cst_95 = arith.constant dense<0.000000e+00> : vector<4x32xf32>
    %144 = tpu.matmul %143, %135, %cst_95 {dimension_numbers = #tpu.dot_dimension_numbers<[1], [0], [0], [1], [0, 0, 1, 1], [], []>} : vector<4x4xf32>, vector<4x32xf32>, vector<4x32xf32> -> vector<4x32xf32>
    %c0_96 = arith.constant 0 : index
    %c0_97 = arith.constant 0 : index
    %c0_98 = arith.constant 0 : index
    %145 = vector.load %arg10[%c0_96, %c0_97, %c0_98] : memref<3x4x4xf32, #tpu.memory_space<vmem>>, vector<1x4x4xf32>
    %146 = vector.shape_cast %145 : vector<1x4x4xf32> to vector<4x4xf32>
    %cst_99 = arith.constant dense<0.000000e+00> : vector<4x32xf32>
    %147 = tpu.matmul %146, %141, %cst_99 {dimension_numbers = #tpu.dot_dimension_numbers<[1], [0], [0], [1], [0, 0, 1, 1], [], []>} : vector<4x4xf32>, vector<4x32xf32>, vector<4x32xf32> -> vector<4x32xf32>
    %c1_100 = arith.constant 1 : index
    %c0_101 = arith.constant 0 : index
    %c0_102 = arith.constant 0 : index
    %148 = vector.load %arg10[%c1_100, %c0_101, %c0_102] : memref<3x4x4xf32, #tpu.memory_space<vmem>>, vector<1x4x4xf32>
    %149 = vector.shape_cast %148 : vector<1x4x4xf32> to vector<4x4xf32>
    %cst_103 = arith.constant dense<0.000000e+00> : vector<4x32xf32>
    %150 = tpu.matmul %149, %135, %cst_103 {dimension_numbers = #tpu.dot_dimension_numbers<[1], [0], [0], [1], [0, 0, 1, 1], [], []>} : vector<4x4xf32>, vector<4x32xf32>, vector<4x32xf32> -> vector<4x32xf32>
    %c1_104 = arith.constant 1 : index
    %c0_105 = arith.constant 0 : index
    %c0_106 = arith.constant 0 : index
    %151 = vector.load %arg10[%c1_104, %c0_105, %c0_106] : memref<3x4x4xf32, #tpu.memory_space<vmem>>, vector<1x4x4xf32>
    %152 = vector.shape_cast %151 : vector<1x4x4xf32> to vector<4x4xf32>
    %cst_107 = arith.constant dense<0.000000e+00> : vector<4x32xf32>
    %153 = tpu.matmul %152, %141, %cst_107 {dimension_numbers = #tpu.dot_dimension_numbers<[1], [0], [0], [1], [0, 0, 1, 1], [], []>} : vector<4x4xf32>, vector<4x32xf32>, vector<4x32xf32> -> vector<4x32xf32>
    %c2_108 = arith.constant 2 : index
    %c0_109 = arith.constant 0 : index
    %c0_110 = arith.constant 0 : index
    %154 = vector.load %arg10[%c2_108, %c0_109, %c0_110] : memref<3x4x4xf32, #tpu.memory_space<vmem>>, vector<1x4x4xf32>
    %155 = vector.shape_cast %154 : vector<1x4x4xf32> to vector<4x4xf32>
    %cst_111 = arith.constant dense<0.000000e+00> : vector<4x32xf32>
    %156 = tpu.matmul %155, %135, %cst_111 {dimension_numbers = #tpu.dot_dimension_numbers<[1], [0], [0], [1], [0, 0, 1, 1], [], []>} : vector<4x4xf32>, vector<4x32xf32>, vector<4x32xf32> -> vector<4x32xf32>
    %c2_112 = arith.constant 2 : index
    %c0_113 = arith.constant 0 : index
    %c0_114 = arith.constant 0 : index
    %157 = vector.load %arg10[%c2_112, %c0_113, %c0_114] : memref<3x4x4xf32, #tpu.memory_space<vmem>>, vector<1x4x4xf32>
    %158 = vector.shape_cast %157 : vector<1x4x4xf32> to vector<4x4xf32>
    %cst_115 = arith.constant dense<0.000000e+00> : vector<4x32xf32>
    %159 = tpu.matmul %158, %141, %cst_115 {dimension_numbers = #tpu.dot_dimension_numbers<[1], [0], [0], [1], [0, 0, 1, 1], [], []>} : vector<4x4xf32>, vector<4x32xf32>, vector<4x32xf32> -> vector<4x32xf32>
    %c0_116 = arith.constant 0 : index
    %c0_117 = arith.constant 0 : index
    %160 = vector.load %arg11[%c0_116, %c0_117] : memref<4x1xf32, #tpu.memory_space<vmem>>, vector<4x1xf32>
    %cst_118 = arith.constant 0.000000e+00 : f32
    %161 = vector.broadcast %cst_118 : f32 to vector<4x1xf32>
    %162 = vector.extract_strided_slice %147 {offsets = [0, 0], sizes = [4, 31], strides = [1, 1]} : vector<4x32xf32> to vector<4x31xf32>
    %163 = tpu.concatenate %161, %162 in 1 : vector<4x1xf32>, vector<4x31xf32> -> vector<4x32xf32>
    %164 = arith.addf %163, %150 : vector<4x32xf32>
    %165 = arith.addf %164, %159 : vector<4x32xf32>
    %166 = vector.broadcast %160 : vector<4x1xf32> to vector<4x32xf32>
    %167 = arith.addf %165, %166 : vector<4x32xf32>
    %168 = arith.addf %144, %153 : vector<4x32xf32>
    %169 = vector.extract_strided_slice %156 {offsets = [0, 1], sizes = [4, 31], strides = [1, 1]} : vector<4x32xf32> to vector<4x31xf32>
    %cst_119 = arith.constant 0.000000e+00 : f32
    %170 = vector.broadcast %cst_119 : f32 to vector<4x1xf32>
    %171 = tpu.concatenate %169, %170 in 1 : vector<4x31xf32>, vector<4x1xf32> -> vector<4x32xf32>
    %172 = arith.addf %168, %171 : vector<4x32xf32>
    %173 = vector.broadcast %160 : vector<4x1xf32> to vector<4x32xf32>
    %174 = arith.addf %172, %173 : vector<4x32xf32>
    %cst_120 = arith.constant 1.000000e-01 : f32
    %175 = vector.broadcast %cst_120 : f32 to vector<4x32xf32>
    %176 = arith.mulf %175, %167 : vector<4x32xf32>
    %177 = arith.addf %90, %176 : vector<4x32xf32>
    %c0_121 = arith.constant 0 : index
    %c0_122 = arith.constant 0 : index
    %c0_123 = arith.constant 0 : index
    %178 = vector.load %arg12[%c0_121, %c0_122, %c0_123] : memref<1x4x32xf32, #tpu.memory_space<vmem>>, vector<1x4x32xf32>
    %179 = vector.shape_cast %178 : vector<1x4x32xf32> to vector<4x32xf32>
    %180 = vector.shape_cast %177 : vector<4x32xf32> to vector<1x4x32xf32>
    tpu.vector_store %arg12[%c0_121, %c0_122, %c0_123], %180 {strides = array<i32>} : memref<1x4x32xf32, #tpu.memory_space<vmem>>, vector<1x4x32xf32>,
    %cst_124 = arith.constant 1.000000e-01 : f32
    %181 = vector.broadcast %cst_124 : f32 to vector<4x32xf32>
    %182 = arith.mulf %181, %174 : vector<4x32xf32>
    %183 = arith.addf %96, %182 : vector<4x32xf32>
    %c0_125 = arith.constant 0 : index
    %c0_126 = arith.constant 0 : index
    %c0_127 = arith.constant 0 : index
    %184 = vector.load %arg13[%c0_125, %c0_126, %c0_127] : memref<1x4x32xf32, #tpu.memory_space<vmem>>, vector<1x4x32xf32>
    %185 = vector.shape_cast %184 : vector<1x4x32xf32> to vector<4x32xf32>
    %186 = vector.shape_cast %183 : vector<4x32xf32> to vector<1x4x32xf32>
    tpu.vector_store %arg13[%c0_125, %c0_126, %c0_127], %186 {strides = array<i32>} : memref<1x4x32xf32, #tpu.memory_space<vmem>>, vector<1x4x32xf32>,
    return
  }
  func.func @transform_0(%arg0: i32) -> (i32, i32, i32) {
    %c0_i32 = arith.constant 0 : i32
    %c0_i32_0 = arith.constant 0 : i32
    %c0_i32_1 = arith.constant 0 : i32
    return %arg0, %c0_i32, %c0_i32_0 : i32, i32, i32
  }
  func.func @transform_1(%arg0: i32) -> (i32, i32, i32) {
    %c0_i32 = arith.constant 0 : i32
    %c0_i32_0 = arith.constant 0 : i32
    %c0_i32_1 = arith.constant 0 : i32
    return %arg0, %c0_i32, %c0_i32_0 : i32, i32, i32
  }
  func.func @transform_2(%arg0: i32) -> (i32, i32, i32) {
    %c0_i32 = arith.constant 0 : i32
    %c0_i32_0 = arith.constant 0 : i32
    %c0_i32_1 = arith.constant 0 : i32
    %c0_i32_2 = arith.constant 0 : i32
    return %c0_i32, %c0_i32_0, %c0_i32_1 : i32, i32, i32
  }
  func.func @transform_3(%arg0: i32) -> (i32, i32, i32) {
    %c0_i32 = arith.constant 0 : i32
    %c0_i32_0 = arith.constant 0 : i32
    %c0_i32_1 = arith.constant 0 : i32
    %c0_i32_2 = arith.constant 0 : i32
    return %c0_i32, %c0_i32_0, %c0_i32_1 : i32, i32, i32
  }
  func.func @transform_4(%arg0: i32) -> (i32, i32) {
    %c0_i32 = arith.constant 0 : i32
    %c0_i32_0 = arith.constant 0 : i32
    %c0_i32_1 = arith.constant 0 : i32
    return %c0_i32, %c0_i32_0 : i32, i32
  }
  func.func @transform_5(%arg0: i32) -> (i32, i32, i32) {
    %c0_i32 = arith.constant 0 : i32
    %c0_i32_0 = arith.constant 0 : i32
    %c0_i32_1 = arith.constant 0 : i32
    %c0_i32_2 = arith.constant 0 : i32
    return %c0_i32, %c0_i32_0, %c0_i32_1 : i32, i32, i32
  }
  func.func @transform_6(%arg0: i32) -> (i32, i32) {
    %c0_i32 = arith.constant 0 : i32
    %c0_i32_0 = arith.constant 0 : i32
    %c0_i32_1 = arith.constant 0 : i32
    return %c0_i32, %c0_i32_0 : i32, i32
  }
  func.func @transform_7(%arg0: i32) -> (i32, i32, i32) {
    %c0_i32 = arith.constant 0 : i32
    %c0_i32_0 = arith.constant 0 : i32
    %c0_i32_1 = arith.constant 0 : i32
    %c0_i32_2 = arith.constant 0 : i32
    return %c0_i32, %c0_i32_0, %c0_i32_1 : i32, i32, i32
  }
  func.func @transform_8(%arg0: i32) -> (i32, i32) {
    %c0_i32 = arith.constant 0 : i32
    %c0_i32_0 = arith.constant 0 : i32
    %c0_i32_1 = arith.constant 0 : i32
    return %c0_i32, %c0_i32_0 : i32, i32
  }
  func.func @transform_9(%arg0: i32) -> (i32, i32, i32) {
    %c0_i32 = arith.constant 0 : i32
    %c0_i32_0 = arith.constant 0 : i32
    %c0_i32_1 = arith.constant 0 : i32
    %c0_i32_2 = arith.constant 0 : i32
    return %c0_i32, %c0_i32_0, %c0_i32_1 : i32, i32, i32
  }
  func.func @transform_10(%arg0: i32) -> (i32, i32) {
    %c0_i32 = arith.constant 0 : i32
    %c0_i32_0 = arith.constant 0 : i32
    %c0_i32_1 = arith.constant 0 : i32
    return %c0_i32, %c0_i32_0 : i32, i32
  }
  func.func @transform_11(%arg0: i32) -> (i32, i32, i32) {
    %c0_i32 = arith.constant 0 : i32
    %c0_i32_0 = arith.constant 0 : i32
    %c0_i32_1 = arith.constant 0 : i32
    return %arg0, %c0_i32, %c0_i32_0 : i32, i32, i32
  }
  func.func @transform_12(%arg0: i32) -> (i32, i32, i32) {
    %c0_i32 = arith.constant 0 : i32
    %c0_i32_0 = arith.constant 0 : i32
    %c0_i32_1 = arith.constant 0 : i32
    return %arg0, %c0_i32, %c0_i32_0 : i32, i32, i32
  }
}

module attributes {stable_mosaic.version = 11 : i64} {
  func.func @_cond_kernel(%arg0: i32, %arg1: memref<1x4x64xf32, #tpu.memory_space<vmem>>, %arg2: memref<1x4x64xf32, #tpu.memory_space<vmem>>, %arg3: memref<3x4x4xf32, #tpu.memory_space<vmem>>, %arg4: memref<4x1xf32, #tpu.memory_space<vmem>>, %arg5: memref<3x4x4xf32, #tpu.memory_space<vmem>>, %arg6: memref<4x1xf32, #tpu.memory_space<vmem>>, %arg7: memref<3x4x4xf32, #tpu.memory_space<vmem>>, %arg8: memref<4x1xf32, #tpu.memory_space<vmem>>, %arg9: memref<3x4x4xf32, #tpu.memory_space<vmem>>, %arg10: memref<4x1xf32, #tpu.memory_space<vmem>>, %arg11: memref<3x4x4xf32, #tpu.memory_space<vmem>>, %arg12: memref<4x1xf32, #tpu.memory_space<vmem>>, %arg13: memref<3x4x4xf32, #tpu.memory_space<vmem>>, %arg14: memref<4x1xf32, #tpu.memory_space<vmem>>, %arg15: memref<1x4x64xf32, #tpu.memory_space<vmem>>) attributes {dimension_semantics = [#tpu.dimension_semantics<parallel>], iteration_bounds = array<i64: 2>, scalar_prefetch = 0 : i64, scratch_operands = 0 : i64, tpu.core_type = #tpu.core_type<tc>, window_params = [{transform_indices = @transform_0, window_bounds = array<i64: 1, 4, 64>}, {transform_indices = @transform_1, window_bounds = array<i64: 1, 4, 64>}, {pipeline_mode = #tpu.pipeline_mode<synchronous>, transform_indices = @transform_2, window_bounds = array<i64: 3, 4, 4>}, {pipeline_mode = #tpu.pipeline_mode<synchronous>, transform_indices = @transform_3, window_bounds = array<i64: 4, 1>}, {pipeline_mode = #tpu.pipeline_mode<synchronous>, transform_indices = @transform_4, window_bounds = array<i64: 3, 4, 4>}, {pipeline_mode = #tpu.pipeline_mode<synchronous>, transform_indices = @transform_5, window_bounds = array<i64: 4, 1>}, {pipeline_mode = #tpu.pipeline_mode<synchronous>, transform_indices = @transform_6, window_bounds = array<i64: 3, 4, 4>}, {pipeline_mode = #tpu.pipeline_mode<synchronous>, transform_indices = @transform_7, window_bounds = array<i64: 4, 1>}, {pipeline_mode = #tpu.pipeline_mode<synchronous>, transform_indices = @transform_8, window_bounds = array<i64: 3, 4, 4>}, {pipeline_mode = #tpu.pipeline_mode<synchronous>, transform_indices = @transform_9, window_bounds = array<i64: 4, 1>}, {pipeline_mode = #tpu.pipeline_mode<synchronous>, transform_indices = @transform_10, window_bounds = array<i64: 3, 4, 4>}, {pipeline_mode = #tpu.pipeline_mode<synchronous>, transform_indices = @transform_11, window_bounds = array<i64: 4, 1>}, {pipeline_mode = #tpu.pipeline_mode<synchronous>, transform_indices = @transform_12, window_bounds = array<i64: 3, 4, 4>}, {pipeline_mode = #tpu.pipeline_mode<synchronous>, transform_indices = @transform_13, window_bounds = array<i64: 4, 1>}, {transform_indices = @transform_14, window_bounds = array<i64: 1, 4, 64>}]} {
    %c0 = arith.constant 0 : index
    %c0_0 = arith.constant 0 : index
    %c0_1 = arith.constant 0 : index
    %0 = vector.load %arg1[%c0, %c0_0, %c0_1] : memref<1x4x64xf32, #tpu.memory_space<vmem>>, vector<1x4x64xf32>
    %1 = vector.shape_cast %0 : vector<1x4x64xf32> to vector<4x64xf32>
    %c0_2 = arith.constant 0 : index
    %c0_3 = arith.constant 0 : index
    %c0_4 = arith.constant 0 : index
    %2 = vector.load %arg3[%c0_2, %c0_3, %c0_4] : memref<3x4x4xf32, #tpu.memory_space<vmem>>, vector<1x4x4xf32>
    %3 = vector.shape_cast %2 : vector<1x4x4xf32> to vector<4x4xf32>
    %cst = arith.constant 0.000000e+00 : f32
    %4 = vector.broadcast %cst : f32 to vector<4x1xf32>
    %5 = vector.extract_strided_slice %1 {offsets = [0, 0], sizes = [4, 63], strides = [1, 1]} : vector<4x64xf32> to vector<4x63xf32>
    %6 = tpu.concatenate %4, %5 in 1 : vector<4x1xf32>, vector<4x63xf32> -> vector<4x64xf32>
    %cst_5 = arith.constant dense<0.000000e+00> : vector<4x64xf32>
    %7 = tpu.matmul %3, %6, %cst_5 {dimension_numbers = #tpu.dot_dimension_numbers<[1], [0], [0], [1], [0, 0, 1, 1], [], []>} : vector<4x4xf32>, vector<4x64xf32>, vector<4x64xf32> -> vector<4x64xf32>
    %c1 = arith.constant 1 : index
    %c0_6 = arith.constant 0 : index
    %c0_7 = arith.constant 0 : index
    %8 = vector.load %arg3[%c1, %c0_6, %c0_7] : memref<3x4x4xf32, #tpu.memory_space<vmem>>, vector<1x4x4xf32>
    %9 = vector.shape_cast %8 : vector<1x4x4xf32> to vector<4x4xf32>
    %cst_8 = arith.constant dense<0.000000e+00> : vector<4x64xf32>
    %10 = tpu.matmul %9, %1, %cst_8 {dimension_numbers = #tpu.dot_dimension_numbers<[1], [0], [0], [1], [0, 0, 1, 1], [], []>} : vector<4x4xf32>, vector<4x64xf32>, vector<4x64xf32> -> vector<4x64xf32>
    %11 = arith.addf %7, %10 : vector<4x64xf32>
    %c2 = arith.constant 2 : index
    %c0_9 = arith.constant 0 : index
    %c0_10 = arith.constant 0 : index
    %12 = vector.load %arg3[%c2, %c0_9, %c0_10] : memref<3x4x4xf32, #tpu.memory_space<vmem>>, vector<1x4x4xf32>
    %13 = vector.shape_cast %12 : vector<1x4x4xf32> to vector<4x4xf32>
    %14 = vector.extract_strided_slice %1 {offsets = [0, 1], sizes = [4, 63], strides = [1, 1]} : vector<4x64xf32> to vector<4x63xf32>
    %cst_11 = arith.constant 0.000000e+00 : f32
    %15 = vector.broadcast %cst_11 : f32 to vector<4x1xf32>
    %16 = tpu.concatenate %14, %15 in 1 : vector<4x63xf32>, vector<4x1xf32> -> vector<4x64xf32>
    %cst_12 = arith.constant dense<0.000000e+00> : vector<4x64xf32>
    %17 = tpu.matmul %13, %16, %cst_12 {dimension_numbers = #tpu.dot_dimension_numbers<[1], [0], [0], [1], [0, 0, 1, 1], [], []>} : vector<4x4xf32>, vector<4x64xf32>, vector<4x64xf32> -> vector<4x64xf32>
    %18 = arith.addf %11, %17 : vector<4x64xf32>
    %c0_13 = arith.constant 0 : index
    %c0_14 = arith.constant 0 : index
    %19 = vector.load %arg4[%c0_13, %c0_14] : memref<4x1xf32, #tpu.memory_space<vmem>>, vector<4x1xf32>
    %20 = vector.broadcast %19 : vector<4x1xf32> to vector<4x64xf32>
    %21 = arith.addf %18, %20 : vector<4x64xf32>
    %22 = arith.negf %21 : vector<4x64xf32>
    %23 = math.exp %22 : vector<4x64xf32>
    %cst_15 = arith.constant 1.000000e+00 : f32
    %24 = vector.broadcast %cst_15 : f32 to vector<4x64xf32>
    %25 = arith.addf %24, %23 : vector<4x64xf32>
    %26 = arith.divf %24, %25 : vector<4x64xf32>
    %27 = arith.mulf %21, %26 : vector<4x64xf32>
    %c0_16 = arith.constant 0 : index
    %c0_17 = arith.constant 0 : index
    %c0_18 = arith.constant 0 : index
    %28 = vector.load %arg5[%c0_16, %c0_17, %c0_18] : memref<3x4x4xf32, #tpu.memory_space<vmem>>, vector<1x4x4xf32>
    %29 = vector.shape_cast %28 : vector<1x4x4xf32> to vector<4x4xf32>
    %cst_19 = arith.constant 0.000000e+00 : f32
    %30 = vector.broadcast %cst_19 : f32 to vector<4x1xf32>
    %31 = vector.extract_strided_slice %27 {offsets = [0, 0], sizes = [4, 63], strides = [1, 1]} : vector<4x64xf32> to vector<4x63xf32>
    %32 = tpu.concatenate %30, %31 in 1 : vector<4x1xf32>, vector<4x63xf32> -> vector<4x64xf32>
    %cst_20 = arith.constant dense<0.000000e+00> : vector<4x64xf32>
    %33 = tpu.matmul %29, %32, %cst_20 {dimension_numbers = #tpu.dot_dimension_numbers<[1], [0], [0], [1], [0, 0, 1, 1], [], []>} : vector<4x4xf32>, vector<4x64xf32>, vector<4x64xf32> -> vector<4x64xf32>
    %c1_21 = arith.constant 1 : index
    %c0_22 = arith.constant 0 : index
    %c0_23 = arith.constant 0 : index
    %34 = vector.load %arg5[%c1_21, %c0_22, %c0_23] : memref<3x4x4xf32, #tpu.memory_space<vmem>>, vector<1x4x4xf32>
    %35 = vector.shape_cast %34 : vector<1x4x4xf32> to vector<4x4xf32>
    %cst_24 = arith.constant dense<0.000000e+00> : vector<4x64xf32>
    %36 = tpu.matmul %35, %27, %cst_24 {dimension_numbers = #tpu.dot_dimension_numbers<[1], [0], [0], [1], [0, 0, 1, 1], [], []>} : vector<4x4xf32>, vector<4x64xf32>, vector<4x64xf32> -> vector<4x64xf32>
    %37 = arith.addf %33, %36 : vector<4x64xf32>
    %c2_25 = arith.constant 2 : index
    %c0_26 = arith.constant 0 : index
    %c0_27 = arith.constant 0 : index
    %38 = vector.load %arg5[%c2_25, %c0_26, %c0_27] : memref<3x4x4xf32, #tpu.memory_space<vmem>>, vector<1x4x4xf32>
    %39 = vector.shape_cast %38 : vector<1x4x4xf32> to vector<4x4xf32>
    %40 = vector.extract_strided_slice %27 {offsets = [0, 1], sizes = [4, 63], strides = [1, 1]} : vector<4x64xf32> to vector<4x63xf32>
    %cst_28 = arith.constant 0.000000e+00 : f32
    %41 = vector.broadcast %cst_28 : f32 to vector<4x1xf32>
    %42 = tpu.concatenate %40, %41 in 1 : vector<4x63xf32>, vector<4x1xf32> -> vector<4x64xf32>
    %cst_29 = arith.constant dense<0.000000e+00> : vector<4x64xf32>
    %43 = tpu.matmul %39, %42, %cst_29 {dimension_numbers = #tpu.dot_dimension_numbers<[1], [0], [0], [1], [0, 0, 1, 1], [], []>} : vector<4x4xf32>, vector<4x64xf32>, vector<4x64xf32> -> vector<4x64xf32>
    %44 = arith.addf %37, %43 : vector<4x64xf32>
    %c0_30 = arith.constant 0 : index
    %c0_31 = arith.constant 0 : index
    %45 = vector.load %arg6[%c0_30, %c0_31] : memref<4x1xf32, #tpu.memory_space<vmem>>, vector<4x1xf32>
    %46 = vector.broadcast %45 : vector<4x1xf32> to vector<4x64xf32>
    %47 = arith.addf %44, %46 : vector<4x64xf32>
    %cst_32 = arith.constant 1.000000e-01 : f32
    %48 = vector.broadcast %cst_32 : f32 to vector<4x64xf32>
    %49 = arith.mulf %48, %47 : vector<4x64xf32>
    %50 = arith.addf %1, %49 : vector<4x64xf32>
    %51 = arith.negf %50 : vector<4x64xf32>
    %52 = math.exp %51 : vector<4x64xf32>
    %cst_33 = arith.constant 1.000000e+00 : f32
    %53 = vector.broadcast %cst_33 : f32 to vector<4x64xf32>
    %54 = arith.addf %53, %52 : vector<4x64xf32>
    %55 = arith.divf %53, %54 : vector<4x64xf32>
    %56 = arith.mulf %50, %55 : vector<4x64xf32>
    %c0_34 = arith.constant 0 : index
    %c0_35 = arith.constant 0 : index
    %c0_36 = arith.constant 0 : index
    %57 = vector.load %arg7[%c0_34, %c0_35, %c0_36] : memref<3x4x4xf32, #tpu.memory_space<vmem>>, vector<1x4x4xf32>
    %58 = vector.shape_cast %57 : vector<1x4x4xf32> to vector<4x4xf32>
    %cst_37 = arith.constant 0.000000e+00 : f32
    %59 = vector.broadcast %cst_37 : f32 to vector<4x1xf32>
    %60 = vector.extract_strided_slice %56 {offsets = [0, 0], sizes = [4, 63], strides = [1, 1]} : vector<4x64xf32> to vector<4x63xf32>
    %61 = tpu.concatenate %59, %60 in 1 : vector<4x1xf32>, vector<4x63xf32> -> vector<4x64xf32>
    %cst_38 = arith.constant dense<0.000000e+00> : vector<4x64xf32>
    %62 = tpu.matmul %58, %61, %cst_38 {dimension_numbers = #tpu.dot_dimension_numbers<[1], [0], [0], [1], [0, 0, 1, 1], [], []>} : vector<4x4xf32>, vector<4x64xf32>, vector<4x64xf32> -> vector<4x64xf32>
    %c1_39 = arith.constant 1 : index
    %c0_40 = arith.constant 0 : index
    %c0_41 = arith.constant 0 : index
    %63 = vector.load %arg7[%c1_39, %c0_40, %c0_41] : memref<3x4x4xf32, #tpu.memory_space<vmem>>, vector<1x4x4xf32>
    %64 = vector.shape_cast %63 : vector<1x4x4xf32> to vector<4x4xf32>
    %cst_42 = arith.constant dense<0.000000e+00> : vector<4x64xf32>
    %65 = tpu.matmul %64, %56, %cst_42 {dimension_numbers = #tpu.dot_dimension_numbers<[1], [0], [0], [1], [0, 0, 1, 1], [], []>} : vector<4x4xf32>, vector<4x64xf32>, vector<4x64xf32> -> vector<4x64xf32>
    %66 = arith.addf %62, %65 : vector<4x64xf32>
    %c2_43 = arith.constant 2 : index
    %c0_44 = arith.constant 0 : index
    %c0_45 = arith.constant 0 : index
    %67 = vector.load %arg7[%c2_43, %c0_44, %c0_45] : memref<3x4x4xf32, #tpu.memory_space<vmem>>, vector<1x4x4xf32>
    %68 = vector.shape_cast %67 : vector<1x4x4xf32> to vector<4x4xf32>
    %69 = vector.extract_strided_slice %56 {offsets = [0, 1], sizes = [4, 63], strides = [1, 1]} : vector<4x64xf32> to vector<4x63xf32>
    %cst_46 = arith.constant 0.000000e+00 : f32
    %70 = vector.broadcast %cst_46 : f32 to vector<4x1xf32>
    %71 = tpu.concatenate %69, %70 in 1 : vector<4x63xf32>, vector<4x1xf32> -> vector<4x64xf32>
    %cst_47 = arith.constant dense<0.000000e+00> : vector<4x64xf32>
    %72 = tpu.matmul %68, %71, %cst_47 {dimension_numbers = #tpu.dot_dimension_numbers<[1], [0], [0], [1], [0, 0, 1, 1], [], []>} : vector<4x4xf32>, vector<4x64xf32>, vector<4x64xf32> -> vector<4x64xf32>
    %73 = arith.addf %66, %72 : vector<4x64xf32>
    %c0_48 = arith.constant 0 : index
    %c0_49 = arith.constant 0 : index
    %74 = vector.load %arg8[%c0_48, %c0_49] : memref<4x1xf32, #tpu.memory_space<vmem>>, vector<4x1xf32>
    %75 = vector.broadcast %74 : vector<4x1xf32> to vector<4x64xf32>
    %76 = arith.addf %73, %75 : vector<4x64xf32>
    %c0_50 = arith.constant 0 : index
    %c0_51 = arith.constant 0 : index
    %c0_52 = arith.constant 0 : index
    %77 = vector.load %arg9[%c0_50, %c0_51, %c0_52] : memref<3x4x4xf32, #tpu.memory_space<vmem>>, vector<1x4x4xf32>
    %78 = vector.shape_cast %77 : vector<1x4x4xf32> to vector<4x4xf32>
    %cst_53 = arith.constant 0.000000e+00 : f32
    %79 = vector.broadcast %cst_53 : f32 to vector<4x1xf32>
    %80 = vector.extract_strided_slice %1 {offsets = [0, 0], sizes = [4, 63], strides = [1, 1]} : vector<4x64xf32> to vector<4x63xf32>
    %81 = tpu.concatenate %79, %80 in 1 : vector<4x1xf32>, vector<4x63xf32> -> vector<4x64xf32>
    %cst_54 = arith.constant dense<0.000000e+00> : vector<4x64xf32>
    %82 = tpu.matmul %78, %81, %cst_54 {dimension_numbers = #tpu.dot_dimension_numbers<[1], [0], [0], [1], [0, 0, 1, 1], [], []>} : vector<4x4xf32>, vector<4x64xf32>, vector<4x64xf32> -> vector<4x64xf32>
    %c1_55 = arith.constant 1 : index
    %c0_56 = arith.constant 0 : index
    %c0_57 = arith.constant 0 : index
    %83 = vector.load %arg9[%c1_55, %c0_56, %c0_57] : memref<3x4x4xf32, #tpu.memory_space<vmem>>, vector<1x4x4xf32>
    %84 = vector.shape_cast %83 : vector<1x4x4xf32> to vector<4x4xf32>
    %cst_58 = arith.constant dense<0.000000e+00> : vector<4x64xf32>
    %85 = tpu.matmul %84, %1, %cst_58 {dimension_numbers = #tpu.dot_dimension_numbers<[1], [0], [0], [1], [0, 0, 1, 1], [], []>} : vector<4x4xf32>, vector<4x64xf32>, vector<4x64xf32> -> vector<4x64xf32>
    %86 = arith.addf %82, %85 : vector<4x64xf32>
    %c2_59 = arith.constant 2 : index
    %c0_60 = arith.constant 0 : index
    %c0_61 = arith.constant 0 : index
    %87 = vector.load %arg9[%c2_59, %c0_60, %c0_61] : memref<3x4x4xf32, #tpu.memory_space<vmem>>, vector<1x4x4xf32>
    %88 = vector.shape_cast %87 : vector<1x4x4xf32> to vector<4x4xf32>
    %89 = vector.extract_strided_slice %1 {offsets = [0, 1], sizes = [4, 63], strides = [1, 1]} : vector<4x64xf32> to vector<4x63xf32>
    %cst_62 = arith.constant 0.000000e+00 : f32
    %90 = vector.broadcast %cst_62 : f32 to vector<4x1xf32>
    %91 = tpu.concatenate %89, %90 in 1 : vector<4x63xf32>, vector<4x1xf32> -> vector<4x64xf32>
    %cst_63 = arith.constant dense<0.000000e+00> : vector<4x64xf32>
    %92 = tpu.matmul %88, %91, %cst_63 {dimension_numbers = #tpu.dot_dimension_numbers<[1], [0], [0], [1], [0, 0, 1, 1], [], []>} : vector<4x4xf32>, vector<4x64xf32>, vector<4x64xf32> -> vector<4x64xf32>
    %93 = arith.addf %86, %92 : vector<4x64xf32>
    %c0_64 = arith.constant 0 : index
    %c0_65 = arith.constant 0 : index
    %94 = vector.load %arg10[%c0_64, %c0_65] : memref<4x1xf32, #tpu.memory_space<vmem>>, vector<4x1xf32>
    %95 = vector.broadcast %94 : vector<4x1xf32> to vector<4x64xf32>
    %96 = arith.addf %93, %95 : vector<4x64xf32>
    %97 = arith.negf %96 : vector<4x64xf32>
    %98 = math.exp %97 : vector<4x64xf32>
    %cst_66 = arith.constant 1.000000e+00 : f32
    %99 = vector.broadcast %cst_66 : f32 to vector<4x64xf32>
    %100 = arith.addf %99, %98 : vector<4x64xf32>
    %101 = arith.divf %99, %100 : vector<4x64xf32>
    %102 = arith.mulf %96, %101 : vector<4x64xf32>
    %c0_67 = arith.constant 0 : index
    %c0_68 = arith.constant 0 : index
    %c0_69 = arith.constant 0 : index
    %103 = vector.load %arg11[%c0_67, %c0_68, %c0_69] : memref<3x4x4xf32, #tpu.memory_space<vmem>>, vector<1x4x4xf32>
    %104 = vector.shape_cast %103 : vector<1x4x4xf32> to vector<4x4xf32>
    %cst_70 = arith.constant 0.000000e+00 : f32
    %105 = vector.broadcast %cst_70 : f32 to vector<4x1xf32>
    %106 = vector.extract_strided_slice %102 {offsets = [0, 0], sizes = [4, 63], strides = [1, 1]} : vector<4x64xf32> to vector<4x63xf32>
    %107 = tpu.concatenate %105, %106 in 1 : vector<4x1xf32>, vector<4x63xf32> -> vector<4x64xf32>
    %cst_71 = arith.constant dense<0.000000e+00> : vector<4x64xf32>
    %108 = tpu.matmul %104, %107, %cst_71 {dimension_numbers = #tpu.dot_dimension_numbers<[1], [0], [0], [1], [0, 0, 1, 1], [], []>} : vector<4x4xf32>, vector<4x64xf32>, vector<4x64xf32> -> vector<4x64xf32>
    %c1_72 = arith.constant 1 : index
    %c0_73 = arith.constant 0 : index
    %c0_74 = arith.constant 0 : index
    %109 = vector.load %arg11[%c1_72, %c0_73, %c0_74] : memref<3x4x4xf32, #tpu.memory_space<vmem>>, vector<1x4x4xf32>
    %110 = vector.shape_cast %109 : vector<1x4x4xf32> to vector<4x4xf32>
    %cst_75 = arith.constant dense<0.000000e+00> : vector<4x64xf32>
    %111 = tpu.matmul %110, %102, %cst_75 {dimension_numbers = #tpu.dot_dimension_numbers<[1], [0], [0], [1], [0, 0, 1, 1], [], []>} : vector<4x4xf32>, vector<4x64xf32>, vector<4x64xf32> -> vector<4x64xf32>
    %112 = arith.addf %108, %111 : vector<4x64xf32>
    %c2_76 = arith.constant 2 : index
    %c0_77 = arith.constant 0 : index
    %c0_78 = arith.constant 0 : index
    %113 = vector.load %arg11[%c2_76, %c0_77, %c0_78] : memref<3x4x4xf32, #tpu.memory_space<vmem>>, vector<1x4x4xf32>
    %114 = vector.shape_cast %113 : vector<1x4x4xf32> to vector<4x4xf32>
    %115 = vector.extract_strided_slice %102 {offsets = [0, 1], sizes = [4, 63], strides = [1, 1]} : vector<4x64xf32> to vector<4x63xf32>
    %cst_79 = arith.constant 0.000000e+00 : f32
    %116 = vector.broadcast %cst_79 : f32 to vector<4x1xf32>
    %117 = tpu.concatenate %115, %116 in 1 : vector<4x63xf32>, vector<4x1xf32> -> vector<4x64xf32>
    %cst_80 = arith.constant dense<0.000000e+00> : vector<4x64xf32>
    %118 = tpu.matmul %114, %117, %cst_80 {dimension_numbers = #tpu.dot_dimension_numbers<[1], [0], [0], [1], [0, 0, 1, 1], [], []>} : vector<4x4xf32>, vector<4x64xf32>, vector<4x64xf32> -> vector<4x64xf32>
    %119 = arith.addf %112, %118 : vector<4x64xf32>
    %c0_81 = arith.constant 0 : index
    %c0_82 = arith.constant 0 : index
    %120 = vector.load %arg12[%c0_81, %c0_82] : memref<4x1xf32, #tpu.memory_space<vmem>>, vector<4x1xf32>
    %121 = vector.broadcast %120 : vector<4x1xf32> to vector<4x64xf32>
    %122 = arith.addf %119, %121 : vector<4x64xf32>
    %cst_83 = arith.constant 1.000000e-01 : f32
    %123 = vector.broadcast %cst_83 : f32 to vector<4x64xf32>
    %124 = arith.mulf %123, %122 : vector<4x64xf32>
    %125 = arith.addf %1, %124 : vector<4x64xf32>
    %126 = arith.negf %125 : vector<4x64xf32>
    %127 = math.exp %126 : vector<4x64xf32>
    %cst_84 = arith.constant 1.000000e+00 : f32
    %128 = vector.broadcast %cst_84 : f32 to vector<4x64xf32>
    %129 = arith.addf %128, %127 : vector<4x64xf32>
    %130 = arith.divf %128, %129 : vector<4x64xf32>
    %131 = arith.mulf %125, %130 : vector<4x64xf32>
    %c0_85 = arith.constant 0 : index
    %c0_86 = arith.constant 0 : index
    %c0_87 = arith.constant 0 : index
    %132 = vector.load %arg13[%c0_85, %c0_86, %c0_87] : memref<3x4x4xf32, #tpu.memory_space<vmem>>, vector<1x4x4xf32>
    %133 = vector.shape_cast %132 : vector<1x4x4xf32> to vector<4x4xf32>
    %cst_88 = arith.constant 0.000000e+00 : f32
    %134 = vector.broadcast %cst_88 : f32 to vector<4x1xf32>
    %135 = vector.extract_strided_slice %131 {offsets = [0, 0], sizes = [4, 63], strides = [1, 1]} : vector<4x64xf32> to vector<4x63xf32>
    %136 = tpu.concatenate %134, %135 in 1 : vector<4x1xf32>, vector<4x63xf32> -> vector<4x64xf32>
    %cst_89 = arith.constant dense<0.000000e+00> : vector<4x64xf32>
    %137 = tpu.matmul %133, %136, %cst_89 {dimension_numbers = #tpu.dot_dimension_numbers<[1], [0], [0], [1], [0, 0, 1, 1], [], []>} : vector<4x4xf32>, vector<4x64xf32>, vector<4x64xf32> -> vector<4x64xf32>
    %c1_90 = arith.constant 1 : index
    %c0_91 = arith.constant 0 : index
    %c0_92 = arith.constant 0 : index
    %138 = vector.load %arg13[%c1_90, %c0_91, %c0_92] : memref<3x4x4xf32, #tpu.memory_space<vmem>>, vector<1x4x4xf32>
    %139 = vector.shape_cast %138 : vector<1x4x4xf32> to vector<4x4xf32>
    %cst_93 = arith.constant dense<0.000000e+00> : vector<4x64xf32>
    %140 = tpu.matmul %139, %131, %cst_93 {dimension_numbers = #tpu.dot_dimension_numbers<[1], [0], [0], [1], [0, 0, 1, 1], [], []>} : vector<4x4xf32>, vector<4x64xf32>, vector<4x64xf32> -> vector<4x64xf32>
    %141 = arith.addf %137, %140 : vector<4x64xf32>
    %c2_94 = arith.constant 2 : index
    %c0_95 = arith.constant 0 : index
    %c0_96 = arith.constant 0 : index
    %142 = vector.load %arg13[%c2_94, %c0_95, %c0_96] : memref<3x4x4xf32, #tpu.memory_space<vmem>>, vector<1x4x4xf32>
    %143 = vector.shape_cast %142 : vector<1x4x4xf32> to vector<4x4xf32>
    %144 = vector.extract_strided_slice %131 {offsets = [0, 1], sizes = [4, 63], strides = [1, 1]} : vector<4x64xf32> to vector<4x63xf32>
    %cst_97 = arith.constant 0.000000e+00 : f32
    %145 = vector.broadcast %cst_97 : f32 to vector<4x1xf32>
    %146 = tpu.concatenate %144, %145 in 1 : vector<4x63xf32>, vector<4x1xf32> -> vector<4x64xf32>
    %cst_98 = arith.constant dense<0.000000e+00> : vector<4x64xf32>
    %147 = tpu.matmul %143, %146, %cst_98 {dimension_numbers = #tpu.dot_dimension_numbers<[1], [0], [0], [1], [0, 0, 1, 1], [], []>} : vector<4x4xf32>, vector<4x64xf32>, vector<4x64xf32> -> vector<4x64xf32>
    %148 = arith.addf %141, %147 : vector<4x64xf32>
    %c0_99 = arith.constant 0 : index
    %c0_100 = arith.constant 0 : index
    %149 = vector.load %arg14[%c0_99, %c0_100] : memref<4x1xf32, #tpu.memory_space<vmem>>, vector<4x1xf32>
    %150 = vector.broadcast %149 : vector<4x1xf32> to vector<4x64xf32>
    %151 = arith.addf %148, %150 : vector<4x64xf32>
    %cst_101 = arith.constant 5.000000e-01 : f32
    %152 = vector.broadcast %cst_101 : f32 to vector<4x64xf32>
    %153 = arith.mulf %152, %151 : vector<4x64xf32>
    %154 = math.exp %153 : vector<4x64xf32>
    %c0_102 = arith.constant 0 : index
    %c0_103 = arith.constant 0 : index
    %c0_104 = arith.constant 0 : index
    %155 = vector.load %arg2[%c0_102, %c0_103, %c0_104] : memref<1x4x64xf32, #tpu.memory_space<vmem>>, vector<1x4x64xf32>
    %156 = vector.shape_cast %155 : vector<1x4x64xf32> to vector<4x64xf32>
    %157 = arith.mulf %154, %156 : vector<4x64xf32>
    %158 = arith.addf %76, %157 : vector<4x64xf32>
    %c0_105 = arith.constant 0 : index
    %c0_106 = arith.constant 0 : index
    %c0_107 = arith.constant 0 : index
    %159 = vector.load %arg15[%c0_105, %c0_106, %c0_107] : memref<1x4x64xf32, #tpu.memory_space<vmem>>, vector<1x4x64xf32>
    %160 = vector.shape_cast %159 : vector<1x4x64xf32> to vector<4x64xf32>
    %161 = vector.shape_cast %158 : vector<4x64xf32> to vector<1x4x64xf32>
    tpu.vector_store %arg15[%c0_105, %c0_106, %c0_107], %161 {strides = array<i32>} : memref<1x4x64xf32, #tpu.memory_space<vmem>>, vector<1x4x64xf32>,
    return
  }
  func.func @transform_0(%arg0: i32) -> (i32, i32, i32) {
    %c0_i32 = arith.constant 0 : i32
    %c0_i32_0 = arith.constant 0 : i32
    %c0_i32_1 = arith.constant 0 : i32
    return %arg0, %c0_i32, %c0_i32_0 : i32, i32, i32
  }
  func.func @transform_1(%arg0: i32) -> (i32, i32, i32) {
    %c0_i32 = arith.constant 0 : i32
    %c0_i32_0 = arith.constant 0 : i32
    %c0_i32_1 = arith.constant 0 : i32
    return %arg0, %c0_i32, %c0_i32_0 : i32, i32, i32
  }
  func.func @transform_2(%arg0: i32) -> (i32, i32, i32) {
    %c0_i32 = arith.constant 0 : i32
    %c0_i32_0 = arith.constant 0 : i32
    %c0_i32_1 = arith.constant 0 : i32
    %c0_i32_2 = arith.constant 0 : i32
    return %c0_i32, %c0_i32_0, %c0_i32_1 : i32, i32, i32
  }
  func.func @transform_3(%arg0: i32) -> (i32, i32) {
    %c0_i32 = arith.constant 0 : i32
    %c0_i32_0 = arith.constant 0 : i32
    %c0_i32_1 = arith.constant 0 : i32
    return %c0_i32, %c0_i32_0 : i32, i32
  }
  func.func @transform_4(%arg0: i32) -> (i32, i32, i32) {
    %c0_i32 = arith.constant 0 : i32
    %c0_i32_0 = arith.constant 0 : i32
    %c0_i32_1 = arith.constant 0 : i32
    %c0_i32_2 = arith.constant 0 : i32
    return %c0_i32, %c0_i32_0, %c0_i32_1 : i32, i32, i32
  }
  func.func @transform_5(%arg0: i32) -> (i32, i32) {
    %c0_i32 = arith.constant 0 : i32
    %c0_i32_0 = arith.constant 0 : i32
    %c0_i32_1 = arith.constant 0 : i32
    return %c0_i32, %c0_i32_0 : i32, i32
  }
  func.func @transform_6(%arg0: i32) -> (i32, i32, i32) {
    %c0_i32 = arith.constant 0 : i32
    %c0_i32_0 = arith.constant 0 : i32
    %c0_i32_1 = arith.constant 0 : i32
    %c0_i32_2 = arith.constant 0 : i32
    return %c0_i32, %c0_i32_0, %c0_i32_1 : i32, i32, i32
  }
  func.func @transform_7(%arg0: i32) -> (i32, i32) {
    %c0_i32 = arith.constant 0 : i32
    %c0_i32_0 = arith.constant 0 : i32
    %c0_i32_1 = arith.constant 0 : i32
    return %c0_i32, %c0_i32_0 : i32, i32
  }
  func.func @transform_8(%arg0: i32) -> (i32, i32, i32) {
    %c0_i32 = arith.constant 0 : i32
    %c0_i32_0 = arith.constant 0 : i32
    %c0_i32_1 = arith.constant 0 : i32
    %c0_i32_2 = arith.constant 0 : i32
    return %c0_i32, %c0_i32_0, %c0_i32_1 : i32, i32, i32
  }
  func.func @transform_9(%arg0: i32) -> (i32, i32) {
    %c0_i32 = arith.constant 0 : i32
    %c0_i32_0 = arith.constant 0 : i32
    %c0_i32_1 = arith.constant 0 : i32
    return %c0_i32, %c0_i32_0 : i32, i32
  }
  func.func @transform_10(%arg0: i32) -> (i32, i32, i32) {
    %c0_i32 = arith.constant 0 : i32
    %c0_i32_0 = arith.constant 0 : i32
    %c0_i32_1 = arith.constant 0 : i32
    %c0_i32_2 = arith.constant 0 : i32
    return %c0_i32, %c0_i32_0, %c0_i32_1 : i32, i32, i32
  }
  func.func @transform_11(%arg0: i32) -> (i32, i32) {
    %c0_i32 = arith.constant 0 : i32
    %c0_i32_0 = arith.constant 0 : i32
    %c0_i32_1 = arith.constant 0 : i32
    return %c0_i32, %c0_i32_0 : i32, i32
  }
  func.func @transform_12(%arg0: i32) -> (i32, i32, i32) {
    %c0_i32 = arith.constant 0 : i32
    %c0_i32_0 = arith.constant 0 : i32
    %c0_i32_1 = arith.constant 0 : i32
    %c0_i32_2 = arith.constant 0 : i32
    return %c0_i32, %c0_i32_0, %c0_i32_1 : i32, i32, i32
  }
  func.func @transform_13(%arg0: i32) -> (i32, i32) {
    %c0_i32 = arith.constant 0 : i32
    %c0_i32_0 = arith.constant 0 : i32
    %c0_i32_1 = arith.constant 0 : i32
    return %c0_i32, %c0_i32_0 : i32, i32
  }
  func.func @transform_14(%arg0: i32) -> (i32, i32, i32) {
    %c0_i32 = arith.constant 0 : i32
    %c0_i32_0 = arith.constant 0 : i32
    %c0_i32_1 = arith.constant 0 : i32
    return %arg0, %c0_i32, %c0_i32_0 : i32, i32, i32
  }
}

module attributes {stable_mosaic.version = 11 : i64} {
  func.func @_level_kernel(%arg0: i32, %arg1: memref<1x4x64xf32, #tpu.memory_space<vmem>>, %arg2: memref<1x4x64xf32, #tpu.memory_space<vmem>>, %arg3: memref<3x8x4xf32, #tpu.memory_space<vmem>>, %arg4: memref<3x8x4xf32, #tpu.memory_space<vmem>>, %arg5: memref<8x1xf32, #tpu.memory_space<vmem>>, %arg6: memref<3x4x8xf32, #tpu.memory_space<vmem>>, %arg7: memref<4x1xf32, #tpu.memory_space<vmem>>, %arg8: memref<3x4x4xf32, #tpu.memory_space<vmem>>, %arg9: memref<4x1xf32, #tpu.memory_space<vmem>>, %arg10: memref<3x4x4xf32, #tpu.memory_space<vmem>>, %arg11: memref<4x1xf32, #tpu.memory_space<vmem>>, %arg12: memref<1x4x64xf32, #tpu.memory_space<vmem>>, %arg13: memref<1x4x64xf32, #tpu.memory_space<vmem>>) attributes {dimension_semantics = [#tpu.dimension_semantics<parallel>], iteration_bounds = array<i64: 2>, scalar_prefetch = 0 : i64, scratch_operands = 0 : i64, tpu.core_type = #tpu.core_type<tc>, window_params = [{transform_indices = @transform_0, window_bounds = array<i64: 1, 4, 64>}, {transform_indices = @transform_1, window_bounds = array<i64: 1, 4, 64>}, {pipeline_mode = #tpu.pipeline_mode<synchronous>, transform_indices = @transform_2, window_bounds = array<i64: 3, 8, 4>}, {pipeline_mode = #tpu.pipeline_mode<synchronous>, transform_indices = @transform_3, window_bounds = array<i64: 3, 8, 4>}, {pipeline_mode = #tpu.pipeline_mode<synchronous>, transform_indices = @transform_4, window_bounds = array<i64: 8, 1>}, {pipeline_mode = #tpu.pipeline_mode<synchronous>, transform_indices = @transform_5, window_bounds = array<i64: 3, 4, 8>}, {pipeline_mode = #tpu.pipeline_mode<synchronous>, transform_indices = @transform_6, window_bounds = array<i64: 4, 1>}, {pipeline_mode = #tpu.pipeline_mode<synchronous>, transform_indices = @transform_7, window_bounds = array<i64: 3, 4, 4>}, {pipeline_mode = #tpu.pipeline_mode<synchronous>, transform_indices = @transform_8, window_bounds = array<i64: 4, 1>}, {pipeline_mode = #tpu.pipeline_mode<synchronous>, transform_indices = @transform_9, window_bounds = array<i64: 3, 4, 4>}, {pipeline_mode = #tpu.pipeline_mode<synchronous>, transform_indices = @transform_10, window_bounds = array<i64: 4, 1>}, {transform_indices = @transform_11, window_bounds = array<i64: 1, 4, 64>}, {transform_indices = @transform_12, window_bounds = array<i64: 1, 4, 64>}]} {
    %c0 = arith.constant 0 : index
    %c0_0 = arith.constant 0 : index
    %c0_1 = arith.constant 0 : index
    %0 = vector.load %arg1[%c0, %c0_0, %c0_1] : memref<1x4x64xf32, #tpu.memory_space<vmem>>, vector<1x4x64xf32>
    %1 = vector.shape_cast %0 : vector<1x4x64xf32> to vector<4x64xf32>
    %c0_2 = arith.constant 0 : index
    %c0_3 = arith.constant 0 : index
    %c0_4 = arith.constant 0 : index
    %2 = vector.load %arg2[%c0_2, %c0_3, %c0_4] : memref<1x4x64xf32, #tpu.memory_space<vmem>>, vector<1x4x64xf32>
    %3 = vector.shape_cast %2 : vector<1x4x64xf32> to vector<4x64xf32>
    %c0_5 = arith.constant 0 : index
    %c0_6 = arith.constant 0 : index
    %c0_7 = arith.constant 0 : index
    %4 = vector.load %arg3[%c0_5, %c0_6, %c0_7] : memref<3x8x4xf32, #tpu.memory_space<vmem>>, vector<1x8x4xf32>
    %5 = vector.shape_cast %4 : vector<1x8x4xf32> to vector<8x4xf32>
    %cst = arith.constant dense<0.000000e+00> : vector<8x64xf32>
    %6 = tpu.matmul %5, %1, %cst {dimension_numbers = #tpu.dot_dimension_numbers<[1], [0], [0], [1], [0, 0, 1, 1], [], []>} : vector<8x4xf32>, vector<4x64xf32>, vector<8x64xf32> -> vector<8x64xf32>
    %c0_8 = arith.constant 0 : index
    %c0_9 = arith.constant 0 : index
    %c0_10 = arith.constant 0 : index
    %7 = vector.load %arg4[%c0_8, %c0_9, %c0_10] : memref<3x8x4xf32, #tpu.memory_space<vmem>>, vector<1x8x4xf32>
    %8 = vector.shape_cast %7 : vector<1x8x4xf32> to vector<8x4xf32>
    %cst_11 = arith.constant dense<0.000000e+00> : vector<8x64xf32>
    %9 = tpu.matmul %8, %3, %cst_11 {dimension_numbers = #tpu.dot_dimension_numbers<[1], [0], [0], [1], [0, 0, 1, 1], [], []>} : vector<8x4xf32>, vector<4x64xf32>, vector<8x64xf32> -> vector<8x64xf32>
    %10 = arith.addf %6, %9 : vector<8x64xf32>
    %c1 = arith.constant 1 : index
    %c0_12 = arith.constant 0 : index
    %c0_13 = arith.constant 0 : index
    %11 = vector.load %arg3[%c1, %c0_12, %c0_13] : memref<3x8x4xf32, #tpu.memory_space<vmem>>, vector<1x8x4xf32>
    %12 = vector.shape_cast %11 : vector<1x8x4xf32> to vector<8x4xf32>
    %cst_14 = arith.constant dense<0.000000e+00> : vector<8x64xf32>
    %13 = tpu.matmul %12, %1, %cst_14 {dimension_numbers = #tpu.dot_dimension_numbers<[1], [0], [0], [1], [0, 0, 1, 1], [], []>} : vector<8x4xf32>, vector<4x64xf32>, vector<8x64xf32> -> vector<8x64xf32>
    %c1_15 = arith.constant 1 : index
    %c0_16 = arith.constant 0 : index
    %c0_17 = arith.constant 0 : index
    %14 = vector.load %arg4[%c1_15, %c0_16, %c0_17] : memref<3x8x4xf32, #tpu.memory_space<vmem>>, vector<1x8x4xf32>
    %15 = vector.shape_cast %14 : vector<1x8x4xf32> to vector<8x4xf32>
    %cst_18 = arith.constant dense<0.000000e+00> : vector<8x64xf32>
    %16 = tpu.matmul %15, %3, %cst_18 {dimension_numbers = #tpu.dot_dimension_numbers<[1], [0], [0], [1], [0, 0, 1, 1], [], []>} : vector<8x4xf32>, vector<4x64xf32>, vector<8x64xf32> -> vector<8x64xf32>
    %17 = arith.addf %13, %16 : vector<8x64xf32>
    %c2 = arith.constant 2 : index
    %c0_19 = arith.constant 0 : index
    %c0_20 = arith.constant 0 : index
    %18 = vector.load %arg3[%c2, %c0_19, %c0_20] : memref<3x8x4xf32, #tpu.memory_space<vmem>>, vector<1x8x4xf32>
    %19 = vector.shape_cast %18 : vector<1x8x4xf32> to vector<8x4xf32>
    %cst_21 = arith.constant dense<0.000000e+00> : vector<8x64xf32>
    %20 = tpu.matmul %19, %1, %cst_21 {dimension_numbers = #tpu.dot_dimension_numbers<[1], [0], [0], [1], [0, 0, 1, 1], [], []>} : vector<8x4xf32>, vector<4x64xf32>, vector<8x64xf32> -> vector<8x64xf32>
    %c2_22 = arith.constant 2 : index
    %c0_23 = arith.constant 0 : index
    %c0_24 = arith.constant 0 : index
    %21 = vector.load %arg4[%c2_22, %c0_23, %c0_24] : memref<3x8x4xf32, #tpu.memory_space<vmem>>, vector<1x8x4xf32>
    %22 = vector.shape_cast %21 : vector<1x8x4xf32> to vector<8x4xf32>
    %cst_25 = arith.constant dense<0.000000e+00> : vector<8x64xf32>
    %23 = tpu.matmul %22, %3, %cst_25 {dimension_numbers = #tpu.dot_dimension_numbers<[1], [0], [0], [1], [0, 0, 1, 1], [], []>} : vector<8x4xf32>, vector<4x64xf32>, vector<8x64xf32> -> vector<8x64xf32>
    %24 = arith.addf %20, %23 : vector<8x64xf32>
    %c0_26 = arith.constant 0 : index
    %c0_27 = arith.constant 0 : index
    %25 = vector.load %arg5[%c0_26, %c0_27] : memref<8x1xf32, #tpu.memory_space<vmem>>, vector<8x1xf32>
    %cst_28 = arith.constant 0.000000e+00 : f32
    %26 = vector.broadcast %cst_28 : f32 to vector<8x1xf32>
    %27 = vector.extract_strided_slice %10 {offsets = [0, 0], sizes = [8, 63], strides = [1, 1]} : vector<8x64xf32> to vector<8x63xf32>
    %28 = tpu.concatenate %26, %27 in 1 : vector<8x1xf32>, vector<8x63xf32> -> vector<8x64xf32>
    %29 = arith.addf %28, %17 : vector<8x64xf32>
    %30 = arith.addf %29, %24 : vector<8x64xf32>
    %31 = vector.broadcast %25 : vector<8x1xf32> to vector<8x64xf32>
    %32 = arith.addf %30, %31 : vector<8x64xf32>
    %33 = arith.negf %32 : vector<8x64xf32>
    %34 = math.exp %33 : vector<8x64xf32>
    %cst_29 = arith.constant 1.000000e+00 : f32
    %35 = vector.broadcast %cst_29 : f32 to vector<8x64xf32>
    %36 = arith.addf %35, %34 : vector<8x64xf32>
    %37 = arith.divf %35, %36 : vector<8x64xf32>
    %38 = arith.mulf %32, %37 : vector<8x64xf32>
    %39 = arith.addf %10, %17 : vector<8x64xf32>
    %40 = vector.extract_strided_slice %24 {offsets = [0, 1], sizes = [8, 63], strides = [1, 1]} : vector<8x64xf32> to vector<8x63xf32>
    %cst_30 = arith.constant 0.000000e+00 : f32
    %41 = vector.broadcast %cst_30 : f32 to vector<8x1xf32>
    %42 = tpu.concatenate %40, %41 in 1 : vector<8x63xf32>, vector<8x1xf32> -> vector<8x64xf32>
    %43 = arith.addf %39, %42 : vector<8x64xf32>
    %44 = vector.broadcast %25 : vector<8x1xf32> to vector<8x64xf32>
    %45 = arith.addf %43, %44 : vector<8x64xf32>
    %46 = arith.negf %45 : vector<8x64xf32>
    %47 = math.exp %46 : vector<8x64xf32>
    %cst_31 = arith.constant 1.000000e+00 : f32
    %48 = vector.broadcast %cst_31 : f32 to vector<8x64xf32>
    %49 = arith.addf %48, %47 : vector<8x64xf32>
    %50 = arith.divf %48, %49 : vector<8x64xf32>
    %51 = arith.mulf %45, %50 : vector<8x64xf32>
    %c0_32 = arith.constant 0 : index
    %c0_33 = arith.constant 0 : index
    %c0_34 = arith.constant 0 : index
    %52 = vector.load %arg6[%c0_32, %c0_33, %c0_34] : memref<3x4x8xf32, #tpu.memory_space<vmem>>, vector<1x4x8xf32>
    %53 = vector.shape_cast %52 : vector<1x4x8xf32> to vector<4x8xf32>
    %cst_35 = arith.constant dense<0.000000e+00> : vector<4x64xf32>
    %54 = tpu.matmul %53, %38, %cst_35 {dimension_numbers = #tpu.dot_dimension_numbers<[1], [0], [0], [1], [0, 0, 1, 1], [], []>} : vector<4x8xf32>, vector<8x64xf32>, vector<4x64xf32> -> vector<4x64xf32>
    %c0_36 = arith.constant 0 : index
    %c0_37 = arith.constant 0 : index
    %c0_38 = arith.constant 0 : index
    %55 = vector.load %arg6[%c0_36, %c0_37, %c0_38] : memref<3x4x8xf32, #tpu.memory_space<vmem>>, vector<1x4x8xf32>
    %56 = vector.shape_cast %55 : vector<1x4x8xf32> to vector<4x8xf32>
    %cst_39 = arith.constant dense<0.000000e+00> : vector<4x64xf32>
    %57 = tpu.matmul %56, %51, %cst_39 {dimension_numbers = #tpu.dot_dimension_numbers<[1], [0], [0], [1], [0, 0, 1, 1], [], []>} : vector<4x8xf32>, vector<8x64xf32>, vector<4x64xf32> -> vector<4x64xf32>
    %c1_40 = arith.constant 1 : index
    %c0_41 = arith.constant 0 : index
    %c0_42 = arith.constant 0 : index
    %58 = vector.load %arg6[%c1_40, %c0_41, %c0_42] : memref<3x4x8xf32, #tpu.memory_space<vmem>>, vector<1x4x8xf32>
    %59 = vector.shape_cast %58 : vector<1x4x8xf32> to vector<4x8xf32>
    %cst_43 = arith.constant dense<0.000000e+00> : vector<4x64xf32>
    %60 = tpu.matmul %59, %38, %cst_43 {dimension_numbers = #tpu.dot_dimension_numbers<[1], [0], [0], [1], [0, 0, 1, 1], [], []>} : vector<4x8xf32>, vector<8x64xf32>, vector<4x64xf32> -> vector<4x64xf32>
    %c1_44 = arith.constant 1 : index
    %c0_45 = arith.constant 0 : index
    %c0_46 = arith.constant 0 : index
    %61 = vector.load %arg6[%c1_44, %c0_45, %c0_46] : memref<3x4x8xf32, #tpu.memory_space<vmem>>, vector<1x4x8xf32>
    %62 = vector.shape_cast %61 : vector<1x4x8xf32> to vector<4x8xf32>
    %cst_47 = arith.constant dense<0.000000e+00> : vector<4x64xf32>
    %63 = tpu.matmul %62, %51, %cst_47 {dimension_numbers = #tpu.dot_dimension_numbers<[1], [0], [0], [1], [0, 0, 1, 1], [], []>} : vector<4x8xf32>, vector<8x64xf32>, vector<4x64xf32> -> vector<4x64xf32>
    %c2_48 = arith.constant 2 : index
    %c0_49 = arith.constant 0 : index
    %c0_50 = arith.constant 0 : index
    %64 = vector.load %arg6[%c2_48, %c0_49, %c0_50] : memref<3x4x8xf32, #tpu.memory_space<vmem>>, vector<1x4x8xf32>
    %65 = vector.shape_cast %64 : vector<1x4x8xf32> to vector<4x8xf32>
    %cst_51 = arith.constant dense<0.000000e+00> : vector<4x64xf32>
    %66 = tpu.matmul %65, %38, %cst_51 {dimension_numbers = #tpu.dot_dimension_numbers<[1], [0], [0], [1], [0, 0, 1, 1], [], []>} : vector<4x8xf32>, vector<8x64xf32>, vector<4x64xf32> -> vector<4x64xf32>
    %c2_52 = arith.constant 2 : index
    %c0_53 = arith.constant 0 : index
    %c0_54 = arith.constant 0 : index
    %67 = vector.load %arg6[%c2_52, %c0_53, %c0_54] : memref<3x4x8xf32, #tpu.memory_space<vmem>>, vector<1x4x8xf32>
    %68 = vector.shape_cast %67 : vector<1x4x8xf32> to vector<4x8xf32>
    %cst_55 = arith.constant dense<0.000000e+00> : vector<4x64xf32>
    %69 = tpu.matmul %68, %51, %cst_55 {dimension_numbers = #tpu.dot_dimension_numbers<[1], [0], [0], [1], [0, 0, 1, 1], [], []>} : vector<4x8xf32>, vector<8x64xf32>, vector<4x64xf32> -> vector<4x64xf32>
    %c0_56 = arith.constant 0 : index
    %c0_57 = arith.constant 0 : index
    %70 = vector.load %arg7[%c0_56, %c0_57] : memref<4x1xf32, #tpu.memory_space<vmem>>, vector<4x1xf32>
    %cst_58 = arith.constant 0.000000e+00 : f32
    %71 = vector.broadcast %cst_58 : f32 to vector<4x1xf32>
    %72 = vector.extract_strided_slice %57 {offsets = [0, 0], sizes = [4, 63], strides = [1, 1]} : vector<4x64xf32> to vector<4x63xf32>
    %73 = tpu.concatenate %71, %72 in 1 : vector<4x1xf32>, vector<4x63xf32> -> vector<4x64xf32>
    %74 = arith.addf %73, %60 : vector<4x64xf32>
    %75 = arith.addf %74, %69 : vector<4x64xf32>
    %76 = vector.broadcast %70 : vector<4x1xf32> to vector<4x64xf32>
    %77 = arith.addf %75, %76 : vector<4x64xf32>
    %78 = arith.addf %54, %63 : vector<4x64xf32>
    %79 = vector.extract_strided_slice %66 {offsets = [0, 1], sizes = [4, 63], strides = [1, 1]} : vector<4x64xf32> to vector<4x63xf32>
    %cst_59 = arith.constant 0.000000e+00 : f32
    %80 = vector.broadcast %cst_59 : f32 to vector<4x1xf32>
    %81 = tpu.concatenate %79, %80 in 1 : vector<4x63xf32>, vector<4x1xf32> -> vector<4x64xf32>
    %82 = arith.addf %78, %81 : vector<4x64xf32>
    %83 = vector.broadcast %70 : vector<4x1xf32> to vector<4x64xf32>
    %84 = arith.addf %82, %83 : vector<4x64xf32>
    %85 = arith.negf %77 : vector<4x64xf32>
    %86 = math.exp %85 : vector<4x64xf32>
    %cst_60 = arith.constant 1.000000e+00 : f32
    %87 = vector.broadcast %cst_60 : f32 to vector<4x64xf32>
    %88 = arith.addf %87, %86 : vector<4x64xf32>
    %89 = arith.divf %87, %88 : vector<4x64xf32>
    %90 = arith.mulf %77, %89 : vector<4x64xf32>
    %91 = arith.negf %84 : vector<4x64xf32>
    %92 = math.exp %91 : vector<4x64xf32>
    %cst_61 = arith.constant 1.000000e+00 : f32
    %93 = vector.broadcast %cst_61 : f32 to vector<4x64xf32>
    %94 = arith.addf %93, %92 : vector<4x64xf32>
    %95 = arith.divf %93, %94 : vector<4x64xf32>
    %96 = arith.mulf %84, %95 : vector<4x64xf32>
    %c0_62 = arith.constant 0 : index
    %c0_63 = arith.constant 0 : index
    %c0_64 = arith.constant 0 : index
    %97 = vector.load %arg8[%c0_62, %c0_63, %c0_64] : memref<3x4x4xf32, #tpu.memory_space<vmem>>, vector<1x4x4xf32>
    %98 = vector.shape_cast %97 : vector<1x4x4xf32> to vector<4x4xf32>
    %cst_65 = arith.constant dense<0.000000e+00> : vector<4x64xf32>
    %99 = tpu.matmul %98, %90, %cst_65 {dimension_numbers = #tpu.dot_dimension_numbers<[1], [0], [0], [1], [0, 0, 1, 1], [], []>} : vector<4x4xf32>, vector<4x64xf32>, vector<4x64xf32> -> vector<4x64xf32>
    %c0_66 = arith.constant 0 : index
    %c0_67 = arith.constant 0 : index
    %c0_68 = arith.constant 0 : index
    %100 = vector.load %arg8[%c0_66, %c0_67, %c0_68] : memref<3x4x4xf32, #tpu.memory_space<vmem>>, vector<1x4x4xf32>
    %101 = vector.shape_cast %100 : vector<1x4x4xf32> to vector<4x4xf32>
    %cst_69 = arith.constant dense<0.000000e+00> : vector<4x64xf32>
    %102 = tpu.matmul %101, %96, %cst_69 {dimension_numbers = #tpu.dot_dimension_numbers<[1], [0], [0], [1], [0, 0, 1, 1], [], []>} : vector<4x4xf32>, vector<4x64xf32>, vector<4x64xf32> -> vector<4x64xf32>
    %c1_70 = arith.constant 1 : index
    %c0_71 = arith.constant 0 : index
    %c0_72 = arith.constant 0 : index
    %103 = vector.load %arg8[%c1_70, %c0_71, %c0_72] : memref<3x4x4xf32, #tpu.memory_space<vmem>>, vector<1x4x4xf32>
    %104 = vector.shape_cast %103 : vector<1x4x4xf32> to vector<4x4xf32>
    %cst_73 = arith.constant dense<0.000000e+00> : vector<4x64xf32>
    %105 = tpu.matmul %104, %90, %cst_73 {dimension_numbers = #tpu.dot_dimension_numbers<[1], [0], [0], [1], [0, 0, 1, 1], [], []>} : vector<4x4xf32>, vector<4x64xf32>, vector<4x64xf32> -> vector<4x64xf32>
    %c1_74 = arith.constant 1 : index
    %c0_75 = arith.constant 0 : index
    %c0_76 = arith.constant 0 : index
    %106 = vector.load %arg8[%c1_74, %c0_75, %c0_76] : memref<3x4x4xf32, #tpu.memory_space<vmem>>, vector<1x4x4xf32>
    %107 = vector.shape_cast %106 : vector<1x4x4xf32> to vector<4x4xf32>
    %cst_77 = arith.constant dense<0.000000e+00> : vector<4x64xf32>
    %108 = tpu.matmul %107, %96, %cst_77 {dimension_numbers = #tpu.dot_dimension_numbers<[1], [0], [0], [1], [0, 0, 1, 1], [], []>} : vector<4x4xf32>, vector<4x64xf32>, vector<4x64xf32> -> vector<4x64xf32>
    %c2_78 = arith.constant 2 : index
    %c0_79 = arith.constant 0 : index
    %c0_80 = arith.constant 0 : index
    %109 = vector.load %arg8[%c2_78, %c0_79, %c0_80] : memref<3x4x4xf32, #tpu.memory_space<vmem>>, vector<1x4x4xf32>
    %110 = vector.shape_cast %109 : vector<1x4x4xf32> to vector<4x4xf32>
    %cst_81 = arith.constant dense<0.000000e+00> : vector<4x64xf32>
    %111 = tpu.matmul %110, %90, %cst_81 {dimension_numbers = #tpu.dot_dimension_numbers<[1], [0], [0], [1], [0, 0, 1, 1], [], []>} : vector<4x4xf32>, vector<4x64xf32>, vector<4x64xf32> -> vector<4x64xf32>
    %c2_82 = arith.constant 2 : index
    %c0_83 = arith.constant 0 : index
    %c0_84 = arith.constant 0 : index
    %112 = vector.load %arg8[%c2_82, %c0_83, %c0_84] : memref<3x4x4xf32, #tpu.memory_space<vmem>>, vector<1x4x4xf32>
    %113 = vector.shape_cast %112 : vector<1x4x4xf32> to vector<4x4xf32>
    %cst_85 = arith.constant dense<0.000000e+00> : vector<4x64xf32>
    %114 = tpu.matmul %113, %96, %cst_85 {dimension_numbers = #tpu.dot_dimension_numbers<[1], [0], [0], [1], [0, 0, 1, 1], [], []>} : vector<4x4xf32>, vector<4x64xf32>, vector<4x64xf32> -> vector<4x64xf32>
    %c0_86 = arith.constant 0 : index
    %c0_87 = arith.constant 0 : index
    %115 = vector.load %arg9[%c0_86, %c0_87] : memref<4x1xf32, #tpu.memory_space<vmem>>, vector<4x1xf32>
    %cst_88 = arith.constant 0.000000e+00 : f32
    %116 = vector.broadcast %cst_88 : f32 to vector<4x1xf32>
    %117 = vector.extract_strided_slice %102 {offsets = [0, 0], sizes = [4, 63], strides = [1, 1]} : vector<4x64xf32> to vector<4x63xf32>
    %118 = tpu.concatenate %116, %117 in 1 : vector<4x1xf32>, vector<4x63xf32> -> vector<4x64xf32>
    %119 = arith.addf %118, %105 : vector<4x64xf32>
    %120 = arith.addf %119, %114 : vector<4x64xf32>
    %121 = vector.broadcast %115 : vector<4x1xf32> to vector<4x64xf32>
    %122 = arith.addf %120, %121 : vector<4x64xf32>
    %123 = arith.addf %99, %108 : vector<4x64xf32>
    %124 = vector.extract_strided_slice %111 {offsets = [0, 1], sizes = [4, 63], strides = [1, 1]} : vector<4x64xf32> to vector<4x63xf32>
    %cst_89 = arith.constant 0.000000e+00 : f32
    %125 = vector.broadcast %cst_89 : f32 to vector<4x1xf32>
    %126 = tpu.concatenate %124, %125 in 1 : vector<4x63xf32>, vector<4x1xf32> -> vector<4x64xf32>
    %127 = arith.addf %123, %126 : vector<4x64xf32>
    %128 = vector.broadcast %115 : vector<4x1xf32> to vector<4x64xf32>
    %129 = arith.addf %127, %128 : vector<4x64xf32>
    %130 = arith.negf %122 : vector<4x64xf32>
    %131 = math.exp %130 : vector<4x64xf32>
    %cst_90 = arith.constant 1.000000e+00 : f32
    %132 = vector.broadcast %cst_90 : f32 to vector<4x64xf32>
    %133 = arith.addf %132, %131 : vector<4x64xf32>
    %134 = arith.divf %132, %133 : vector<4x64xf32>
    %135 = arith.mulf %122, %134 : vector<4x64xf32>
    %136 = arith.negf %129 : vector<4x64xf32>
    %137 = math.exp %136 : vector<4x64xf32>
    %cst_91 = arith.constant 1.000000e+00 : f32
    %138 = vector.broadcast %cst_91 : f32 to vector<4x64xf32>
    %139 = arith.addf %138, %137 : vector<4x64xf32>
    %140 = arith.divf %138, %139 : vector<4x64xf32>
    %141 = arith.mulf %129, %140 : vector<4x64xf32>
    %c0_92 = arith.constant 0 : index
    %c0_93 = arith.constant 0 : index
    %c0_94 = arith.constant 0 : index
    %142 = vector.load %arg10[%c0_92, %c0_93, %c0_94] : memref<3x4x4xf32, #tpu.memory_space<vmem>>, vector<1x4x4xf32>
    %143 = vector.shape_cast %142 : vector<1x4x4xf32> to vector<4x4xf32>
    %cst_95 = arith.constant dense<0.000000e+00> : vector<4x64xf32>
    %144 = tpu.matmul %143, %135, %cst_95 {dimension_numbers = #tpu.dot_dimension_numbers<[1], [0], [0], [1], [0, 0, 1, 1], [], []>} : vector<4x4xf32>, vector<4x64xf32>, vector<4x64xf32> -> vector<4x64xf32>
    %c0_96 = arith.constant 0 : index
    %c0_97 = arith.constant 0 : index
    %c0_98 = arith.constant 0 : index
    %145 = vector.load %arg10[%c0_96, %c0_97, %c0_98] : memref<3x4x4xf32, #tpu.memory_space<vmem>>, vector<1x4x4xf32>
    %146 = vector.shape_cast %145 : vector<1x4x4xf32> to vector<4x4xf32>
    %cst_99 = arith.constant dense<0.000000e+00> : vector<4x64xf32>
    %147 = tpu.matmul %146, %141, %cst_99 {dimension_numbers = #tpu.dot_dimension_numbers<[1], [0], [0], [1], [0, 0, 1, 1], [], []>} : vector<4x4xf32>, vector<4x64xf32>, vector<4x64xf32> -> vector<4x64xf32>
    %c1_100 = arith.constant 1 : index
    %c0_101 = arith.constant 0 : index
    %c0_102 = arith.constant 0 : index
    %148 = vector.load %arg10[%c1_100, %c0_101, %c0_102] : memref<3x4x4xf32, #tpu.memory_space<vmem>>, vector<1x4x4xf32>
    %149 = vector.shape_cast %148 : vector<1x4x4xf32> to vector<4x4xf32>
    %cst_103 = arith.constant dense<0.000000e+00> : vector<4x64xf32>
    %150 = tpu.matmul %149, %135, %cst_103 {dimension_numbers = #tpu.dot_dimension_numbers<[1], [0], [0], [1], [0, 0, 1, 1], [], []>} : vector<4x4xf32>, vector<4x64xf32>, vector<4x64xf32> -> vector<4x64xf32>
    %c1_104 = arith.constant 1 : index
    %c0_105 = arith.constant 0 : index
    %c0_106 = arith.constant 0 : index
    %151 = vector.load %arg10[%c1_104, %c0_105, %c0_106] : memref<3x4x4xf32, #tpu.memory_space<vmem>>, vector<1x4x4xf32>
    %152 = vector.shape_cast %151 : vector<1x4x4xf32> to vector<4x4xf32>
    %cst_107 = arith.constant dense<0.000000e+00> : vector<4x64xf32>
    %153 = tpu.matmul %152, %141, %cst_107 {dimension_numbers = #tpu.dot_dimension_numbers<[1], [0], [0], [1], [0, 0, 1, 1], [], []>} : vector<4x4xf32>, vector<4x64xf32>, vector<4x64xf32> -> vector<4x64xf32>
    %c2_108 = arith.constant 2 : index
    %c0_109 = arith.constant 0 : index
    %c0_110 = arith.constant 0 : index
    %154 = vector.load %arg10[%c2_108, %c0_109, %c0_110] : memref<3x4x4xf32, #tpu.memory_space<vmem>>, vector<1x4x4xf32>
    %155 = vector.shape_cast %154 : vector<1x4x4xf32> to vector<4x4xf32>
    %cst_111 = arith.constant dense<0.000000e+00> : vector<4x64xf32>
    %156 = tpu.matmul %155, %135, %cst_111 {dimension_numbers = #tpu.dot_dimension_numbers<[1], [0], [0], [1], [0, 0, 1, 1], [], []>} : vector<4x4xf32>, vector<4x64xf32>, vector<4x64xf32> -> vector<4x64xf32>
    %c2_112 = arith.constant 2 : index
    %c0_113 = arith.constant 0 : index
    %c0_114 = arith.constant 0 : index
    %157 = vector.load %arg10[%c2_112, %c0_113, %c0_114] : memref<3x4x4xf32, #tpu.memory_space<vmem>>, vector<1x4x4xf32>
    %158 = vector.shape_cast %157 : vector<1x4x4xf32> to vector<4x4xf32>
    %cst_115 = arith.constant dense<0.000000e+00> : vector<4x64xf32>
    %159 = tpu.matmul %158, %141, %cst_115 {dimension_numbers = #tpu.dot_dimension_numbers<[1], [0], [0], [1], [0, 0, 1, 1], [], []>} : vector<4x4xf32>, vector<4x64xf32>, vector<4x64xf32> -> vector<4x64xf32>
    %c0_116 = arith.constant 0 : index
    %c0_117 = arith.constant 0 : index
    %160 = vector.load %arg11[%c0_116, %c0_117] : memref<4x1xf32, #tpu.memory_space<vmem>>, vector<4x1xf32>
    %cst_118 = arith.constant 0.000000e+00 : f32
    %161 = vector.broadcast %cst_118 : f32 to vector<4x1xf32>
    %162 = vector.extract_strided_slice %147 {offsets = [0, 0], sizes = [4, 63], strides = [1, 1]} : vector<4x64xf32> to vector<4x63xf32>
    %163 = tpu.concatenate %161, %162 in 1 : vector<4x1xf32>, vector<4x63xf32> -> vector<4x64xf32>
    %164 = arith.addf %163, %150 : vector<4x64xf32>
    %165 = arith.addf %164, %159 : vector<4x64xf32>
    %166 = vector.broadcast %160 : vector<4x1xf32> to vector<4x64xf32>
    %167 = arith.addf %165, %166 : vector<4x64xf32>
    %168 = arith.addf %144, %153 : vector<4x64xf32>
    %169 = vector.extract_strided_slice %156 {offsets = [0, 1], sizes = [4, 63], strides = [1, 1]} : vector<4x64xf32> to vector<4x63xf32>
    %cst_119 = arith.constant 0.000000e+00 : f32
    %170 = vector.broadcast %cst_119 : f32 to vector<4x1xf32>
    %171 = tpu.concatenate %169, %170 in 1 : vector<4x63xf32>, vector<4x1xf32> -> vector<4x64xf32>
    %172 = arith.addf %168, %171 : vector<4x64xf32>
    %173 = vector.broadcast %160 : vector<4x1xf32> to vector<4x64xf32>
    %174 = arith.addf %172, %173 : vector<4x64xf32>
    %cst_120 = arith.constant 1.000000e-01 : f32
    %175 = vector.broadcast %cst_120 : f32 to vector<4x64xf32>
    %176 = arith.mulf %175, %167 : vector<4x64xf32>
    %177 = arith.addf %90, %176 : vector<4x64xf32>
    %c0_121 = arith.constant 0 : index
    %c0_122 = arith.constant 0 : index
    %c0_123 = arith.constant 0 : index
    %178 = vector.load %arg12[%c0_121, %c0_122, %c0_123] : memref<1x4x64xf32, #tpu.memory_space<vmem>>, vector<1x4x64xf32>
    %179 = vector.shape_cast %178 : vector<1x4x64xf32> to vector<4x64xf32>
    %180 = vector.shape_cast %177 : vector<4x64xf32> to vector<1x4x64xf32>
    tpu.vector_store %arg12[%c0_121, %c0_122, %c0_123], %180 {strides = array<i32>} : memref<1x4x64xf32, #tpu.memory_space<vmem>>, vector<1x4x64xf32>,
    %cst_124 = arith.constant 1.000000e-01 : f32
    %181 = vector.broadcast %cst_124 : f32 to vector<4x64xf32>
    %182 = arith.mulf %181, %174 : vector<4x64xf32>
    %183 = arith.addf %96, %182 : vector<4x64xf32>
    %c0_125 = arith.constant 0 : index
    %c0_126 = arith.constant 0 : index
    %c0_127 = arith.constant 0 : index
    %184 = vector.load %arg13[%c0_125, %c0_126, %c0_127] : memref<1x4x64xf32, #tpu.memory_space<vmem>>, vector<1x4x64xf32>
    %185 = vector.shape_cast %184 : vector<1x4x64xf32> to vector<4x64xf32>
    %186 = vector.shape_cast %183 : vector<4x64xf32> to vector<1x4x64xf32>
    tpu.vector_store %arg13[%c0_125, %c0_126, %c0_127], %186 {strides = array<i32>} : memref<1x4x64xf32, #tpu.memory_space<vmem>>, vector<1x4x64xf32>,
    return
  }
  func.func @transform_0(%arg0: i32) -> (i32, i32, i32) {
    %c0_i32 = arith.constant 0 : i32
    %c0_i32_0 = arith.constant 0 : i32
    %c0_i32_1 = arith.constant 0 : i32
    return %arg0, %c0_i32, %c0_i32_0 : i32, i32, i32
  }
  func.func @transform_1(%arg0: i32) -> (i32, i32, i32) {
    %c0_i32 = arith.constant 0 : i32
    %c0_i32_0 = arith.constant 0 : i32
    %c0_i32_1 = arith.constant 0 : i32
    return %arg0, %c0_i32, %c0_i32_0 : i32, i32, i32
  }
  func.func @transform_2(%arg0: i32) -> (i32, i32, i32) {
    %c0_i32 = arith.constant 0 : i32
    %c0_i32_0 = arith.constant 0 : i32
    %c0_i32_1 = arith.constant 0 : i32
    %c0_i32_2 = arith.constant 0 : i32
    return %c0_i32, %c0_i32_0, %c0_i32_1 : i32, i32, i32
  }
  func.func @transform_3(%arg0: i32) -> (i32, i32, i32) {
    %c0_i32 = arith.constant 0 : i32
    %c0_i32_0 = arith.constant 0 : i32
    %c0_i32_1 = arith.constant 0 : i32
    %c0_i32_2 = arith.constant 0 : i32
    return %c0_i32, %c0_i32_0, %c0_i32_1 : i32, i32, i32
  }
  func.func @transform_4(%arg0: i32) -> (i32, i32) {
    %c0_i32 = arith.constant 0 : i32
    %c0_i32_0 = arith.constant 0 : i32
    %c0_i32_1 = arith.constant 0 : i32
    return %c0_i32, %c0_i32_0 : i32, i32
  }
  func.func @transform_5(%arg0: i32) -> (i32, i32, i32) {
    %c0_i32 = arith.constant 0 : i32
    %c0_i32_0 = arith.constant 0 : i32
    %c0_i32_1 = arith.constant 0 : i32
    %c0_i32_2 = arith.constant 0 : i32
    return %c0_i32, %c0_i32_0, %c0_i32_1 : i32, i32, i32
  }
  func.func @transform_6(%arg0: i32) -> (i32, i32) {
    %c0_i32 = arith.constant 0 : i32
    %c0_i32_0 = arith.constant 0 : i32
    %c0_i32_1 = arith.constant 0 : i32
    return %c0_i32, %c0_i32_0 : i32, i32
  }
  func.func @transform_7(%arg0: i32) -> (i32, i32, i32) {
    %c0_i32 = arith.constant 0 : i32
    %c0_i32_0 = arith.constant 0 : i32
    %c0_i32_1 = arith.constant 0 : i32
    %c0_i32_2 = arith.constant 0 : i32
    return %c0_i32, %c0_i32_0, %c0_i32_1 : i32, i32, i32
  }
  func.func @transform_8(%arg0: i32) -> (i32, i32) {
    %c0_i32 = arith.constant 0 : i32
    %c0_i32_0 = arith.constant 0 : i32
    %c0_i32_1 = arith.constant 0 : i32
    return %c0_i32, %c0_i32_0 : i32, i32
  }
  func.func @transform_9(%arg0: i32) -> (i32, i32, i32) {
    %c0_i32 = arith.constant 0 : i32
    %c0_i32_0 = arith.constant 0 : i32
    %c0_i32_1 = arith.constant 0 : i32
    %c0_i32_2 = arith.constant 0 : i32
    return %c0_i32, %c0_i32_0, %c0_i32_1 : i32, i32, i32
  }
  func.func @transform_10(%arg0: i32) -> (i32, i32) {
    %c0_i32 = arith.constant 0 : i32
    %c0_i32_0 = arith.constant 0 : i32
    %c0_i32_1 = arith.constant 0 : i32
    return %c0_i32, %c0_i32_0 : i32, i32
  }
  func.func @transform_11(%arg0: i32) -> (i32, i32, i32) {
    %c0_i32 = arith.constant 0 : i32
    %c0_i32_0 = arith.constant 0 : i32
    %c0_i32_1 = arith.constant 0 : i32
    return %arg0, %c0_i32, %c0_i32_0 : i32, i32, i32
  }
  func.func @transform_12(%arg0: i32) -> (i32, i32, i32) {
    %c0_i32 = arith.constant 0 : i32
    %c0_i32_0 = arith.constant 0 : i32
    %c0_i32_1 = arith.constant 0 : i32
    return %arg0, %c0_i32, %c0_i32_0 : i32, i32, i32
  }
}

module attributes {stable_mosaic.version = 11 : i64} {
  func.func @_recon_kernel(%arg0: i32, %arg1: memref<1x4x128xf32, #tpu.memory_space<vmem>>, %arg2: memref<3x4x4xf32, #tpu.memory_space<vmem>>, %arg3: memref<4x1xf32, #tpu.memory_space<vmem>>, %arg4: memref<3x4x4xf32, #tpu.memory_space<vmem>>, %arg5: memref<4x1xf32, #tpu.memory_space<vmem>>, %arg6: memref<3x4x4xf32, #tpu.memory_space<vmem>>, %arg7: memref<4x1xf32, #tpu.memory_space<vmem>>, %arg8: memref<3x4x4xf32, #tpu.memory_space<vmem>>, %arg9: memref<4x1xf32, #tpu.memory_space<vmem>>, %arg10: memref<1x4x128xf32, #tpu.memory_space<vmem>>, %arg11: memref<1x4x128xf32, #tpu.memory_space<vmem>>) attributes {dimension_semantics = [#tpu.dimension_semantics<parallel>], iteration_bounds = array<i64: 2>, scalar_prefetch = 0 : i64, scratch_operands = 0 : i64, tpu.core_type = #tpu.core_type<tc>, window_params = [{transform_indices = @transform_0, window_bounds = array<i64: 1, 4, 128>}, {pipeline_mode = #tpu.pipeline_mode<synchronous>, transform_indices = @transform_1, window_bounds = array<i64: 3, 4, 4>}, {pipeline_mode = #tpu.pipeline_mode<synchronous>, transform_indices = @transform_2, window_bounds = array<i64: 4, 1>}, {pipeline_mode = #tpu.pipeline_mode<synchronous>, transform_indices = @transform_3, window_bounds = array<i64: 3, 4, 4>}, {pipeline_mode = #tpu.pipeline_mode<synchronous>, transform_indices = @transform_4, window_bounds = array<i64: 4, 1>}, {pipeline_mode = #tpu.pipeline_mode<synchronous>, transform_indices = @transform_5, window_bounds = array<i64: 3, 4, 4>}, {pipeline_mode = #tpu.pipeline_mode<synchronous>, transform_indices = @transform_6, window_bounds = array<i64: 4, 1>}, {pipeline_mode = #tpu.pipeline_mode<synchronous>, transform_indices = @transform_7, window_bounds = array<i64: 3, 4, 4>}, {pipeline_mode = #tpu.pipeline_mode<synchronous>, transform_indices = @transform_8, window_bounds = array<i64: 4, 1>}, {transform_indices = @transform_9, window_bounds = array<i64: 1, 4, 128>}, {transform_indices = @transform_10, window_bounds = array<i64: 1, 4, 128>}]} {
    %c0 = arith.constant 0 : index
    %c0_0 = arith.constant 0 : index
    %c0_1 = arith.constant 0 : index
    %0 = vector.load %arg1[%c0, %c0_0, %c0_1] : memref<1x4x128xf32, #tpu.memory_space<vmem>>, vector<1x4x128xf32>
    %1 = vector.shape_cast %0 : vector<1x4x128xf32> to vector<4x128xf32>
    %c0_2 = arith.constant 0 : index
    %c0_3 = arith.constant 0 : index
    %c0_4 = arith.constant 0 : index
    %2 = vector.load %arg2[%c0_2, %c0_3, %c0_4] : memref<3x4x4xf32, #tpu.memory_space<vmem>>, vector<1x4x4xf32>
    %3 = vector.shape_cast %2 : vector<1x4x4xf32> to vector<4x4xf32>
    %cst = arith.constant 0.000000e+00 : f32
    %4 = vector.broadcast %cst : f32 to vector<4x1xf32>
    %5 = vector.extract_strided_slice %1 {offsets = [0, 0], sizes = [4, 127], strides = [1, 1]} : vector<4x128xf32> to vector<4x127xf32>
    %6 = tpu.concatenate %4, %5 in 1 : vector<4x1xf32>, vector<4x127xf32> -> vector<4x128xf32>
    %cst_5 = arith.constant dense<0.000000e+00> : vector<4x128xf32>
    %7 = tpu.matmul %3, %6, %cst_5 {dimension_numbers = #tpu.dot_dimension_numbers<[1], [0], [0], [1], [0, 0, 1, 1], [], []>} : vector<4x4xf32>, vector<4x128xf32>, vector<4x128xf32> -> vector<4x128xf32>
    %c1 = arith.constant 1 : index
    %c0_6 = arith.constant 0 : index
    %c0_7 = arith.constant 0 : index
    %8 = vector.load %arg2[%c1, %c0_6, %c0_7] : memref<3x4x4xf32, #tpu.memory_space<vmem>>, vector<1x4x4xf32>
    %9 = vector.shape_cast %8 : vector<1x4x4xf32> to vector<4x4xf32>
    %cst_8 = arith.constant dense<0.000000e+00> : vector<4x128xf32>
    %10 = tpu.matmul %9, %1, %cst_8 {dimension_numbers = #tpu.dot_dimension_numbers<[1], [0], [0], [1], [0, 0, 1, 1], [], []>} : vector<4x4xf32>, vector<4x128xf32>, vector<4x128xf32> -> vector<4x128xf32>
    %11 = arith.addf %7, %10 : vector<4x128xf32>
    %c2 = arith.constant 2 : index
    %c0_9 = arith.constant 0 : index
    %c0_10 = arith.constant 0 : index
    %12 = vector.load %arg2[%c2, %c0_9, %c0_10] : memref<3x4x4xf32, #tpu.memory_space<vmem>>, vector<1x4x4xf32>
    %13 = vector.shape_cast %12 : vector<1x4x4xf32> to vector<4x4xf32>
    %14 = vector.extract_strided_slice %1 {offsets = [0, 1], sizes = [4, 127], strides = [1, 1]} : vector<4x128xf32> to vector<4x127xf32>
    %cst_11 = arith.constant 0.000000e+00 : f32
    %15 = vector.broadcast %cst_11 : f32 to vector<4x1xf32>
    %16 = tpu.concatenate %14, %15 in 1 : vector<4x127xf32>, vector<4x1xf32> -> vector<4x128xf32>
    %cst_12 = arith.constant dense<0.000000e+00> : vector<4x128xf32>
    %17 = tpu.matmul %13, %16, %cst_12 {dimension_numbers = #tpu.dot_dimension_numbers<[1], [0], [0], [1], [0, 0, 1, 1], [], []>} : vector<4x4xf32>, vector<4x128xf32>, vector<4x128xf32> -> vector<4x128xf32>
    %18 = arith.addf %11, %17 : vector<4x128xf32>
    %c0_13 = arith.constant 0 : index
    %c0_14 = arith.constant 0 : index
    %19 = vector.load %arg3[%c0_13, %c0_14] : memref<4x1xf32, #tpu.memory_space<vmem>>, vector<4x1xf32>
    %20 = vector.broadcast %19 : vector<4x1xf32> to vector<4x128xf32>
    %21 = arith.addf %18, %20 : vector<4x128xf32>
    %22 = arith.negf %21 : vector<4x128xf32>
    %23 = math.exp %22 : vector<4x128xf32>
    %cst_15 = arith.constant 1.000000e+00 : f32
    %24 = vector.broadcast %cst_15 : f32 to vector<4x128xf32>
    %25 = arith.addf %24, %23 : vector<4x128xf32>
    %26 = arith.divf %24, %25 : vector<4x128xf32>
    %27 = arith.mulf %21, %26 : vector<4x128xf32>
    %c0_16 = arith.constant 0 : index
    %c0_17 = arith.constant 0 : index
    %c0_18 = arith.constant 0 : index
    %28 = vector.load %arg4[%c0_16, %c0_17, %c0_18] : memref<3x4x4xf32, #tpu.memory_space<vmem>>, vector<1x4x4xf32>
    %29 = vector.shape_cast %28 : vector<1x4x4xf32> to vector<4x4xf32>
    %cst_19 = arith.constant 0.000000e+00 : f32
    %30 = vector.broadcast %cst_19 : f32 to vector<4x1xf32>
    %31 = vector.extract_strided_slice %27 {offsets = [0, 0], sizes = [4, 127], strides = [1, 1]} : vector<4x128xf32> to vector<4x127xf32>
    %32 = tpu.concatenate %30, %31 in 1 : vector<4x1xf32>, vector<4x127xf32> -> vector<4x128xf32>
    %cst_20 = arith.constant dense<0.000000e+00> : vector<4x128xf32>
    %33 = tpu.matmul %29, %32, %cst_20 {dimension_numbers = #tpu.dot_dimension_numbers<[1], [0], [0], [1], [0, 0, 1, 1], [], []>} : vector<4x4xf32>, vector<4x128xf32>, vector<4x128xf32> -> vector<4x128xf32>
    %c1_21 = arith.constant 1 : index
    %c0_22 = arith.constant 0 : index
    %c0_23 = arith.constant 0 : index
    %34 = vector.load %arg4[%c1_21, %c0_22, %c0_23] : memref<3x4x4xf32, #tpu.memory_space<vmem>>, vector<1x4x4xf32>
    %35 = vector.shape_cast %34 : vector<1x4x4xf32> to vector<4x4xf32>
    %cst_24 = arith.constant dense<0.000000e+00> : vector<4x128xf32>
    %36 = tpu.matmul %35, %27, %cst_24 {dimension_numbers = #tpu.dot_dimension_numbers<[1], [0], [0], [1], [0, 0, 1, 1], [], []>} : vector<4x4xf32>, vector<4x128xf32>, vector<4x128xf32> -> vector<4x128xf32>
    %37 = arith.addf %33, %36 : vector<4x128xf32>
    %c2_25 = arith.constant 2 : index
    %c0_26 = arith.constant 0 : index
    %c0_27 = arith.constant 0 : index
    %38 = vector.load %arg4[%c2_25, %c0_26, %c0_27] : memref<3x4x4xf32, #tpu.memory_space<vmem>>, vector<1x4x4xf32>
    %39 = vector.shape_cast %38 : vector<1x4x4xf32> to vector<4x4xf32>
    %40 = vector.extract_strided_slice %27 {offsets = [0, 1], sizes = [4, 127], strides = [1, 1]} : vector<4x128xf32> to vector<4x127xf32>
    %cst_28 = arith.constant 0.000000e+00 : f32
    %41 = vector.broadcast %cst_28 : f32 to vector<4x1xf32>
    %42 = tpu.concatenate %40, %41 in 1 : vector<4x127xf32>, vector<4x1xf32> -> vector<4x128xf32>
    %cst_29 = arith.constant dense<0.000000e+00> : vector<4x128xf32>
    %43 = tpu.matmul %39, %42, %cst_29 {dimension_numbers = #tpu.dot_dimension_numbers<[1], [0], [0], [1], [0, 0, 1, 1], [], []>} : vector<4x4xf32>, vector<4x128xf32>, vector<4x128xf32> -> vector<4x128xf32>
    %44 = arith.addf %37, %43 : vector<4x128xf32>
    %c0_30 = arith.constant 0 : index
    %c0_31 = arith.constant 0 : index
    %45 = vector.load %arg5[%c0_30, %c0_31] : memref<4x1xf32, #tpu.memory_space<vmem>>, vector<4x1xf32>
    %46 = vector.broadcast %45 : vector<4x1xf32> to vector<4x128xf32>
    %47 = arith.addf %44, %46 : vector<4x128xf32>
    %cst_32 = arith.constant 1.000000e-01 : f32
    %48 = vector.broadcast %cst_32 : f32 to vector<4x128xf32>
    %49 = arith.mulf %48, %47 : vector<4x128xf32>
    %50 = arith.addf %1, %49 : vector<4x128xf32>
    %c0_33 = arith.constant 0 : index
    %c0_34 = arith.constant 0 : index
    %c0_35 = arith.constant 0 : index
    %51 = vector.load %arg6[%c0_33, %c0_34, %c0_35] : memref<3x4x4xf32, #tpu.memory_space<vmem>>, vector<1x4x4xf32>
    %52 = vector.shape_cast %51 : vector<1x4x4xf32> to vector<4x4xf32>
    %cst_36 = arith.constant 0.000000e+00 : f32
    %53 = vector.broadcast %cst_36 : f32 to vector<4x1xf32>
    %54 = vector.extract_strided_slice %50 {offsets = [0, 0], sizes = [4, 127], strides = [1, 1]} : vector<4x128xf32> to vector<4x127xf32>
    %55 = tpu.concatenate %53, %54 in 1 : vector<4x1xf32>, vector<4x127xf32> -> vector<4x128xf32>
    %cst_37 = arith.constant dense<0.000000e+00> : vector<4x128xf32>
    %56 = tpu.matmul %52, %55, %cst_37 {dimension_numbers = #tpu.dot_dimension_numbers<[1], [0], [0], [1], [0, 0, 1, 1], [], []>} : vector<4x4xf32>, vector<4x128xf32>, vector<4x128xf32> -> vector<4x128xf32>
    %c1_38 = arith.constant 1 : index
    %c0_39 = arith.constant 0 : index
    %c0_40 = arith.constant 0 : index
    %57 = vector.load %arg6[%c1_38, %c0_39, %c0_40] : memref<3x4x4xf32, #tpu.memory_space<vmem>>, vector<1x4x4xf32>
    %58 = vector.shape_cast %57 : vector<1x4x4xf32> to vector<4x4xf32>
    %cst_41 = arith.constant dense<0.000000e+00> : vector<4x128xf32>
    %59 = tpu.matmul %58, %50, %cst_41 {dimension_numbers = #tpu.dot_dimension_numbers<[1], [0], [0], [1], [0, 0, 1, 1], [], []>} : vector<4x4xf32>, vector<4x128xf32>, vector<4x128xf32> -> vector<4x128xf32>
    %60 = arith.addf %56, %59 : vector<4x128xf32>
    %c2_42 = arith.constant 2 : index
    %c0_43 = arith.constant 0 : index
    %c0_44 = arith.constant 0 : index
    %61 = vector.load %arg6[%c2_42, %c0_43, %c0_44] : memref<3x4x4xf32, #tpu.memory_space<vmem>>, vector<1x4x4xf32>
    %62 = vector.shape_cast %61 : vector<1x4x4xf32> to vector<4x4xf32>
    %63 = vector.extract_strided_slice %50 {offsets = [0, 1], sizes = [4, 127], strides = [1, 1]} : vector<4x128xf32> to vector<4x127xf32>
    %cst_45 = arith.constant 0.000000e+00 : f32
    %64 = vector.broadcast %cst_45 : f32 to vector<4x1xf32>
    %65 = tpu.concatenate %63, %64 in 1 : vector<4x127xf32>, vector<4x1xf32> -> vector<4x128xf32>
    %cst_46 = arith.constant dense<0.000000e+00> : vector<4x128xf32>
    %66 = tpu.matmul %62, %65, %cst_46 {dimension_numbers = #tpu.dot_dimension_numbers<[1], [0], [0], [1], [0, 0, 1, 1], [], []>} : vector<4x4xf32>, vector<4x128xf32>, vector<4x128xf32> -> vector<4x128xf32>
    %67 = arith.addf %60, %66 : vector<4x128xf32>
    %c0_47 = arith.constant 0 : index
    %c0_48 = arith.constant 0 : index
    %68 = vector.load %arg7[%c0_47, %c0_48] : memref<4x1xf32, #tpu.memory_space<vmem>>, vector<4x1xf32>
    %69 = vector.broadcast %68 : vector<4x1xf32> to vector<4x128xf32>
    %70 = arith.addf %67, %69 : vector<4x128xf32>
    %71 = arith.negf %70 : vector<4x128xf32>
    %72 = math.exp %71 : vector<4x128xf32>
    %cst_49 = arith.constant 1.000000e+00 : f32
    %73 = vector.broadcast %cst_49 : f32 to vector<4x128xf32>
    %74 = arith.addf %73, %72 : vector<4x128xf32>
    %75 = arith.divf %73, %74 : vector<4x128xf32>
    %76 = arith.mulf %70, %75 : vector<4x128xf32>
    %c0_50 = arith.constant 0 : index
    %c0_51 = arith.constant 0 : index
    %c0_52 = arith.constant 0 : index
    %77 = vector.load %arg8[%c0_50, %c0_51, %c0_52] : memref<3x4x4xf32, #tpu.memory_space<vmem>>, vector<1x4x4xf32>
    %78 = vector.shape_cast %77 : vector<1x4x4xf32> to vector<4x4xf32>
    %cst_53 = arith.constant 0.000000e+00 : f32
    %79 = vector.broadcast %cst_53 : f32 to vector<4x1xf32>
    %80 = vector.extract_strided_slice %76 {offsets = [0, 0], sizes = [4, 127], strides = [1, 1]} : vector<4x128xf32> to vector<4x127xf32>
    %81 = tpu.concatenate %79, %80 in 1 : vector<4x1xf32>, vector<4x127xf32> -> vector<4x128xf32>
    %cst_54 = arith.constant dense<0.000000e+00> : vector<4x128xf32>
    %82 = tpu.matmul %78, %81, %cst_54 {dimension_numbers = #tpu.dot_dimension_numbers<[1], [0], [0], [1], [0, 0, 1, 1], [], []>} : vector<4x4xf32>, vector<4x128xf32>, vector<4x128xf32> -> vector<4x128xf32>
    %c1_55 = arith.constant 1 : index
    %c0_56 = arith.constant 0 : index
    %c0_57 = arith.constant 0 : index
    %83 = vector.load %arg8[%c1_55, %c0_56, %c0_57] : memref<3x4x4xf32, #tpu.memory_space<vmem>>, vector<1x4x4xf32>
    %84 = vector.shape_cast %83 : vector<1x4x4xf32> to vector<4x4xf32>
    %cst_58 = arith.constant dense<0.000000e+00> : vector<4x128xf32>
    %85 = tpu.matmul %84, %76, %cst_58 {dimension_numbers = #tpu.dot_dimension_numbers<[1], [0], [0], [1], [0, 0, 1, 1], [], []>} : vector<4x4xf32>, vector<4x128xf32>, vector<4x128xf32> -> vector<4x128xf32>
    %86 = arith.addf %82, %85 : vector<4x128xf32>
    %c2_59 = arith.constant 2 : index
    %c0_60 = arith.constant 0 : index
    %c0_61 = arith.constant 0 : index
    %87 = vector.load %arg8[%c2_59, %c0_60, %c0_61] : memref<3x4x4xf32, #tpu.memory_space<vmem>>, vector<1x4x4xf32>
    %88 = vector.shape_cast %87 : vector<1x4x4xf32> to vector<4x4xf32>
    %89 = vector.extract_strided_slice %76 {offsets = [0, 1], sizes = [4, 127], strides = [1, 1]} : vector<4x128xf32> to vector<4x127xf32>
    %cst_62 = arith.constant 0.000000e+00 : f32
    %90 = vector.broadcast %cst_62 : f32 to vector<4x1xf32>
    %91 = tpu.concatenate %89, %90 in 1 : vector<4x127xf32>, vector<4x1xf32> -> vector<4x128xf32>
    %cst_63 = arith.constant dense<0.000000e+00> : vector<4x128xf32>
    %92 = tpu.matmul %88, %91, %cst_63 {dimension_numbers = #tpu.dot_dimension_numbers<[1], [0], [0], [1], [0, 0, 1, 1], [], []>} : vector<4x4xf32>, vector<4x128xf32>, vector<4x128xf32> -> vector<4x128xf32>
    %93 = arith.addf %86, %92 : vector<4x128xf32>
    %c0_64 = arith.constant 0 : index
    %c0_65 = arith.constant 0 : index
    %94 = vector.load %arg9[%c0_64, %c0_65] : memref<4x1xf32, #tpu.memory_space<vmem>>, vector<4x1xf32>
    %95 = vector.broadcast %94 : vector<4x1xf32> to vector<4x128xf32>
    %96 = arith.addf %93, %95 : vector<4x128xf32>
    %c0_66 = arith.constant 0 : index
    %c0_67 = arith.constant 0 : index
    %c0_68 = arith.constant 0 : index
    %97 = vector.load %arg10[%c0_66, %c0_67, %c0_68] : memref<1x4x128xf32, #tpu.memory_space<vmem>>, vector<1x4x128xf32>
    %98 = vector.shape_cast %97 : vector<1x4x128xf32> to vector<4x128xf32>
    %99 = vector.shape_cast %96 : vector<4x128xf32> to vector<1x4x128xf32>
    tpu.vector_store %arg10[%c0_66, %c0_67, %c0_68], %99 {strides = array<i32>} : memref<1x4x128xf32, #tpu.memory_space<vmem>>, vector<1x4x128xf32>,
    %100 = arith.negf %96 : vector<4x128xf32>
    %101 = math.exp %100 : vector<4x128xf32>
    %cst_69 = arith.constant 1.000000e+00 : f32
    %102 = vector.broadcast %cst_69 : f32 to vector<4x128xf32>
    %103 = arith.addf %102, %101 : vector<4x128xf32>
    %104 = arith.divf %102, %103 : vector<4x128xf32>
    %c0_70 = arith.constant 0 : index
    %c0_71 = arith.constant 0 : index
    %c0_72 = arith.constant 0 : index
    %105 = vector.load %arg11[%c0_70, %c0_71, %c0_72] : memref<1x4x128xf32, #tpu.memory_space<vmem>>, vector<1x4x128xf32>
    %106 = vector.shape_cast %105 : vector<1x4x128xf32> to vector<4x128xf32>
    %107 = vector.shape_cast %104 : vector<4x128xf32> to vector<1x4x128xf32>
    tpu.vector_store %arg11[%c0_70, %c0_71, %c0_72], %107 {strides = array<i32>} : memref<1x4x128xf32, #tpu.memory_space<vmem>>, vector<1x4x128xf32>,
    return
  }
  func.func @transform_0(%arg0: i32) -> (i32, i32, i32) {
    %c0_i32 = arith.constant 0 : i32
    %c0_i32_0 = arith.constant 0 : i32
    %c0_i32_1 = arith.constant 0 : i32
    return %arg0, %c0_i32, %c0_i32_0 : i32, i32, i32
  }
  func.func @transform_1(%arg0: i32) -> (i32, i32, i32) {
    %c0_i32 = arith.constant 0 : i32
    %c0_i32_0 = arith.constant 0 : i32
    %c0_i32_1 = arith.constant 0 : i32
    %c0_i32_2 = arith.constant 0 : i32
    return %c0_i32, %c0_i32_0, %c0_i32_1 : i32, i32, i32
  }
  func.func @transform_2(%arg0: i32) -> (i32, i32) {
    %c0_i32 = arith.constant 0 : i32
    %c0_i32_0 = arith.constant 0 : i32
    %c0_i32_1 = arith.constant 0 : i32
    return %c0_i32, %c0_i32_0 : i32, i32
  }
  func.func @transform_3(%arg0: i32) -> (i32, i32, i32) {
    %c0_i32 = arith.constant 0 : i32
    %c0_i32_0 = arith.constant 0 : i32
    %c0_i32_1 = arith.constant 0 : i32
    %c0_i32_2 = arith.constant 0 : i32
    return %c0_i32, %c0_i32_0, %c0_i32_1 : i32, i32, i32
  }
  func.func @transform_4(%arg0: i32) -> (i32, i32) {
    %c0_i32 = arith.constant 0 : i32
    %c0_i32_0 = arith.constant 0 : i32
    %c0_i32_1 = arith.constant 0 : i32
    return %c0_i32, %c0_i32_0 : i32, i32
  }
  func.func @transform_5(%arg0: i32) -> (i32, i32, i32) {
    %c0_i32 = arith.constant 0 : i32
    %c0_i32_0 = arith.constant 0 : i32
    %c0_i32_1 = arith.constant 0 : i32
    %c0_i32_2 = arith.constant 0 : i32
    return %c0_i32, %c0_i32_0, %c0_i32_1 : i32, i32, i32
  }
  func.func @transform_6(%arg0: i32) -> (i32, i32) {
    %c0_i32 = arith.constant 0 : i32
    %c0_i32_0 = arith.constant 0 : i32
    %c0_i32_1 = arith.constant 0 : i32
    return %c0_i32, %c0_i32_0 : i32, i32
  }
  func.func @transform_7(%arg0: i32) -> (i32, i32, i32) {
    %c0_i32 = arith.constant 0 : i32
    %c0_i32_0 = arith.constant 0 : i32
    %c0_i32_1 = arith.constant 0 : i32
    %c0_i32_2 = arith.constant 0 : i32
    return %c0_i32, %c0_i32_0, %c0_i32_1 : i32, i32, i32
  }
  func.func @transform_8(%arg0: i32) -> (i32, i32) {
    %c0_i32 = arith.constant 0 : i32
    %c0_i32_0 = arith.constant 0 : i32
    %c0_i32_1 = arith.constant 0 : i32
    return %c0_i32, %c0_i32_0 : i32, i32
  }
  func.func @transform_9(%arg0: i32) -> (i32, i32, i32) {
    %c0_i32 = arith.constant 0 : i32
    %c0_i32_0 = arith.constant 0 : i32
    %c0_i32_1 = arith.constant 0 : i32
    return %arg0, %c0_i32, %c0_i32_0 : i32, i32, i32
  }
  func.func @transform_10(%arg0: i32) -> (i32, i32, i32) {
    %c0_i32 = arith.constant 0 : i32
    %c0_i32_0 = arith.constant 0 : i32
    %c0_i32_1 = arith.constant 0 : i32
    return %arg0, %c0_i32, %c0_i32_0 : i32, i32, i32
  }
}

</mosaic_0001>

<bundles_post_ra>
// kernel: decoder_forward.10
= control target key start
LH: loop header
LB: loop body
LE: loop exit
PB: predicated region body
PF: predicated region fallthrough
CT: control target
= control target key end

     0   :  { %s1502_s21 = smov 0   ;;  %s1652_s0 = inlined_call_operand.vmem [shape: f32[2,4,8], index: 0, kind: input, shape index: {}]   ;;  %s1653_s1 = inlined_call_operand.vmem [shape: f32[2,4,8], index: 1, kind: input, shape index: {}]   ;;  %s1654_s2 = inlined_call_operand.vmem [shape: f32[3,8,4], index: 2, kind: input, shape index: {}]   ;;  %s1655_s3 = inlined_call_operand.vmem [shape: f32[3,8,4], index: 3, kind: input, shape index: {}]   ;;  %s1656_s4 = inlined_call_operand.vmem [shape: f32[8,1], index: 4, kind: input, shape index: {}]   ;;  %s1657_s5 = inlined_call_operand.vmem [shape: f32[3,4,8], index: 5, kind: input, shape index: {}]   ;;  %s1658_s6 = inlined_call_operand.vmem [shape: f32[4,1], index: 6, kind: input, shape index: {}]   ;;  %s1659_s7 = inlined_call_operand.vmem [shape: f32[3,4,4], index: 7, kind: input, shape index: {}]   ;;  %s1660_s8 = inlined_call_operand.vmem [shape: f32[4,1], index: 8, kind: input, shape index: {}]   ;;  %s1661_s9 = inlined_call_operand.vmem [shape: f32[3,4,4], index: 9, kind: input, shape index: {}]   ;;  %s1662_s10 = inlined_call_operand.vmem [shape: f32[4,1], index: 10, kind: input, shape index: {}]   ;;  %s1663_s11 = inlined_call_operand.vmem [shape: f32[2,4,8], index: 11, kind: output, shape index: {0}]   ;;  %s1664_s12 = inlined_call_operand.vmem [shape: f32[2,4,8], index: 12, kind: output, shape index: {1}]  }
   0x1 LB: > { %s1320_s22 = sadd.s32 4294967295, %s1432_s21   ;;  %p1324_p0 = scmp.ge.s32.totalorder %s1432_s21, 1  ;;  %s1432_s21 = sphi %s1502_s21, %s23_s21  }
   0x2   : > { %p373_p1 = scmp.lt.s32.totalorder %s1432_s21, 3 }
   0x4   : > { %p374_p2 = pnand %p1324_p0, %p373_p1 }
   0x5   : > { %p421_p3 = scmp.lt.s32.totalorder (!%p374_p2), %s1320_s22, 1  ;;  %s1436_s27 = smov (!%p374_p2), 127  }
   0x6   : > { %377 = sbr.rel (%p374_p2) target bundleno = 1137 (0x471), region = 64 }
   0xb   : > { %s1666_s22 = smov (!%p421_p3, %s1320_s22), 1  ;;  %vm445_vm0 = vcmask 1043456   ;;  %v440_v1 = vld [vmem:[%s1655_s3] sm:$0xff]  ;;  %vm441_vm1 = vcmask 31744   ;;  %v1334_v4 = vld [vmem:[%s1655_s3 + $0x8] sm:$0xff]  ;;  %v1340_v6 = vld [vmem:[%s1655_s3 + $0x10] sm:$0xff] }
   0xc   : > { %s1510_s23 = sshll.u32 %s1666_s22, 2  ;;  %v439_v2 = vld [vmem:[%s1654_s2] sm:$0xff]  ;;  %v1333_v5 = vld [vmem:[%s1654_s2 + $0x8] sm:$0xff]  ;;  %v1339_v7 = vld [vmem:[%s1654_s2 + $0x10] sm:$0xff]  ;;  %v1434_v8 = vmov 0   ;;  %vm600_vm2 = vcmask 7168  }
   0xd   : > { %s428_s26 = scalar_lea.vmem %s1653_s1, %s1510_s23  ;;  %s424_s29 = scalar_lea.vmem %s1652_s0, %s1510_s23  ;;  %1400 = vset.pattern.permute.xlu0 %v1434_v8  ;;  %1401 = vset.pattern.permute.xlu2 %v1434_v8  ;;  %v595_v15 = vld [vmem:[%s1656_s4] sm:$0xff]  ;;  %vm635_vm3 = vcmask 56320   ;;  %vm660_vm12 = vcmask 64512   ;;  %v1351_v60 = vld [vmem:[%s1657_s5 + $0x8] sm:$0xf] }
   0xe   : > { %v438_v0 = vld [vmem:[%s428_s26] sm:$0xf]  ;;  %s1435_s26 = smov 1   ;;  %v1348_v61 = vld [vmem:[%s1657_s5 + $0x4] sm:$0xf]  ;;  %s436_s28 = scalar_lea.vmem %s1664_s12, %s1510_s23 }
   0xf   : > { %1329 = vmatpush.msk.msra.mxu0 %vm445_vm0, %v438_v0  ;;  %v437_v3 = vld [vmem:[%s424_s29] sm:$0xf]  ;;  %1335 = vmatpush.msk.msra.mxu2 %vm445_vm0, %v438_v0  ;;  %s432_s29 = scalar_lea.vmem %s1663_s11, %s1510_s23 }
  0x10   : > { %1331 = vmatpush.msk.msra.mxu1 %vm445_vm0, %v437_v3  ;;  %1337 = vmatpush.msk.msra.mxu3 %vm445_vm0, %v437_v3  ;;  %v774_v36 = vld [vmem:[%s1658_s6] sm:$0xf] }
  0x11   : > { %1330 = vmatmul.msk.f32.vlgmr.msra.gmra.mxu0 %vm441_vm1, %v440_v1  ;;  %1332 = vmatmul.msk.f32.vlgmr.msra.gmra.mxu1 %vm441_vm1, %v439_v2  ;;  %v659_v59 = vld [vmem:[%s1657_s5] sm:$0xf] }
  0x12   : > { %1336 = vmatmul.msk.f32.vlgmr.msra.gmra.mxu2 %vm441_vm1, %v1334_v4  ;;  %1338 = vmatmul.msk.f32.vlgmr.msra.gmra.mxu3 %vm441_vm1, %v1333_v5 }
  0x13   : > { %1341 = vmatpush.msk.msrb.mxu0 %vm445_vm0, %v438_v0  ;;  %1343 = vmatpush.msk.msrb.mxu1 %vm445_vm0, %v437_v3  ;;  %v975_v0 = vld [vmem:[%s1660_s8] sm:$0xf] }
  0x14   : > { %784 = vperm.xlu2 %1401, %v774_v36  }
  0x19   : > { %1342 = vmatmul.msk.f32.vlgmr.msrb.gmra.mxu0 %vm441_vm1, %v1340_v6  ;;  %1344 = vmatmul.msk.f32.vlgmr.msrb.gmra.mxu1 %vm441_vm1, %v1339_v7 }
  0x6e   : > { %v785_v2 = vpop.permute.xlu2 %784 }
  0x8e   : > { %v466_v9 = vpop.f32.mrf.mxu0  ;;  %v492_v10 = vpop.f32.mrf.mxu1 }
  0x8f   : > { %v493_v11 = vadd.f32 %v492_v10, %v466_v9 }
  0x91   : > { %597 = vrot.lane.b32.xlu1 %v493_v11, %s1435_s26 }
  0x95   : > { %v519_v17 = vpop.f32.mrf.mxu2  ;;  %v542_v18 = vpop.f32.mrf.mxu3 }
  0x96   : > { %v569_v12 = vpop.f32.mrf.mxu0  ;;  %v592_v13 = vpop.f32.mrf.mxu1  ;;  %v543_v21 = vadd.f32 %v542_v18, %v519_v17 }
  0x97   : > { %v593_v14 = vadd.f32 %v592_v13, %v569_v12 }
  0x98   : > { %v630_v24 = vadd.f32 %v543_v21, %v493_v11 }
  0x99   : > { %632 = vrot.lane.b32.xlu0 %v593_v14, %s1436_s27 }
  0xa1   : > { %606 = vperm.xlu0 %1400, %v595_v15  }
 0x103   : > { %v598_v16 = vpop.permute.xlu1 %597 }
 0x104   : > { %v601_v19 = vsel %vm600_vm2, 0.0, %v598_v16 }
 0x105   : > { %v602_v22 = vadd.f32 %v601_v19, %v543_v21 }
 0x107   : > { %v603_v25 = vadd.f32 %v602_v22, %v593_v14 }
 0x10b   : > { %v633_v20 = vpop.permute.xlu0 %632 }
 0x10c   : > { %v636_v23 = vsel %vm635_vm3, %v633_v20, 0.0 }
 0x10d   : > { %v637_v26 = vadd.f32 %v636_v23, %v630_v24 }
 0x113   : > { %v607_v27 = vpop.permute.xlu0 %606 }
 0x114   : > { %v609_v28 = vadd.f32 %v607_v27, %v603_v25  ;;  %v638_v29 = vadd.f32 %v637_v26, %v607_v27 }
 0x116   : > { %v1345_v30 = vmul.f32 -1.442695, %v609_v28  ;;  %v1346_v31 = vmul.f32 -1.442695, %v638_v29 }
 0x118   : > { %1402 = vpow2.f32 %v1345_v30 }
 0x119   : > { %1404 = vpow2.f32 %v1346_v31  ;;  %v1359_v31 = vld [vmem:[%s1659_s7 + $0x4] sm:$0xf] }
 0x11e   : > { %v1403_v32 = vpop.eup %1402 }
 0x11f   : > { %v1405_v33 = vpop.eup %1404  ;;  %v613_v34 = vadd.f32 1.0, %v1403_v32 }
 0x120   : > { %v642_v35 = vadd.f32 1.0, %v1405_v33  ;;  %v1364_v33 = vld [vmem:[%s1659_s7 + $0x8] sm:$0xf] }
 0x121   : > { %1406 = vrcp.f32 %v613_v34  ;;  %v625_v42 = vand.u32 2147483648, %v613_v34  ;;  %v623_v45 = vand.u32 2147483647, %v613_v34  ;;  %vm619_vm6 = vweird.f32 %v613_v34 }
 0x122   : > { %1408 = vrcp.f32 %v642_v35  ;;  %v654_v46 = vand.u32 2147483648, %v642_v35  ;;  %v652_v48 = vand.u32 2147483647, %v642_v35  ;;  %vm648_vm8 = vweird.f32 %v642_v35 }
 0x123   : > { %v626_v50 = vor.u32 1.1754944e-38, %v625_v42  ;;  %vm624_vm9 = vcmp.eq.f32.partialorder %v623_v45, 8.507059e+37 }
 0x124   : > { %v655_v53 = vor.u32 1.1754944e-38, %v654_v46  ;;  %vm653_vm11 = vcmp.eq.f32.partialorder %v652_v48, 8.507059e+37  ;;  %v1176_v48 = vld [vmem:[%s1662_s10] sm:$0xf] }
 0x127   : > { %v1407_v37 = vpop.eup %1406 }
 0x128   : > { %v1409_v38 = vpop.eup %1408  ;;  %v615_v39 = vmul.f32 %v1407_v37, %v613_v34  ;;  %vm620_vm4 = vweird.f32 %v1407_v37 }
 0x129   : > { %v644_v40 = vmul.f32 %v1409_v38, %v642_v35  ;;  %vm649_vm5 = vweird.f32 %v1409_v38  ;;  %vm621_vm7 = vmor %vm619_vm6, %vm620_vm4 }
 0x12a   : > { %v616_v41 = vsub.f32 1.0, %v615_v39  ;;  %vm650_vm10 = vmor %vm648_vm8, %vm649_vm5 }
 0x12b   : > { %v645_v43 = vsub.f32 1.0, %v644_v40 }
 0x12c   : > { %v617_v44 = vmul.f32 %v1407_v37, %v616_v41 }
 0x12d   : > { %v646_v47 = vmul.f32 %v1409_v38, %v645_v43 }
 0x12e   : > { %v618_v49 = vadd.f32 %v1407_v37, %v617_v44 }
 0x12f   : > { %v647_v51 = vadd.f32 %v1409_v38, %v646_v47 }
 0x130   : > { %v622_v52 = vsel %vm621_vm7, %v1407_v37, %v618_v49 }
 0x131   : > { %v627_v54 = vsel %vm624_vm9, %v626_v50, %v622_v52  ;;  %v651_v55 = vsel %vm650_vm10, %v1409_v38, %v647_v51 }
 0x132   : > { %v629_v56 = vmul.f32 %v627_v54, %v609_v28  ;;  %v656_v57 = vsel %vm653_vm11, %v655_v53, %v651_v55 }
 0x133   : > { %v658_v58 = vmul.f32 %v656_v57, %v638_v29  ;;  %v855_v29 = vld [vmem:[%s1659_s7] sm:$0xf] }
 0x134   : > { %704 = vmatpush.msrb.mxu3 %v629_v56  ;;  %749 = vmatpush.msra.mxu1 %v629_v56 }
 0x135   : > { %679 = vmatpush.msrb.mxu2 %v658_v58  ;;  %724 = vmatpush.msra.mxu0 %v658_v58 }
 0x136   : > { %1347 = vmatmul.msk.f32.vlgmr.msrb.gmra.mxu2 %vm660_vm12, %v659_v59  ;;  %1352 = vmatmul.msk.f32.vlgmr.msra.gmra.mxu1 %vm660_vm12, %v1351_v60 }
 0x137   : > { %769 = vmatpush.msra.mxu2 %v658_v58  ;;  %803 = vmatpush.msra.mxu3 %v629_v56 }
 0x138   : > { %1349 = vmatmul.msk.f32.vlgmr.msrb.gmra.mxu3 %vm660_vm12, %v1348_v61  ;;  %1350 = vmatmul.msk.f32.vlgmr.msra.gmra.mxu0 %vm660_vm12, %v1348_v61 }
 0x13e   : > { %1353 = vmatmul.msk.f32.vlgmr.msra.gmra.mxu2 %vm660_vm12, %v1351_v60 }
 0x140   : > { %1354 = vmatmul.msk.f32.vlgmr.msra.gmra.mxu3 %vm660_vm12, %v659_v59 }
 0x1b3   : > { %v751_v62 = vpop.f32.mrf.mxu1 }
 0x1b4   : > { %809 = vrot.lane.b32.xlu2 %v751_v62, %s1436_s27 }
 0x1b5   : > { %v726_v3 = vpop.f32.mrf.mxu0 }
 0x1b9   : > { %v681_v63 = vpop.f32.mrf.mxu2 }
 0x1ba   : > { %776 = vrot.lane.b32.xlu1 %v681_v63, %s1435_s26 }
 0x1bb   : > { %v706_v1 = vpop.f32.mrf.mxu3 }
 0x1bc   : > { %985 = vperm.xlu2 %1401, %v975_v0  }
 0x1c1   : > { %v771_v23 = vpop.f32.mrf.mxu2 }
 0x1c3   : > { %v805_v4 = vpop.f32.mrf.mxu3 }
 0x1c4   : > { %v806_v5 = vadd.f32 %v805_v4, %v726_v3 }
 0x20e   : > { %v810_v6 = vpop.permute.xlu2 %809 }
 0x20f   : > { %v812_v7 = vsel %vm635_vm3, %v810_v6, 0.0 }
 0x210   : > { %v813_v8 = vadd.f32 %v812_v7, %v806_v5 }
 0x212   : > { %v814_v9 = vadd.f32 %v813_v8, %v785_v2 }
 0x214   : > { %v1356_v10 = vmul.f32 -1.442695, %v814_v9 }
 0x216   : > { %1410 = vpow2.f32 %v1356_v10  ;;  %v986_v56 = vpop.permute.xlu2 %985 }
 0x21c   : > { %v1411_v11 = vpop.eup %1410 }
 0x21d   : > { %v838_v12 = vadd.f32 1.0, %v1411_v11  ;;  %v1380_v11 = vld [vmem:[%s1661_s9 + $0x8] sm:$0xf] }
 0x21f   : > { %1412 = vrcp.f32 %v838_v12  ;;  %v850_v15 = vand.u32 2147483648, %v838_v12  ;;  %vm844_vm13 = vweird.f32 %v838_v12  ;;  %v848_v17 = vand.u32 2147483647, %v838_v12 }
 0x221   : > { %v851_v19 = vor.u32 1.1754944e-38, %v850_v15  ;;  %vm849_vm4 = vcmp.eq.f32.partialorder %v848_v17, 8.507059e+37  ;;  %v1375_v17 = vld [vmem:[%s1661_s9 + $0x4] sm:$0xf] }
 0x225   : > { %v1413_v13 = vpop.eup %1412 }
 0x226   : > { %v840_v14 = vmul.f32 %v1413_v13, %v838_v12  ;;  %vm845_vm14 = vweird.f32 %v1413_v13 }
 0x227   : > { %vm846_vm15 = vmor %vm844_vm13, %vm845_vm14 }
 0x228   : > { %v841_v16 = vsub.f32 1.0, %v840_v14 }
 0x22a   : > { %v842_v18 = vmul.f32 %v1413_v13, %v841_v16 }
 0x22c   : > { %v843_v20 = vadd.f32 %v1413_v13, %v842_v18  ;;  %v777_v21 = vpop.permute.xlu1 %776 }
 0x22d   : > { %v779_v22 = vsel %vm600_vm2, 0.0, %v777_v21 }
 0x22e   : > { %v847_v24 = vsel %vm846_vm15, %v1413_v13, %v843_v20  ;;  %v780_v25 = vadd.f32 %v779_v22, %v706_v1 }
 0x22f   : > { %v852_v26 = vsel %vm849_vm4, %v851_v19, %v847_v24  ;;  %v1056_v19 = vld [vmem:[%s1661_s9] sm:$0xf] }
 0x230   : > { %v1576_v27 = vmul.f32 %v852_v26, %v814_v9  ;;  %v781_v28 = vadd.f32 %v780_v25, %v771_v23 }
 0x232   : > { %v787_v30 = vadd.f32 %v785_v2, %v781_v28  ;;  %1357 = vmatpush.msk.msrb.mxu0 %vm445_vm0, %v1576_v27  ;;  %1362 = vmatpush.msk.msrb.mxu2 %vm445_vm0, %v1576_v27 }
 0x233   : > { %1358 = vmatmul.msk.f32.vlgmr.msrb.gmra.mxu0 %vm441_vm1, %v855_v29  ;;  %1363 = vmatmul.msk.f32.vlgmr.msrb.gmra.mxu2 %vm441_vm1, %v1359_v31 }
 0x234   : > { %v1355_v32 = vmul.f32 -1.442695, %v787_v30  ;;  %1367 = vmatpush.msk.msra.mxu0 %vm445_vm0, %v1576_v27 }
 0x236   : > { %1414 = vpow2.f32 %v1355_v32 }
 0x23b   : > { %1368 = vmatmul.msk.f32.vlgmr.msra.gmra.mxu0 %vm441_vm1, %v1364_v33 }
 0x23c   : > { %v1415_v34 = vpop.eup %1414 }
 0x23d   : > { %v818_v35 = vadd.f32 1.0, %v1415_v34 }
 0x23f   : > { %1416 = vrcp.f32 %v818_v35  ;;  %v830_v39 = vand.u32 2147483648, %v818_v35  ;;  %v828_v41 = vand.u32 2147483647, %v818_v35  ;;  %vm824_vm6 = vweird.f32 %v818_v35 }
 0x241   : > { %v831_v43 = vor.u32 1.1754944e-38, %v830_v39  ;;  %vm829_vm8 = vcmp.eq.f32.partialorder %v828_v41, 8.507059e+37 }
 0x245   : > { %v1417_v36 = vpop.eup %1416 }
 0x246   : > { %v820_v37 = vmul.f32 %v1417_v36, %v818_v35  ;;  %vm825_vm5 = vweird.f32 %v1417_v36 }
 0x247   : > { %vm826_vm7 = vmor %vm824_vm6, %vm825_vm5 }
 0x248   : > { %v821_v38 = vsub.f32 1.0, %v820_v37 }
 0x24a   : > { %v822_v40 = vmul.f32 %v1417_v36, %v821_v38 }
 0x24c   : > { %v823_v42 = vadd.f32 %v1417_v36, %v822_v40 }
 0x24e   : > { %v827_v44 = vsel %vm826_vm7, %v1417_v36, %v823_v42 }
 0x24f   : > { %v832_v45 = vsel %vm829_vm8, %v831_v43, %v827_v44 }
 0x250   : > { %v1596_v46 = vmul.f32 %v832_v45, %v787_v30 }
 0x252   : > { %1360 = vmatpush.msk.msrb.mxu1 %vm445_vm0, %v1596_v46  ;;  %1365 = vmatpush.msk.msrb.mxu3 %vm445_vm0, %v1596_v46 }
 0x253   : > { %1366 = vmatmul.msk.f32.vlgmr.msrb.gmra.mxu3 %vm441_vm1, %v1364_v33  ;;  %1361 = vmatmul.msk.f32.vlgmr.msrb.gmra.mxu1 %vm441_vm1, %v1359_v31 }
 0x254   : > { %1369 = vmatpush.msk.msra.mxu1 %vm445_vm0, %v1596_v46 }
 0x25b   : > { %1370 = vmatmul.msk.f32.vlgmr.msra.gmra.mxu1 %vm441_vm1, %v855_v29 }
 0x2b0   : > { %v879_v47 = vpop.f32.mrf.mxu0 }
 0x2b1   : > { %977 = vrot.lane.b32.xlu0 %v879_v47, %s1435_s26 }
 0x2b6   : > { %v927_v5 = vpop.f32.mrf.mxu2 }
 0x2b8   : > { %v972_v53 = vpop.f32.mrf.mxu0 }
 0x2b9   : > { %1186 = vperm.xlu0 %1400, %v1176_v48  }
 0x2d0   : > { %v907_v50 = vpop.f32.mrf.mxu1 }
 0x2d6   : > { %v952_v49 = vpop.f32.mrf.mxu3 }
 0x2d7   : > { %1010 = vrot.lane.b32.xlu1 %v952_v49, %s1436_s27 }
 0x2d8   : > { %v1006_v6 = vpop.f32.mrf.mxu1 }
 0x2d9   : > { %v1007_v10 = vadd.f32 %v1006_v6, %v927_v5 }
 0x323   : > { %v978_v51 = vpop.permute.xlu0 %977 }
 0x324   : > { %v980_v52 = vsel %vm600_vm2, 0.0, %v978_v51 }
 0x325   : > { %v981_v54 = vadd.f32 %v980_v52, %v907_v50 }
 0x327   : > { %v982_v55 = vadd.f32 %v981_v54, %v972_v53 }
 0x329   : > { %v988_v57 = vadd.f32 %v986_v56, %v982_v55 }
 0x32b   : > { %v1371_v58 = vmul.f32 -1.442695, %v988_v57  ;;  %v1187_v42 = vpop.permute.xlu0 %1186 }
 0x32d   : > { %1418 = vpow2.f32 %v1371_v58 }
 0x333   : > { %v1419_v59 = vpop.eup %1418 }
 0x334   : > { %v1019_v60 = vadd.f32 1.0, %v1419_v59 }
 0x336   : > { %1420 = vrcp.f32 %v1019_v60  ;;  %v1031_v0 = vand.u32 2147483648, %v1019_v60  ;;  %v1029_v2 = vand.u32 2147483647, %v1019_v60  ;;  %vm1025_vm10 = vweird.f32 %v1019_v60 }
 0x338   : > { %v1032_v4 = vor.u32 1.1754944e-38, %v1031_v0  ;;  %vm1030_vm12 = vcmp.eq.f32.partialorder %v1029_v2, 8.507059e+37 }
 0x33c   : > { %v1421_v61 = vpop.eup %1420 }
 0x33d   : > { %v1021_v62 = vmul.f32 %v1421_v61, %v1019_v60  ;;  %vm1026_vm9 = vweird.f32 %v1421_v61 }
 0x33e   : > { %vm1027_vm11 = vmor %vm1025_vm10, %vm1026_vm9 }
 0x33f   : > { %v1022_v63 = vsub.f32 1.0, %v1021_v62 }
 0x341   : > { %v1023_v1 = vmul.f32 %v1421_v61, %v1022_v63 }
 0x343   : > { %v1024_v3 = vadd.f32 %v1421_v61, %v1023_v1 }
 0x345   : > { %v1028_v7 = vsel %vm1027_vm11, %v1421_v61, %v1024_v3 }
 0x346   : > { %v1033_v8 = vsel %vm1030_vm12, %v1032_v4, %v1028_v7 }
 0x347   : > { %v1035_v9 = vmul.f32 %v1033_v8, %v988_v57 }
 0x349   : > { %v1011_v12 = vpop.permute.xlu1 %1010  ;;  %1376 = vmatpush.msk.msra.mxu3 %vm445_vm0, %v1035_v9  ;;  %1381 = vmatpush.msk.msrb.mxu1 %vm445_vm0, %v1035_v9 }
 0x34a   : > { %v1013_v13 = vsel %vm635_vm3, %v1011_v12, 0.0  ;;  %1382 = vmatmul.msk.f32.vlgmr.msrb.gmra.mxu1 %vm441_vm1, %v1380_v11  ;;  %1377 = vmatmul.msk.f32.vlgmr.msra.gmra.mxu3 %vm441_vm1, %v1375_v17 }
 0x34b   : > { %1385 = vmatpush.msk.msrb.mxu3 %vm445_vm0, %v1035_v9  ;;  %v1014_v14 = vadd.f32 %v1013_v13, %v1007_v10 }
 0x34d   : > { %v1015_v15 = vadd.f32 %v1014_v14, %v986_v56 }
 0x34f   : > { %v1372_v16 = vmul.f32 -1.442695, %v1015_v15 }
 0x351   : > { %1422 = vpow2.f32 %v1372_v16 }
 0x352   : > { %1386 = vmatmul.msk.f32.vlgmr.msrb.gmra.mxu3 %vm441_vm1, %v1056_v19 }
 0x357   : > { %v1423_v18 = vpop.eup %1422 }
 0x358   : > { %v1039_v20 = vadd.f32 1.0, %v1423_v18 }
 0x35a   : > { %1424 = vrcp.f32 %v1039_v20  ;;  %v1051_v24 = vand.u32 2147483648, %v1039_v20  ;;  %v1049_v26 = vand.u32 2147483647, %v1039_v20  ;;  %vm1045_vm14 = vweird.f32 %v1039_v20 }
 0x35c   : > { %v1052_v29 = vor.u32 1.1754944e-38, %v1051_v24  ;;  %vm1050_vm4 = vcmp.eq.f32.partialorder %v1049_v26, 8.507059e+37 }
 0x360   : > { %v1425_v21 = vpop.eup %1424 }
 0x361   : > { %v1041_v22 = vmul.f32 %v1425_v21, %v1039_v20  ;;  %vm1046_vm13 = vweird.f32 %v1425_v21 }
 0x362   : > { %vm1047_vm15 = vmor %vm1045_vm14, %vm1046_vm13 }
 0x363   : > { %v1042_v23 = vsub.f32 1.0, %v1041_v22 }
 0x365   : > { %v1043_v25 = vmul.f32 %v1425_v21, %v1042_v23 }
 0x367   : > { %v1044_v28 = vadd.f32 %v1425_v21, %v1043_v25 }
 0x369   : > { %v1048_v30 = vsel %vm1047_vm15, %v1425_v21, %v1044_v28 }
 0x36a   : > { %v1053_v31 = vsel %vm1050_vm4, %v1052_v29, %v1048_v30 }
 0x36b   : > { %v1055_v32 = vmul.f32 %v1053_v31, %v1015_v15 }
 0x36d   : > { %1373 = vmatpush.msk.msra.mxu2 %vm445_vm0, %v1055_v32  ;;  %1378 = vmatpush.msk.msrb.mxu0 %vm445_vm0, %v1055_v32 }
 0x36e   : > { %1374 = vmatmul.msk.f32.vlgmr.msra.gmra.mxu2 %vm441_vm1, %v1056_v19  ;;  %1379 = vmatmul.msk.f32.vlgmr.msrb.gmra.mxu0 %vm441_vm1, %v1375_v17 }
 0x36f   : > { %1383 = vmatpush.msk.msrb.mxu2 %vm445_vm0, %v1055_v32  ;;  %vm1219_vm0 = vcmask 60416  }
 0x376   : > { %1384 = vmatmul.msk.f32.vlgmr.msrb.gmra.mxu2 %vm441_vm1, %v1380_v11 }
 0x3c7   : > { %v1153_v33 = vpop.f32.mrf.mxu1 }
 0x3c8   : > { %1211 = vrot.lane.b32.xlu2 %v1153_v33, %s1436_s27 }
 0x3cd   : > { %v1108_v35 = vpop.f32.mrf.mxu3 }
 0x3d5   : > { %v1207_v37 = vpop.f32.mrf.mxu3 }
 0x3eb   : > { %v1128_v36 = vpop.f32.mrf.mxu0 }
 0x3ec   : > { %v1208_v38 = vadd.f32 %v1207_v37, %v1128_v36 }
 0x3f1   : > { %v1080_v34 = vpop.f32.mrf.mxu2 }
 0x3f2   : > { %1178 = vrot.lane.b32.xlu1 %v1080_v34, %s1435_s26 }
 0x3f9   : > { %v1173_v49 = vpop.f32.mrf.mxu2 }
 0x422   : > { %v1212_v39 = vpop.permute.xlu2 %1211 }
 0x423   : > { %v1214_v40 = vsel %vm635_vm3, %v1212_v39, 0.0 }
 0x424   : > { %v1215_v41 = vadd.f32 %v1214_v40, %v1208_v38 }
 0x426   : > { %v1216_v43 = vadd.f32 %v1215_v41, %v1187_v42 }
 0x428   : > { %v1221_v44 = vmul.f32 0.1, %v1216_v43 }
 0x42a   : > { %v1222_v45 = vadd.f32 %v1221_v44, %v1576_v27 }
 0x42c   : > { %1223 = vst.msk [vmem:[%s436_s28] sm:$0xf] %vm1219_vm0, %v1222_v45 }
 0x464   : > { %v1179_v47 = vpop.permute.xlu1 %1178 }
 0x465   : > { %v1181_v48 = vsel %vm600_vm2, 0.0, %v1179_v47 }
 0x466   : > { %v1182_v50 = vadd.f32 %v1181_v48, %v1108_v35 }
 0x468   : > { %v1183_v51 = vadd.f32 %v1182_v50, %v1173_v49 }
 0x46a   : > { %v1189_v52 = vadd.f32 %v1187_v42, %v1183_v51 }
 0x46c   : > { %v1217_v53 = vmul.f32 0.1, %v1189_v52 }
 0x46e   : > { %v1218_v54 = vadd.f32 %v1217_v53, %v1596_v46 }
 0x470   : > { %1220 = vst.msk [vmem:[%s432_s29] sm:$0xf] %vm1219_vm0, %v1218_v54 }
 0x471 PF: > { %s23_s21 = sadd.s32 1, %s1432_s21  }
 0x472   : > { %p20_p4 = scmp.ge.s32.totalorder %s23_s21, 4  }
 0x474   :  { %22 = sbr.rel (!%p20_p4) target bundleno = 1 (0x1), region = 119 }

// kernel: decoder_forward.11
= control target key start
LH: loop header
LB: loop body
LE: loop exit
PB: predicated region body
PF: predicated region fallthrough
CT: control target
= control target key end

     0   :  { %s1399_s29 = smov 0   ;;  %s1571_s0 = inlined_call_operand.vmem [shape: f32[2,4,16], index: 0, kind: input, shape index: {}]   ;;  %s1572_s1 = inlined_call_operand.vmem [shape: f32[2,4,16], index: 1, kind: input, shape index: {}]   ;;  %s1573_s2 = inlined_call_operand.vmem [shape: f32[3,4,4], index: 2, kind: input, shape index: {}]   ;;  %s1574_s3 = inlined_call_operand.vmem [shape: f32[4,1], index: 3, kind: input, shape index: {}]   ;;  %s1575_s4 = inlined_call_operand.vmem [shape: f32[3,4,4], index: 4, kind: input, shape index: {}]   ;;  %s1576_s5 = inlined_call_operand.vmem [shape: f32[4,1], index: 5, kind: input, shape index: {}]   ;;  %s1577_s6 = inlined_call_operand.vmem [shape: f32[3,4,4], index: 6, kind: input, shape index: {}]   ;;  %s1578_s7 = inlined_call_operand.vmem [shape: f32[4,1], index: 7, kind: input, shape index: {}]   ;;  %s1579_s8 = inlined_call_operand.vmem [shape: f32[3,4,4], index: 8, kind: input, shape index: {}]   ;;  %s1580_s9 = inlined_call_operand.vmem [shape: f32[4,1], index: 9, kind: input, shape index: {}]   ;;  %s1581_s10 = inlined_call_operand.vmem [shape: f32[3,4,4], index: 10, kind: input, shape index: {}]   ;;  %s1582_s11 = inlined_call_operand.vmem [shape: f32[4,1], index: 11, kind: input, shape index: {}]   ;;  %s1583_s12 = inlined_call_operand.vmem [shape: f32[3,4,4], index: 12, kind: input, shape index: {}]   ;;  %s1584_s13 = inlined_call_operand.vmem [shape: f32[4,1], index: 13, kind: input, shape index: {}]   ;;  %s1585_s14 = inlined_call_operand.vmem [shape: f32[2,4,16], index: 14, kind: output, shape index: {}]  }
   0x1 LB: > { %s1219_s30 = sadd.s32 4294967295, %s1319_s29   ;;  %p1223_p0 = scmp.ge.s32.totalorder %s1319_s29, 1  ;;  %s1319_s29 = sphi %s1399_s29, %s24_s29  }
   0x2   : > { %p420_p1 = scmp.lt.s32.totalorder %s1319_s29, 3 }
   0x4   : > { %p421_p2 = pnand %p1223_p0, %p420_p1 }
   0x5   : > { %p468_p3 = scmp.lt.s32.totalorder (!%p421_p2), %s1219_s30, 1  ;;  %s1321_s19 = smov (!%p421_p2), 127  }
   0x6   : > { %424 = sbr.rel (%p421_p2) target bundleno = 1428 (0x594), region = 76  ;;  %s1322_s20 = smov (!%p421_p2), 1  }
   0xb   : > { %s1587_s30 = smov (!%p468_p3, %s1219_s30), 1  ;;  %vm494_vm0 = vcmask 1043456   ;;  %vm490_vm1 = vcmask 31744   ;;  %v1227_v1 = vld [vmem:[%s1573_s2 + $0x4] sm:$0xf]  ;;  %v1323_v3 = vmov 0  }
   0xc   : > { %s1407_s15 = sshll.u32 %s1587_s30, 2  ;;  %v577_v2 = vld [vmem:[%s1574_s3] sm:$0xf]  ;;  %1292 = vset.pattern.permute.xlu1 %v1323_v3  ;;  %1293 = vset.pattern.permute.xlu2 %v1323_v3  ;;  %vm548_vm2 = vcmask 121856   ;;  %v1232_v5 = vld [vmem:[%s1573_s2 + $0x8] sm:$0xf] }
   0xd   : > { %s471_s18 = scalar_lea.vmem %s1571_s0, %s1407_s15  ;;  %580 = vperm.xlu1 %1292, %v577_v2   ;;  %1294 = vset.pattern.permute.xlu0 %v1323_v3  ;;  %vm486_vm3 = vcmask 7168   ;;  %v481_v8 = vld [vmem:[%s1573_s2] sm:$0xf]  ;;  %v1236_v32 = vld [vmem:[%s1575_s4 + $0x4] sm:$0xf]  ;;  %s475_s21 = scalar_lea.vmem %s1572_s1, %s1407_s15 }
   0xe   : > { %v1413_v0 = vld [vmem:[%s471_s18] sm:$0xf]  ;;  %v1241_v34 = vld [vmem:[%s1575_s4 + $0x8] sm:$0xf]  ;;  %v1245_v2 = vld [vmem:[%s1577_s6 + $0x4] sm:$0xf]  ;;  %s479_s24 = scalar_lea.vmem %s1585_s14, %s1407_s15 }
   0xf   : > { %545 = vrot.lane.b32.xlu0 %v1413_v0, %s1321_s19  ;;  %1228 = vmatpush.msk.msra.mxu0 %vm494_vm0, %v1413_v0  ;;  %v899_v31 = vld [vmem:[%s1580_s9] sm:$0xf] }
  0x10   : > { %1229 = vmatmul.msk.f32.vlgmr.msra.gmra.mxu0 %vm490_vm1, %v1227_v1  ;;  %v696_v35 = vld [vmem:[%s1576_s5] sm:$0xf] }
  0x11   : > { %v604_v38 = vld [vmem:[%s1575_s4] sm:$0xf] }
  0x12   : > { %v1018_v63 = vld [vmem:[%s1582_s11] sm:$0xf] }
  0x13   : > { %v1139_v1 = vld [vmem:[%s1584_s13] sm:$0xf] }
  0x14   : > { %v824_v3 = vld [vmem:[%s1579_s8] sm:$0xf] }
  0x17   : > { %483 = vrot.lane.b32.xlu0 %v1413_v0, %s1322_s20 }
  0x7f   : > { %v581_v14 = vpop.permute.xlu1 %580 }
  0x81   : > { %v546_v4 = vpop.permute.xlu0 %545 }
  0x82   : > { %v1432_v6 = vsel %vm548_vm2, %v546_v4, 0.0 }
  0x83   : > { %1233 = vmatpush.msk.msra.mxu2 %vm494_vm0, %v1432_v6 }
  0x84   : > { %1234 = vmatmul.msk.f32.vlgmr.msra.gmra.mxu2 %vm490_vm1, %v1232_v5  ;;  %v1250_v5 = vld [vmem:[%s1577_s6 + $0x8] sm:$0xf] }
  0x89   : > { %v484_v7 = vpop.permute.xlu0 %483 }
  0x8a   : > { %v1441_v9 = vsel %vm486_vm3, 0.0, %v484_v7 }
  0x8b   : > { %1230 = vmatpush.msk.msra.mxu1 %vm494_vm0, %v1441_v9 }
  0x8c   : > { %1231 = vmatmul.msk.f32.vlgmr.msra.gmra.mxu1 %vm490_vm1, %v481_v8  ;;  %v1253_v8 = vld [vmem:[%s1579_s8 + $0x4] sm:$0xf] }
  0x8d   : > { %v514_v10 = vpop.f32.mrf.mxu0 }
 0x107   : > { %v573_v12 = vpop.f32.mrf.mxu2 }
 0x109   : > { %v540_v11 = vpop.f32.mrf.mxu1 }
 0x10a   : > { %v541_v13 = vadd.f32 %v540_v11, %v514_v10  ;;  %v725_v10 = vld [vmem:[%s1577_s6] sm:$0xf] }
 0x10c   : > { %v576_v15 = vadd.f32 %v573_v12, %v541_v13  ;;  %v1258_v12 = vld [vmem:[%s1579_s8 + $0x8] sm:$0xf] }
 0x10e   : > { %v583_v16 = vadd.f32 %v581_v14, %v576_v15 }
 0x110   : > { %v1235_v17 = vmul.f32 -1.442695, %v583_v16 }
 0x112   : > { %1295 = vpow2.f32 %v1235_v17 }
 0x118   : > { %v1296_v18 = vpop.eup %1295 }
 0x119   : > { %v587_v19 = vadd.f32 1.0, %v1296_v18 }
 0x11b   : > { %1297 = vrcp.f32 %v587_v19  ;;  %v599_v23 = vand.u32 2147483648, %v587_v19  ;;  %v597_v25 = vand.u32 2147483647, %v587_v19  ;;  %vm593_vm5 = vweird.f32 %v587_v19 }
 0x11d   : > { %v600_v27 = vor.u32 1.1754944e-38, %v599_v23  ;;  %vm598_vm7 = vcmp.eq.f32.partialorder %v597_v25, 8.507059e+37 }
 0x121   : > { %v1298_v20 = vpop.eup %1297 }
 0x122   : > { %v589_v21 = vmul.f32 %v1298_v20, %v587_v19  ;;  %vm594_vm4 = vweird.f32 %v1298_v20 }
 0x123   : > { %vm595_vm6 = vmor %vm593_vm5, %vm594_vm4 }
 0x124   : > { %v590_v22 = vsub.f32 1.0, %v589_v21 }
 0x126   : > { %v591_v24 = vmul.f32 %v1298_v20, %v590_v22 }
 0x128   : > { %v592_v26 = vadd.f32 %v1298_v20, %v591_v24 }
 0x12a   : > { %v596_v28 = vsel %vm595_vm6, %v1298_v20, %v592_v26 }
 0x12b   : > { %v601_v29 = vsel %vm598_vm7, %v600_v27, %v596_v28 }
 0x12c   : > { %v603_v30 = vmul.f32 %v601_v29, %v583_v16 }
 0x12e   : > { %665 = vrot.lane.b32.xlu2 %v603_v30, %s1321_s19  ;;  %606 = vrot.lane.b32.xlu1 %v603_v30, %s1322_s20 }
 0x12f   : > { %1237 = vmatpush.msk.msra.mxu3 %vm494_vm0, %v603_v30 }
 0x130   : > { %1238 = vmatmul.msk.f32.vlgmr.msra.gmra.mxu3 %vm490_vm1, %v1236_v32 }
 0x136   : > { %902 = vperm.xlu1 %1292, %v899_v31   ;;  %699 = vperm.xlu2 %1293, %v696_v35  }
 0x188   : > { %v666_v33 = vpop.permute.xlu2 %665 }
 0x189   : > { %v668_v36 = vsel %vm548_vm2, %v666_v33, 0.0 }
 0x18a   : > { %1242 = vmatpush.msk.msrb.mxu1 %vm494_vm0, %v668_v36  ;;  %v1262_v36 = vld [vmem:[%s1581_s10 + $0x4] sm:$0xf] }
 0x18b   : > { %1243 = vmatmul.msk.f32.vlgmr.msrb.gmra.mxu1 %vm490_vm1, %v1241_v34 }
 0x18c   : > { %1254 = vmatpush.msk.msra.mxu1 %vm494_vm0, %v1413_v0 }
 0x190   : > { %v700_v44 = vpop.permute.xlu2 %699 }
 0x193   : > { %1255 = vmatmul.msk.f32.vlgmr.msra.gmra.mxu1 %vm490_vm1, %v1253_v8  ;;  %v1047_v8 = vld [vmem:[%s1583_s12] sm:$0xf] }
 0x1a0   : > { %v607_v37 = vpop.permute.xlu1 %606 }
 0x1a1   : > { %v609_v39 = vsel %vm486_vm3, 0.0, %v607_v37 }
 0x1a2   : > { %1239 = vmatpush.msk.msrb.mxu0 %vm494_vm0, %v609_v39  ;;  %v1267_v39 = vld [vmem:[%s1581_s10 + $0x8] sm:$0xf] }
 0x1a3   : > { %1240 = vmatmul.msk.f32.vlgmr.msrb.gmra.mxu0 %vm490_vm1, %v604_v38 }
 0x1a8   : > { %v903_v21 = vpop.permute.xlu1 %902 }
 0x1b3   : > { %v634_v40 = vpop.f32.mrf.mxu3 }
 0x208   : > { %v692_v42 = vpop.f32.mrf.mxu1 }
 0x210   : > { %v847_v16 = vpop.f32.mrf.mxu1 }
 0x220   : > { %v660_v41 = vpop.f32.mrf.mxu0 }
 0x221   : > { %v661_v43 = vadd.f32 %v660_v41, %v634_v40  ;;  %v926_v40 = vld [vmem:[%s1581_s10] sm:$0xf] }
 0x223   : > { %v695_v45 = vadd.f32 %v692_v42, %v661_v43 }
 0x225   : > { %v702_v46 = vadd.f32 %v700_v44, %v695_v45 }
 0x227   : > { %v703_v47 = vmul.f32 0.1, %v702_v46 }
 0x229   : > { %v704_v48 = vadd.f32 %v703_v47, %v1413_v0 }
 0x22b   : > { %v1244_v49 = vmul.f32 -1.442695, %v704_v48 }
 0x22d   : > { %1299 = vpow2.f32 %v1244_v49 }
 0x233   : > { %v1300_v50 = vpop.eup %1299 }
 0x234   : > { %v708_v51 = vadd.f32 1.0, %v1300_v50 }
 0x236   : > { %1301 = vrcp.f32 %v708_v51  ;;  %v720_v55 = vand.u32 2147483648, %v708_v51  ;;  %v718_v57 = vand.u32 2147483647, %v708_v51  ;;  %vm714_vm9 = vweird.f32 %v708_v51 }
 0x238   : > { %v721_v59 = vor.u32 1.1754944e-38, %v720_v55  ;;  %vm719_vm11 = vcmp.eq.f32.partialorder %v718_v57, 8.507059e+37 }
 0x23c   : > { %v1302_v52 = vpop.eup %1301 }
 0x23d   : > { %v710_v53 = vmul.f32 %v1302_v52, %v708_v51  ;;  %vm715_vm8 = vweird.f32 %v1302_v52 }
 0x23e   : > { %vm716_vm10 = vmor %vm714_vm9, %vm715_vm8 }
 0x23f   : > { %v711_v54 = vsub.f32 1.0, %v710_v53 }
 0x241   : > { %v712_v56 = vmul.f32 %v1302_v52, %v711_v54 }
 0x243   : > { %v713_v58 = vadd.f32 %v1302_v52, %v712_v56 }
 0x245   : > { %v717_v60 = vsel %vm716_vm10, %v1302_v52, %v713_v58 }
 0x246   : > { %v722_v61 = vsel %vm719_vm11, %v721_v59, %v717_v60 }
 0x247   : > { %v724_v62 = vmul.f32 %v722_v61, %v704_v48 }
 0x249   : > { %786 = vrot.lane.b32.xlu2 %v724_v62, %s1321_s19  ;;  %727 = vrot.lane.b32.xlu0 %v724_v62, %s1322_s20 }
 0x24a   : > { %1246 = vmatpush.msk.msrb.mxu2 %vm494_vm0, %v724_v62 }
 0x24b   : > { %1247 = vmatmul.msk.f32.vlgmr.msrb.gmra.mxu2 %vm490_vm1, %v1245_v2 }
 0x24c   : > { %1256 = vmatpush.msk.msra.mxu2 %vm494_vm0, %v1441_v9 }
 0x251   : > { %1021 = vperm.xlu2 %1293, %v1018_v63  }
 0x253   : > { %1257 = vmatmul.msk.f32.vlgmr.msra.gmra.mxu2 %vm490_vm1, %v824_v3  ;;  %v1271_v3 = vld [vmem:[%s1583_s12 + $0x4] sm:$0xf] }
 0x259   : > { %1142 = vperm.xlu2 %1293, %v1139_v1  }
 0x2a3   : > { %v787_v4 = vpop.permute.xlu2 %786 }
 0x2a4   : > { %v789_v7 = vsel %vm548_vm2, %v787_v4, 0.0  ;;  %v817_v4 = vld [vmem:[%s1578_s7] sm:$0xf] }
 0x2a5   : > { %1251 = vmatpush.msk.msra.mxu0 %vm494_vm0, %v789_v7 }
 0x2a6   : > { %1252 = vmatmul.msk.f32.vlgmr.msra.gmra.mxu0 %vm490_vm1, %v1250_v5 }
 0x2ab   : > { %v1022_v49 = vpop.permute.xlu2 %1021 }
 0x2bb   : > { %v728_v9 = vpop.permute.xlu0 %727 }
 0x2bc   : > { %v730_v11 = vsel %vm486_vm3, 0.0, %v728_v9  ;;  %v1276_v9 = vld [vmem:[%s1583_s12 + $0x8] sm:$0xf] }
 0x2bd   : > { %1248 = vmatpush.msk.msrb.mxu3 %vm494_vm0, %v730_v11 }
 0x2be   : > { %1249 = vmatmul.msk.f32.vlgmr.msrb.gmra.mxu3 %vm490_vm1, %v725_v10 }
 0x2bf   : > { %1259 = vmatpush.msk.msra.mxu3 %vm494_vm0, %v1432_v6 }
 0x2c6   : > { %1260 = vmatmul.msk.f32.vlgmr.msra.gmra.mxu3 %vm490_vm1, %v1258_v12 }
 0x2ce   : > { %v755_v13 = vpop.f32.mrf.mxu2 }
 0x2d6   : > { %v870_v17 = vpop.f32.mrf.mxu2 }
 0x2d7   : > { %v871_v18 = vadd.f32 %v870_v17, %v847_v16 }
 0x323   : > { %v813_v43 = vpop.f32.mrf.mxu0 }
 0x341   : > { %v781_v14 = vpop.f32.mrf.mxu3 }
 0x342   : > { %v1515_v15 = vadd.f32 %v781_v14, %v755_v13 }
 0x349   : > { %v895_v19 = vpop.f32.mrf.mxu3 }
 0x34a   : > { %v898_v20 = vadd.f32 %v895_v19, %v871_v18  ;;  %v1143_v18 = vpop.permute.xlu2 %1142 }
 0x34c   : > { %v905_v22 = vadd.f32 %v903_v21, %v898_v20 }
 0x34e   : > { %v1261_v23 = vmul.f32 -1.442695, %v905_v22 }
 0x350   : > { %1303 = vpow2.f32 %v1261_v23  ;;  %v1149_v23 = vld [vmem:[%s475_s21] sm:$0xf] }
 0x356   : > { %v1304_v6 = vpop.eup %1303 }
 0x357   : > { %v909_v24 = vadd.f32 1.0, %v1304_v6  ;;  %v816_v6 = vadd.f32 %v813_v43, %v1515_v15 }
 0x359   : > { %1305 = vrcp.f32 %v909_v24  ;;  %v921_v28 = vand.u32 2147483648, %v909_v24  ;;  %v919_v30 = vand.u32 2147483647, %v909_v24  ;;  %vm915_vm13 = vweird.f32 %v909_v24 }
 0x35b   : > { %v922_v32 = vor.u32 1.1754944e-38, %v921_v28  ;;  %vm920_vm15 = vcmp.eq.f32.partialorder %v919_v30, 8.507059e+37 }
 0x35f   : > { %v1306_v25 = vpop.eup %1305 }
 0x360   : > { %v911_v26 = vmul.f32 %v1306_v25, %v909_v24  ;;  %vm916_vm12 = vweird.f32 %v1306_v25 }
 0x361   : > { %vm917_vm14 = vmor %vm915_vm13, %vm916_vm12 }
 0x362   : > { %v912_v27 = vsub.f32 1.0, %v911_v26 }
 0x364   : > { %v913_v29 = vmul.f32 %v1306_v25, %v912_v27 }
 0x366   : > { %v914_v31 = vadd.f32 %v1306_v25, %v913_v29 }
 0x368   : > { %v918_v33 = vsel %vm917_vm14, %v1306_v25, %v914_v31 }
 0x369   : > { %v923_v34 = vsel %vm920_vm15, %v922_v32, %v918_v33 }
 0x36a   : > { %v925_v35 = vmul.f32 %v923_v34, %v905_v22 }
 0x36c   : > { %928 = vrot.lane.b32.xlu1 %v925_v35, %s1322_s20  ;;  %987 = vrot.lane.b32.xlu0 %v925_v35, %s1321_s19 }
 0x36d   : > { %1263 = vmatpush.msk.msrb.mxu0 %vm494_vm0, %v925_v35 }
 0x36e   : > { %1264 = vmatmul.msk.f32.vlgmr.msrb.gmra.mxu0 %vm490_vm1, %v1262_v36 }
 0x3de   : > { %v929_v37 = vpop.permute.xlu1 %928  ;;  %v988_v38 = vpop.permute.xlu0 %987 }
 0x3df   : > { %v931_v41 = vsel %vm486_vm3, 0.0, %v929_v37  ;;  %v990_v42 = vsel %vm548_vm2, %v988_v38, 0.0 }
 0x3e0   : > { %1265 = vmatpush.msk.msrb.mxu1 %vm494_vm0, %v931_v41  ;;  %1268 = vmatpush.msk.msrb.mxu2 %vm494_vm0, %v990_v42 }
 0x3e1   : > { %1269 = vmatmul.msk.f32.vlgmr.msrb.gmra.mxu2 %vm490_vm1, %v1267_v39  ;;  %1266 = vmatmul.msk.f32.vlgmr.msrb.gmra.mxu1 %vm490_vm1, %v926_v40 }
 0x3eb   : > { %v956_v44 = vpop.f32.mrf.mxu0 }
 0x45e   : > { %v982_v45 = vpop.f32.mrf.mxu1 }
 0x45f   : > { %v983_v46 = vadd.f32 %v982_v45, %v956_v44 }
 0x464   : > { %v1014_v47 = vpop.f32.mrf.mxu2 }
 0x465   : > { %v1017_v48 = vadd.f32 %v1014_v47, %v983_v46 }
 0x467   : > { %v1024_v50 = vadd.f32 %v1022_v49, %v1017_v48 }
 0x469   : > { %v1025_v51 = vmul.f32 0.1, %v1024_v50 }
 0x46b   : > { %v1026_v52 = vadd.f32 %v1025_v51, %v1413_v0 }
 0x46d   : > { %v1270_v53 = vmul.f32 -1.442695, %v1026_v52 }
 0x46f   : > { %1307 = vpow2.f32 %v1270_v53 }
 0x475   : > { %v1308_v54 = vpop.eup %1307 }
 0x476   : > { %v1030_v55 = vadd.f32 1.0, %v1308_v54 }
 0x478   : > { %1309 = vrcp.f32 %v1030_v55  ;;  %v1042_v59 = vand.u32 2147483648, %v1030_v55  ;;  %v1040_v61 = vand.u32 2147483647, %v1030_v55  ;;  %vm1036_vm5 = vweird.f32 %v1030_v55 }
 0x47a   : > { %v1043_v63 = vor.u32 1.1754944e-38, %v1042_v59  ;;  %vm1041_vm7 = vcmp.eq.f32.partialorder %v1040_v61, 8.507059e+37 }
 0x47e   : > { %v1310_v56 = vpop.eup %1309 }
 0x47f   : > { %v1032_v57 = vmul.f32 %v1310_v56, %v1030_v55  ;;  %vm1037_vm4 = vweird.f32 %v1310_v56 }
 0x480   : > { %vm1038_vm6 = vmor %vm1036_vm5, %vm1037_vm4 }
 0x481   : > { %v1033_v58 = vsub.f32 1.0, %v1032_v57 }
 0x483   : > { %v1034_v60 = vmul.f32 %v1310_v56, %v1033_v58 }
 0x485   : > { %v1035_v62 = vadd.f32 %v1310_v56, %v1034_v60 }
 0x487   : > { %v1039_v1 = vsel %vm1038_vm6, %v1310_v56, %v1035_v62 }
 0x488   : > { %v1044_v2 = vsel %vm1041_vm7, %v1043_v63, %v1039_v1 }
 0x489   : > { %v1046_v0 = vmul.f32 %v1044_v2, %v1026_v52 }
 0x48b   : > { %1108 = vrot.lane.b32.xlu1 %v1046_v0, %s1321_s19  ;;  %1049 = vrot.lane.b32.xlu0 %v1046_v0, %s1322_s20 }
 0x48c   : > { %1272 = vmatpush.msk.msrb.mxu3 %vm494_vm0, %v1046_v0 }
 0x48d   : > { %1273 = vmatmul.msk.f32.vlgmr.msrb.gmra.mxu3 %vm490_vm1, %v1271_v3 }
 0x493   : > { %820 = vperm.xlu0 %1294, %v817_v4  }
 0x4fd   : > { %v1109_v5 = vpop.permute.xlu1 %1108  ;;  %v1050_v7 = vpop.permute.xlu0 %1049 }
 0x4fe   : > { %v1111_v10 = vsel %vm548_vm2, %v1109_v5, 0.0  ;;  %v1052_v11 = vsel %vm486_vm3, 0.0, %v1050_v7 }
 0x4ff   : > { %1274 = vmatpush.msk.msra.mxu0 %vm494_vm0, %v1052_v11  ;;  %1277 = vmatpush.msk.msra.mxu1 %vm494_vm0, %v1111_v10  ;;  %vm1152_vm0 = vcmask 125952  }
 0x500   : > { %1275 = vmatmul.msk.f32.vlgmr.msra.gmra.mxu0 %vm490_vm1, %v1047_v8  ;;  %1278 = vmatmul.msk.f32.vlgmr.msra.gmra.mxu1 %vm490_vm1, %v1276_v9 }
 0x505   : > { %v821_v22 = vpop.permute.xlu0 %820 }
 0x506   : > { %v823_v25 = vadd.f32 %v821_v22, %v816_v6 }
 0x510   : > { %v1077_v12 = vpop.f32.mrf.mxu3 }
 0x57d   : > { %v1103_v13 = vpop.f32.mrf.mxu0  ;;  %v1135_v14 = vpop.f32.mrf.mxu1 }
 0x57e   : > { %v1104_v16 = vadd.f32 %v1103_v13, %v1077_v12 }
 0x580   : > { %v1138_v17 = vadd.f32 %v1135_v14, %v1104_v16 }
 0x582   : > { %v1145_v19 = vadd.f32 %v1143_v18, %v1138_v17 }
 0x584   : > { %v1146_v20 = vmul.f32 0.5, %v1145_v19 }
 0x586   : > { %v1147_v21 = vmul.f32 1.442695, %v1146_v20 }
 0x588   : > { %1311 = vpow2.f32 %v1147_v21 }
 0x58e   : > { %v1312_v24 = vpop.eup %1311 }
 0x58f   : > { %v1150_v26 = vmul.f32 %v1312_v24, %v1149_v23 }
 0x591   : > { %v1151_v27 = vadd.f32 %v1150_v26, %v823_v25 }
 0x593   : > { %1153 = vst.msk [vmem:[%s479_s24] sm:$0xf] %vm1152_vm0, %v1151_v27 }
 0x594 PF: > { %s24_s29 = sadd.s32 1, %s1319_s29  }
 0x595   : > { %p21_p4 = scmp.ge.s32.totalorder %s24_s29, 4  }
 0x597   :  { %23 = sbr.rel (!%p21_p4) target bundleno = 1 (0x1), region = 121 }

// kernel: decoder_forward.12
= control target key start
LH: loop header
LB: loop body
LE: loop exit
PB: predicated region body
PF: predicated region fallthrough
CT: control target
= control target key end

     0   :  { %s1502_s21 = smov 0   ;;  %s1652_s0 = inlined_call_operand.vmem [shape: f32[2,4,16], index: 0, kind: input, shape index: {}]   ;;  %s1653_s1 = inlined_call_operand.vmem [shape: f32[2,4,16], index: 1, kind: input, shape index: {}]   ;;  %s1654_s2 = inlined_call_operand.vmem [shape: f32[3,8,4], index: 2, kind: input, shape index: {}]   ;;  %s1655_s3 = inlined_call_operand.vmem [shape: f32[3,8,4], index: 3, kind: input, shape index: {}]   ;;  %s1656_s4 = inlined_call_operand.vmem [shape: f32[8,1], index: 4, kind: input, shape index: {}]   ;;  %s1657_s5 = inlined_call_operand.vmem [shape: f32[3,4,8], index: 5, kind: input, shape index: {}]   ;;  %s1658_s6 = inlined_call_operand.vmem [shape: f32[4,1], index: 6, kind: input, shape index: {}]   ;;  %s1659_s7 = inlined_call_operand.vmem [shape: f32[3,4,4], index: 7, kind: input, shape index: {}]   ;;  %s1660_s8 = inlined_call_operand.vmem [shape: f32[4,1], index: 8, kind: input, shape index: {}]   ;;  %s1661_s9 = inlined_call_operand.vmem [shape: f32[3,4,4], index: 9, kind: input, shape index: {}]   ;;  %s1662_s10 = inlined_call_operand.vmem [shape: f32[4,1], index: 10, kind: input, shape index: {}]   ;;  %s1663_s11 = inlined_call_operand.vmem [shape: f32[2,4,16], index: 11, kind: output, shape index: {0}]   ;;  %s1664_s12 = inlined_call_operand.vmem [shape: f32[2,4,16], index: 12, kind: output, shape index: {1}]  }
   0x1 LB: > { %s1320_s22 = sadd.s32 4294967295, %s1432_s21   ;;  %p1324_p0 = scmp.ge.s32.totalorder %s1432_s21, 1  ;;  %s1432_s21 = sphi %s1502_s21, %s23_s21  }
   0x2   : > { %p373_p1 = scmp.lt.s32.totalorder %s1432_s21, 3 }
   0x4   : > { %p374_p2 = pnand %p1324_p0, %p373_p1 }
   0x5   : > { %p421_p3 = scmp.lt.s32.totalorder (!%p374_p2), %s1320_s22, 1  ;;  %s1436_s27 = smov (!%p374_p2), 127  }
   0x6   : > { %377 = sbr.rel (%p374_p2) target bundleno = 1137 (0x471), region = 64 }
   0xb   : > { %s1666_s22 = smov (!%p421_p3, %s1320_s22), 1  ;;  %vm445_vm0 = vcmask 1043456   ;;  %v440_v1 = vld [vmem:[%s1655_s3] sm:$0xff]  ;;  %vm441_vm1 = vcmask 31744   ;;  %v1334_v4 = vld [vmem:[%s1655_s3 + $0x8] sm:$0xff]  ;;  %v1340_v6 = vld [vmem:[%s1655_s3 + $0x10] sm:$0xff] }
   0xc   : > { %s1510_s23 = sshll.u32 %s1666_s22, 2  ;;  %v439_v2 = vld [vmem:[%s1654_s2] sm:$0xff]  ;;  %v1333_v5 = vld [vmem:[%s1654_s2 + $0x8] sm:$0xff]  ;;  %v1339_v7 = vld [vmem:[%s1654_s2 + $0x10] sm:$0xff]  ;;  %v1434_v8 = vmov 0   ;;  %vm600_vm2 = vcmask 7168  }
   0xd   : > { %s428_s26 = scalar_lea.vmem %s1653_s1, %s1510_s23  ;;  %s424_s29 = scalar_lea.vmem %s1652_s0, %s1510_s23  ;;  %1400 = vset.pattern.permute.xlu0 %v1434_v8  ;;  %1401 = vset.pattern.permute.xlu2 %v1434_v8  ;;  %v595_v15 = vld [vmem:[%s1656_s4] sm:$0xff]  ;;  %vm635_vm3 = vcmask 121856   ;;  %vm660_vm12 = vcmask 64512   ;;  %v1351_v60 = vld [vmem:[%s1657_s5 + $0x8] sm:$0xf] }
   0xe   : > { %v438_v0 = vld [vmem:[%s428_s26] sm:$0xf]  ;;  %s1435_s26 = smov 1   ;;  %v1348_v61 = vld [vmem:[%s1657_s5 + $0x4] sm:$0xf]  ;;  %s436_s28 = scalar_lea.vmem %s1664_s12, %s1510_s23 }
   0xf   : > { %1329 = vmatpush.msk.msra.mxu0 %vm445_vm0, %v438_v0  ;;  %v437_v3 = vld [vmem:[%s424_s29] sm:$0xf]  ;;  %1335 = vmatpush.msk.msra.mxu2 %vm445_vm0, %v438_v0  ;;  %s432_s29 = scalar_lea.vmem %s1663_s11, %s1510_s23 }
  0x10   : > { %1331 = vmatpush.msk.msra.mxu1 %vm445_vm0, %v437_v3  ;;  %1337 = vmatpush.msk.msra.mxu3 %vm445_vm0, %v437_v3  ;;  %v774_v36 = vld [vmem:[%s1658_s6] sm:$0xf] }
  0x11   : > { %1330 = vmatmul.msk.f32.vlgmr.msra.gmra.mxu0 %vm441_vm1, %v440_v1  ;;  %1332 = vmatmul.msk.f32.vlgmr.msra.gmra.mxu1 %vm441_vm1, %v439_v2  ;;  %v659_v59 = vld [vmem:[%s1657_s5] sm:$0xf] }
  0x12   : > { %1336 = vmatmul.msk.f32.vlgmr.msra.gmra.mxu2 %vm441_vm1, %v1334_v4  ;;  %1338 = vmatmul.msk.f32.vlgmr.msra.gmra.mxu3 %vm441_vm1, %v1333_v5 }
  0x13   : > { %1341 = vmatpush.msk.msrb.mxu0 %vm445_vm0, %v438_v0  ;;  %1343 = vmatpush.msk.msrb.mxu1 %vm445_vm0, %v437_v3  ;;  %v975_v0 = vld [vmem:[%s1660_s8] sm:$0xf] }
  0x14   : > { %784 = vperm.xlu2 %1401, %v774_v36  }
  0x19   : > { %1342 = vmatmul.msk.f32.vlgmr.msrb.gmra.mxu0 %vm441_vm1, %v1340_v6  ;;  %1344 = vmatmul.msk.f32.vlgmr.msrb.gmra.mxu1 %vm441_vm1, %v1339_v7 }
  0x6e   : > { %v785_v2 = vpop.permute.xlu2 %784 }
  0x8e   : > { %v466_v9 = vpop.f32.mrf.mxu0  ;;  %v492_v10 = vpop.f32.mrf.mxu1 }
  0x8f   : > { %v493_v11 = vadd.f32 %v492_v10, %v466_v9 }
  0x91   : > { %597 = vrot.lane.b32.xlu1 %v493_v11, %s1435_s26 }
  0x95   : > { %v519_v17 = vpop.f32.mrf.mxu2  ;;  %v542_v18 = vpop.f32.mrf.mxu3 }
  0x96   : > { %v569_v12 = vpop.f32.mrf.mxu0  ;;  %v592_v13 = vpop.f32.mrf.mxu1  ;;  %v543_v21 = vadd.f32 %v542_v18, %v519_v17 }
  0x97   : > { %v593_v14 = vadd.f32 %v592_v13, %v569_v12 }
  0x98   : > { %v630_v24 = vadd.f32 %v543_v21, %v493_v11 }
  0x99   : > { %632 = vrot.lane.b32.xlu0 %v593_v14, %s1436_s27 }
  0xa1   : > { %606 = vperm.xlu0 %1400, %v595_v15  }
 0x103   : > { %v598_v16 = vpop.permute.xlu1 %597 }
 0x104   : > { %v601_v19 = vsel %vm600_vm2, 0.0, %v598_v16 }
 0x105   : > { %v602_v22 = vadd.f32 %v601_v19, %v543_v21 }
 0x107   : > { %v603_v25 = vadd.f32 %v602_v22, %v593_v14 }
 0x10b   : > { %v633_v20 = vpop.permute.xlu0 %632 }
 0x10c   : > { %v636_v23 = vsel %vm635_vm3, %v633_v20, 0.0 }
 0x10d   : > { %v637_v26 = vadd.f32 %v636_v23, %v630_v24 }
 0x113   : > { %v607_v27 = vpop.permute.xlu0 %606 }
 0x114   : > { %v609_v28 = vadd.f32 %v607_v27, %v603_v25  ;;  %v638_v29 = vadd.f32 %v637_v26, %v607_v27 }
 0x116   : > { %v1345_v30 = vmul.f32 -1.442695, %v609_v28  ;;  %v1346_v31 = vmul.f32 -1.442695, %v638_v29 }
 0x118   : > { %1402 = vpow2.f32 %v1345_v30 }
 0x119   : > { %1404 = vpow2.f32 %v1346_v31  ;;  %v1359_v31 = vld [vmem:[%s1659_s7 + $0x4] sm:$0xf] }
 0x11e   : > { %v1403_v32 = vpop.eup %1402 }
 0x11f   : > { %v1405_v33 = vpop.eup %1404  ;;  %v613_v34 = vadd.f32 1.0, %v1403_v32 }
 0x120   : > { %v642_v35 = vadd.f32 1.0, %v1405_v33  ;;  %v1364_v33 = vld [vmem:[%s1659_s7 + $0x8] sm:$0xf] }
 0x121   : > { %1406 = vrcp.f32 %v613_v34  ;;  %v625_v42 = vand.u32 2147483648, %v613_v34  ;;  %v623_v45 = vand.u32 2147483647, %v613_v34  ;;  %vm619_vm6 = vweird.f32 %v613_v34 }
 0x122   : > { %1408 = vrcp.f32 %v642_v35  ;;  %v654_v46 = vand.u32 2147483648, %v642_v35  ;;  %v652_v48 = vand.u32 2147483647, %v642_v35  ;;  %vm648_vm8 = vweird.f32 %v642_v35 }
 0x123   : > { %v626_v50 = vor.u32 1.1754944e-38, %v625_v42  ;;  %vm624_vm9 = vcmp.eq.f32.partialorder %v623_v45, 8.507059e+37 }
 0x124   : > { %v655_v53 = vor.u32 1.1754944e-38, %v654_v46  ;;  %vm653_vm11 = vcmp.eq.f32.partialorder %v652_v48, 8.507059e+37  ;;  %v1176_v48 = vld [vmem:[%s1662_s10] sm:$0xf] }
 0x127   : > { %v1407_v37 = vpop.eup %1406 }
 0x128   : > { %v1409_v38 = vpop.eup %1408  ;;  %v615_v39 = vmul.f32 %v1407_v37, %v613_v34  ;;  %vm620_vm4 = vweird.f32 %v1407_v37 }
 0x129   : > { %v644_v40 = vmul.f32 %v1409_v38, %v642_v35  ;;  %vm649_vm5 = vweird.f32 %v1409_v38  ;;  %vm621_vm7 = vmor %vm619_vm6, %vm620_vm4 }
 0x12a   : > { %v616_v41 = vsub.f32 1.0, %v615_v39  ;;  %vm650_vm10 = vmor %vm648_vm8, %vm649_vm5 }
 0x12b   : > { %v645_v43 = vsub.f32 1.0, %v644_v40 }
 0x12c   : > { %v617_v44 = vmul.f32 %v1407_v37, %v616_v41 }
 0x12d   : > { %v646_v47 = vmul.f32 %v1409_v38, %v645_v43 }
 0x12e   : > { %v618_v49 = vadd.f32 %v1407_v37, %v617_v44 }
 0x12f   : > { %v647_v51 = vadd.f32 %v1409_v38, %v646_v47 }
 0x130   : > { %v622_v52 = vsel %vm621_vm7, %v1407_v37, %v618_v49 }
 0x131   : > { %v627_v54 = vsel %vm624_vm9, %v626_v50, %v622_v52  ;;  %v651_v55 = vsel %vm650_vm10, %v1409_v38, %v647_v51 }
 0x132   : > { %v629_v56 = vmul.f32 %v627_v54, %v609_v28  ;;  %v656_v57 = vsel %vm653_vm11, %v655_v53, %v651_v55 }
 0x133   : > { %v658_v58 = vmul.f32 %v656_v57, %v638_v29  ;;  %v855_v29 = vld [vmem:[%s1659_s7] sm:$0xf] }
 0x134   : > { %704 = vmatpush.msrb.mxu3 %v629_v56  ;;  %749 = vmatpush.msra.mxu1 %v629_v56 }
 0x135   : > { %679 = vmatpush.msrb.mxu2 %v658_v58  ;;  %724 = vmatpush.msra.mxu0 %v658_v58 }
 0x136   : > { %1347 = vmatmul.msk.f32.vlgmr.msrb.gmra.mxu2 %vm660_vm12, %v659_v59  ;;  %1352 = vmatmul.msk.f32.vlgmr.msra.gmra.mxu1 %vm660_vm12, %v1351_v60 }
 0x137   : > { %769 = vmatpush.msra.mxu2 %v658_v58  ;;  %803 = vmatpush.msra.mxu3 %v629_v56 }
 0x138   : > { %1349 = vmatmul.msk.f32.vlgmr.msrb.gmra.mxu3 %vm660_vm12, %v1348_v61  ;;  %1350 = vmatmul.msk.f32.vlgmr.msra.gmra.mxu0 %vm660_vm12, %v1348_v61 }
 0x13e   : > { %1353 = vmatmul.msk.f32.vlgmr.msra.gmra.mxu2 %vm660_vm12, %v1351_v60 }
 0x140   : > { %1354 = vmatmul.msk.f32.vlgmr.msra.gmra.mxu3 %vm660_vm12, %v659_v59 }
 0x1b3   : > { %v751_v62 = vpop.f32.mrf.mxu1 }
 0x1b4   : > { %809 = vrot.lane.b32.xlu2 %v751_v62, %s1436_s27 }
 0x1b5   : > { %v726_v3 = vpop.f32.mrf.mxu0 }
 0x1b9   : > { %v681_v63 = vpop.f32.mrf.mxu2 }
 0x1ba   : > { %776 = vrot.lane.b32.xlu1 %v681_v63, %s1435_s26 }
 0x1bb   : > { %v706_v1 = vpop.f32.mrf.mxu3 }
 0x1bc   : > { %985 = vperm.xlu2 %1401, %v975_v0  }
 0x1c1   : > { %v771_v23 = vpop.f32.mrf.mxu2 }
 0x1c3   : > { %v805_v4 = vpop.f32.mrf.mxu3 }
 0x1c4   : > { %v806_v5 = vadd.f32 %v805_v4, %v726_v3 }
 0x20e   : > { %v810_v6 = vpop.permute.xlu2 %809 }
 0x20f   : > { %v812_v7 = vsel %vm635_vm3, %v810_v6, 0.0 }
 0x210   : > { %v813_v8 = vadd.f32 %v812_v7, %v806_v5 }
 0x212   : > { %v814_v9 = vadd.f32 %v813_v8, %v785_v2 }
 0x214   : > { %v1356_v10 = vmul.f32 -1.442695, %v814_v9 }
 0x216   : > { %1410 = vpow2.f32 %v1356_v10  ;;  %v986_v56 = vpop.permute.xlu2 %985 }
 0x21c   : > { %v1411_v11 = vpop.eup %1410 }
 0x21d   : > { %v838_v12 = vadd.f32 1.0, %v1411_v11  ;;  %v1380_v11 = vld [vmem:[%s1661_s9 + $0x8] sm:$0xf] }
 0x21f   : > { %1412 = vrcp.f32 %v838_v12  ;;  %v850_v15 = vand.u32 2147483648, %v838_v12  ;;  %vm844_vm13 = vweird.f32 %v838_v12  ;;  %v848_v17 = vand.u32 2147483647, %v838_v12 }
 0x221   : > { %v851_v19 = vor.u32 1.1754944e-38, %v850_v15  ;;  %vm849_vm4 = vcmp.eq.f32.partialorder %v848_v17, 8.507059e+37  ;;  %v1375_v17 = vld [vmem:[%s1661_s9 + $0x4] sm:$0xf] }
 0x225   : > { %v1413_v13 = vpop.eup %1412 }
 0x226   : > { %v840_v14 = vmul.f32 %v1413_v13, %v838_v12  ;;  %vm845_vm14 = vweird.f32 %v1413_v13 }
 0x227   : > { %vm846_vm15 = vmor %vm844_vm13, %vm845_vm14 }
 0x228   : > { %v841_v16 = vsub.f32 1.0, %v840_v14 }
 0x22a   : > { %v842_v18 = vmul.f32 %v1413_v13, %v841_v16 }
 0x22c   : > { %v843_v20 = vadd.f32 %v1413_v13, %v842_v18  ;;  %v777_v21 = vpop.permute.xlu1 %776 }
 0x22d   : > { %v779_v22 = vsel %vm600_vm2, 0.0, %v777_v21 }
 0x22e   : > { %v847_v24 = vsel %vm846_vm15, %v1413_v13, %v843_v20  ;;  %v780_v25 = vadd.f32 %v779_v22, %v706_v1 }
 0x22f   : > { %v852_v26 = vsel %vm849_vm4, %v851_v19, %v847_v24  ;;  %v1056_v19 = vld [vmem:[%s1661_s9] sm:$0xf] }
 0x230   : > { %v1576_v27 = vmul.f32 %v852_v26, %v814_v9  ;;  %v781_v28 = vadd.f32 %v780_v25, %v771_v23 }
 0x232   : > { %v787_v30 = vadd.f32 %v785_v2, %v781_v28  ;;  %1357 = vmatpush.msk.msrb.mxu0 %vm445_vm0, %v1576_v27  ;;  %1362 = vmatpush.msk.msrb.mxu2 %vm445_vm0, %v1576_v27 }
 0x233   : > { %1358 = vmatmul.msk.f32.vlgmr.msrb.gmra.mxu0 %vm441_vm1, %v855_v29  ;;  %1363 = vmatmul.msk.f32.vlgmr.msrb.gmra.mxu2 %vm441_vm1, %v1359_v31 }
 0x234   : > { %v1355_v32 = vmul.f32 -1.442695, %v787_v30  ;;  %1367 = vmatpush.msk.msra.mxu0 %vm445_vm0, %v1576_v27 }
 0x236   : > { %1414 = vpow2.f32 %v1355_v32 }
 0x23b   : > { %1368 = vmatmul.msk.f32.vlgmr.msra.gmra.mxu0 %vm441_vm1, %v1364_v33 }
 0x23c   : > { %v1415_v34 = vpop.eup %1414 }
 0x23d   : > { %v818_v35 = vadd.f32 1.0, %v1415_v34 }
 0x23f   : > { %1416 = vrcp.f32 %v818_v35  ;;  %v830_v39 = vand.u32 2147483648, %v818_v35  ;;  %v828_v41 = vand.u32 2147483647, %v818_v35  ;;  %vm824_vm6 = vweird.f32 %v818_v35 }
 0x241   : > { %v831_v43 = vor.u32 1.1754944e-38, %v830_v39  ;;  %vm829_vm8 = vcmp.eq.f32.partialorder %v828_v41, 8.507059e+37 }
 0x245   : > { %v1417_v36 = vpop.eup %1416 }
 0x246   : > { %v820_v37 = vmul.f32 %v1417_v36, %v818_v35  ;;  %vm825_vm5 = vweird.f32 %v1417_v36 }
 0x247   : > { %vm826_vm7 = vmor %vm824_vm6, %vm825_vm5 }
 0x248   : > { %v821_v38 = vsub.f32 1.0, %v820_v37 }
 0x24a   : > { %v822_v40 = vmul.f32 %v1417_v36, %v821_v38 }
 0x24c   : > { %v823_v42 = vadd.f32 %v1417_v36, %v822_v40 }
 0x24e   : > { %v827_v44 = vsel %vm826_vm7, %v1417_v36, %v823_v42 }
 0x24f   : > { %v832_v45 = vsel %vm829_vm8, %v831_v43, %v827_v44 }
 0x250   : > { %v1596_v46 = vmul.f32 %v832_v45, %v787_v30 }
 0x252   : > { %1360 = vmatpush.msk.msrb.mxu1 %vm445_vm0, %v1596_v46  ;;  %1365 = vmatpush.msk.msrb.mxu3 %vm445_vm0, %v1596_v46 }
 0x253   : > { %1366 = vmatmul.msk.f32.vlgmr.msrb.gmra.mxu3 %vm441_vm1, %v1364_v33  ;;  %1361 = vmatmul.msk.f32.vlgmr.msrb.gmra.mxu1 %vm441_vm1, %v1359_v31 }
 0x254   : > { %1369 = vmatpush.msk.msra.mxu1 %vm445_vm0, %v1596_v46 }
 0x25b   : > { %1370 = vmatmul.msk.f32.vlgmr.msra.gmra.mxu1 %vm441_vm1, %v855_v29 }
 0x2b0   : > { %v879_v47 = vpop.f32.mrf.mxu0 }
 0x2b1   : > { %977 = vrot.lane.b32.xlu0 %v879_v47, %s1435_s26 }
 0x2b6   : > { %v927_v5 = vpop.f32.mrf.mxu2 }
 0x2b8   : > { %v972_v53 = vpop.f32.mrf.mxu0 }
 0x2b9   : > { %1186 = vperm.xlu0 %1400, %v1176_v48  }
 0x2d0   : > { %v907_v50 = vpop.f32.mrf.mxu1 }
 0x2d6   : > { %v952_v49 = vpop.f32.mrf.mxu3 }
 0x2d7   : > { %1010 = vrot.lane.b32.xlu1 %v952_v49, %s1436_s27 }
 0x2d8   : > { %v1006_v6 = vpop.f32.mrf.mxu1 }
 0x2d9   : > { %v1007_v10 = vadd.f32 %v1006_v6, %v927_v5 }
 0x323   : > { %v978_v51 = vpop.permute.xlu0 %977 }
 0x324   : > { %v980_v52 = vsel %vm600_vm2, 0.0, %v978_v51 }
 0x325   : > { %v981_v54 = vadd.f32 %v980_v52, %v907_v50 }
 0x327   : > { %v982_v55 = vadd.f32 %v981_v54, %v972_v53 }
 0x329   : > { %v988_v57 = vadd.f32 %v986_v56, %v982_v55 }
 0x32b   : > { %v1371_v58 = vmul.f32 -1.442695, %v988_v57  ;;  %v1187_v42 = vpop.permute.xlu0 %1186 }
 0x32d   : > { %1418 = vpow2.f32 %v1371_v58 }
 0x333   : > { %v1419_v59 = vpop.eup %1418 }
 0x334   : > { %v1019_v60 = vadd.f32 1.0, %v1419_v59 }
 0x336   : > { %1420 = vrcp.f32 %v1019_v60  ;;  %v1031_v0 = vand.u32 2147483648, %v1019_v60  ;;  %v1029_v2 = vand.u32 2147483647, %v1019_v60  ;;  %vm1025_vm10 = vweird.f32 %v1019_v60 }
 0x338   : > { %v1032_v4 = vor.u32 1.1754944e-38, %v1031_v0  ;;  %vm1030_vm12 = vcmp.eq.f32.partialorder %v1029_v2, 8.507059e+37 }
 0x33c   : > { %v1421_v61 = vpop.eup %1420 }
 0x33d   : > { %v1021_v62 = vmul.f32 %v1421_v61, %v1019_v60  ;;  %vm1026_vm9 = vweird.f32 %v1421_v61 }
 0x33e   : > { %vm1027_vm11 = vmor %vm1025_vm10, %vm1026_vm9 }
 0x33f   : > { %v1022_v63 = vsub.f32 1.0, %v1021_v62 }
 0x341   : > { %v1023_v1 = vmul.f32 %v1421_v61, %v1022_v63 }
 0x343   : > { %v1024_v3 = vadd.f32 %v1421_v61, %v1023_v1 }
 0x345   : > { %v1028_v7 = vsel %vm1027_vm11, %v1421_v61, %v1024_v3 }
 0x346   : > { %v1033_v8 = vsel %vm1030_vm12, %v1032_v4, %v1028_v7 }
 0x347   : > { %v1035_v9 = vmul.f32 %v1033_v8, %v988_v57 }
 0x349   : > { %v1011_v12 = vpop.permute.xlu1 %1010  ;;  %1376 = vmatpush.msk.msra.mxu3 %vm445_vm0, %v1035_v9  ;;  %1381 = vmatpush.msk.msrb.mxu1 %vm445_vm0, %v1035_v9 }
 0x34a   : > { %v1013_v13 = vsel %vm635_vm3, %v1011_v12, 0.0  ;;  %1382 = vmatmul.msk.f32.vlgmr.msrb.gmra.mxu1 %vm441_vm1, %v1380_v11  ;;  %1377 = vmatmul.msk.f32.vlgmr.msra.gmra.mxu3 %vm441_vm1, %v1375_v17 }
 0x34b   : > { %1385 = vmatpush.msk.msrb.mxu3 %vm445_vm0, %v1035_v9  ;;  %v1014_v14 = vadd.f32 %v1013_v13, %v1007_v10 }
 0x34d   : > { %v1015_v15 = vadd.f32 %v1014_v14, %v986_v56 }
 0x34f   : > { %v1372_v16 = vmul.f32 -1.442695, %v1015_v15 }
 0x351   : > { %1422 = vpow2.f32 %v1372_v16 }
 0x352   : > { %1386 = vmatmul.msk.f32.vlgmr.msrb.gmra.mxu3 %vm441_vm1, %v1056_v19 }
 0x357   : > { %v1423_v18 = vpop.eup %1422 }
 0x358   : > { %v1039_v20 = vadd.f32 1.0, %v1423_v18 }
 0x35a   : > { %1424 = vrcp.f32 %v1039_v20  ;;  %v1051_v24 = vand.u32 2147483648, %v1039_v20  ;;  %v1049_v26 = vand.u32 2147483647, %v1039_v20  ;;  %vm1045_vm14 = vweird.f32 %v1039_v20 }
 0x35c   : > { %v1052_v29 = vor.u32 1.1754944e-38, %v1051_v24  ;;  %vm1050_vm4 = vcmp.eq.f32.partialorder %v1049_v26, 8.507059e+37 }
 0x360   : > { %v1425_v21 = vpop.eup %1424 }
 0x361   : > { %v1041_v22 = vmul.f32 %v1425_v21, %v1039_v20  ;;  %vm1046_vm13 = vweird.f32 %v1425_v21 }
 0x362   : > { %vm1047_vm15 = vmor %vm1045_vm14, %vm1046_vm13 }
 0x363   : > { %v1042_v23 = vsub.f32 1.0, %v1041_v22 }
 0x365   : > { %v1043_v25 = vmul.f32 %v1425_v21, %v1042_v23 }
 0x367   : > { %v1044_v28 = vadd.f32 %v1425_v21, %v1043_v25 }
 0x369   : > { %v1048_v30 = vsel %vm1047_vm15, %v1425_v21, %v1044_v28 }
 0x36a   : > { %v1053_v31 = vsel %vm1050_vm4, %v1052_v29, %v1048_v30 }
 0x36b   : > { %v1055_v32 = vmul.f32 %v1053_v31, %v1015_v15 }
 0x36d   : > { %1373 = vmatpush.msk.msra.mxu2 %vm445_vm0, %v1055_v32  ;;  %1378 = vmatpush.msk.msrb.mxu0 %vm445_vm0, %v1055_v32 }
 0x36e   : > { %1374 = vmatmul.msk.f32.vlgmr.msra.gmra.mxu2 %vm441_vm1, %v1056_v19  ;;  %1379 = vmatmul.msk.f32.vlgmr.msrb.gmra.mxu0 %vm441_vm1, %v1375_v17 }
 0x36f   : > { %1383 = vmatpush.msk.msrb.mxu2 %vm445_vm0, %v1055_v32  ;;  %vm1219_vm0 = vcmask 125952  }
 0x376   : > { %1384 = vmatmul.msk.f32.vlgmr.msrb.gmra.mxu2 %vm441_vm1, %v1380_v11 }
 0x3c7   : > { %v1153_v33 = vpop.f32.mrf.mxu1 }
 0x3c8   : > { %1211 = vrot.lane.b32.xlu2 %v1153_v33, %s1436_s27 }
 0x3cd   : > { %v1108_v35 = vpop.f32.mrf.mxu3 }
 0x3d5   : > { %v1207_v37 = vpop.f32.mrf.mxu3 }
 0x3eb   : > { %v1128_v36 = vpop.f32.mrf.mxu0 }
 0x3ec   : > { %v1208_v38 = vadd.f32 %v1207_v37, %v1128_v36 }
 0x3f1   : > { %v1080_v34 = vpop.f32.mrf.mxu2 }
 0x3f2   : > { %1178 = vrot.lane.b32.xlu1 %v1080_v34, %s1435_s26 }
 0x3f9   : > { %v1173_v49 = vpop.f32.mrf.mxu2 }
 0x422   : > { %v1212_v39 = vpop.permute.xlu2 %1211 }
 0x423   : > { %v1214_v40 = vsel %vm635_vm3, %v1212_v39, 0.0 }
 0x424   : > { %v1215_v41 = vadd.f32 %v1214_v40, %v1208_v38 }
 0x426   : > { %v1216_v43 = vadd.f32 %v1215_v41, %v1187_v42 }
 0x428   : > { %v1221_v44 = vmul.f32 0.1, %v1216_v43 }
 0x42a   : > { %v1222_v45 = vadd.f32 %v1221_v44, %v1576_v27 }
 0x42c   : > { %1223 = vst.msk [vmem:[%s436_s28] sm:$0xf] %vm1219_vm0, %v1222_v45 }
 0x464   : > { %v1179_v47 = vpop.permute.xlu1 %1178 }
 0x465   : > { %v1181_v48 = vsel %vm600_vm2, 0.0, %v1179_v47 }
 0x466   : > { %v1182_v50 = vadd.f32 %v1181_v48, %v1108_v35 }
 0x468   : > { %v1183_v51 = vadd.f32 %v1182_v50, %v1173_v49 }
 0x46a   : > { %v1189_v52 = vadd.f32 %v1187_v42, %v1183_v51 }
 0x46c   : > { %v1217_v53 = vmul.f32 0.1, %v1189_v52 }
 0x46e   : > { %v1218_v54 = vadd.f32 %v1217_v53, %v1596_v46 }
 0x470   : > { %1220 = vst.msk [vmem:[%s432_s29] sm:$0xf] %vm1219_vm0, %v1218_v54 }
 0x471 PF: > { %s23_s21 = sadd.s32 1, %s1432_s21  }
 0x472   : > { %p20_p4 = scmp.ge.s32.totalorder %s23_s21, 4  }
 0x474   :  { %22 = sbr.rel (!%p20_p4) target bundleno = 1 (0x1), region = 119 }

// kernel: decoder_forward.13
= control target key start
LH: loop header
LB: loop body
LE: loop exit
PB: predicated region body
PF: predicated region fallthrough
CT: control target
= control target key end

     0   :  { %s1399_s29 = smov 0   ;;  %s1571_s0 = inlined_call_operand.vmem [shape: f32[2,4,32], index: 0, kind: input, shape index: {}]   ;;  %s1572_s1 = inlined_call_operand.vmem [shape: f32[2,4,32], index: 1, kind: input, shape index: {}]   ;;  %s1573_s2 = inlined_call_operand.vmem [shape: f32[3,4,4], index: 2, kind: input, shape index: {}]   ;;  %s1574_s3 = inlined_call_operand.vmem [shape: f32[4,1], index: 3, kind: input, shape index: {}]   ;;  %s1575_s4 = inlined_call_operand.vmem [shape: f32[3,4,4], index: 4, kind: input, shape index: {}]   ;;  %s1576_s5 = inlined_call_operand.vmem [shape: f32[4,1], index: 5, kind: input, shape index: {}]   ;;  %s1577_s6 = inlined_call_operand.vmem [shape: f32[3,4,4], index: 6, kind: input, shape index: {}]   ;;  %s1578_s7 = inlined_call_operand.vmem [shape: f32[4,1], index: 7, kind: input, shape index: {}]   ;;  %s1579_s8 = inlined_call_operand.vmem [shape: f32[3,4,4], index: 8, kind: input, shape index: {}]   ;;  %s1580_s9 = inlined_call_operand.vmem [shape: f32[4,1], index: 9, kind: input, shape index: {}]   ;;  %s1581_s10 = inlined_call_operand.vmem [shape: f32[3,4,4], index: 10, kind: input, shape index: {}]   ;;  %s1582_s11 = inlined_call_operand.vmem [shape: f32[4,1], index: 11, kind: input, shape index: {}]   ;;  %s1583_s12 = inlined_call_operand.vmem [shape: f32[3,4,4], index: 12, kind: input, shape index: {}]   ;;  %s1584_s13 = inlined_call_operand.vmem [shape: f32[4,1], index: 13, kind: input, shape index: {}]   ;;  %s1585_s14 = inlined_call_operand.vmem [shape: f32[2,4,32], index: 14, kind: output, shape index: {}]  }
   0x1 LB: > { %s1219_s30 = sadd.s32 4294967295, %s1319_s29   ;;  %p1223_p0 = scmp.ge.s32.totalorder %s1319_s29, 1  ;;  %s1319_s29 = sphi %s1399_s29, %s24_s29  }
   0x2   : > { %p420_p1 = scmp.lt.s32.totalorder %s1319_s29, 3 }
   0x4   : > { %p421_p2 = pnand %p1223_p0, %p420_p1 }
   0x5   : > { %p468_p3 = scmp.lt.s32.totalorder (!%p421_p2), %s1219_s30, 1  ;;  %s1321_s19 = smov (!%p421_p2), 127  }
   0x6   : > { %424 = sbr.rel (%p421_p2) target bundleno = 1428 (0x594), region = 76  ;;  %s1322_s20 = smov (!%p421_p2), 1  }
   0xb   : > { %s1587_s30 = smov (!%p468_p3, %s1219_s30), 1  ;;  %vm494_vm0 = vcmask 1043456   ;;  %vm490_vm1 = vcmask 31744   ;;  %v1227_v1 = vld [vmem:[%s1573_s2 + $0x4] sm:$0xf]  ;;  %v1323_v3 = vmov 0  }
   0xc   : > { %s1407_s15 = sshll.u32 %s1587_s30, 2  ;;  %v577_v2 = vld [vmem:[%s1574_s3] sm:$0xf]  ;;  %1292 = vset.pattern.permute.xlu1 %v1323_v3  ;;  %1293 = vset.pattern.permute.xlu2 %v1323_v3  ;;  %vm548_vm2 = vcmask 252928   ;;  %v1232_v5 = vld [vmem:[%s1573_s2 + $0x8] sm:$0xf] }
   0xd   : > { %s471_s18 = scalar_lea.vmem %s1571_s0, %s1407_s15  ;;  %580 = vperm.xlu1 %1292, %v577_v2   ;;  %1294 = vset.pattern.permute.xlu0 %v1323_v3  ;;  %vm486_vm3 = vcmask 7168   ;;  %v481_v8 = vld [vmem:[%s1573_s2] sm:$0xf]  ;;  %v1236_v32 = vld [vmem:[%s1575_s4 + $0x4] sm:$0xf]  ;;  %s475_s21 = scalar_lea.vmem %s1572_s1, %s1407_s15 }
   0xe   : > { %v1413_v0 = vld [vmem:[%s471_s18] sm:$0xf]  ;;  %v1241_v34 = vld [vmem:[%s1575_s4 + $0x8] sm:$0xf]  ;;  %v1245_v2 = vld [vmem:[%s1577_s6 + $0x4] sm:$0xf]  ;;  %s479_s24 = scalar_lea.vmem %s1585_s14, %s1407_s15 }
   0xf   : > { %545 = vrot.lane.b32.xlu0 %v1413_v0, %s1321_s19  ;;  %1228 = vmatpush.msk.msra.mxu0 %vm494_vm0, %v1413_v0  ;;  %v899_v31 = vld [vmem:[%s1580_s9] sm:$0xf] }
  0x10   : > { %1229 = vmatmul.msk.f32.vlgmr.msra.gmra.mxu0 %vm490_vm1, %v1227_v1  ;;  %v696_v35 = vld [vmem:[%s1576_s5] sm:$0xf] }
  0x11   : > { %v604_v38 = vld [vmem:[%s1575_s4] sm:$0xf] }
  0x12   : > { %v1018_v63 = vld [vmem:[%s1582_s11] sm:$0xf] }
  0x13   : > { %v1139_v1 = vld [vmem:[%s1584_s13] sm:$0xf] }
  0x14   : > { %v824_v3 = vld [vmem:[%s1579_s8] sm:$0xf] }
  0x17   : > { %483 = vrot.lane.b32.xlu0 %v1413_v0, %s1322_s20 }
  0x7f   : > { %v581_v14 = vpop.permute.xlu1 %580 }
  0x81   : > { %v546_v4 = vpop.permute.xlu0 %545 }
  0x82   : > { %v1432_v6 = vsel %vm548_vm2, %v546_v4, 0.0 }
  0x83   : > { %1233 = vmatpush.msk.msra.mxu2 %vm494_vm0, %v1432_v6 }
  0x84   : > { %1234 = vmatmul.msk.f32.vlgmr.msra.gmra.mxu2 %vm490_vm1, %v1232_v5  ;;  %v1250_v5 = vld [vmem:[%s1577_s6 + $0x8] sm:$0xf] }
  0x89   : > { %v484_v7 = vpop.permute.xlu0 %483 }
  0x8a   : > { %v1441_v9 = vsel %vm486_vm3, 0.0, %v484_v7 }
  0x8b   : > { %1230 = vmatpush.msk.msra.mxu1 %vm494_vm0, %v1441_v9 }
  0x8c   : > { %1231 = vmatmul.msk.f32.vlgmr.msra.gmra.mxu1 %vm490_vm1, %v481_v8  ;;  %v1253_v8 = vld [vmem:[%s1579_s8 + $0x4] sm:$0xf] }
  0x8d   : > { %v514_v10 = vpop.f32.mrf.mxu0 }
 0x107   : > { %v573_v12 = vpop.f32.mrf.mxu2 }
 0x109   : > { %v540_v11 = vpop.f32.mrf.mxu1 }
 0x10a   : > { %v541_v13 = vadd.f32 %v540_v11, %v514_v10  ;;  %v725_v10 = vld [vmem:[%s1577_s6] sm:$0xf] }
 0x10c   : > { %v576_v15 = vadd.f32 %v573_v12, %v541_v13  ;;  %v1258_v12 = vld [vmem:[%s1579_s8 + $0x8] sm:$0xf] }
 0x10e   : > { %v583_v16 = vadd.f32 %v581_v14, %v576_v15 }
 0x110   : > { %v1235_v17 = vmul.f32 -1.442695, %v583_v16 }
 0x112   : > { %1295 = vpow2.f32 %v1235_v17 }
 0x118   : > { %v1296_v18 = vpop.eup %1295 }
 0x119   : > { %v587_v19 = vadd.f32 1.0, %v1296_v18 }
 0x11b   : > { %1297 = vrcp.f32 %v587_v19  ;;  %v599_v23 = vand.u32 2147483648, %v587_v19  ;;  %v597_v25 = vand.u32 2147483647, %v587_v19  ;;  %vm593_vm5 = vweird.f32 %v587_v19 }
 0x11d   : > { %v600_v27 = vor.u32 1.1754944e-38, %v599_v23  ;;  %vm598_vm7 = vcmp.eq.f32.partialorder %v597_v25, 8.507059e+37 }
 0x121   : > { %v1298_v20 = vpop.eup %1297 }
 0x122   : > { %v589_v21 = vmul.f32 %v1298_v20, %v587_v19  ;;  %vm594_vm4 = vweird.f32 %v1298_v20 }
 0x123   : > { %vm595_vm6 = vmor %vm593_vm5, %vm594_vm4 }
 0x124   : > { %v590_v22 = vsub.f32 1.0, %v589_v21 }
 0x126   : > { %v591_v24 = vmul.f32 %v1298_v20, %v590_v22 }
 0x128   : > { %v592_v26 = vadd.f32 %v1298_v20, %v591_v24 }
 0x12a   : > { %v596_v28 = vsel %vm595_vm6, %v1298_v20, %v592_v26 }
 0x12b   : > { %v601_v29 = vsel %vm598_vm7, %v600_v27, %v596_v28 }
 0x12c   : > { %v603_v30 = vmul.f32 %v601_v29, %v583_v16 }
 0x12e   : > { %665 = vrot.lane.b32.xlu2 %v603_v30, %s1321_s19  ;;  %606 = vrot.lane.b32.xlu1 %v603_v30, %s1322_s20 }
 0x12f   : > { %1237 = vmatpush.msk.msra.mxu3 %vm494_vm0, %v603_v30 }
 0x130   : > { %1238 = vmatmul.msk.f32.vlgmr.msra.gmra.mxu3 %vm490_vm1, %v1236_v32 }
 0x136   : > { %902 = vperm.xlu1 %1292, %v899_v31   ;;  %699 = vperm.xlu2 %1293, %v696_v35  }
 0x188   : > { %v666_v33 = vpop.permute.xlu2 %665 }
 0x189   : > { %v668_v36 = vsel %vm548_vm2, %v666_v33, 0.0 }
 0x18a   : > { %1242 = vmatpush.msk.msrb.mxu1 %vm494_vm0, %v668_v36  ;;  %v1262_v36 = vld [vmem:[%s1581_s10 + $0x4] sm:$0xf] }
 0x18b   : > { %1243 = vmatmul.msk.f32.vlgmr.msrb.gmra.mxu1 %vm490_vm1, %v1241_v34 }
 0x18c   : > { %1254 = vmatpush.msk.msra.mxu1 %vm494_vm0, %v1413_v0 }
 0x190   : > { %v700_v44 = vpop.permute.xlu2 %699 }
 0x193   : > { %1255 = vmatmul.msk.f32.vlgmr.msra.gmra.mxu1 %vm490_vm1, %v1253_v8  ;;  %v1047_v8 = vld [vmem:[%s1583_s12] sm:$0xf] }
 0x1a0   : > { %v607_v37 = vpop.permute.xlu1 %606 }
 0x1a1   : > { %v609_v39 = vsel %vm486_vm3, 0.0, %v607_v37 }
 0x1a2   : > { %1239 = vmatpush.msk.msrb.mxu0 %vm494_vm0, %v609_v39  ;;  %v1267_v39 = vld [vmem:[%s1581_s10 + $0x8] sm:$0xf] }
 0x1a3   : > { %1240 = vmatmul.msk.f32.vlgmr.msrb.gmra.mxu0 %vm490_vm1, %v604_v38 }
 0x1a8   : > { %v903_v21 = vpop.permute.xlu1 %902 }
 0x1b3   : > { %v634_v40 = vpop.f32.mrf.mxu3 }
 0x208   : > { %v692_v42 = vpop.f32.mrf.mxu1 }
 0x210   : > { %v847_v16 = vpop.f32.mrf.mxu1 }
 0x220   : > { %v660_v41 = vpop.f32.mrf.mxu0 }
 0x221   : > { %v661_v43 = vadd.f32 %v660_v41, %v634_v40  ;;  %v926_v40 = vld [vmem:[%s1581_s10] sm:$0xf] }
 0x223   : > { %v695_v45 = vadd.f32 %v692_v42, %v661_v43 }
 0x225   : > { %v702_v46 = vadd.f32 %v700_v44, %v695_v45 }
 0x227   : > { %v703_v47 = vmul.f32 0.1, %v702_v46 }
 0x229   : > { %v704_v48 = vadd.f32 %v703_v47, %v1413_v0 }
 0x22b   : > { %v1244_v49 = vmul.f32 -1.442695, %v704_v48 }
 0x22d   : > { %1299 = vpow2.f32 %v1244_v49 }
 0x233   : > { %v1300_v50 = vpop.eup %1299 }
 0x234   : > { %v708_v51 = vadd.f32 1.0, %v1300_v50 }
 0x236   : > { %1301 = vrcp.f32 %v708_v51  ;;  %v720_v55 = vand.u32 2147483648, %v708_v51  ;;  %v718_v57 = vand.u32 2147483647, %v708_v51  ;;  %vm714_vm9 = vweird.f32 %v708_v51 }
 0x238   : > { %v721_v59 = vor.u32 1.1754944e-38, %v720_v55  ;;  %vm719_vm11 = vcmp.eq.f32.partialorder %v718_v57, 8.507059e+37 }
 0x23c   : > { %v1302_v52 = vpop.eup %1301 }
 0x23d   : > { %v710_v53 = vmul.f32 %v1302_v52, %v708_v51  ;;  %vm715_vm8 = vweird.f32 %v1302_v52 }
 0x23e   : > { %vm716_vm10 = vmor %vm714_vm9, %vm715_vm8 }
 0x23f   : > { %v711_v54 = vsub.f32 1.0, %v710_v53 }
 0x241   : > { %v712_v56 = vmul.f32 %v1302_v52, %v711_v54 }
 0x243   : > { %v713_v58 = vadd.f32 %v1302_v52, %v712_v56 }
 0x245   : > { %v717_v60 = vsel %vm716_vm10, %v1302_v52, %v713_v58 }
 0x246   : > { %v722_v61 = vsel %vm719_vm11, %v721_v59, %v717_v60 }
 0x247   : > { %v724_v62 = vmul.f32 %v722_v61, %v704_v48 }
 0x249   : > { %786 = vrot.lane.b32.xlu2 %v724_v62, %s1321_s19  ;;  %727 = vrot.lane.b32.xlu0 %v724_v62, %s1322_s20 }
 0x24a   : > { %1246 = vmatpush.msk.msrb.mxu2 %vm494_vm0, %v724_v62 }
 0x24b   : > { %1247 = vmatmul.msk.f32.vlgmr.msrb.gmra.mxu2 %vm490_vm1, %v1245_v2 }
 0x24c   : > { %1256 = vmatpush.msk.msra.mxu2 %vm494_vm0, %v1441_v9 }
 0x251   : > { %1021 = vperm.xlu2 %1293, %v1018_v63  }
 0x253   : > { %1257 = vmatmul.msk.f32.vlgmr.msra.gmra.mxu2 %vm490_vm1, %v824_v3  ;;  %v1271_v3 = vld [vmem:[%s1583_s12 + $0x4] sm:$0xf] }
 0x259   : > { %1142 = vperm.xlu2 %1293, %v1139_v1  }
 0x2a3   : > { %v787_v4 = vpop.permute.xlu2 %786 }
 0x2a4   : > { %v789_v7 = vsel %vm548_vm2, %v787_v4, 0.0  ;;  %v817_v4 = vld [vmem:[%s1578_s7] sm:$0xf] }
 0x2a5   : > { %1251 = vmatpush.msk.msra.mxu0 %vm494_vm0, %v789_v7 }
 0x2a6   : > { %1252 = vmatmul.msk.f32.vlgmr.msra.gmra.mxu0 %vm490_vm1, %v1250_v5 }
 0x2ab   : > { %v1022_v49 = vpop.permute.xlu2 %1021 }
 0x2bb   : > { %v728_v9 = vpop.permute.xlu0 %727 }
 0x2bc   : > { %v730_v11 = vsel %vm486_vm3, 0.0, %v728_v9  ;;  %v1276_v9 = vld [vmem:[%s1583_s12 + $0x8] sm:$0xf] }
 0x2bd   : > { %1248 = vmatpush.msk.msrb.mxu3 %vm494_vm0, %v730_v11 }
 0x2be   : > { %1249 = vmatmul.msk.f32.vlgmr.msrb.gmra.mxu3 %vm490_vm1, %v725_v10 }
 0x2bf   : > { %1259 = vmatpush.msk.msra.mxu3 %vm494_vm0, %v1432_v6 }
 0x2c6   : > { %1260 = vmatmul.msk.f32.vlgmr.msra.gmra.mxu3 %vm490_vm1, %v1258_v12 }
 0x2ce   : > { %v755_v13 = vpop.f32.mrf.mxu2 }
 0x2d6   : > { %v870_v17 = vpop.f32.mrf.mxu2 }
 0x2d7   : > { %v871_v18 = vadd.f32 %v870_v17, %v847_v16 }
 0x323   : > { %v813_v43 = vpop.f32.mrf.mxu0 }
 0x341   : > { %v781_v14 = vpop.f32.mrf.mxu3 }
 0x342   : > { %v1515_v15 = vadd.f32 %v781_v14, %v755_v13 }
 0x349   : > { %v895_v19 = vpop.f32.mrf.mxu3 }
 0x34a   : > { %v898_v20 = vadd.f32 %v895_v19, %v871_v18  ;;  %v1143_v18 = vpop.permute.xlu2 %1142 }
 0x34c   : > { %v905_v22 = vadd.f32 %v903_v21, %v898_v20 }
 0x34e   : > { %v1261_v23 = vmul.f32 -1.442695, %v905_v22 }
 0x350   : > { %1303 = vpow2.f32 %v1261_v23  ;;  %v1149_v23 = vld [vmem:[%s475_s21] sm:$0xf] }
 0x356   : > { %v1304_v6 = vpop.eup %1303 }
 0x357   : > { %v909_v24 = vadd.f32 1.0, %v1304_v6  ;;  %v816_v6 = vadd.f32 %v813_v43, %v1515_v15 }
 0x359   : > { %1305 = vrcp.f32 %v909_v24  ;;  %v921_v28 = vand.u32 2147483648, %v909_v24  ;;  %v919_v30 = vand.u32 2147483647, %v909_v24  ;;  %vm915_vm13 = vweird.f32 %v909_v24 }
 0x35b   : > { %v922_v32 = vor.u32 1.1754944e-38, %v921_v28  ;;  %vm920_vm15 = vcmp.eq.f32.partialorder %v919_v30, 8.507059e+37 }
 0x35f   : > { %v1306_v25 = vpop.eup %1305 }
 0x360   : > { %v911_v26 = vmul.f32 %v1306_v25, %v909_v24  ;;  %vm916_vm12 = vweird.f32 %v1306_v25 }
 0x361   : > { %vm917_vm14 = vmor %vm915_vm13, %vm916_vm12 }
 0x362   : > { %v912_v27 = vsub.f32 1.0, %v911_v26 }
 0x364   : > { %v913_v29 = vmul.f32 %v1306_v25, %v912_v27 }
 0x366   : > { %v914_v31 = vadd.f32 %v1306_v25, %v913_v29 }
 0x368   : > { %v918_v33 = vsel %vm917_vm14, %v1306_v25, %v914_v31 }
 0x369   : > { %v923_v34 = vsel %vm920_vm15, %v922_v32, %v918_v33 }
 0x36a   : > { %v925_v35 = vmul.f32 %v923_v34, %v905_v22 }
 0x36c   : > { %928 = vrot.lane.b32.xlu1 %v925_v35, %s1322_s20  ;;  %987 = vrot.lane.b32.xlu0 %v925_v35, %s1321_s19 }
 0x36d   : > { %1263 = vmatpush.msk.msrb.mxu0 %vm494_vm0, %v925_v35 }
 0x36e   : > { %1264 = vmatmul.msk.f32.vlgmr.msrb.gmra.mxu0 %vm490_vm1, %v1262_v36 }
 0x3de   : > { %v929_v37 = vpop.permute.xlu1 %928  ;;  %v988_v38 = vpop.permute.xlu0 %987 }
 0x3df   : > { %v931_v41 = vsel %vm486_vm3, 0.0, %v929_v37  ;;  %v990_v42 = vsel %vm548_vm2, %v988_v38, 0.0 }
 0x3e0   : > { %1265 = vmatpush.msk.msrb.mxu1 %vm494_vm0, %v931_v41  ;;  %1268 = vmatpush.msk.msrb.mxu2 %vm494_vm0, %v990_v42 }
 0x3e1   : > { %1269 = vmatmul.msk.f32.vlgmr.msrb.gmra.mxu2 %vm490_vm1, %v1267_v39  ;;  %1266 = vmatmul.msk.f32.vlgmr.msrb.gmra.mxu1 %vm490_vm1, %v926_v40 }
 0x3eb   : > { %v956_v44 = vpop.f32.mrf.mxu0 }
 0x45e   : > { %v982_v45 = vpop.f32.mrf.mxu1 }
 0x45f   : > { %v983_v46 = vadd.f32 %v982_v45, %v956_v44 }
 0x464   : > { %v1014_v47 = vpop.f32.mrf.mxu2 }
 0x465   : > { %v1017_v48 = vadd.f32 %v1014_v47, %v983_v46 }
 0x467   : > { %v1024_v50 = vadd.f32 %v1022_v49, %v1017_v48 }
 0x469   : > { %v1025_v51 = vmul.f32 0.1, %v1024_v50 }
 0x46b   : > { %v1026_v52 = vadd.f32 %v1025_v51, %v1413_v0 }
 0x46d   : > { %v1270_v53 = vmul.f32 -1.442695, %v1026_v52 }
 0x46f   : > { %1307 = vpow2.f32 %v1270_v53 }
 0x475   : > { %v1308_v54 = vpop.eup %1307 }
 0x476   : > { %v1030_v55 = vadd.f32 1.0, %v1308_v54 }
 0x478   : > { %1309 = vrcp.f32 %v1030_v55  ;;  %v1042_v59 = vand.u32 2147483648, %v1030_v55  ;;  %v1040_v61 = vand.u32 2147483647, %v1030_v55  ;;  %vm1036_vm5 = vweird.f32 %v1030_v55 }
 0x47a   : > { %v1043_v63 = vor.u32 1.1754944e-38, %v1042_v59  ;;  %vm1041_vm7 = vcmp.eq.f32.partialorder %v1040_v61, 8.507059e+37 }
 0x47e   : > { %v1310_v56 = vpop.eup %1309 }
 0x47f   : > { %v1032_v57 = vmul.f32 %v1310_v56, %v1030_v55  ;;  %vm1037_vm4 = vweird.f32 %v1310_v56 }
 0x480   : > { %vm1038_vm6 = vmor %vm1036_vm5, %vm1037_vm4 }
 0x481   : > { %v1033_v58 = vsub.f32 1.0, %v1032_v57 }
 0x483   : > { %v1034_v60 = vmul.f32 %v1310_v56, %v1033_v58 }
 0x485   : > { %v1035_v62 = vadd.f32 %v1310_v56, %v1034_v60 }
 0x487   : > { %v1039_v1 = vsel %vm1038_vm6, %v1310_v56, %v1035_v62 }
 0x488   : > { %v1044_v2 = vsel %vm1041_vm7, %v1043_v63, %v1039_v1 }
 0x489   : > { %v1046_v0 = vmul.f32 %v1044_v2, %v1026_v52 }
 0x48b   : > { %1108 = vrot.lane.b32.xlu1 %v1046_v0, %s1321_s19  ;;  %1049 = vrot.lane.b32.xlu0 %v1046_v0, %s1322_s20 }
 0x48c   : > { %1272 = vmatpush.msk.msrb.mxu3 %vm494_vm0, %v1046_v0 }
 0x48d   : > { %1273 = vmatmul.msk.f32.vlgmr.msrb.gmra.mxu3 %vm490_vm1, %v1271_v3 }
 0x493   : > { %820 = vperm.xlu0 %1294, %v817_v4  }
 0x4fd   : > { %v1109_v5 = vpop.permute.xlu1 %1108  ;;  %v1050_v7 = vpop.permute.xlu0 %1049 }
 0x4fe   : > { %v1111_v10 = vsel %vm548_vm2, %v1109_v5, 0.0  ;;  %v1052_v11 = vsel %vm486_vm3, 0.0, %v1050_v7 }
 0x4ff   : > { %1274 = vmatpush.msk.msra.mxu0 %vm494_vm0, %v1052_v11  ;;  %1277 = vmatpush.msk.msra.mxu1 %vm494_vm0, %v1111_v10  ;;  %vm1152_vm0 = vcmask 257024  }
 0x500   : > { %1275 = vmatmul.msk.f32.vlgmr.msra.gmra.mxu0 %vm490_vm1, %v1047_v8  ;;  %1278 = vmatmul.msk.f32.vlgmr.msra.gmra.mxu1 %vm490_vm1, %v1276_v9 }
 0x505   : > { %v821_v22 = vpop.permute.xlu0 %820 }
 0x506   : > { %v823_v25 = vadd.f32 %v821_v22, %v816_v6 }
 0x510   : > { %v1077_v12 = vpop.f32.mrf.mxu3 }
 0x57d   : > { %v1103_v13 = vpop.f32.mrf.mxu0  ;;  %v1135_v14 = vpop.f32.mrf.mxu1 }
 0x57e   : > { %v1104_v16 = vadd.f32 %v1103_v13, %v1077_v12 }
 0x580   : > { %v1138_v17 = vadd.f32 %v1135_v14, %v1104_v16 }
 0x582   : > { %v1145_v19 = vadd.f32 %v1143_v18, %v1138_v17 }
 0x584   : > { %v1146_v20 = vmul.f32 0.5, %v1145_v19 }
 0x586   : > { %v1147_v21 = vmul.f32 1.442695, %v1146_v20 }
 0x588   : > { %1311 = vpow2.f32 %v1147_v21 }
 0x58e   : > { %v1312_v24 = vpop.eup %1311 }
 0x58f   : > { %v1150_v26 = vmul.f32 %v1312_v24, %v1149_v23 }
 0x591   : > { %v1151_v27 = vadd.f32 %v1150_v26, %v823_v25 }
 0x593   : > { %1153 = vst.msk [vmem:[%s479_s24] sm:$0xf] %vm1152_vm0, %v1151_v27 }
 0x594 PF: > { %s24_s29 = sadd.s32 1, %s1319_s29  }
 0x595   : > { %p21_p4 = scmp.ge.s32.totalorder %s24_s29, 4  }
 0x597   :  { %23 = sbr.rel (!%p21_p4) target bundleno = 1 (0x1), region = 121 }

// kernel: decoder_forward.14
= control target key start
LH: loop header
LB: loop body
LE: loop exit
PB: predicated region body
PF: predicated region fallthrough
CT: control target
= control target key end

     0   :  { %s1502_s21 = smov 0   ;;  %s1652_s0 = inlined_call_operand.vmem [shape: f32[2,4,32], index: 0, kind: input, shape index: {}]   ;;  %s1653_s1 = inlined_call_operand.vmem [shape: f32[2,4,32], index: 1, kind: input, shape index: {}]   ;;  %s1654_s2 = inlined_call_operand.vmem [shape: f32[3,8,4], index: 2, kind: input, shape index: {}]   ;;  %s1655_s3 = inlined_call_operand.vmem [shape: f32[3,8,4], index: 3, kind: input, shape index: {}]   ;;  %s1656_s4 = inlined_call_operand.vmem [shape: f32[8,1], index: 4, kind: input, shape index: {}]   ;;  %s1657_s5 = inlined_call_operand.vmem [shape: f32[3,4,8], index: 5, kind: input, shape index: {}]   ;;  %s1658_s6 = inlined_call_operand.vmem [shape: f32[4,1], index: 6, kind: input, shape index: {}]   ;;  %s1659_s7 = inlined_call_operand.vmem [shape: f32[3,4,4], index: 7, kind: input, shape index: {}]   ;;  %s1660_s8 = inlined_call_operand.vmem [shape: f32[4,1], index: 8, kind: input, shape index: {}]   ;;  %s1661_s9 = inlined_call_operand.vmem [shape: f32[3,4,4], index: 9, kind: input, shape index: {}]   ;;  %s1662_s10 = inlined_call_operand.vmem [shape: f32[4,1], index: 10, kind: input, shape index: {}]   ;;  %s1663_s11 = inlined_call_operand.vmem [shape: f32[2,4,32], index: 11, kind: output, shape index: {0}]   ;;  %s1664_s12 = inlined_call_operand.vmem [shape: f32[2,4,32], index: 12, kind: output, shape index: {1}]  }
   0x1 LB: > { %s1320_s22 = sadd.s32 4294967295, %s1432_s21   ;;  %p1324_p0 = scmp.ge.s32.totalorder %s1432_s21, 1  ;;  %s1432_s21 = sphi %s1502_s21, %s23_s21  }
   0x2   : > { %p373_p1 = scmp.lt.s32.totalorder %s1432_s21, 3 }
   0x4   : > { %p374_p2 = pnand %p1324_p0, %p373_p1 }
   0x5   : > { %p421_p3 = scmp.lt.s32.totalorder (!%p374_p2), %s1320_s22, 1  ;;  %s1436_s27 = smov (!%p374_p2), 127  }
   0x6   : > { %377 = sbr.rel (%p374_p2) target bundleno = 1137 (0x471), region = 64 }
   0xb   : > { %s1666_s22 = smov (!%p421_p3, %s1320_s22), 1  ;;  %vm445_vm0 = vcmask 1043456   ;;  %v440_v1 = vld [vmem:[%s1655_s3] sm:$0xff]  ;;  %vm441_vm1 = vcmask 31744   ;;  %v1334_v4 = vld [vmem:[%s1655_s3 + $0x8] sm:$0xff]  ;;  %v1340_v6 = vld [vmem:[%s1655_s3 + $0x10] sm:$0xff] }
   0xc   : > { %s1510_s23 = sshll.u32 %s1666_s22, 2  ;;  %v439_v2 = vld [vmem:[%s1654_s2] sm:$0xff]  ;;  %v1333_v5 = vld [vmem:[%s1654_s2 + $0x8] sm:$0xff]  ;;  %v1339_v7 = vld [vmem:[%s1654_s2 + $0x10] sm:$0xff]  ;;  %v1434_v8 = vmov 0   ;;  %vm600_vm2 = vcmask 7168  }
   0xd   : > { %s428_s26 = scalar_lea.vmem %s1653_s1, %s1510_s23  ;;  %s424_s29 = scalar_lea.vmem %s1652_s0, %s1510_s23  ;;  %1400 = vset.pattern.permute.xlu0 %v1434_v8  ;;  %1401 = vset.pattern.permute.xlu2 %v1434_v8  ;;  %v595_v15 = vld [vmem:[%s1656_s4] sm:$0xff]  ;;  %vm635_vm3 = vcmask 252928   ;;  %vm660_vm12 = vcmask 64512   ;;  %v1351_v60 = vld [vmem:[%s1657_s5 + $0x8] sm:$0xf] }
   0xe   : > { %v438_v0 = vld [vmem:[%s428_s26] sm:$0xf]  ;;  %s1435_s26 = smov 1   ;;  %v1348_v61 = vld [vmem:[%s1657_s5 + $0x4] sm:$0xf]  ;;  %s436_s28 = scalar_lea.vmem %s1664_s12, %s1510_s23 }
   0xf   : > { %1329 = vmatpush.msk.msra.mxu0 %vm445_vm0, %v438_v0  ;;  %v437_v3 = vld [vmem:[%s424_s29] sm:$0xf]  ;;  %1335 = vmatpush.msk.msra.mxu2 %vm445_vm0, %v438_v0  ;;  %s432_s29 = scalar_lea.vmem %s1663_s11, %s1510_s23 }
  0x10   : > { %1331 = vmatpush.msk.msra.mxu1 %vm445_vm0, %v437_v3  ;;  %1337 = vmatpush.msk.msra.mxu3 %vm445_vm0, %v437_v3  ;;  %v774_v36 = vld [vmem:[%s1658_s6] sm:$0xf] }
  0x11   : > { %1330 = vmatmul.msk.f32.vlgmr.msra.gmra.mxu0 %vm441_vm1, %v440_v1  ;;  %1332 = vmatmul.msk.f32.vlgmr.msra.gmra.mxu1 %vm441_vm1, %v439_v2  ;;  %v659_v59 = vld [vmem:[%s1657_s5] sm:$0xf] }
  0x12   : > { %1336 = vmatmul.msk.f32.vlgmr.msra.gmra.mxu2 %vm441_vm1, %v1334_v4  ;;  %1338 = vmatmul.msk.f32.vlgmr.msra.gmra.mxu3 %vm441_vm1, %v1333_v5 }
  0x13   : > { %1341 = vmatpush.msk.msrb.mxu0 %vm445_vm0, %v438_v0  ;;  %1343 = vmatpush.msk.msrb.mxu1 %vm445_vm0, %v437_v3  ;;  %v975_v0 = vld [vmem:[%s1660_s8] sm:$0xf] }
  0x14   : > { %784 = vperm.xlu2 %1401, %v774_v36  }
  0x19   : > { %1342 = vmatmul.msk.f32.vlgmr.msrb.gmra.mxu0 %vm441_vm1, %v1340_v6  ;;  %1344 = vmatmul.msk.f32.vlgmr.msrb.gmra.mxu1 %vm441_vm1, %v1339_v7 }
  0x6e   : > { %v785_v2 = vpop.permute.xlu2 %784 }
  0x8e   : > { %v466_v9 = vpop.f32.mrf.mxu0  ;;  %v492_v10 = vpop.f32.mrf.mxu1 }
  0x8f   : > { %v493_v11 = vadd.f32 %v492_v10, %v466_v9 }
  0x91   : > { %597 = vrot.lane.b32.xlu1 %v493_v11, %s1435_s26 }
  0x95   : > { %v519_v17 = vpop.f32.mrf.mxu2  ;;  %v542_v18 = vpop.f32.mrf.mxu3 }
  0x96   : > { %v569_v12 = vpop.f32.mrf.mxu0  ;;  %v592_v13 = vpop.f32.mrf.mxu1  ;;  %v543_v21 = vadd.f32 %v542_v18, %v519_v17 }
  0x97   : > { %v593_v14 = vadd.f32 %v592_v13, %v569_v12 }
  0x98   : > { %v630_v24 = vadd.f32 %v543_v21, %v493_v11 }
  0x99   : > { %632 = vrot.lane.b32.xlu0 %v593_v14, %s1436_s27 }
  0xa1   : > { %606 = vperm.xlu0 %1400, %v595_v15  }
 0x103   : > { %v598_v16 = vpop.permute.xlu1 %597 }
 0x104   : > { %v601_v19 = vsel %vm600_vm2, 0.0, %v598_v16 }
 0x105   : > { %v602_v22 = vadd.f32 %v601_v19, %v543_v21 }
 0x107   : > { %v603_v25 = vadd.f32 %v602_v22, %v593_v14 }
 0x10b   : > { %v633_v20 = vpop.permute.xlu0 %632 }
 0x10c   : > { %v636_v23 = vsel %vm635_vm3, %v633_v20, 0.0 }
 0x10d   : > { %v637_v26 = vadd.f32 %v636_v23, %v630_v24 }
 0x113   : > { %v607_v27 = vpop.permute.xlu0 %606 }
 0x114   : > { %v609_v28 = vadd.f32 %v607_v27, %v603_v25  ;;  %v638_v29 = vadd.f32 %v637_v26, %v607_v27 }
 0x116   : > { %v1345_v30 = vmul.f32 -1.442695, %v609_v28  ;;  %v1346_v31 = vmul.f32 -1.442695, %v638_v29 }
 0x118   : > { %1402 = vpow2.f32 %v1345_v30 }
 0x119   : > { %1404 = vpow2.f32 %v1346_v31  ;;  %v1359_v31 = vld [vmem:[%s1659_s7 + $0x4] sm:$0xf] }
 0x11e   : > { %v1403_v32 = vpop.eup %1402 }
 0x11f   : > { %v1405_v33 = vpop.eup %1404  ;;  %v613_v34 = vadd.f32 1.0, %v1403_v32 }
 0x120   : > { %v642_v35 = vadd.f32 1.0, %v1405_v33  ;;  %v1364_v33 = vld [vmem:[%s1659_s7 + $0x8] sm:$0xf] }
 0x121   : > { %1406 = vrcp.f32 %v613_v34  ;;  %v625_v42 = vand.u32 2147483648, %v613_v34  ;;  %v623_v45 = vand.u32 2147483647, %v613_v34  ;;  %vm619_vm6 = vweird.f32 %v613_v34 }
 0x122   : > { %1408 = vrcp.f32 %v642_v35  ;;  %v654_v46 = vand.u32 2147483648, %v642_v35  ;;  %v652_v48 = vand.u32 2147483647, %v642_v35  ;;  %vm648_vm8 = vweird.f32 %v642_v35 }
 0x123   : > { %v626_v50 = vor.u32 1.1754944e-38, %v625_v42  ;;  %vm624_vm9 = vcmp.eq.f32.partialorder %v623_v45, 8.507059e+37 }
 0x124   : > { %v655_v53 = vor.u32 1.1754944e-38, %v654_v46  ;;  %vm653_vm11 = vcmp.eq.f32.partialorder %v652_v48, 8.507059e+37  ;;  %v1176_v48 = vld [vmem:[%s1662_s10] sm:$0xf] }
 0x127   : > { %v1407_v37 = vpop.eup %1406 }
 0x128   : > { %v1409_v38 = vpop.eup %1408  ;;  %v615_v39 = vmul.f32 %v1407_v37, %v613_v34  ;;  %vm620_vm4 = vweird.f32 %v1407_v37 }
 0x129   : > { %v644_v40 = vmul.f32 %v1409_v38, %v642_v35  ;;  %vm649_vm5 = vweird.f32 %v1409_v38  ;;  %vm621_vm7 = vmor %vm619_vm6, %vm620_vm4 }
 0x12a   : > { %v616_v41 = vsub.f32 1.0, %v615_v39  ;;  %vm650_vm10 = vmor %vm648_vm8, %vm649_vm5 }
 0x12b   : > { %v645_v43 = vsub.f32 1.0, %v644_v40 }
 0x12c   : > { %v617_v44 = vmul.f32 %v1407_v37, %v616_v41 }
 0x12d   : > { %v646_v47 = vmul.f32 %v1409_v38, %v645_v43 }
 0x12e   : > { %v618_v49 = vadd.f32 %v1407_v37, %v617_v44 }
 0x12f   : > { %v647_v51 = vadd.f32 %v1409_v38, %v646_v47 }
 0x130   : > { %v622_v52 = vsel %vm621_vm7, %v1407_v37, %v618_v49 }
 0x131   : > { %v627_v54 = vsel %vm624_vm9, %v626_v50, %v622_v52  ;;  %v651_v55 = vsel %vm650_vm10, %v1409_v38, %v647_v51 }
 0x132   : > { %v629_v56 = vmul.f32 %v627_v54, %v609_v28  ;;  %v656_v57 = vsel %vm653_vm11, %v655_v53, %v651_v55 }
 0x133   : > { %v658_v58 = vmul.f32 %v656_v57, %v638_v29  ;;  %v855_v29 = vld [vmem:[%s1659_s7] sm:$0xf] }
 0x134   : > { %704 = vmatpush.msrb.mxu3 %v629_v56  ;;  %749 = vmatpush.msra.mxu1 %v629_v56 }
 0x135   : > { %679 = vmatpush.msrb.mxu2 %v658_v58  ;;  %724 = vmatpush.msra.mxu0 %v658_v58 }
 0x136   : > { %1347 = vmatmul.msk.f32.vlgmr.msrb.gmra.mxu2 %vm660_vm12, %v659_v59  ;;  %1352 = vmatmul.msk.f32.vlgmr.msra.gmra.mxu1 %vm660_vm12, %v1351_v60 }
 0x137   : > { %769 = vmatpush.msra.mxu2 %v658_v58  ;;  %803 = vmatpush.msra.mxu3 %v629_v56 }
 0x138   : > { %1349 = vmatmul.msk.f32.vlgmr.msrb.gmra.mxu3 %vm660_vm12, %v1348_v61  ;;  %1350 = vmatmul.msk.f32.vlgmr.msra.gmra.mxu0 %vm660_vm12, %v1348_v61 }
 0x13e   : > { %1353 = vmatmul.msk.f32.vlgmr.msra.gmra.mxu2 %vm660_vm12, %v1351_v60 }
 0x140   : > { %1354 = vmatmul.msk.f32.vlgmr.msra.gmra.mxu3 %vm660_vm12, %v659_v59 }
 0x1b3   : > { %v751_v62 = vpop.f32.mrf.mxu1 }
 0x1b4   : > { %809 = vrot.lane.b32.xlu2 %v751_v62, %s1436_s27 }
 0x1b5   : > { %v726_v3 = vpop.f32.mrf.mxu0 }
 0x1b9   : > { %v681_v63 = vpop.f32.mrf.mxu2 }
 0x1ba   : > { %776 = vrot.lane.b32.xlu1 %v681_v63, %s1435_s26 }
 0x1bb   : > { %v706_v1 = vpop.f32.mrf.mxu3 }
 0x1bc   : > { %985 = vperm.xlu2 %1401, %v975_v0  }
 0x1c1   : > { %v771_v23 = vpop.f32.mrf.mxu2 }
 0x1c3   : > { %v805_v4 = vpop.f32.mrf.mxu3 }
 0x1c4   : > { %v806_v5 = vadd.f32 %v805_v4, %v726_v3 }
 0x20e   : > { %v810_v6 = vpop.permute.xlu2 %809 }
 0x20f   : > { %v812_v7 = vsel %vm635_vm3, %v810_v6, 0.0 }
 0x210   : > { %v813_v8 = vadd.f32 %v812_v7, %v806_v5 }
 0x212   : > { %v814_v9 = vadd.f32 %v813_v8, %v785_v2 }
 0x214   : > { %v1356_v10 = vmul.f32 -1.442695, %v814_v9 }
 0x216   : > { %1410 = vpow2.f32 %v1356_v10  ;;  %v986_v56 = vpop.permute.xlu2 %985 }
 0x21c   : > { %v1411_v11 = vpop.eup %1410 }
 0x21d   : > { %v838_v12 = vadd.f32 1.0, %v1411_v11  ;;  %v1380_v11 = vld [vmem:[%s1661_s9 + $0x8] sm:$0xf] }
 0x21f   : > { %1412 = vrcp.f32 %v838_v12  ;;  %v850_v15 = vand.u32 2147483648, %v838_v12  ;;  %vm844_vm13 = vweird.f32 %v838_v12  ;;  %v848_v17 = vand.u32 2147483647, %v838_v12 }
 0x221   : > { %v851_v19 = vor.u32 1.1754944e-38, %v850_v15  ;;  %vm849_vm4 = vcmp.eq.f32.partialorder %v848_v17, 8.507059e+37  ;;  %v1375_v17 = vld [vmem:[%s1661_s9 + $0x4] sm:$0xf] }
 0x225   : > { %v1413_v13 = vpop.eup %1412 }
 0x226   : > { %v840_v14 = vmul.f32 %v1413_v13, %v838_v12  ;;  %vm845_vm14 = vweird.f32 %v1413_v13 }
 0x227   : > { %vm846_vm15 = vmor %vm844_vm13, %vm845_vm14 }
 0x228   : > { %v841_v16 = vsub.f32 1.0, %v840_v14 }
 0x22a   : > { %v842_v18 = vmul.f32 %v1413_v13, %v841_v16 }
 0x22c   : > { %v843_v20 = vadd.f32 %v1413_v13, %v842_v18  ;;  %v777_v21 = vpop.permute.xlu1 %776 }
 0x22d   : > { %v779_v22 = vsel %vm600_vm2, 0.0, %v777_v21 }
 0x22e   : > { %v847_v24 = vsel %vm846_vm15, %v1413_v13, %v843_v20  ;;  %v780_v25 = vadd.f32 %v779_v22, %v706_v1 }
 0x22f   : > { %v852_v26 = vsel %vm849_vm4, %v851_v19, %v847_v24  ;;  %v1056_v19 = vld [vmem:[%s1661_s9] sm:$0xf] }
 0x230   : > { %v1576_v27 = vmul.f32 %v852_v26, %v814_v9  ;;  %v781_v28 = vadd.f32 %v780_v25, %v771_v23 }
 0x232   : > { %v787_v30 = vadd.f32 %v785_v2, %v781_v28  ;;  %1357 = vmatpush.msk.msrb.mxu0 %vm445_vm0, %v1576_v27  ;;  %1362 = vmatpush.msk.msrb.mxu2 %vm445_vm0, %v1576_v27 }
 0x233   : > { %1358 = vmatmul.msk.f32.vlgmr.msrb.gmra.mxu0 %vm441_vm1, %v855_v29  ;;  %1363 = vmatmul.msk.f32.vlgmr.msrb.gmra.mxu2 %vm441_vm1, %v1359_v31 }
 0x234   : > { %v1355_v32 = vmul.f32 -1.442695, %v787_v30  ;;  %1367 = vmatpush.msk.msra.mxu0 %vm445_vm0, %v1576_v27 }
 0x236   : > { %1414 = vpow2.f32 %v1355_v32 }
 0x23b   : > { %1368 = vmatmul.msk.f32.vlgmr.msra.gmra.mxu0 %vm441_vm1, %v1364_v33 }
 0x23c   : > { %v1415_v34 = vpop.eup %1414 }
 0x23d   : > { %v818_v35 = vadd.f32 1.0, %v1415_v34 }
 0x23f   : > { %1416 = vrcp.f32 %v818_v35  ;;  %v830_v39 = vand.u32 2147483648, %v818_v35  ;;  %v828_v41 = vand.u32 2147483647, %v818_v35  ;;  %vm824_vm6 = vweird.f32 %v818_v35 }
 0x241   : > { %v831_v43 = vor.u32 1.1754944e-38, %v830_v39  ;;  %vm829_vm8 = vcmp.eq.f32.partialorder %v828_v41, 8.507059e+37 }
 0x245   : > { %v1417_v36 = vpop.eup %1416 }
 0x246   : > { %v820_v37 = vmul.f32 %v1417_v36, %v818_v35  ;;  %vm825_vm5 = vweird.f32 %v1417_v36 }
 0x247   : > { %vm826_vm7 = vmor %vm824_vm6, %vm825_vm5 }
 0x248   : > { %v821_v38 = vsub.f32 1.0, %v820_v37 }
 0x24a   : > { %v822_v40 = vmul.f32 %v1417_v36, %v821_v38 }
 0x24c   : > { %v823_v42 = vadd.f32 %v1417_v36, %v822_v40 }
 0x24e   : > { %v827_v44 = vsel %vm826_vm7, %v1417_v36, %v823_v42 }
 0x24f   : > { %v832_v45 = vsel %vm829_vm8, %v831_v43, %v827_v44 }
 0x250   : > { %v1596_v46 = vmul.f32 %v832_v45, %v787_v30 }
 0x252   : > { %1360 = vmatpush.msk.msrb.mxu1 %vm445_vm0, %v1596_v46  ;;  %1365 = vmatpush.msk.msrb.mxu3 %vm445_vm0, %v1596_v46 }
 0x253   : > { %1366 = vmatmul.msk.f32.vlgmr.msrb.gmra.mxu3 %vm441_vm1, %v1364_v33  ;;  %1361 = vmatmul.msk.f32.vlgmr.msrb.gmra.mxu1 %vm441_vm1, %v1359_v31 }
 0x254   : > { %1369 = vmatpush.msk.msra.mxu1 %vm445_vm0, %v1596_v46 }
 0x25b   : > { %1370 = vmatmul.msk.f32.vlgmr.msra.gmra.mxu1 %vm441_vm1, %v855_v29 }
 0x2b0   : > { %v879_v47 = vpop.f32.mrf.mxu0 }
 0x2b1   : > { %977 = vrot.lane.b32.xlu0 %v879_v47, %s1435_s26 }
 0x2b6   : > { %v927_v5 = vpop.f32.mrf.mxu2 }
 0x2b8   : > { %v972_v53 = vpop.f32.mrf.mxu0 }
 0x2b9   : > { %1186 = vperm.xlu0 %1400, %v1176_v48  }
 0x2d0   : > { %v907_v50 = vpop.f32.mrf.mxu1 }
 0x2d6   : > { %v952_v49 = vpop.f32.mrf.mxu3 }
 0x2d7   : > { %1010 = vrot.lane.b32.xlu1 %v952_v49, %s1436_s27 }
 0x2d8   : > { %v1006_v6 = vpop.f32.mrf.mxu1 }
 0x2d9   : > { %v1007_v10 = vadd.f32 %v1006_v6, %v927_v5 }
 0x323   : > { %v978_v51 = vpop.permute.xlu0 %977 }
 0x324   : > { %v980_v52 = vsel %vm600_vm2, 0.0, %v978_v51 }
 0x325   : > { %v981_v54 = vadd.f32 %v980_v52, %v907_v50 }
 0x327   : > { %v982_v55 = vadd.f32 %v981_v54, %v972_v53 }
 0x329   : > { %v988_v57 = vadd.f32 %v986_v56, %v982_v55 }
 0x32b   : > { %v1371_v58 = vmul.f32 -1.442695, %v988_v57  ;;  %v1187_v42 = vpop.permute.xlu0 %1186 }
 0x32d   : > { %1418 = vpow2.f32 %v1371_v58 }
 0x333   : > { %v1419_v59 = vpop.eup %1418 }
 0x334   : > { %v1019_v60 = vadd.f32 1.0, %v1419_v59 }
 0x336   : > { %1420 = vrcp.f32 %v1019_v60  ;;  %v1031_v0 = vand.u32 2147483648, %v1019_v60  ;;  %v1029_v2 = vand.u32 2147483647, %v1019_v60  ;;  %vm1025_vm10 = vweird.f32 %v1019_v60 }
 0x338   : > { %v1032_v4 = vor.u32 1.1754944e-38, %v1031_v0  ;;  %vm1030_vm12 = vcmp.eq.f32.partialorder %v1029_v2, 8.507059e+37 }
 0x33c   : > { %v1421_v61 = vpop.eup %1420 }
 0x33d   : > { %v1021_v62 = vmul.f32 %v1421_v61, %v1019_v60  ;;  %vm1026_vm9 = vweird.f32 %v1421_v61 }
 0x33e   : > { %vm1027_vm11 = vmor %vm1025_vm10, %vm1026_vm9 }
 0x33f   : > { %v1022_v63 = vsub.f32 1.0, %v1021_v62 }
 0x341   : > { %v1023_v1 = vmul.f32 %v1421_v61, %v1022_v63 }
 0x343   : > { %v1024_v3 = vadd.f32 %v1421_v61, %v1023_v1 }
 0x345   : > { %v1028_v7 = vsel %vm1027_vm11, %v1421_v61, %v1024_v3 }
 0x346   : > { %v1033_v8 = vsel %vm1030_vm12, %v1032_v4, %v1028_v7 }
 0x347   : > { %v1035_v9 = vmul.f32 %v1033_v8, %v988_v57 }
 0x349   : > { %v1011_v12 = vpop.permute.xlu1 %1010  ;;  %1376 = vmatpush.msk.msra.mxu3 %vm445_vm0, %v1035_v9  ;;  %1381 = vmatpush.msk.msrb.mxu1 %vm445_vm0, %v1035_v9 }
 0x34a   : > { %v1013_v13 = vsel %vm635_vm3, %v1011_v12, 0.0  ;;  %1382 = vmatmul.msk.f32.vlgmr.msrb.gmra.mxu1 %vm441_vm1, %v1380_v11  ;;  %1377 = vmatmul.msk.f32.vlgmr.msra.gmra.mxu3 %vm441_vm1, %v1375_v17 }
 0x34b   : > { %1385 = vmatpush.msk.msrb.mxu3 %vm445_vm0, %v1035_v9  ;;  %v1014_v14 = vadd.f32 %v1013_v13, %v1007_v10 }
 0x34d   : > { %v1015_v15 = vadd.f32 %v1014_v14, %v986_v56 }
 0x34f   : > { %v1372_v16 = vmul.f32 -1.442695, %v1015_v15 }
 0x351   : > { %1422 = vpow2.f32 %v1372_v16 }
 0x352   : > { %1386 = vmatmul.msk.f32.vlgmr.msrb.gmra.mxu3 %vm441_vm1, %v1056_v19 }
 0x357   : > { %v1423_v18 = vpop.eup %1422 }
 0x358   : > { %v1039_v20 = vadd.f32 1.0, %v1423_v18 }
 0x35a   : > { %1424 = vrcp.f32 %v1039_v20  ;;  %v1051_v24 = vand.u32 2147483648, %v1039_v20  ;;  %v1049_v26 = vand.u32 2147483647, %v1039_v20  ;;  %vm1045_vm14 = vweird.f32 %v1039_v20 }
 0x35c   : > { %v1052_v29 = vor.u32 1.1754944e-38, %v1051_v24  ;;  %vm1050_vm4 = vcmp.eq.f32.partialorder %v1049_v26, 8.507059e+37 }
 0x360   : > { %v1425_v21 = vpop.eup %1424 }
 0x361   : > { %v1041_v22 = vmul.f32 %v1425_v21, %v1039_v20  ;;  %vm1046_vm13 = vweird.f32 %v1425_v21 }
 0x362   : > { %vm1047_vm15 = vmor %vm1045_vm14, %vm1046_vm13 }
 0x363   : > { %v1042_v23 = vsub.f32 1.0, %v1041_v22 }
 0x365   : > { %v1043_v25 = vmul.f32 %v1425_v21, %v1042_v23 }
 0x367   : > { %v1044_v28 = vadd.f32 %v1425_v21, %v1043_v25 }
 0x369   : > { %v1048_v30 = vsel %vm1047_vm15, %v1425_v21, %v1044_v28 }
 0x36a   : > { %v1053_v31 = vsel %vm1050_vm4, %v1052_v29, %v1048_v30 }
 0x36b   : > { %v1055_v32 = vmul.f32 %v1053_v31, %v1015_v15 }
 0x36d   : > { %1373 = vmatpush.msk.msra.mxu2 %vm445_vm0, %v1055_v32  ;;  %1378 = vmatpush.msk.msrb.mxu0 %vm445_vm0, %v1055_v32 }
 0x36e   : > { %1374 = vmatmul.msk.f32.vlgmr.msra.gmra.mxu2 %vm441_vm1, %v1056_v19  ;;  %1379 = vmatmul.msk.f32.vlgmr.msrb.gmra.mxu0 %vm441_vm1, %v1375_v17 }
 0x36f   : > { %1383 = vmatpush.msk.msrb.mxu2 %vm445_vm0, %v1055_v32  ;;  %vm1219_vm0 = vcmask 257024  }
 0x376   : > { %1384 = vmatmul.msk.f32.vlgmr.msrb.gmra.mxu2 %vm441_vm1, %v1380_v11 }
 0x3c7   : > { %v1153_v33 = vpop.f32.mrf.mxu1 }
 0x3c8   : > { %1211 = vrot.lane.b32.xlu2 %v1153_v33, %s1436_s27 }
 0x3cd   : > { %v1108_v35 = vpop.f32.mrf.mxu3 }
 0x3d5   : > { %v1207_v37 = vpop.f32.mrf.mxu3 }
 0x3eb   : > { %v1128_v36 = vpop.f32.mrf.mxu0 }
 0x3ec   : > { %v1208_v38 = vadd.f32 %v1207_v37, %v1128_v36 }
 0x3f1   : > { %v1080_v34 = vpop.f32.mrf.mxu2 }
 0x3f2   : > { %1178 = vrot.lane.b32.xlu1 %v1080_v34, %s1435_s26 }
 0x3f9   : > { %v1173_v49 = vpop.f32.mrf.mxu2 }
 0x422   : > { %v1212_v39 = vpop.permute.xlu2 %1211 }
 0x423   : > { %v1214_v40 = vsel %vm635_vm3, %v1212_v39, 0.0 }
 0x424   : > { %v1215_v41 = vadd.f32 %v1214_v40, %v1208_v38 }
 0x426   : > { %v1216_v43 = vadd.f32 %v1215_v41, %v1187_v42 }
 0x428   : > { %v1221_v44 = vmul.f32 0.1, %v1216_v43 }
 0x42a   : > { %v1222_v45 = vadd.f32 %v1221_v44, %v1576_v27 }
 0x42c   : > { %1223 = vst.msk [vmem:[%s436_s28] sm:$0xf] %vm1219_vm0, %v1222_v45 }
 0x464   : > { %v1179_v47 = vpop.permute.xlu1 %1178 }
 0x465   : > { %v1181_v48 = vsel %vm600_vm2, 0.0, %v1179_v47 }
 0x466   : > { %v1182_v50 = vadd.f32 %v1181_v48, %v1108_v35 }
 0x468   : > { %v1183_v51 = vadd.f32 %v1182_v50, %v1173_v49 }
 0x46a   : > { %v1189_v52 = vadd.f32 %v1187_v42, %v1183_v51 }
 0x46c   : > { %v1217_v53 = vmul.f32 0.1, %v1189_v52 }
 0x46e   : > { %v1218_v54 = vadd.f32 %v1217_v53, %v1596_v46 }
 0x470   : > { %1220 = vst.msk [vmem:[%s432_s29] sm:$0xf] %vm1219_vm0, %v1218_v54 }
 0x471 PF: > { %s23_s21 = sadd.s32 1, %s1432_s21  }
 0x472   : > { %p20_p4 = scmp.ge.s32.totalorder %s23_s21, 4  }
 0x474   :  { %22 = sbr.rel (!%p20_p4) target bundleno = 1 (0x1), region = 119 }

// kernel: decoder_forward.15
= control target key start
LH: loop header
LB: loop body
LE: loop exit
PB: predicated region body
PF: predicated region fallthrough
CT: control target
= control target key end

     0   :  { %s1399_s29 = smov 0   ;;  %s1571_s0 = inlined_call_operand.vmem [shape: f32[2,4,64], index: 0, kind: input, shape index: {}]   ;;  %s1572_s1 = inlined_call_operand.vmem [shape: f32[2,4,64], index: 1, kind: input, shape index: {}]   ;;  %s1573_s2 = inlined_call_operand.vmem [shape: f32[3,4,4], index: 2, kind: input, shape index: {}]   ;;  %s1574_s3 = inlined_call_operand.vmem [shape: f32[4,1], index: 3, kind: input, shape index: {}]   ;;  %s1575_s4 = inlined_call_operand.vmem [shape: f32[3,4,4], index: 4, kind: input, shape index: {}]   ;;  %s1576_s5 = inlined_call_operand.vmem [shape: f32[4,1], index: 5, kind: input, shape index: {}]   ;;  %s1577_s6 = inlined_call_operand.vmem [shape: f32[3,4,4], index: 6, kind: input, shape index: {}]   ;;  %s1578_s7 = inlined_call_operand.vmem [shape: f32[4,1], index: 7, kind: input, shape index: {}]   ;;  %s1579_s8 = inlined_call_operand.vmem [shape: f32[3,4,4], index: 8, kind: input, shape index: {}]   ;;  %s1580_s9 = inlined_call_operand.vmem [shape: f32[4,1], index: 9, kind: input, shape index: {}]   ;;  %s1581_s10 = inlined_call_operand.vmem [shape: f32[3,4,4], index: 10, kind: input, shape index: {}]   ;;  %s1582_s11 = inlined_call_operand.vmem [shape: f32[4,1], index: 11, kind: input, shape index: {}]   ;;  %s1583_s12 = inlined_call_operand.vmem [shape: f32[3,4,4], index: 12, kind: input, shape index: {}]   ;;  %s1584_s13 = inlined_call_operand.vmem [shape: f32[4,1], index: 13, kind: input, shape index: {}]   ;;  %s1585_s14 = inlined_call_operand.vmem [shape: f32[2,4,64], index: 14, kind: output, shape index: {}]  }
   0x1 LB: > { %s1219_s30 = sadd.s32 4294967295, %s1319_s29   ;;  %p1223_p0 = scmp.ge.s32.totalorder %s1319_s29, 1  ;;  %s1319_s29 = sphi %s1399_s29, %s24_s29  }
   0x2   : > { %p420_p1 = scmp.lt.s32.totalorder %s1319_s29, 3 }
   0x4   : > { %p421_p2 = pnand %p1223_p0, %p420_p1 }
   0x5   : > { %p468_p3 = scmp.lt.s32.totalorder (!%p421_p2), %s1219_s30, 1  ;;  %s1321_s19 = smov (!%p421_p2), 127  }
   0x6   : > { %424 = sbr.rel (%p421_p2) target bundleno = 1428 (0x594), region = 76  ;;  %s1322_s20 = smov (!%p421_p2), 1  }
   0xb   : > { %s1587_s30 = smov (!%p468_p3, %s1219_s30), 1  ;;  %vm494_vm0 = vcmask 1043456   ;;  %vm490_vm1 = vcmask 31744   ;;  %v1227_v1 = vld [vmem:[%s1573_s2 + $0x4] sm:$0xf]  ;;  %v1323_v3 = vmov 0  }
   0xc   : > { %s1407_s15 = sshll.u32 %s1587_s30, 2  ;;  %v577_v2 = vld [vmem:[%s1574_s3] sm:$0xf]  ;;  %1292 = vset.pattern.permute.xlu1 %v1323_v3  ;;  %1293 = vset.pattern.permute.xlu2 %v1323_v3  ;;  %vm548_vm2 = vcmask 515072   ;;  %v1232_v5 = vld [vmem:[%s1573_s2 + $0x8] sm:$0xf] }
   0xd   : > { %s471_s18 = scalar_lea.vmem %s1571_s0, %s1407_s15  ;;  %580 = vperm.xlu1 %1292, %v577_v2   ;;  %1294 = vset.pattern.permute.xlu0 %v1323_v3  ;;  %vm486_vm3 = vcmask 7168   ;;  %v481_v8 = vld [vmem:[%s1573_s2] sm:$0xf]  ;;  %v1236_v32 = vld [vmem:[%s1575_s4 + $0x4] sm:$0xf]  ;;  %s475_s21 = scalar_lea.vmem %s1572_s1, %s1407_s15 }
   0xe   : > { %v1413_v0 = vld [vmem:[%s471_s18] sm:$0xf]  ;;  %v1241_v34 = vld [vmem:[%s1575_s4 + $0x8] sm:$0xf]  ;;  %v1245_v2 = vld [vmem:[%s1577_s6 + $0x4] sm:$0xf]  ;;  %s479_s24 = scalar_lea.vmem %s1585_s14, %s1407_s15 }
   0xf   : > { %545 = vrot.lane.b32.xlu0 %v1413_v0, %s1321_s19  ;;  %1228 = vmatpush.msk.msra.mxu0 %vm494_vm0, %v1413_v0  ;;  %v899_v31 = vld [vmem:[%s1580_s9] sm:$0xf] }
  0x10   : > { %1229 = vmatmul.msk.f32.vlgmr.msra.gmra.mxu0 %vm490_vm1, %v1227_v1  ;;  %v696_v35 = vld [vmem:[%s1576_s5] sm:$0xf] }
  0x11   : > { %v604_v38 = vld [vmem:[%s1575_s4] sm:$0xf] }
  0x12   : > { %v1018_v63 = vld [vmem:[%s1582_s11] sm:$0xf] }
  0x13   : > { %v1139_v1 = vld [vmem:[%s1584_s13] sm:$0xf] }
  0x14   : > { %v824_v3 = vld [vmem:[%s1579_s8] sm:$0xf] }
  0x17   : > { %483 = vrot.lane.b32.xlu0 %v1413_v0, %s1322_s20 }
  0x7f   : > { %v581_v14 = vpop.permute.xlu1 %580 }
  0x81   : > { %v546_v4 = vpop.permute.xlu0 %545 }
  0x82   : > { %v1432_v6 = vsel %vm548_vm2, %v546_v4, 0.0 }
  0x83   : > { %1233 = vmatpush.msk.msra.mxu2 %vm494_vm0, %v1432_v6 }
  0x84   : > { %1234 = vmatmul.msk.f32.vlgmr.msra.gmra.mxu2 %vm490_vm1, %v1232_v5  ;;  %v1250_v5 = vld [vmem:[%s1577_s6 + $0x8] sm:$0xf] }
  0x89   : > { %v484_v7 = vpop.permute.xlu0 %483 }
  0x8a   : > { %v1441_v9 = vsel %vm486_vm3, 0.0, %v484_v7 }
  0x8b   : > { %1230 = vmatpush.msk.msra.mxu1 %vm494_vm0, %v1441_v9 }
  0x8c   : > { %1231 = vmatmul.msk.f32.vlgmr.msra.gmra.mxu1 %vm490_vm1, %v481_v8  ;;  %v1253_v8 = vld [vmem:[%s1579_s8 + $0x4] sm:$0xf] }
  0x8d   : > { %v514_v10 = vpop.f32.mrf.mxu0 }
 0x107   : > { %v573_v12 = vpop.f32.mrf.mxu2 }
 0x109   : > { %v540_v11 = vpop.f32.mrf.mxu1 }
 0x10a   : > { %v541_v13 = vadd.f32 %v540_v11, %v514_v10  ;;  %v725_v10 = vld [vmem:[%s1577_s6] sm:$0xf] }
 0x10c   : > { %v576_v15 = vadd.f32 %v573_v12, %v541_v13  ;;  %v1258_v12 = vld [vmem:[%s1579_s8 + $0x8] sm:$0xf] }
 0x10e   : > { %v583_v16 = vadd.f32 %v581_v14, %v576_v15 }
 0x110   : > { %v1235_v17 = vmul.f32 -1.442695, %v583_v16 }
 0x112   : > { %1295 = vpow2.f32 %v1235_v17 }
 0x118   : > { %v1296_v18 = vpop.eup %1295 }
 0x119   : > { %v587_v19 = vadd.f32 1.0, %v1296_v18 }
 0x11b   : > { %1297 = vrcp.f32 %v587_v19  ;;  %v599_v23 = vand.u32 2147483648, %v587_v19  ;;  %v597_v25 = vand.u32 2147483647, %v587_v19  ;;  %vm593_vm5 = vweird.f32 %v587_v19 }
 0x11d   : > { %v600_v27 = vor.u32 1.1754944e-38, %v599_v23  ;;  %vm598_vm7 = vcmp.eq.f32.partialorder %v597_v25, 8.507059e+37 }
 0x121   : > { %v1298_v20 = vpop.eup %1297 }
 0x122   : > { %v589_v21 = vmul.f32 %v1298_v20, %v587_v19  ;;  %vm594_vm4 = vweird.f32 %v1298_v20 }
 0x123   : > { %vm595_vm6 = vmor %vm593_vm5, %vm594_vm4 }
 0x124   : > { %v590_v22 = vsub.f32 1.0, %v589_v21 }
 0x126   : > { %v591_v24 = vmul.f32 %v1298_v20, %v590_v22 }
 0x128   : > { %v592_v26 = vadd.f32 %v1298_v20, %v591_v24 }
 0x12a   : > { %v596_v28 = vsel %vm595_vm6, %v1298_v20, %v592_v26 }
 0x12b   : > { %v601_v29 = vsel %vm598_vm7, %v600_v27, %v596_v28 }
 0x12c   : > { %v603_v30 = vmul.f32 %v601_v29, %v583_v16 }
 0x12e   : > { %665 = vrot.lane.b32.xlu2 %v603_v30, %s1321_s19  ;;  %606 = vrot.lane.b32.xlu1 %v603_v30, %s1322_s20 }
 0x12f   : > { %1237 = vmatpush.msk.msra.mxu3 %vm494_vm0, %v603_v30 }
 0x130   : > { %1238 = vmatmul.msk.f32.vlgmr.msra.gmra.mxu3 %vm490_vm1, %v1236_v32 }
 0x136   : > { %902 = vperm.xlu1 %1292, %v899_v31   ;;  %699 = vperm.xlu2 %1293, %v696_v35  }
 0x188   : > { %v666_v33 = vpop.permute.xlu2 %665 }
 0x189   : > { %v668_v36 = vsel %vm548_vm2, %v666_v33, 0.0 }
 0x18a   : > { %1242 = vmatpush.msk.msrb.mxu1 %vm494_vm0, %v668_v36  ;;  %v1262_v36 = vld [vmem:[%s1581_s10 + $0x4] sm:$0xf] }
 0x18b   : > { %1243 = vmatmul.msk.f32.vlgmr.msrb.gmra.mxu1 %vm490_vm1, %v1241_v34 }
 0x18c   : > { %1254 = vmatpush.msk.msra.mxu1 %vm494_vm0, %v1413_v0 }
 0x190   : > { %v700_v44 = vpop.permute.xlu2 %699 }
 0x193   : > { %1255 = vmatmul.msk.f32.vlgmr.msra.gmra.mxu1 %vm490_vm1, %v1253_v8  ;;  %v1047_v8 = vld [vmem:[%s1583_s12] sm:$0xf] }
 0x1a0   : > { %v607_v37 = vpop.permute.xlu1 %606 }
 0x1a1   : > { %v609_v39 = vsel %vm486_vm3, 0.0, %v607_v37 }
 0x1a2   : > { %1239 = vmatpush.msk.msrb.mxu0 %vm494_vm0, %v609_v39  ;;  %v1267_v39 = vld [vmem:[%s1581_s10 + $0x8] sm:$0xf] }
 0x1a3   : > { %1240 = vmatmul.msk.f32.vlgmr.msrb.gmra.mxu0 %vm490_vm1, %v604_v38 }
 0x1a8   : > { %v903_v21 = vpop.permute.xlu1 %902 }
 0x1b3   : > { %v634_v40 = vpop.f32.mrf.mxu3 }
 0x208   : > { %v692_v42 = vpop.f32.mrf.mxu1 }
 0x210   : > { %v847_v16 = vpop.f32.mrf.mxu1 }
 0x220   : > { %v660_v41 = vpop.f32.mrf.mxu0 }
 0x221   : > { %v661_v43 = vadd.f32 %v660_v41, %v634_v40  ;;  %v926_v40 = vld [vmem:[%s1581_s10] sm:$0xf] }
 0x223   : > { %v695_v45 = vadd.f32 %v692_v42, %v661_v43 }
 0x225   : > { %v702_v46 = vadd.f32 %v700_v44, %v695_v45 }
 0x227   : > { %v703_v47 = vmul.f32 0.1, %v702_v46 }
 0x229   : > { %v704_v48 = vadd.f32 %v703_v47, %v1413_v0 }
 0x22b   : > { %v1244_v49 = vmul.f32 -1.442695, %v704_v48 }
 0x22d   : > { %1299 = vpow2.f32 %v1244_v49 }
 0x233   : > { %v1300_v50 = vpop.eup %1299 }
 0x234   : > { %v708_v51 = vadd.f32 1.0, %v1300_v50 }
 0x236   : > { %1301 = vrcp.f32 %v708_v51  ;;  %v720_v55 = vand.u32 2147483648, %v708_v51  ;;  %v718_v57 = vand.u32 2147483647, %v708_v51  ;;  %vm714_vm9 = vweird.f32 %v708_v51 }
 0x238   : > { %v721_v59 = vor.u32 1.1754944e-38, %v720_v55  ;;  %vm719_vm11 = vcmp.eq.f32.partialorder %v718_v57, 8.507059e+37 }
 0x23c   : > { %v1302_v52 = vpop.eup %1301 }
 0x23d   : > { %v710_v53 = vmul.f32 %v1302_v52, %v708_v51  ;;  %vm715_vm8 = vweird.f32 %v1302_v52 }
 0x23e   : > { %vm716_vm10 = vmor %vm714_vm9, %vm715_vm8 }
 0x23f   : > { %v711_v54 = vsub.f32 1.0, %v710_v53 }
 0x241   : > { %v712_v56 = vmul.f32 %v1302_v52, %v711_v54 }
 0x243   : > { %v713_v58 = vadd.f32 %v1302_v52, %v712_v56 }
 0x245   : > { %v717_v60 = vsel %vm716_vm10, %v1302_v52, %v713_v58 }
 0x246   : > { %v722_v61 = vsel %vm719_vm11, %v721_v59, %v717_v60 }
 0x247   : > { %v724_v62 = vmul.f32 %v722_v61, %v704_v48 }
 0x249   : > { %786 = vrot.lane.b32.xlu2 %v724_v62, %s1321_s19  ;;  %727 = vrot.lane.b32.xlu0 %v724_v62, %s1322_s20 }
 0x24a   : > { %1246 = vmatpush.msk.msrb.mxu2 %vm494_vm0, %v724_v62 }
 0x24b   : > { %1247 = vmatmul.msk.f32.vlgmr.msrb.gmra.mxu2 %vm490_vm1, %v1245_v2 }
 0x24c   : > { %1256 = vmatpush.msk.msra.mxu2 %vm494_vm0, %v1441_v9 }
 0x251   : > { %1021 = vperm.xlu2 %1293, %v1018_v63  }
 0x253   : > { %1257 = vmatmul.msk.f32.vlgmr.msra.gmra.mxu2 %vm490_vm1, %v824_v3  ;;  %v1271_v3 = vld [vmem:[%s1583_s12 + $0x4] sm:$0xf] }
 0x259   : > { %1142 = vperm.xlu2 %1293, %v1139_v1  }
 0x2a3   : > { %v787_v4 = vpop.permute.xlu2 %786 }
 0x2a4   : > { %v789_v7 = vsel %vm548_vm2, %v787_v4, 0.0  ;;  %v817_v4 = vld [vmem:[%s1578_s7] sm:$0xf] }
 0x2a5   : > { %1251 = vmatpush.msk.msra.mxu0 %vm494_vm0, %v789_v7 }
 0x2a6   : > { %1252 = vmatmul.msk.f32.vlgmr.msra.gmra.mxu0 %vm490_vm1, %v1250_v5 }
 0x2ab   : > { %v1022_v49 = vpop.permute.xlu2 %1021 }
 0x2bb   : > { %v728_v9 = vpop.permute.xlu0 %727 }
 0x2bc   : > { %v730_v11 = vsel %vm486_vm3, 0.0, %v728_v9  ;;  %v1276_v9 = vld [vmem:[%s1583_s12 + $0x8] sm:$0xf] }
 0x2bd   : > { %1248 = vmatpush.msk.msrb.mxu3 %vm494_vm0, %v730_v11 }
 0x2be   : > { %1249 = vmatmul.msk.f32.vlgmr.msrb.gmra.mxu3 %vm490_vm1, %v725_v10 }
 0x2bf   : > { %1259 = vmatpush.msk.msra.mxu3 %vm494_vm0, %v1432_v6 }
 0x2c6   : > { %1260 = vmatmul.msk.f32.vlgmr.msra.gmra.mxu3 %vm490_vm1, %v1258_v12 }
 0x2ce   : > { %v755_v13 = vpop.f32.mrf.mxu2 }
 0x2d6   : > { %v870_v17 = vpop.f32.mrf.mxu2 }
 0x2d7   : > { %v871_v18 = vadd.f32 %v870_v17, %v847_v16 }
 0x323   : > { %v813_v43 = vpop.f32.mrf.mxu0 }
 0x341   : > { %v781_v14 = vpop.f32.mrf.mxu3 }
 0x342   : > { %v1515_v15 = vadd.f32 %v781_v14, %v755_v13 }
 0x349   : > { %v895_v19 = vpop.f32.mrf.mxu3 }
 0x34a   : > { %v898_v20 = vadd.f32 %v895_v19, %v871_v18  ;;  %v1143_v18 = vpop.permute.xlu2 %1142 }
 0x34c   : > { %v905_v22 = vadd.f32 %v903_v21, %v898_v20 }
 0x34e   : > { %v1261_v23 = vmul.f32 -1.442695, %v905_v22 }
 0x350   : > { %1303 = vpow2.f32 %v1261_v23  ;;  %v1149_v23 = vld [vmem:[%s475_s21] sm:$0xf] }
 0x356   : > { %v1304_v6 = vpop.eup %1303 }
 0x357   : > { %v909_v24 = vadd.f32 1.0, %v1304_v6  ;;  %v816_v6 = vadd.f32 %v813_v43, %v1515_v15 }
 0x359   : > { %1305 = vrcp.f32 %v909_v24  ;;  %v921_v28 = vand.u32 2147483648, %v909_v24  ;;  %v919_v30 = vand.u32 2147483647, %v909_v24  ;;  %vm915_vm13 = vweird.f32 %v909_v24 }
 0x35b   : > { %v922_v32 = vor.u32 1.1754944e-38, %v921_v28  ;;  %vm920_vm15 = vcmp.eq.f32.partialorder %v919_v30, 8.507059e+37 }
 0x35f   : > { %v1306_v25 = vpop.eup %1305 }
 0x360   : > { %v911_v26 = vmul.f32 %v1306_v25, %v909_v24  ;;  %vm916_vm12 = vweird.f32 %v1306_v25 }
 0x361   : > { %vm917_vm14 = vmor %vm915_vm13, %vm916_vm12 }
 0x362   : > { %v912_v27 = vsub.f32 1.0, %v911_v26 }
 0x364   : > { %v913_v29 = vmul.f32 %v1306_v25, %v912_v27 }
 0x366   : > { %v914_v31 = vadd.f32 %v1306_v25, %v913_v29 }
 0x368   : > { %v918_v33 = vsel %vm917_vm14, %v1306_v25, %v914_v31 }
 0x369   : > { %v923_v34 = vsel %vm920_vm15, %v922_v32, %v918_v33 }
 0x36a   : > { %v925_v35 = vmul.f32 %v923_v34, %v905_v22 }
 0x36c   : > { %928 = vrot.lane.b32.xlu1 %v925_v35, %s1322_s20  ;;  %987 = vrot.lane.b32.xlu0 %v925_v35, %s1321_s19 }
 0x36d   : > { %1263 = vmatpush.msk.msrb.mxu0 %vm494_vm0, %v925_v35 }
 0x36e   : > { %1264 = vmatmul.msk.f32.vlgmr.msrb.gmra.mxu0 %vm490_vm1, %v1262_v36 }
 0x3de   : > { %v929_v37 = vpop.permute.xlu1 %928  ;;  %v988_v38 = vpop.permute.xlu0 %987 }
 0x3df   : > { %v931_v41 = vsel %vm486_vm3, 0.0, %v929_v37  ;;  %v990_v42 = vsel %vm548_vm2, %v988_v38, 0.0 }
 0x3e0   : > { %1265 = vmatpush.msk.msrb.mxu1 %vm494_vm0, %v931_v41  ;;  %1268 = vmatpush.msk.msrb.mxu2 %vm494_vm0, %v990_v42 }
 0x3e1   : > { %1269 = vmatmul.msk.f32.vlgmr.msrb.gmra.mxu2 %vm490_vm1, %v1267_v39  ;;  %1266 = vmatmul.msk.f32.vlgmr.msrb.gmra.mxu1 %vm490_vm1, %v926_v40 }
 0x3eb   : > { %v956_v44 = vpop.f32.mrf.mxu0 }
 0x45e   : > { %v982_v45 = vpop.f32.mrf.mxu1 }
 0x45f   : > { %v983_v46 = vadd.f32 %v982_v45, %v956_v44 }
 0x464   : > { %v1014_v47 = vpop.f32.mrf.mxu2 }
 0x465   : > { %v1017_v48 = vadd.f32 %v1014_v47, %v983_v46 }
 0x467   : > { %v1024_v50 = vadd.f32 %v1022_v49, %v1017_v48 }
 0x469   : > { %v1025_v51 = vmul.f32 0.1, %v1024_v50 }
 0x46b   : > { %v1026_v52 = vadd.f32 %v1025_v51, %v1413_v0 }
 0x46d   : > { %v1270_v53 = vmul.f32 -1.442695, %v1026_v52 }
 0x46f   : > { %1307 = vpow2.f32 %v1270_v53 }
 0x475   : > { %v1308_v54 = vpop.eup %1307 }
 0x476   : > { %v1030_v55 = vadd.f32 1.0, %v1308_v54 }
 0x478   : > { %1309 = vrcp.f32 %v1030_v55  ;;  %v1042_v59 = vand.u32 2147483648, %v1030_v55  ;;  %v1040_v61 = vand.u32 2147483647, %v1030_v55  ;;  %vm1036_vm5 = vweird.f32 %v1030_v55 }
 0x47a   : > { %v1043_v63 = vor.u32 1.1754944e-38, %v1042_v59  ;;  %vm1041_vm7 = vcmp.eq.f32.partialorder %v1040_v61, 8.507059e+37 }
 0x47e   : > { %v1310_v56 = vpop.eup %1309 }
 0x47f   : > { %v1032_v57 = vmul.f32 %v1310_v56, %v1030_v55  ;;  %vm1037_vm4 = vweird.f32 %v1310_v56 }
 0x480   : > { %vm1038_vm6 = vmor %vm1036_vm5, %vm1037_vm4 }
 0x481   : > { %v1033_v58 = vsub.f32 1.0, %v1032_v57 }
 0x483   : > { %v1034_v60 = vmul.f32 %v1310_v56, %v1033_v58 }
 0x485   : > { %v1035_v62 = vadd.f32 %v1310_v56, %v1034_v60 }
 0x487   : > { %v1039_v1 = vsel %vm1038_vm6, %v1310_v56, %v1035_v62 }
 0x488   : > { %v1044_v2 = vsel %vm1041_vm7, %v1043_v63, %v1039_v1 }
 0x489   : > { %v1046_v0 = vmul.f32 %v1044_v2, %v1026_v52 }
 0x48b   : > { %1108 = vrot.lane.b32.xlu1 %v1046_v0, %s1321_s19  ;;  %1049 = vrot.lane.b32.xlu0 %v1046_v0, %s1322_s20 }
 0x48c   : > { %1272 = vmatpush.msk.msrb.mxu3 %vm494_vm0, %v1046_v0 }
 0x48d   : > { %1273 = vmatmul.msk.f32.vlgmr.msrb.gmra.mxu3 %vm490_vm1, %v1271_v3 }
 0x493   : > { %820 = vperm.xlu0 %1294, %v817_v4  }
 0x4fd   : > { %v1109_v5 = vpop.permute.xlu1 %1108  ;;  %v1050_v7 = vpop.permute.xlu0 %1049 }
 0x4fe   : > { %v1111_v10 = vsel %vm548_vm2, %v1109_v5, 0.0  ;;  %v1052_v11 = vsel %vm486_vm3, 0.0, %v1050_v7 }
 0x4ff   : > { %1274 = vmatpush.msk.msra.mxu0 %vm494_vm0, %v1052_v11  ;;  %1277 = vmatpush.msk.msra.mxu1 %vm494_vm0, %v1111_v10  ;;  %vm1152_vm0 = vcmask 519168  }
 0x500   : > { %1275 = vmatmul.msk.f32.vlgmr.msra.gmra.mxu0 %vm490_vm1, %v1047_v8  ;;  %1278 = vmatmul.msk.f32.vlgmr.msra.gmra.mxu1 %vm490_vm1, %v1276_v9 }
 0x505   : > { %v821_v22 = vpop.permute.xlu0 %820 }
 0x506   : > { %v823_v25 = vadd.f32 %v821_v22, %v816_v6 }
 0x510   : > { %v1077_v12 = vpop.f32.mrf.mxu3 }
 0x57d   : > { %v1103_v13 = vpop.f32.mrf.mxu0  ;;  %v1135_v14 = vpop.f32.mrf.mxu1 }
 0x57e   : > { %v1104_v16 = vadd.f32 %v1103_v13, %v1077_v12 }
 0x580   : > { %v1138_v17 = vadd.f32 %v1135_v14, %v1104_v16 }
 0x582   : > { %v1145_v19 = vadd.f32 %v1143_v18, %v1138_v17 }
 0x584   : > { %v1146_v20 = vmul.f32 0.5, %v1145_v19 }
 0x586   : > { %v1147_v21 = vmul.f32 1.442695, %v1146_v20 }
 0x588   : > { %1311 = vpow2.f32 %v1147_v21 }
 0x58e   : > { %v1312_v24 = vpop.eup %1311 }
 0x58f   : > { %v1150_v26 = vmul.f32 %v1312_v24, %v1149_v23 }
 0x591   : > { %v1151_v27 = vadd.f32 %v1150_v26, %v823_v25 }
 0x593   : > { %1153 = vst.msk [vmem:[%s479_s24] sm:$0xf] %vm1152_vm0, %v1151_v27 }
 0x594 PF: > { %s24_s29 = sadd.s32 1, %s1319_s29  }
 0x595   : > { %p21_p4 = scmp.ge.s32.totalorder %s24_s29, 4  }
 0x597   :  { %23 = sbr.rel (!%p21_p4) target bundleno = 1 (0x1), region = 121 }

// kernel: decoder_forward.16
= control target key start
LH: loop header
LB: loop body
LE: loop exit
PB: predicated region body
PF: predicated region fallthrough
CT: control target
= control target key end

     0   :  { %s1502_s21 = smov 0   ;;  %s1652_s0 = inlined_call_operand.vmem [shape: f32[2,4,64], index: 0, kind: input, shape index: {}]   ;;  %s1653_s1 = inlined_call_operand.vmem [shape: f32[2,4,64], index: 1, kind: input, shape index: {}]   ;;  %s1654_s2 = inlined_call_operand.vmem [shape: f32[3,8,4], index: 2, kind: input, shape index: {}]   ;;  %s1655_s3 = inlined_call_operand.vmem [shape: f32[3,8,4], index: 3, kind: input, shape index: {}]   ;;  %s1656_s4 = inlined_call_operand.vmem [shape: f32[8,1], index: 4, kind: input, shape index: {}]   ;;  %s1657_s5 = inlined_call_operand.vmem [shape: f32[3,4,8], index: 5, kind: input, shape index: {}]   ;;  %s1658_s6 = inlined_call_operand.vmem [shape: f32[4,1], index: 6, kind: input, shape index: {}]   ;;  %s1659_s7 = inlined_call_operand.vmem [shape: f32[3,4,4], index: 7, kind: input, shape index: {}]   ;;  %s1660_s8 = inlined_call_operand.vmem [shape: f32[4,1], index: 8, kind: input, shape index: {}]   ;;  %s1661_s9 = inlined_call_operand.vmem [shape: f32[3,4,4], index: 9, kind: input, shape index: {}]   ;;  %s1662_s10 = inlined_call_operand.vmem [shape: f32[4,1], index: 10, kind: input, shape index: {}]   ;;  %s1663_s11 = inlined_call_operand.vmem [shape: f32[2,4,64], index: 11, kind: output, shape index: {0}]   ;;  %s1664_s12 = inlined_call_operand.vmem [shape: f32[2,4,64], index: 12, kind: output, shape index: {1}]  }
   0x1 LB: > { %s1320_s22 = sadd.s32 4294967295, %s1432_s21   ;;  %p1324_p0 = scmp.ge.s32.totalorder %s1432_s21, 1  ;;  %s1432_s21 = sphi %s1502_s21, %s23_s21  }
   0x2   : > { %p373_p1 = scmp.lt.s32.totalorder %s1432_s21, 3 }
   0x4   : > { %p374_p2 = pnand %p1324_p0, %p373_p1 }
   0x5   : > { %p421_p3 = scmp.lt.s32.totalorder (!%p374_p2), %s1320_s22, 1  ;;  %s1436_s27 = smov (!%p374_p2), 127  }
   0x6   : > { %377 = sbr.rel (%p374_p2) target bundleno = 1137 (0x471), region = 64 }
   0xb   : > { %s1666_s22 = smov (!%p421_p3, %s1320_s22), 1  ;;  %vm445_vm0 = vcmask 1043456   ;;  %v440_v1 = vld [vmem:[%s1655_s3] sm:$0xff]  ;;  %vm441_vm1 = vcmask 31744   ;;  %v1334_v4 = vld [vmem:[%s1655_s3 + $0x8] sm:$0xff]  ;;  %v1340_v6 = vld [vmem:[%s1655_s3 + $0x10] sm:$0xff] }
   0xc   : > { %s1510_s23 = sshll.u32 %s1666_s22, 2  ;;  %v439_v2 = vld [vmem:[%s1654_s2] sm:$0xff]  ;;  %v1333_v5 = vld [vmem:[%s1654_s2 + $0x8] sm:$0xff]  ;;  %v1339_v7 = vld [vmem:[%s1654_s2 + $0x10] sm:$0xff]  ;;  %v1434_v8 = vmov 0   ;;  %vm600_vm2 = vcmask 7168  }
   0xd   : > { %s428_s26 = scalar_lea.vmem %s1653_s1, %s1510_s23  ;;  %s424_s29 = scalar_lea.vmem %s1652_s0, %s1510_s23  ;;  %1400 = vset.pattern.permute.xlu0 %v1434_v8  ;;  %1401 = vset.pattern.permute.xlu2 %v1434_v8  ;;  %v595_v15 = vld [vmem:[%s1656_s4] sm:$0xff]  ;;  %vm635_vm3 = vcmask 515072   ;;  %vm660_vm12 = vcmask 64512   ;;  %v1351_v60 = vld [vmem:[%s1657_s5 + $0x8] sm:$0xf] }
   0xe   : > { %v438_v0 = vld [vmem:[%s428_s26] sm:$0xf]  ;;  %s1435_s26 = smov 1   ;;  %v1348_v61 = vld [vmem:[%s1657_s5 + $0x4] sm:$0xf]  ;;  %s436_s28 = scalar_lea.vmem %s1664_s12, %s1510_s23 }
   0xf   : > { %1329 = vmatpush.msk.msra.mxu0 %vm445_vm0, %v438_v0  ;;  %v437_v3 = vld [vmem:[%s424_s29] sm:$0xf]  ;;  %1335 = vmatpush.msk.msra.mxu2 %vm445_vm0, %v438_v0  ;;  %s432_s29 = scalar_lea.vmem %s1663_s11, %s1510_s23 }
  0x10   : > { %1331 = vmatpush.msk.msra.mxu1 %vm445_vm0, %v437_v3  ;;  %1337 = vmatpush.msk.msra.mxu3 %vm445_vm0, %v437_v3  ;;  %v774_v36 = vld [vmem:[%s1658_s6] sm:$0xf] }
  0x11   : > { %1330 = vmatmul.msk.f32.vlgmr.msra.gmra.mxu0 %vm441_vm1, %v440_v1  ;;  %1332 = vmatmul.msk.f32.vlgmr.msra.gmra.mxu1 %vm441_vm1, %v439_v2  ;;  %v659_v59 = vld [vmem:[%s1657_s5] sm:$0xf] }
  0x12   : > { %1336 = vmatmul.msk.f32.vlgmr.msra.gmra.mxu2 %vm441_vm1, %v1334_v4  ;;  %1338 = vmatmul.msk.f32.vlgmr.msra.gmra.mxu3 %vm441_vm1, %v1333_v5 }
  0x13   : > { %1341 = vmatpush.msk.msrb.mxu0 %vm445_vm0, %v438_v0  ;;  %1343 = vmatpush.msk.msrb.mxu1 %vm445_vm0, %v437_v3  ;;  %v975_v0 = vld [vmem:[%s1660_s8] sm:$0xf] }
  0x14   : > { %784 = vperm.xlu2 %1401, %v774_v36  }
  0x19   : > { %1342 = vmatmul.msk.f32.vlgmr.msrb.gmra.mxu0 %vm441_vm1, %v1340_v6  ;;  %1344 = vmatmul.msk.f32.vlgmr.msrb.gmra.mxu1 %vm441_vm1, %v1339_v7 }
  0x6e   : > { %v785_v2 = vpop.permute.xlu2 %784 }
  0x8e   : > { %v466_v9 = vpop.f32.mrf.mxu0  ;;  %v492_v10 = vpop.f32.mrf.mxu1 }
  0x8f   : > { %v493_v11 = vadd.f32 %v492_v10, %v466_v9 }
  0x91   : > { %597 = vrot.lane.b32.xlu1 %v493_v11, %s1435_s26 }
  0x95   : > { %v519_v17 = vpop.f32.mrf.mxu2  ;;  %v542_v18 = vpop.f32.mrf.mxu3 }
  0x96   : > { %v569_v12 = vpop.f32.mrf.mxu0  ;;  %v592_v13 = vpop.f32.mrf.mxu1  ;;  %v543_v21 = vadd.f32 %v542_v18, %v519_v17 }
  0x97   : > { %v593_v14 = vadd.f32 %v592_v13, %v569_v12 }
  0x98   : > { %v630_v24 = vadd.f32 %v543_v21, %v493_v11 }
  0x99   : > { %632 = vrot.lane.b32.xlu0 %v593_v14, %s1436_s27 }
  0xa1   : > { %606 = vperm.xlu0 %1400, %v595_v15  }
 0x103   : > { %v598_v16 = vpop.permute.xlu1 %597 }
 0x104   : > { %v601_v19 = vsel %vm600_vm2, 0.0, %v598_v16 }
 0x105   : > { %v602_v22 = vadd.f32 %v601_v19, %v543_v21 }
 0x107   : > { %v603_v25 = vadd.f32 %v602_v22, %v593_v14 }
 0x10b   : > { %v633_v20 = vpop.permute.xlu0 %632 }
 0x10c   : > { %v636_v23 = vsel %vm635_vm3, %v633_v20, 0.0 }
 0x10d   : > { %v637_v26 = vadd.f32 %v636_v23, %v630_v24 }
 0x113   : > { %v607_v27 = vpop.permute.xlu0 %606 }
 0x114   : > { %v609_v28 = vadd.f32 %v607_v27, %v603_v25  ;;  %v638_v29 = vadd.f32 %v637_v26, %v607_v27 }
 0x116   : > { %v1345_v30 = vmul.f32 -1.442695, %v609_v28  ;;  %v1346_v31 = vmul.f32 -1.442695, %v638_v29 }
 0x118   : > { %1402 = vpow2.f32 %v1345_v30 }
 0x119   : > { %1404 = vpow2.f32 %v1346_v31  ;;  %v1359_v31 = vld [vmem:[%s1659_s7 + $0x4] sm:$0xf] }
 0x11e   : > { %v1403_v32 = vpop.eup %1402 }
 0x11f   : > { %v1405_v33 = vpop.eup %1404  ;;  %v613_v34 = vadd.f32 1.0, %v1403_v32 }
 0x120   : > { %v642_v35 = vadd.f32 1.0, %v1405_v33  ;;  %v1364_v33 = vld [vmem:[%s1659_s7 + $0x8] sm:$0xf] }
 0x121   : > { %1406 = vrcp.f32 %v613_v34  ;;  %v625_v42 = vand.u32 2147483648, %v613_v34  ;;  %v623_v45 = vand.u32 2147483647, %v613_v34  ;;  %vm619_vm6 = vweird.f32 %v613_v34 }
 0x122   : > { %1408 = vrcp.f32 %v642_v35  ;;  %v654_v46 = vand.u32 2147483648, %v642_v35  ;;  %v652_v48 = vand.u32 2147483647, %v642_v35  ;;  %vm648_vm8 = vweird.f32 %v642_v35 }
 0x123   : > { %v626_v50 = vor.u32 1.1754944e-38, %v625_v42  ;;  %vm624_vm9 = vcmp.eq.f32.partialorder %v623_v45, 8.507059e+37 }
 0x124   : > { %v655_v53 = vor.u32 1.1754944e-38, %v654_v46  ;;  %vm653_vm11 = vcmp.eq.f32.partialorder %v652_v48, 8.507059e+37  ;;  %v1176_v48 = vld [vmem:[%s1662_s10] sm:$0xf] }
 0x127   : > { %v1407_v37 = vpop.eup %1406 }
 0x128   : > { %v1409_v38 = vpop.eup %1408  ;;  %v615_v39 = vmul.f32 %v1407_v37, %v613_v34  ;;  %vm620_vm4 = vweird.f32 %v1407_v37 }
 0x129   : > { %v644_v40 = vmul.f32 %v1409_v38, %v642_v35  ;;  %vm649_vm5 = vweird.f32 %v1409_v38  ;;  %vm621_vm7 = vmor %vm619_vm6, %vm620_vm4 }
 0x12a   : > { %v616_v41 = vsub.f32 1.0, %v615_v39  ;;  %vm650_vm10 = vmor %vm648_vm8, %vm649_vm5 }
 0x12b   : > { %v645_v43 = vsub.f32 1.0, %v644_v40 }
 0x12c   : > { %v617_v44 = vmul.f32 %v1407_v37, %v616_v41 }
 0x12d   : > { %v646_v47 = vmul.f32 %v1409_v38, %v645_v43 }
 0x12e   : > { %v618_v49 = vadd.f32 %v1407_v37, %v617_v44 }
 0x12f   : > { %v647_v51 = vadd.f32 %v1409_v38, %v646_v47 }
 0x130   : > { %v622_v52 = vsel %vm621_vm7, %v1407_v37, %v618_v49 }
 0x131   : > { %v627_v54 = vsel %vm624_vm9, %v626_v50, %v622_v52  ;;  %v651_v55 = vsel %vm650_vm10, %v1409_v38, %v647_v51 }
 0x132   : > { %v629_v56 = vmul.f32 %v627_v54, %v609_v28  ;;  %v656_v57 = vsel %vm653_vm11, %v655_v53, %v651_v55 }
 0x133   : > { %v658_v58 = vmul.f32 %v656_v57, %v638_v29  ;;  %v855_v29 = vld [vmem:[%s1659_s7] sm:$0xf] }
 0x134   : > { %704 = vmatpush.msrb.mxu3 %v629_v56  ;;  %749 = vmatpush.msra.mxu1 %v629_v56 }
 0x135   : > { %679 = vmatpush.msrb.mxu2 %v658_v58  ;;  %724 = vmatpush.msra.mxu0 %v658_v58 }
 0x136   : > { %1347 = vmatmul.msk.f32.vlgmr.msrb.gmra.mxu2 %vm660_vm12, %v659_v59  ;;  %1352 = vmatmul.msk.f32.vlgmr.msra.gmra.mxu1 %vm660_vm12, %v1351_v60 }
 0x137   : > { %769 = vmatpush.msra.mxu2 %v658_v58  ;;  %803 = vmatpush.msra.mxu3 %v629_v56 }
 0x138   : > { %1349 = vmatmul.msk.f32.vlgmr.msrb.gmra.mxu3 %vm660_vm12, %v1348_v61  ;;  %1350 = vmatmul.msk.f32.vlgmr.msra.gmra.mxu0 %vm660_vm12, %v1348_v61 }
 0x13e   : > { %1353 = vmatmul.msk.f32.vlgmr.msra.gmra.mxu2 %vm660_vm12, %v1351_v60 }
 0x140   : > { %1354 = vmatmul.msk.f32.vlgmr.msra.gmra.mxu3 %vm660_vm12, %v659_v59 }
 0x1b3   : > { %v751_v62 = vpop.f32.mrf.mxu1 }
 0x1b4   : > { %809 = vrot.lane.b32.xlu2 %v751_v62, %s1436_s27 }
 0x1b5   : > { %v726_v3 = vpop.f32.mrf.mxu0 }
 0x1b9   : > { %v681_v63 = vpop.f32.mrf.mxu2 }
 0x1ba   : > { %776 = vrot.lane.b32.xlu1 %v681_v63, %s1435_s26 }
 0x1bb   : > { %v706_v1 = vpop.f32.mrf.mxu3 }
 0x1bc   : > { %985 = vperm.xlu2 %1401, %v975_v0  }
 0x1c1   : > { %v771_v23 = vpop.f32.mrf.mxu2 }
 0x1c3   : > { %v805_v4 = vpop.f32.mrf.mxu3 }
 0x1c4   : > { %v806_v5 = vadd.f32 %v805_v4, %v726_v3 }
 0x20e   : > { %v810_v6 = vpop.permute.xlu2 %809 }
 0x20f   : > { %v812_v7 = vsel %vm635_vm3, %v810_v6, 0.0 }
 0x210   : > { %v813_v8 = vadd.f32 %v812_v7, %v806_v5 }
 0x212   : > { %v814_v9 = vadd.f32 %v813_v8, %v785_v2 }
 0x214   : > { %v1356_v10 = vmul.f32 -1.442695, %v814_v9 }
 0x216   : > { %1410 = vpow2.f32 %v1356_v10  ;;  %v986_v56 = vpop.permute.xlu2 %985 }
 0x21c   : > { %v1411_v11 = vpop.eup %1410 }
 0x21d   : > { %v838_v12 = vadd.f32 1.0, %v1411_v11  ;;  %v1380_v11 = vld [vmem:[%s1661_s9 + $0x8] sm:$0xf] }
 0x21f   : > { %1412 = vrcp.f32 %v838_v12  ;;  %v850_v15 = vand.u32 2147483648, %v838_v12  ;;  %vm844_vm13 = vweird.f32 %v838_v12  ;;  %v848_v17 = vand.u32 2147483647, %v838_v12 }
 0x221   : > { %v851_v19 = vor.u32 1.1754944e-38, %v850_v15  ;;  %vm849_vm4 = vcmp.eq.f32.partialorder %v848_v17, 8.507059e+37  ;;  %v1375_v17 = vld [vmem:[%s1661_s9 + $0x4] sm:$0xf] }
 0x225   : > { %v1413_v13 = vpop.eup %1412 }
 0x226   : > { %v840_v14 = vmul.f32 %v1413_v13, %v838_v12  ;;  %vm845_vm14 = vweird.f32 %v1413_v13 }
 0x227   : > { %vm846_vm15 = vmor %vm844_vm13, %vm845_vm14 }
 0x228   : > { %v841_v16 = vsub.f32 1.0, %v840_v14 }
 0x22a   : > { %v842_v18 = vmul.f32 %v1413_v13, %v841_v16 }
 0x22c   : > { %v843_v20 = vadd.f32 %v1413_v13, %v842_v18  ;;  %v777_v21 = vpop.permute.xlu1 %776 }
 0x22d   : > { %v779_v22 = vsel %vm600_vm2, 0.0, %v777_v21 }
 0x22e   : > { %v847_v24 = vsel %vm846_vm15, %v1413_v13, %v843_v20  ;;  %v780_v25 = vadd.f32 %v779_v22, %v706_v1 }
 0x22f   : > { %v852_v26 = vsel %vm849_vm4, %v851_v19, %v847_v24  ;;  %v1056_v19 = vld [vmem:[%s1661_s9] sm:$0xf] }
 0x230   : > { %v1576_v27 = vmul.f32 %v852_v26, %v814_v9  ;;  %v781_v28 = vadd.f32 %v780_v25, %v771_v23 }
 0x232   : > { %v787_v30 = vadd.f32 %v785_v2, %v781_v28  ;;  %1357 = vmatpush.msk.msrb.mxu0 %vm445_vm0, %v1576_v27  ;;  %1362 = vmatpush.msk.msrb.mxu2 %vm445_vm0, %v1576_v27 }
 0x233   : > { %1358 = vmatmul.msk.f32.vlgmr.msrb.gmra.mxu0 %vm441_vm1, %v855_v29  ;;  %1363 = vmatmul.msk.f32.vlgmr.msrb.gmra.mxu2 %vm441_vm1, %v1359_v31 }
 0x234   : > { %v1355_v32 = vmul.f32 -1.442695, %v787_v30  ;;  %1367 = vmatpush.msk.msra.mxu0 %vm445_vm0, %v1576_v27 }
 0x236   : > { %1414 = vpow2.f32 %v1355_v32 }
 0x23b   : > { %1368 = vmatmul.msk.f32.vlgmr.msra.gmra.mxu0 %vm441_vm1, %v1364_v33 }
 0x23c   : > { %v1415_v34 = vpop.eup %1414 }
 0x23d   : > { %v818_v35 = vadd.f32 1.0, %v1415_v34 }
 0x23f   : > { %1416 = vrcp.f32 %v818_v35  ;;  %v830_v39 = vand.u32 2147483648, %v818_v35  ;;  %v828_v41 = vand.u32 2147483647, %v818_v35  ;;  %vm824_vm6 = vweird.f32 %v818_v35 }
 0x241   : > { %v831_v43 = vor.u32 1.1754944e-38, %v830_v39  ;;  %vm829_vm8 = vcmp.eq.f32.partialorder %v828_v41, 8.507059e+37 }
 0x245   : > { %v1417_v36 = vpop.eup %1416 }
 0x246   : > { %v820_v37 = vmul.f32 %v1417_v36, %v818_v35  ;;  %vm825_vm5 = vweird.f32 %v1417_v36 }
 0x247   : > { %vm826_vm7 = vmor %vm824_vm6, %vm825_vm5 }
 0x248   : > { %v821_v38 = vsub.f32 1.0, %v820_v37 }
 0x24a   : > { %v822_v40 = vmul.f32 %v1417_v36, %v821_v38 }
 0x24c   : > { %v823_v42 = vadd.f32 %v1417_v36, %v822_v40 }
 0x24e   : > { %v827_v44 = vsel %vm826_vm7, %v1417_v36, %v823_v42 }
 0x24f   : > { %v832_v45 = vsel %vm829_vm8, %v831_v43, %v827_v44 }
 0x250   : > { %v1596_v46 = vmul.f32 %v832_v45, %v787_v30 }
 0x252   : > { %1360 = vmatpush.msk.msrb.mxu1 %vm445_vm0, %v1596_v46  ;;  %1365 = vmatpush.msk.msrb.mxu3 %vm445_vm0, %v1596_v46 }
 0x253   : > { %1366 = vmatmul.msk.f32.vlgmr.msrb.gmra.mxu3 %vm441_vm1, %v1364_v33  ;;  %1361 = vmatmul.msk.f32.vlgmr.msrb.gmra.mxu1 %vm441_vm1, %v1359_v31 }
 0x254   : > { %1369 = vmatpush.msk.msra.mxu1 %vm445_vm0, %v1596_v46 }
 0x25b   : > { %1370 = vmatmul.msk.f32.vlgmr.msra.gmra.mxu1 %vm441_vm1, %v855_v29 }
 0x2b0   : > { %v879_v47 = vpop.f32.mrf.mxu0 }
 0x2b1   : > { %977 = vrot.lane.b32.xlu0 %v879_v47, %s1435_s26 }
 0x2b6   : > { %v927_v5 = vpop.f32.mrf.mxu2 }
 0x2b8   : > { %v972_v53 = vpop.f32.mrf.mxu0 }
 0x2b9   : > { %1186 = vperm.xlu0 %1400, %v1176_v48  }
 0x2d0   : > { %v907_v50 = vpop.f32.mrf.mxu1 }
 0x2d6   : > { %v952_v49 = vpop.f32.mrf.mxu3 }
 0x2d7   : > { %1010 = vrot.lane.b32.xlu1 %v952_v49, %s1436_s27 }
 0x2d8   : > { %v1006_v6 = vpop.f32.mrf.mxu1 }
 0x2d9   : > { %v1007_v10 = vadd.f32 %v1006_v6, %v927_v5 }
 0x323   : > { %v978_v51 = vpop.permute.xlu0 %977 }
 0x324   : > { %v980_v52 = vsel %vm600_vm2, 0.0, %v978_v51 }
 0x325   : > { %v981_v54 = vadd.f32 %v980_v52, %v907_v50 }
 0x327   : > { %v982_v55 = vadd.f32 %v981_v54, %v972_v53 }
 0x329   : > { %v988_v57 = vadd.f32 %v986_v56, %v982_v55 }
 0x32b   : > { %v1371_v58 = vmul.f32 -1.442695, %v988_v57  ;;  %v1187_v42 = vpop.permute.xlu0 %1186 }
 0x32d   : > { %1418 = vpow2.f32 %v1371_v58 }
 0x333   : > { %v1419_v59 = vpop.eup %1418 }
 0x334   : > { %v1019_v60 = vadd.f32 1.0, %v1419_v59 }
 0x336   : > { %1420 = vrcp.f32 %v1019_v60  ;;  %v1031_v0 = vand.u32 2147483648, %v1019_v60  ;;  %v1029_v2 = vand.u32 2147483647, %v1019_v60  ;;  %vm1025_vm10 = vweird.f32 %v1019_v60 }
 0x338   : > { %v1032_v4 = vor.u32 1.1754944e-38, %v1031_v0  ;;  %vm1030_vm12 = vcmp.eq.f32.partialorder %v1029_v2, 8.507059e+37 }
 0x33c   : > { %v1421_v61 = vpop.eup %1420 }
 0x33d   : > { %v1021_v62 = vmul.f32 %v1421_v61, %v1019_v60  ;;  %vm1026_vm9 = vweird.f32 %v1421_v61 }
 0x33e   : > { %vm1027_vm11 = vmor %vm1025_vm10, %vm1026_vm9 }
 0x33f   : > { %v1022_v63 = vsub.f32 1.0, %v1021_v62 }
 0x341   : > { %v1023_v1 = vmul.f32 %v1421_v61, %v1022_v63 }
 0x343   : > { %v1024_v3 = vadd.f32 %v1421_v61, %v1023_v1 }
 0x345   : > { %v1028_v7 = vsel %vm1027_vm11, %v1421_v61, %v1024_v3 }
 0x346   : > { %v1033_v8 = vsel %vm1030_vm12, %v1032_v4, %v1028_v7 }
 0x347   : > { %v1035_v9 = vmul.f32 %v1033_v8, %v988_v57 }
 0x349   : > { %v1011_v12 = vpop.permute.xlu1 %1010  ;;  %1376 = vmatpush.msk.msra.mxu3 %vm445_vm0, %v1035_v9  ;;  %1381 = vmatpush.msk.msrb.mxu1 %vm445_vm0, %v1035_v9 }
 0x34a   : > { %v1013_v13 = vsel %vm635_vm3, %v1011_v12, 0.0  ;;  %1382 = vmatmul.msk.f32.vlgmr.msrb.gmra.mxu1 %vm441_vm1, %v1380_v11  ;;  %1377 = vmatmul.msk.f32.vlgmr.msra.gmra.mxu3 %vm441_vm1, %v1375_v17 }
 0x34b   : > { %1385 = vmatpush.msk.msrb.mxu3 %vm445_vm0, %v1035_v9  ;;  %v1014_v14 = vadd.f32 %v1013_v13, %v1007_v10 }
 0x34d   : > { %v1015_v15 = vadd.f32 %v1014_v14, %v986_v56 }
 0x34f   : > { %v1372_v16 = vmul.f32 -1.442695, %v1015_v15 }
 0x351   : > { %1422 = vpow2.f32 %v1372_v16 }
 0x352   : > { %1386 = vmatmul.msk.f32.vlgmr.msrb.gmra.mxu3 %vm441_vm1, %v1056_v19 }
 0x357   : > { %v1423_v18 = vpop.eup %1422 }
 0x358   : > { %v1039_v20 = vadd.f32 1.0, %v1423_v18 }
 0x35a   : > { %1424 = vrcp.f32 %v1039_v20  ;;  %v1051_v24 = vand.u32 2147483648, %v1039_v20  ;;  %v1049_v26 = vand.u32 2147483647, %v1039_v20  ;;  %vm1045_vm14 = vweird.f32 %v1039_v20 }
 0x35c   : > { %v1052_v29 = vor.u32 1.1754944e-38, %v1051_v24  ;;  %vm1050_vm4 = vcmp.eq.f32.partialorder %v1049_v26, 8.507059e+37 }
 0x360   : > { %v1425_v21 = vpop.eup %1424 }
 0x361   : > { %v1041_v22 = vmul.f32 %v1425_v21, %v1039_v20  ;;  %vm1046_vm13 = vweird.f32 %v1425_v21 }
 0x362   : > { %vm1047_vm15 = vmor %vm1045_vm14, %vm1046_vm13 }
 0x363   : > { %v1042_v23 = vsub.f32 1.0, %v1041_v22 }
 0x365   : > { %v1043_v25 = vmul.f32 %v1425_v21, %v1042_v23 }
 0x367   : > { %v1044_v28 = vadd.f32 %v1425_v21, %v1043_v25 }
 0x369   : > { %v1048_v30 = vsel %vm1047_vm15, %v1425_v21, %v1044_v28 }
 0x36a   : > { %v1053_v31 = vsel %vm1050_vm4, %v1052_v29, %v1048_v30 }
 0x36b   : > { %v1055_v32 = vmul.f32 %v1053_v31, %v1015_v15 }
 0x36d   : > { %1373 = vmatpush.msk.msra.mxu2 %vm445_vm0, %v1055_v32  ;;  %1378 = vmatpush.msk.msrb.mxu0 %vm445_vm0, %v1055_v32 }
 0x36e   : > { %1374 = vmatmul.msk.f32.vlgmr.msra.gmra.mxu2 %vm441_vm1, %v1056_v19  ;;  %1379 = vmatmul.msk.f32.vlgmr.msrb.gmra.mxu0 %vm441_vm1, %v1375_v17 }
 0x36f   : > { %1383 = vmatpush.msk.msrb.mxu2 %vm445_vm0, %v1055_v32  ;;  %vm1219_vm0 = vcmask 519168  }
 0x376   : > { %1384 = vmatmul.msk.f32.vlgmr.msrb.gmra.mxu2 %vm441_vm1, %v1380_v11 }
 0x3c7   : > { %v1153_v33 = vpop.f32.mrf.mxu1 }
 0x3c8   : > { %1211 = vrot.lane.b32.xlu2 %v1153_v33, %s1436_s27 }
 0x3cd   : > { %v1108_v35 = vpop.f32.mrf.mxu3 }
 0x3d5   : > { %v1207_v37 = vpop.f32.mrf.mxu3 }
 0x3eb   : > { %v1128_v36 = vpop.f32.mrf.mxu0 }
 0x3ec   : > { %v1208_v38 = vadd.f32 %v1207_v37, %v1128_v36 }
 0x3f1   : > { %v1080_v34 = vpop.f32.mrf.mxu2 }
 0x3f2   : > { %1178 = vrot.lane.b32.xlu1 %v1080_v34, %s1435_s26 }
 0x3f9   : > { %v1173_v49 = vpop.f32.mrf.mxu2 }
 0x422   : > { %v1212_v39 = vpop.permute.xlu2 %1211 }
 0x423   : > { %v1214_v40 = vsel %vm635_vm3, %v1212_v39, 0.0 }
 0x424   : > { %v1215_v41 = vadd.f32 %v1214_v40, %v1208_v38 }
 0x426   : > { %v1216_v43 = vadd.f32 %v1215_v41, %v1187_v42 }
 0x428   : > { %v1221_v44 = vmul.f32 0.1, %v1216_v43 }
 0x42a   : > { %v1222_v45 = vadd.f32 %v1221_v44, %v1576_v27 }
 0x42c   : > { %1223 = vst.msk [vmem:[%s436_s28] sm:$0xf] %vm1219_vm0, %v1222_v45 }
 0x464   : > { %v1179_v47 = vpop.permute.xlu1 %1178 }
 0x465   : > { %v1181_v48 = vsel %vm600_vm2, 0.0, %v1179_v47 }
 0x466   : > { %v1182_v50 = vadd.f32 %v1181_v48, %v1108_v35 }
 0x468   : > { %v1183_v51 = vadd.f32 %v1182_v50, %v1173_v49 }
 0x46a   : > { %v1189_v52 = vadd.f32 %v1187_v42, %v1183_v51 }
 0x46c   : > { %v1217_v53 = vmul.f32 0.1, %v1189_v52 }
 0x46e   : > { %v1218_v54 = vadd.f32 %v1217_v53, %v1596_v46 }
 0x470   : > { %1220 = vst.msk [vmem:[%s432_s29] sm:$0xf] %vm1219_vm0, %v1218_v54 }
 0x471 PF: > { %s23_s21 = sadd.s32 1, %s1432_s21  }
 0x472   : > { %p20_p4 = scmp.ge.s32.totalorder %s23_s21, 4  }
 0x474   :  { %22 = sbr.rel (!%p20_p4) target bundleno = 1 (0x1), region = 119 }

// kernel: decoder_forward.17
= control target key start
LH: loop header
LB: loop body
LE: loop exit
PB: predicated region body
PF: predicated region fallthrough
CT: control target
= control target key end

     0   :  { %s1426_s0 = inlined_call_operand.vmem [shape: f32[2,4,128], index: 0, kind: input, shape index: {}]   ;;  %s1427_s1 = inlined_call_operand.vmem [shape: f32[3,4,4], index: 1, kind: input, shape index: {}]   ;;  %s1428_s2 = inlined_call_operand.vmem [shape: f32[4,1], index: 2, kind: input, shape index: {}]   ;;  %s1429_s3 = inlined_call_operand.vmem [shape: f32[3,4,4], index: 3, kind: input, shape index: {}]   ;;  %s1430_s4 = inlined_call_operand.vmem [shape: f32[4,1], index: 4, kind: input, shape index: {}]   ;;  %s1431_s5 = inlined_call_operand.vmem [shape: f32[3,4,4], index: 5, kind: input, shape index: {}]   ;;  %s1432_s6 = inlined_call_operand.vmem [shape: f32[4,1], index: 6, kind: input, shape index: {}]   ;;  %s1433_s7 = inlined_call_operand.vmem [shape: f32[3,4,4], index: 7, kind: input, shape index: {}]   ;;  %s1434_s8 = inlined_call_operand.vmem [shape: f32[4,1], index: 8, kind: input, shape index: {}]   ;;  %s1435_s9 = inlined_call_operand.hbm [shape: f32[2,4,128], index: 9, kind: output, shape index: {0}]   ;;  %s1436_s10 = inlined_call_operand.hbm [shape: f32[2,4,128], index: 10, kind: output, shape index: {1}]  }
   0x1   :  { %1439 = sst [smem:[#allocation8_spill]] %s1426_s0 }
   0x2   :  { %16 = vsyncpa [#allocation3], 0 }
   0x3   :  { %18 = vsyncpa [#allocation3 + $0x1], 0 }
   0x4   :  { %19 = vsyncpa [#allocation5], 0 }
   0x5   :  { %21 = vsyncpa [#allocation5 + $0x1], 0  ;;  %s1221_s13 = smov 0   ;;  %s1223_s14 = smov 0  }
   0x6   :  { %s1225_s15 = smov 0   ;;  %s1227_s16 = smov 0  }
   0x7 LB: > { %s1242_s17 = sadd.s32 4294967295, %s1161_s16   ;;  %s957_s18 = sadd.s32 4294967294, %s1161_s16   ;;  %s1161_s16 = sphi %s1227_s16, %s1448_s16   ;;  %s1157_s15 = sphi %s1225_s15, %s1447_s15   ;;  %s1153_s14 = sphi %s1223_s14, %s1446_s14   ;;  %s1149_s13 = sphi %s1221_s13, %s1445_s13  }
   0x8   : > { %s1246_s19 = sadd.s32 1, %s1161_s16   ;;  %s228_s20 = sadd.s32 1, %s1157_s15 }
   0x9   : > { %s225_s21 = ssub.s32 %s1161_s16, %s1246_s19  ;;  %p238_p0 = scmp.ne.s32.totalorder %s1157_s15, %s1153_s14 }
   0xa   : > { %p226_p1 = scmp.eq.s32.totalorder %s225_s21, 0  ;;  %p239_p2 = scmp.eq.s32.totalorder %s1242_s17, 1 }
   0xb   : > { %p244_p3 = scmp.ne.s32.totalorder %s1153_s14, %s1149_s13  ;;  %p245_p4 = scmp.eq.s32.totalorder %s957_s18, 1 }
   0xc   : > { %s1257_s22 = scalar_select %p226_p1, %s1157_s15, %s228_s20  }
   0xd   : > { %p1259_p5 = por %p239_p2, %p238_p0  ;;  %p1263_p6 = por %p245_p4, %p244_p3 }
   0xe   : > { %p960_p7 = scmp.ge.s32.totalorder %s1161_s16, 1  ;;  %p320_p8 = scmp.lt.s32.totalorder %s1161_s16, 3 }
  0x10   : > { %p321_p9 = pnand %p960_p7, %p320_p8 }
  0x11   : > { %p362_p10 = scmp.lt.s32.totalorder (!%p321_p9), %s1242_s17, 1  ;;  %s1442_s0 = sld [smem:[#allocation8_spill]] (!%p321_p9) }
  0x12   : > { %324 = sbr.rel (%p321_p9) target bundleno = 1139 (0x473), region = 56  ;;  %s1163_s30 = smov (!%p321_p9), 127  }
  0x13   : > { %s1164_s11 = smov (!%p321_p9), 1  }
  0x17   : > { %s363_s25 = scalar_select %p362_p10, %s1242_s17, 1  ;;  %vm380_vm0 = vcmask 1043456   ;;  %vm376_vm1 = vcmask 31744   ;;  %v964_v1 = vld [vmem:[%s1427_s1 + $0x4] sm:$0xf]  ;;  %v1165_v3 = vmov 0  }
  0x18   : > { %v463_v2 = vld [vmem:[%s1428_s2] sm:$0xf]  ;;  %1052 = vset.pattern.permute.xlu1 %v1165_v3  ;;  %1053 = vset.pattern.permute.xlu2 %v1165_v3  ;;  %vm434_vm2 = vcmask 1039360   ;;  %v969_v5 = vld [vmem:[%s1427_s1 + $0x8] sm:$0xf]  ;;  %vm372_vm3 = vcmask 7168  }
  0x19   : > { %s963_s26 = sshll.u32 %s363_s25, 2  ;;  %466 = vperm.xlu1 %1052, %v463_v2   ;;  %1054 = vset.pattern.permute.xlu0 %v1165_v3  ;;  %v367_v8 = vld [vmem:[%s1427_s1] sm:$0xf]  ;;  %v973_v31 = vld [vmem:[%s1429_s3 + $0x4] sm:$0xf]  ;;  %s1437_s25 = sshll.u32 %s1242_s17, 2 }
  0x1a   : > { %s365_s29 = scalar_lea.vmem %s1442_s0, %s963_s26  ;;  %v582_v32 = vld [vmem:[%s1430_s4] sm:$0xf]  ;;  %v978_v34 = vld [vmem:[%s1429_s3 + $0x8] sm:$0xf]  ;;  %v981_v50 = vld [vmem:[%s1431_s5 + $0x4] sm:$0xf] }
  0x1b   : > { %v1274_v0 = vld [vmem:[%s365_s29] sm:$0xf]  ;;  %v986_v54 = vld [vmem:[%s1431_s5 + $0x8] sm:$0xf]  ;;  %s846_s29 = scalar_lea.hbm %s1435_s9, %s1437_s25 }
  0x1c   : > { %431 = vrot.lane.b32.xlu0 %v1274_v0, %s1163_s30  ;;  %965 = vmatpush.msk.msra.mxu0 %vm380_vm0, %v1274_v0  ;;  %v683_v36 = vld [vmem:[%s1432_s6] sm:$0xf]  ;;  %s850_s20 = sshll.u32 %s846_s29, 4  ;;  %s851_s20 = int_to_ptr.hbm [resolvable:$true] %s850_s20 }
  0x1d   : > { %966 = vmatmul.msk.f32.vlgmr.msra.gmra.mxu0 %vm376_vm1, %v964_v1  ;;  %v802_v37 = vld [vmem:[%s1434_s8] sm:$0xf] }
  0x1e   : > { %v490_v39 = vld [vmem:[%s1429_s3] sm:$0xf] }
  0x1f   : > { %v591_v53 = vld [vmem:[%s1431_s5] sm:$0xf] }
  0x24   : > { %369 = vrot.lane.b32.xlu0 %v1274_v0, %s1164_s11 }
  0x8b   : > { %v467_v14 = vpop.permute.xlu1 %466 }
  0x8e   : > { %v432_v4 = vpop.permute.xlu0 %431 }
  0x8f   : > { %v435_v6 = vsel %vm434_vm2, %v432_v4, 0.0 }
  0x90   : > { %970 = vmatpush.msk.msra.mxu2 %vm380_vm0, %v435_v6 }
  0x91   : > { %971 = vmatmul.msk.f32.vlgmr.msra.gmra.mxu2 %vm376_vm1, %v969_v5 }
  0x96   : > { %v370_v7 = vpop.permute.xlu0 %369 }
  0x97   : > { %v373_v9 = vsel %vm372_vm3, 0.0, %v370_v7 }
  0x98   : > { %967 = vmatpush.msk.msra.mxu1 %vm380_vm0, %v373_v9 }
  0x99   : > { %968 = vmatmul.msk.f32.vlgmr.msra.gmra.mxu1 %vm376_vm1, %v367_v8 }
  0x9a   : > { %v400_v10 = vpop.f32.mrf.mxu0 }
 0x114   : > { %v459_v12 = vpop.f32.mrf.mxu2 }
 0x116   : > { %v426_v11 = vpop.f32.mrf.mxu1 }
 0x117   : > { %v427_v13 = vadd.f32 %v426_v11, %v400_v10 }
 0x119   : > { %v462_v15 = vadd.f32 %v459_v12, %v427_v13 }
 0x11b   : > { %v469_v16 = vadd.f32 %v467_v14, %v462_v15  ;;  %v990_v14 = vld [vmem:[%s1433_s7 + $0x4] sm:$0xf] }
 0x11d   : > { %v972_v17 = vmul.f32 -1.442695, %v469_v16 }
 0x11f   : > { %1055 = vpow2.f32 %v972_v17  ;;  %v710_v17 = vld [vmem:[%s1433_s7] sm:$0xf] }
 0x125   : > { %v1056_v18 = vpop.eup %1055 }
 0x126   : > { %v473_v19 = vadd.f32 1.0, %v1056_v18  ;;  %v995_v18 = vld [vmem:[%s1433_s7 + $0x8] sm:$0xf] }
 0x128   : > { %1057 = vrcp.f32 %v473_v19  ;;  %v485_v23 = vand.u32 2147483648, %v473_v19  ;;  %v483_v25 = vand.u32 2147483647, %v473_v19  ;;  %vm479_vm5 = vweird.f32 %v473_v19 }
 0x12a   : > { %v486_v27 = vor.u32 1.1754944e-38, %v485_v23  ;;  %vm484_vm7 = vcmp.eq.f32.partialorder %v483_v25, 8.507059e+37 }
 0x12e   : > { %v1058_v20 = vpop.eup %1057 }
 0x12f   : > { %v475_v21 = vmul.f32 %v1058_v20, %v473_v19  ;;  %vm480_vm4 = vweird.f32 %v1058_v20 }
 0x130   : > { %vm481_vm6 = vmor %vm479_vm5, %vm480_vm4 }
 0x131   : > { %v476_v22 = vsub.f32 1.0, %v475_v21 }
 0x133   : > { %v477_v24 = vmul.f32 %v1058_v20, %v476_v22 }
 0x135   : > { %v478_v26 = vadd.f32 %v1058_v20, %v477_v24 }
 0x137   : > { %v482_v28 = vsel %vm481_vm6, %v1058_v20, %v478_v26 }
 0x138   : > { %v487_v29 = vsel %vm484_vm7, %v486_v27, %v482_v28 }
 0x139   : > { %v489_v30 = vmul.f32 %v487_v29, %v469_v16 }
 0x13b   : > { %551 = vrot.lane.b32.xlu2 %v489_v30, %s1163_s30  ;;  %492 = vrot.lane.b32.xlu1 %v489_v30, %s1164_s11 }
 0x13c   : > { %974 = vmatpush.msk.msra.mxu3 %vm380_vm0, %v489_v30 }
 0x13d   : > { %975 = vmatmul.msk.f32.vlgmr.msra.gmra.mxu3 %vm376_vm1, %v973_v31 }
 0x143   : > { %585 = vperm.xlu2 %1053, %v582_v32  }
 0x14b   : > { %686 = vperm.xlu2 %1053, %v683_v36  }
 0x153   : > { %805 = vperm.xlu2 %1053, %v802_v37  }
 0x195   : > { %v552_v33 = vpop.permute.xlu2 %551 }
 0x196   : > { %v554_v35 = vsel %vm434_vm2, %v552_v33, 0.0 }
 0x197   : > { %979 = vmatpush.msk.msrb.mxu1 %vm380_vm0, %v554_v35 }
 0x198   : > { %980 = vmatmul.msk.f32.vlgmr.msrb.gmra.mxu1 %vm376_vm1, %v978_v34 }
 0x19d   : > { %v586_v46 = vpop.permute.xlu2 %585 }
 0x1a5   : > { %v687_v62 = vpop.permute.xlu2 %686 }
 0x1ad   : > { %v493_v38 = vpop.permute.xlu1 %492  ;;  %v806_v26 = vpop.permute.xlu2 %805 }
 0x1ae   : > { %v495_v40 = vsel %vm372_vm3, 0.0, %v493_v38 }
 0x1af   : > { %976 = vmatpush.msk.msrb.mxu0 %vm380_vm0, %v495_v40 }
 0x1b0   : > { %977 = vmatmul.msk.f32.vlgmr.msrb.gmra.mxu0 %vm376_vm1, %v490_v39 }
 0x1c0   : > { %v520_v41 = vpop.f32.mrf.mxu3 }
 0x215   : > { %v578_v43 = vpop.f32.mrf.mxu1 }
 0x22d   : > { %v546_v42 = vpop.f32.mrf.mxu0 }
 0x22e   : > { %v547_v44 = vadd.f32 %v546_v42, %v520_v41 }
 0x230   : > { %v581_v45 = vadd.f32 %v578_v43, %v547_v44 }
 0x232   : > { %v588_v47 = vadd.f32 %v586_v46, %v581_v45 }
 0x234   : > { %v589_v48 = vmul.f32 0.1, %v588_v47 }
 0x236   : > { %v590_v49 = vadd.f32 %v589_v48, %v1274_v0 }
 0x238   : > { %652 = vrot.lane.b32.xlu1 %v590_v49, %s1163_s30  ;;  %593 = vrot.lane.b32.xlu0 %v590_v49, %s1164_s11 }
 0x239   : > { %982 = vmatpush.msk.msrb.mxu2 %vm380_vm0, %v590_v49 }
 0x23a   : > { %983 = vmatmul.msk.f32.vlgmr.msrb.gmra.mxu2 %vm376_vm1, %v981_v50 }
 0x2aa   : > { %v653_v51 = vpop.permute.xlu1 %652  ;;  %v594_v52 = vpop.permute.xlu0 %593 }
 0x2ab   : > { %v655_v55 = vsel %vm434_vm2, %v653_v51, 0.0  ;;  %v596_v56 = vsel %vm372_vm3, 0.0, %v594_v52 }
 0x2ac   : > { %984 = vmatpush.msk.msrb.mxu3 %vm380_vm0, %v596_v56  ;;  %987 = vmatpush.msk.msra.mxu0 %vm380_vm0, %v655_v55 }
 0x2ad   : > { %985 = vmatmul.msk.f32.vlgmr.msrb.gmra.mxu3 %vm376_vm1, %v591_v53  ;;  %988 = vmatmul.msk.f32.vlgmr.msra.gmra.mxu0 %vm376_vm1, %v986_v54 }
 0x2bd   : > { %v621_v57 = vpop.f32.mrf.mxu2 }
 0x32a   : > { %v679_v59 = vpop.f32.mrf.mxu0 }
 0x330   : > { %v647_v58 = vpop.f32.mrf.mxu3 }
 0x331   : > { %v648_v60 = vadd.f32 %v647_v58, %v621_v57 }
 0x333   : > { %v682_v61 = vadd.f32 %v679_v59, %v648_v60 }
 0x335   : > { %v689_v63 = vadd.f32 %v687_v62, %v682_v61 }
 0x337   : > { %v989_v0 = vmul.f32 -1.442695, %v689_v63 }
 0x339   : > { %1059 = vpow2.f32 %v989_v0 }
 0x33f   : > { %v1060_v1 = vpop.eup %1059 }
 0x340   : > { %v693_v2 = vadd.f32 1.0, %v1060_v1 }
 0x342   : > { %1061 = vrcp.f32 %v693_v2  ;;  %v705_v6 = vand.u32 2147483648, %v693_v2  ;;  %v703_v8 = vand.u32 2147483647, %v693_v2  ;;  %vm699_vm9 = vweird.f32 %v693_v2 }
 0x344   : > { %v706_v10 = vor.u32 1.1754944e-38, %v705_v6  ;;  %vm704_vm11 = vcmp.eq.f32.partialorder %v703_v8, 8.507059e+37 }
 0x348   : > { %v1062_v3 = vpop.eup %1061 }
 0x349   : > { %v695_v4 = vmul.f32 %v1062_v3, %v693_v2  ;;  %vm700_vm8 = vweird.f32 %v1062_v3 }
 0x34a   : > { %vm701_vm10 = vmor %vm699_vm9, %vm700_vm8 }
 0x34b   : > { %v696_v5 = vsub.f32 1.0, %v695_v4 }
 0x34d   : > { %v697_v7 = vmul.f32 %v1062_v3, %v696_v5 }
 0x34f   : > { %v698_v9 = vadd.f32 %v1062_v3, %v697_v7 }
 0x351   : > { %v702_v11 = vsel %vm701_vm10, %v1062_v3, %v698_v9 }
 0x352   : > { %v707_v12 = vsel %vm704_vm11, %v706_v10, %v702_v11 }
 0x353   : > { %v709_v13 = vmul.f32 %v707_v12, %v689_v63 }
 0x355   : > { %771 = vrot.lane.b32.xlu1 %v709_v13, %s1163_s30  ;;  %712 = vrot.lane.b32.xlu0 %v709_v13, %s1164_s11  ;;  %s1369_s11 = sand.u32 1, %s1153_s14   ;;  %s1081_s30 = sshra.s32 %s851_s20, 4  ;;  %s1082_s30 = int_to_ptr.hbm [resolvable:$true] %s1081_s30 }
 0x356   : > { %991 = vmatpush.msk.msra.mxu1 %vm380_vm0, %v709_v13  ;;  %s1438_s26 = sshll.u32 %s1369_s11, 2  ;;  %s831_s21 = scalar_lea.sflag [#allocation3], %s1369_s11 }
 0x357   : > { %992 = vmatmul.msk.f32.vlgmr.msra.gmra.mxu1 %vm376_vm1, %v990_v14  ;;  %s354_s12 = scalar_lea.vmem [#allocation2], %s1438_s26  ;;  %s1083_s27 = scalar_lea.hbm %s1082_s30, 4 }
 0x358   : > { %s848_s18 = sshll.u32 %s354_s12, 4  ;;  %p1084_p11 = scmp.ne.s32.totalorder %s1082_s30, %s1083_s27  ;;  %s849_s18 = int_to_ptr.vmem [resolvable:$true] %s848_s18 }
 0x359   : > { %s1087_s26 = scalar_lea.hbm %s1435_s9, 8  ;;  %p1088_p0 = scmp.lt.s32.totalorder %s1082_s30, %s1435_s9 }
 0x35a   : > { %p1085_p12 = pnand %p1084_p11, %p1259_p5  ;;  %p1089_p1 = scmp.lt.s32.totalorder %s1087_s26, %s1083_s27 }
 0x35c   : > { %p1086_p13 = pneg %p1085_p12  ;;  %p1090_p2 = por %p1089_p1, %p1088_p0 }
 0x35e   : > { %p1091_p3 = pnand %p1090_p2, %p1086_p13 }
 0x3c7   : > { %v772_v15 = vpop.permute.xlu1 %771  ;;  %v713_v16 = vpop.permute.xlu0 %712 }
 0x3c8   : > { %v774_v19 = vsel %vm434_vm2, %v772_v15, 0.0  ;;  %v715_v20 = vsel %vm372_vm3, 0.0, %v713_v16 }
 0x3c9   : > { %993 = vmatpush.msk.msra.mxu2 %vm380_vm0, %v715_v20  ;;  %996 = vmatpush.msk.msra.mxu3 %vm380_vm0, %v774_v19 }
 0x3ca   : > { %994 = vmatmul.msk.f32.vlgmr.msra.gmra.mxu2 %vm376_vm1, %v710_v17  ;;  %997 = vmatmul.msk.f32.vlgmr.msra.gmra.mxu3 %vm376_vm1, %v995_v18 }
 0x3d4   : > { %v740_v21 = vpop.f32.mrf.mxu1 }
 0x44d   : > { %v766_v22 = vpop.f32.mrf.mxu2  ;;  %v798_v23 = vpop.f32.mrf.mxu3 }
 0x44e   : > { %v767_v24 = vadd.f32 %v766_v22, %v740_v21 }
 0x450   : > { %v801_v25 = vadd.f32 %v798_v23, %v767_v24 }
 0x452   : > { %v808_v27 = vadd.f32 %v806_v26, %v801_v25 }
 0x454   : > { %v998_v28 = vmul.f32 -1.442695, %v808_v27  ;;  %809 = vst [vmem:[%s354_s12] sm:$0xf] %v808_v27 }
 0x455   : > { %1094 = shalt.err (!%p1091_p3)
}
 0x456   : > { %1005 = dma.vmem_to_hbm [thread:$0]  (%p1259_p5), %s849_s18, 64, %s851_s20, %s831_s21   ;;  %1063 = vpow2.f32 %v998_v28 }
 0x457   : > { %s1443_s25 = sshll.u32 %s1242_s17, 2  ;;  %s1444_s30 = sshll.u32 %s1369_s11, 2 }
 0x458   : > { %s860_s26 = scalar_lea.hbm %s1436_s10, %s1443_s25  ;;  %s361_s27 = scalar_lea.vmem [#allocation4], %s1444_s30 }
 0x459   : > { %s862_s18 = sshll.u32 %s361_s27, 4  ;;  %s864_s20 = sshll.u32 %s860_s26, 4  ;;  %s863_s18 = int_to_ptr.vmem [resolvable:$true] %s862_s18  ;;  %s865_s20 = int_to_ptr.hbm [resolvable:$true] %s864_s20 }
 0x45a   : > { %s836_s17 = scalar_lea.sflag [#allocation5], %s1369_s11  ;;  %s1109_s21 = sshra.s32 %s865_s20, 4  ;;  %s1110_s21 = int_to_ptr.hbm [resolvable:$true] %s1109_s21 }
 0x45b   : > { %s1111_s28 = scalar_lea.hbm %s1110_s21, 4  ;;  %s1115_s12 = scalar_lea.hbm %s1436_s10, 8 }
 0x45c   : > { %v1064_v29 = vpop.eup %1063  ;;  %p1112_p4 = scmp.ne.s32.totalorder %s1110_s21, %s1111_s28  ;;  %p1116_p9 = scmp.lt.s32.totalorder %s1110_s21, %s1436_s10 }
 0x45d   : > { %v813_v30 = vadd.f32 1.0, %v1064_v29  ;;  %p1117_p10 = scmp.lt.s32.totalorder %s1115_s12, %s1111_s28 }
 0x45e   : > { %p1113_p7 = pnand %p1112_p4, %p1259_p5 }
 0x45f   : > { %1065 = vrcp.f32 %v813_v30  ;;  %v825_v34 = vand.u32 2147483648, %v813_v30  ;;  %v823_v36 = vand.u32 2147483647, %v813_v30  ;;  %vm819_vm13 = vweird.f32 %v813_v30  ;;  %p1118_p11 = por %p1117_p10, %p1116_p9 }
 0x460   : > { %p1114_p8 = pneg %p1113_p7 }
 0x461   : > { %v826_v38 = vor.u32 1.1754944e-38, %v825_v34  ;;  %vm824_vm15 = vcmp.eq.f32.partialorder %v823_v36, 8.507059e+37 }
 0x462   : > { %p1119_p12 = pnand %p1118_p11, %p1114_p8 }
 0x465   : > { %v1066_v31 = vpop.eup %1065 }
 0x466   : > { %v815_v32 = vmul.f32 %v1066_v31, %v813_v30  ;;  %vm820_vm12 = vweird.f32 %v1066_v31 }
 0x467   : > { %vm821_vm14 = vmor %vm819_vm13, %vm820_vm12 }
 0x468   : > { %v816_v33 = vsub.f32 1.0, %v815_v32 }
 0x46a   : > { %v817_v35 = vmul.f32 %v1066_v31, %v816_v33 }
 0x46c   : > { %v818_v37 = vadd.f32 %v1066_v31, %v817_v35 }
 0x46e   : > { %v822_v39 = vsel %vm821_vm14, %v1066_v31, %v818_v37 }
 0x46f   : > { %v827_v40 = vsel %vm824_vm15, %v826_v38, %v822_v39 }
 0x470   : > { %829 = vst [vmem:[%s361_s27] sm:$0xf] %v827_v40 }
 0x471   : > { %1122 = shalt.err (!%p1119_p12)
}
 0x472   : > { %1006 = dma.vmem_to_hbm [thread:$0]  (%p1259_p5), %s863_s18, 64, %s865_s20, %s836_s17  }
 0x473 PF: > { %p1016_p13 = scmp.ge.s32.totalorder %s1161_s16, 2  ;;  %s876_s11 = sand.u32 1, %s1149_s13  }
 0x474   : > { %s877_s30 = scalar_lea.sflag [#allocation3], %s876_s11 }
 0x475   : > { %p1010_p0 = pnand %p1016_p13, %p1263_p6 }
 0x477   : > { %p1011_p1 = pneg %p1010_p0 }
 0x479   : > { %1140 = dma.done.wait (%p1011_p1), %s877_s30, 64  }
 0x47a   : > { %1142 = vsyncadd (%p1011_p1), %s877_s30, 4294967232  ;;  %s887_s27 = scalar_lea.sflag [#allocation5], %s876_s11 }
 0x47b   : > { %1144 = dma.done.wait (%p1011_p1), %s887_s27, 64  }
 0x47c   : > { %1146 = vsyncadd (%p1011_p1), %s887_s27, 4294967232  ;;  %p24_p5 = scmp.ge.s32.totalorder %s1246_s19, 4   ;;  %s1445_s13 = smov %s1153_s14 }
 0x47d   : > { %s1446_s14 = smov %s1157_s15  ;;  %s1447_s15 = smov %s1257_s22 }
 0x47e   : > { %s1448_s16 = smov %s1246_s19  ;;  %26 = sbr.rel (!%p24_p5) target bundleno = 7 (0x7), region = 116 }
 0x483   :  { %893 = vsyncpa [#allocation3], 1 }
 0x484   :  { %895 = vsyncpa [#allocation3 + $0x1], 1 }
 0x485   :  { %896 = vsyncpa [#allocation5], 1 }
 0x486   :  { %898 = vsyncpa [#allocation5 + $0x1], 1 }

</bundles_post_ra>
